<compile_context>
chip_gen: v6e
topology: v6e:2x2x1
jax: 0.10.0
libtpu: 0.0.40
codegen_flags: <defaults>
</compile_context>

<pallas_src>
import math

import jax
import jax.numpy as jnp
from jax.experimental import pallas as pl
from jax.experimental.pallas import tpu as pltpu

_BN_EPS = 1e-5
_VMEM_LIMIT = 32 * 1024 * 1024           # safe on v5e / v6e / v7x
_WHOLE_VMEM = pl.BlockSpec(memory_space=pltpu.MemorySpace.VMEM)
_STAGE_STRIDES = (1, 2, 2, 2)            # static architecture config


def _round_up(x, m):
    return (x + m - 1) // m * m


# ---------------------------------------------------------------------------
# Pallas kernels
# ---------------------------------------------------------------------------
def _make_fused_matmul_kernel(use_relu: bool, use_res: bool):
    """o = [relu]( (x @ w) * scale + shift [+ residual] ), K-gridded on the MXU."""

    def kernel(x_ref, w_ref, s_ref, b_ref, *rest):
        if use_res:
            res_ref, o_ref, acc_ref = rest
        else:
            o_ref, acc_ref = rest
        k = pl.program_id(2)

        @pl.when(k == 0)
        def _init():
            acc_ref[...] = jnp.zeros_like(acc_ref)

        acc_ref[...] += jnp.dot(x_ref[...], w_ref[...],
                                preferred_element_type=jnp.float32)

        @pl.when(k == pl.num_programs(2) - 1)
        def _epilogue():
            y = acc_ref[...] * s_ref[...] + b_ref[...]
            if use_res:
                y = y + res_ref[...].astype(jnp.float32)
            if use_relu:
                y = jnp.maximum(y, 0.0)
            o_ref[...] = y.astype(o_ref.dtype)

    return kernel


def _maxpool_kernel(*refs):
    # refs = 9 shifted-window tiles (TM, C) + output tile (TM, C): running max.
    o_ref = refs[-1]
    acc = refs[0][...]
    for r in refs[1:-1]:
        acc = jnp.maximum(acc, r[...])
    o_ref[...] = acc


def _gap_fc_kernel(x_ref, w_ref, b_ref, o_ref):
    # Fused global average pool (over H*W) + classifier matmul + bias.
    pooled = jnp.mean(x_ref[...].astype(jnp.float32), axis=1)        # (N, C)
    o_ref[...] = jnp.dot(pooled, w_ref[...],
                         preferred_element_type=jnp.float32) + b_ref[...]


# ---------------------------------------------------------------------------
# Fused matmul wrapper (tiled, bf16 in / f32 acc / bf16 out)
# ---------------------------------------------------------------------------
def _pick_tiles(m, n, k):
    tm = min(512, _round_up(m, 8))
    tn = 256 if (n % 256 == 0) else 128
    if k <= 1024:
        tk = k                                 # single K step, block = full dim
    else:
        tk = 512
        for cand in (512, 384, 256, 128):      # keep K tile a 128-multiple that
            if k % cand == 0:                  # divides K (9*Cin cases -> 384)
                tk = cand
                break
    return tm, tn, tk


def fused_matmul(x2d, w2d, scale, shift, residual=None, relu=True,
                 out_dtype=jnp.bfloat16):
    m, k = x2d.shape
    n = w2d.shape[1]
    tm, tn, tk = _pick_tiles(m, n, k)
    mp, npad, kp = _round_up(m, tm), _round_up(n, tn), _round_up(k, tk)

    x2d = x2d.astype(jnp.bfloat16)
    w2d = w2d.astype(jnp.bfloat16)
    if (mp, kp) != (m, k):
        x2d = jnp.pad(x2d, ((0, mp - m), (0, kp - k)))
    if (kp, npad) != (k, n):
        w2d = jnp.pad(w2d, ((0, kp - k), (0, npad - n)))
    scale = jnp.pad(scale.reshape(1, n).astype(jnp.float32),
                    ((0, 0), (0, npad - n)))
    shift = jnp.pad(shift.reshape(1, n).astype(jnp.float32),
                    ((0, 0), (0, npad - n)))

    args = [x2d, w2d, scale, shift]
    in_specs = [
        pl.BlockSpec((tm, tk), lambda i, j, kk: (i, kk)),
        pl.BlockSpec((tk, tn), lambda i, j, kk: (kk, j)),
        pl.BlockSpec((1, tn), lambda i, j, kk: (0, j)),
        pl.BlockSpec((1, tn), lambda i, j, kk: (0, j)),
    ]
    if residual is not None:
        res = residual.reshape(m, n).astype(jnp.bfloat16)
        if (mp, npad) != (m, n):
            res = jnp.pad(res, ((0, mp - m), (0, npad - n)))
        args.append(res)
        in_specs.append(pl.BlockSpec((tm, tn), lambda i, j, kk: (i, j)))

    out = pl.pallas_call(
        _make_fused_matmul_kernel(relu, residual is not None),
        out_shape=jax.ShapeDtypeStruct((mp, npad), out_dtype),
        grid=(mp // tm, npad // tn, kp // tk),
        in_specs=in_specs,
        out_specs=pl.BlockSpec((tm, tn), lambda i, j, kk: (i, j)),
        scratch_shapes=[pltpu.VMEM((tm, tn), jnp.float32)],
        compiler_params=pltpu.CompilerParams(
            dimension_semantics=("parallel", "parallel", "arbitrary"),
            vmem_limit_bytes=_VMEM_LIMIT),
    )(*args)
    return out[:m, :n]


# ---------------------------------------------------------------------------
# Conv / pool wrappers (XLA glue around the Pallas kernels)
# ---------------------------------------------------------------------------
def _shifted_slices(x, kh, kw, stride, padding, pad_value=0.0):
    """Static shifted window views of NHWC x. Returns list of (N,Ho,Wo,C)."""
    n, h, w, c = x.shape
    ho = (h + 2 * padding - kh) // stride + 1
    wo = (w + 2 * padding - kw) // stride + 1
    xp = x
    if padding:
        xp = jnp.pad(x, ((0, 0), (padding, padding), (padding, padding), (0, 0)),
                     constant_values=pad_value)
    slices = []
    for i in range(kh):
        for j in range(kw):
            slices.append(
                xp[:, i:i + stride * (ho - 1) + 1:stride,
                      j:j + stride * (wo - 1) + 1:stride, :])
    return slices, ho, wo


def conv2d_bn_act(x, w, scale, shift, *, stride=1, padding=0, relu=True,
                  residual=None):
    """Conv2d (no bias) + folded BN + optional residual + optional ReLU."""
    kh, kw, cin, cout = w.shape
    n = x.shape[0]
    if kh == 1 and kw == 1 and padding == 0:
        xs = x[:, ::stride, ::stride, :]
        ho, wo = xs.shape[1], xs.shape[2]
        x2d = xs.reshape(n * ho * wo, cin)
    else:
        slices, ho, wo = _shifted_slices(x, kh, kw, stride, padding)
        m = n * ho * wo
        # Tap-major K ordering matches w.reshape(kh*kw*cin, cout).
        x2d = jnp.concatenate(
            [s.astype(jnp.bfloat16).reshape(m, cin) for s in slices], axis=1)
    m = n * ho * wo
    w2d = w.reshape(kh * kw * cin, cout)
    res2d = None if residual is None else residual.reshape(m, cout)
    y2d = fused_matmul(x2d, w2d, scale, shift, residual=res2d, relu=relu)
    return y2d.reshape(n, ho, wo, cout)


def maxpool_3x3_s2(x):
    n, h, w, c = x.shape
    slices, ho, wo = _shifted_slices(x, 3, 3, 2, 1, pad_value=-jnp.inf)
    m = n * ho * wo
    tm = min(512, _round_up(m, 8))
    mp = _round_up(m, tm)
    flat = []
    for s in slices:
        s2 = s.reshape(m, c)
        if mp != m:
            s2 = jnp.pad(s2, ((0, mp - m), (0, 0)))
        flat.append(s2)
    spec = pl.BlockSpec((tm, c), lambda i: (i, 0))
    out = pl.pallas_call(
        _maxpool_kernel,
        out_shape=jax.ShapeDtypeStruct((mp, c), x.dtype),
        grid=(mp // tm,),
        in_specs=[spec] * 9,
        out_specs=spec,
        compiler_params=pltpu.CompilerParams(
            dimension_semantics=("parallel",),
            vmem_limit_bytes=_VMEM_LIMIT),
    )(*flat)
    return out[:m].reshape(n, ho, wo, c)


def gap_fc(x, fc_w, fc_b):
    """Fused global average pool + classifier; lane-dense padded to 128."""
    n, h, w, c = x.shape
    xr = x.reshape(n, h * w, c)
    num_classes = fc_w.shape[1]
    ncp = _round_up(num_classes, 128)
    wp = jnp.pad(fc_w.astype(jnp.float32), ((0, 0), (0, ncp - num_classes)))
    bp = jnp.pad(fc_b.astype(jnp.float32), (0, ncp - num_classes)).reshape(1, ncp)
    out = pl.pallas_call(
        _gap_fc_kernel,
        out_shape=jax.ShapeDtypeStruct((n, ncp), jnp.float32),
        in_specs=[_WHOLE_VMEM] * 3,
        out_specs=_WHOLE_VMEM,
        compiler_params=pltpu.CompilerParams(vmem_limit_bytes=_VMEM_LIMIT),
    )(xr, wp, bp)
    return out[:, :num_classes]


# ---------------------------------------------------------------------------
# Parameter construction (deterministic, mirrors PyTorch __init__ shapes)
# ---------------------------------------------------------------------------
def _kaiming_conv(key, kh, kw, cin, cout):
    fan_out = cout * kh * kw
    std = math.sqrt(2.0 / fan_out)
    return std * jax.random.normal(key, (kh, kw, cin, cout), jnp.float32)


def _bn_fold(gamma):
    # running_mean = 0, running_var = 1, beta = 0 (PyTorch init-time values).
    scale = gamma / jnp.sqrt(1.0 + _BN_EPS)
    shift = jnp.zeros_like(gamma)
    return scale, shift


def _make_block_params(keys, inplanes, planes, stride, zero_init_last_bn=True):
    p = {}
    p["conv1_w"] = _kaiming_conv(next(keys), 3, 3, inplanes, planes)
    p["bn1"] = _bn_fold(jnp.ones((planes,), jnp.float32))
    p["conv2_w"] = _kaiming_conv(next(keys), 3, 3, planes, planes)
    g2 = (jnp.zeros((planes,), jnp.float32) if zero_init_last_bn
          else jnp.ones((planes,), jnp.float32))
    p["bn2"] = _bn_fold(g2)
    if stride != 1 or inplanes != planes:        # 1x1 conv downsample + BN
        p["down_w"] = _kaiming_conv(next(keys), 1, 1, inplanes, planes)
        p["dbn"] = _bn_fold(jnp.ones((planes,), jnp.float32))
    return p


def make_resnet_params(key, in_chans=3, num_classes=10, layers=(1, 1, 1, 1),
                       stem_width=64):
    keys = iter(jax.random.split(key, 64))
    params = {}
    # 7x7 stride-2 stem ('b' variant) + BN.
    params["conv1_w"] = _kaiming_conv(next(keys), 7, 7, in_chans, stem_width)
    params["bn1"] = _bn_fold(jnp.ones((stem_width,), jnp.float32))
    inplanes = 64
    stage_planes = (64, 128, 256, 512)
    stages = []
    for planes, stride, nblocks in zip(stage_planes, _STAGE_STRIDES, layers):
        blocks = []
        for bi in range(nblocks):
            s = stride if bi == 0 else 1
            blocks.append(_make_block_params(keys, inplanes, planes, s))
            inplanes = planes                    # BasicBlock expansion = 1
        stages.append(blocks)
    params["stages"] = stages
    num_features = 512                           # 512 * expansion(=1)
    params["fc_w"] = 0.01 * jax.random.normal(
        next(keys), (num_features, num_classes), jnp.float32)
    params["fc_b"] = jnp.zeros((num_classes,), jnp.float32)
    return params


# ---------------------------------------------------------------------------
# Forward pass
# ---------------------------------------------------------------------------
def _basic_block(x, p, stride):
    identity = x
    out = conv2d_bn_act(x, p["conv1_w"], p["bn1"][0], p["bn1"][1],
                        stride=stride, padding=1, relu=True)
    if "down_w" in p:
        identity = conv2d_bn_act(x, p["down_w"], p["dbn"][0], p["dbn"][1],
                                 stride=stride, padding=0, relu=False)
    # conv2 + bn2 + residual add + final relu fused into one kernel call.
    out = conv2d_bn_act(out, p["conv2_w"], p["bn2"][0], p["bn2"][1],
                        stride=1, padding=1, relu=True, residual=identity)
    return out


def resnet_forward(x_nchw, params):
    x = jnp.transpose(x_nchw, (0, 2, 3, 1)).astype(jnp.bfloat16)  # NCHW -> NHWC
    # Stem: conv7x7/2 + BN + ReLU, then MaxPool 3x3/2.
    x = conv2d_bn_act(x, params["conv1_w"], params["bn1"][0], params["bn1"][1],
                      stride=2, padding=3, relu=True)
    x = maxpool_3x3_s2(x)
    # Residual stages (strides are static Python config, not pytree leaves).
    for si, blocks in enumerate(params["stages"]):
        for bi, blk in enumerate(blocks):
            stride = _STAGE_STRIDES[si] if bi == 0 else 1
            x = _basic_block(x, blk, stride)
    # Fused global average pool + classifier (drop_rate=0.0 -> no dropout).
    logits = gap_fc(x, params["fc_w"], params["fc_b"])
    return logits


# ---------------------------------------------------------------------------
if __name__ == "__main__":
    key = jax.random.PRNGKey(0)
    pkey, xkey = jax.random.split(key)

    params = make_resnet_params(pkey, in_chans=3, num_classes=10,
                                layers=(1, 1, 1, 1))
    # Small input, PyTorch NCHW convention.
    x = jax.random.normal(xkey, (2, 3, 32, 32), jnp.float32)

    logits = jax.jit(resnet_forward)(x, params)
    logits = jax.block_until_ready(logits)
    assert logits.shape == (2, 10), logits.shape
    assert bool(jnp.all(jnp.isfinite(logits)))
    print("KERNEL_OK")
</pallas_src>

<mosaic_0001>
module attributes {stable_mosaic.version = 11 : i64} {
  func.func @kernel(%arg0: i32, %arg1: i32, %arg2: i32, %arg3: memref<512x147xbf16, #tpu.memory_space<vmem>>, %arg4: memref<147x128xbf16, #tpu.memory_space<vmem>>, %arg5: memref<1x128xf32, #tpu.memory_space<vmem>>, %arg6: memref<1x128xf32, #tpu.memory_space<vmem>>, %arg7: memref<512x128xbf16, #tpu.memory_space<vmem>>, %arg8: memref<512x128xf32, #tpu.memory_space<vmem>>) attributes {dimension_semantics = [#tpu.dimension_semantics<parallel>, #tpu.dimension_semantics<parallel>, #tpu.dimension_semantics<arbitrary>], iteration_bounds = array<i64: 1, 1, 1>, scalar_prefetch = 0 : i64, scratch_operands = 1 : i64, tpu.core_type = #tpu.core_type<tc>, window_params = [{transform_indices = @transform_0, window_bounds = array<i64: 512, 147>}, {transform_indices = @transform_1, window_bounds = array<i64: 147, 128>}, {transform_indices = @transform_2, window_bounds = array<i64: 1, 128>}, {transform_indices = @transform_3, window_bounds = array<i64: 1, 128>}, {transform_indices = @transform_4, window_bounds = array<i64: 512, 128>}]} {
    %c0_i32 = arith.constant 0 : i32
    %0 = arith.cmpi eq, %arg2, %c0_i32 : i32
    %1 = arith.extui %0 : i1 to i32
    %c0_i32_0 = arith.constant 0 : i32
    %2 = arith.cmpi ne, %1, %c0_i32_0 : i32
    scf.if %2 {
      %cst_10 = arith.constant 0.000000e+00 : f32
      %12 = vector.broadcast %cst_10 : f32 to vector<512x128xf32>
      %c0_11 = arith.constant 0 : index
      %c0_12 = arith.constant 0 : index
      %13 = vector.load %arg8[%c0_11, %c0_12] : memref<512x128xf32, #tpu.memory_space<vmem>>, vector<512x128xf32>
      tpu.vector_store %arg8[%c0_11, %c0_12], %12 {strides = array<i32>} : memref<512x128xf32, #tpu.memory_space<vmem>>, vector<512x128xf32>,
    } else {
    }
    %c0 = arith.constant 0 : index
    %c0_1 = arith.constant 0 : index
    %3 = vector.load %arg8[%c0, %c0_1] : memref<512x128xf32, #tpu.memory_space<vmem>>, vector<512x128xf32>
    %c0_2 = arith.constant 0 : index
    %c0_3 = arith.constant 0 : index
    %4 = vector.load %arg3[%c0_2, %c0_3] : memref<512x147xbf16, #tpu.memory_space<vmem>>, vector<512x147xbf16>
    %c0_4 = arith.constant 0 : index
    %c0_5 = arith.constant 0 : index
    %5 = vector.load %arg4[%c0_4, %c0_5] : memref<147x128xbf16, #tpu.memory_space<vmem>>, vector<147x128xbf16>
    %cst = arith.constant dense<0.000000e+00> : vector<512x128xf32>
    %6 = tpu.matmul %4, %5, %cst {dimension_numbers = #tpu.dot_dimension_numbers<[1], [0], [0], [1], [0, 0, 1, 1], [], []>} : vector<512x147xbf16>, vector<147x128xbf16>, vector<512x128xf32> -> vector<512x128xf32>
    %7 = arith.addf %3, %6 : vector<512x128xf32>
    %c0_6 = arith.constant 0 : index
    %c0_7 = arith.constant 0 : index
    %8 = vector.load %arg8[%c0_6, %c0_7] : memref<512x128xf32, #tpu.memory_space<vmem>>, vector<512x128xf32>
    tpu.vector_store %arg8[%c0_6, %c0_7], %7 {strides = array<i32>} : memref<512x128xf32, #tpu.memory_space<vmem>>, vector<512x128xf32>,
    %c0_i32_8 = arith.constant 0 : i32
    %9 = arith.cmpi eq, %arg2, %c0_i32_8 : i32
    %10 = arith.extui %9 : i1 to i32
    %c0_i32_9 = arith.constant 0 : i32
    %11 = arith.cmpi ne, %10, %c0_i32_9 : i32
    scf.if %11 {
      %c0_10 = arith.constant 0 : index
      %c0_11 = arith.constant 0 : index
      %12 = vector.load %arg8[%c0_10, %c0_11] : memref<512x128xf32, #tpu.memory_space<vmem>>, vector<512x128xf32>
      %c0_12 = arith.constant 0 : index
      %c0_13 = arith.constant 0 : index
      %13 = vector.load %arg5[%c0_12, %c0_13] : memref<1x128xf32, #tpu.memory_space<vmem>>, vector<1x128xf32>
      %14 = vector.broadcast %13 : vector<1x128xf32> to vector<512x128xf32>
      %15 = arith.mulf %12, %14 : vector<512x128xf32>
      %c0_14 = arith.constant 0 : index
      %c0_15 = arith.constant 0 : index
      %16 = vector.load %arg6[%c0_14, %c0_15] : memref<1x128xf32, #tpu.memory_space<vmem>>, vector<1x128xf32>
      %17 = vector.broadcast %16 : vector<1x128xf32> to vector<512x128xf32>
      %18 = arith.addf %15, %17 : vector<512x128xf32>
      %cst_16 = arith.constant 0.000000e+00 : f32
      %19 = vector.broadcast %cst_16 : f32 to vector<512x128xf32>
      %20 = arith.maximumf %18, %19 : vector<512x128xf32>
      %21 = arith.truncf %20 : vector<512x128xf32> to vector<512x128xbf16>
      %c0_17 = arith.constant 0 : index
      %c0_18 = arith.constant 0 : index
      %22 = vector.load %arg7[%c0_17, %c0_18] : memref<512x128xbf16, #tpu.memory_space<vmem>>, vector<512x128xbf16>
      tpu.vector_store %arg7[%c0_17, %c0_18], %21 {strides = array<i32>} : memref<512x128xbf16, #tpu.memory_space<vmem>>, vector<512x128xbf16>,
    } else {
    }
    return
  }
  func.func @transform_0(%arg0: i32, %arg1: i32, %arg2: i32) -> (i32, i32) {
    %c0_i32 = arith.constant 0 : i32
    return %arg0, %arg2 : i32, i32
  }
  func.func @transform_1(%arg0: i32, %arg1: i32, %arg2: i32) -> (i32, i32) {
    %c0_i32 = arith.constant 0 : i32
    return %arg2, %arg1 : i32, i32
  }
  func.func @transform_2(%arg0: i32, %arg1: i32, %arg2: i32) -> (i32, i32) {
    %c0_i32 = arith.constant 0 : i32
    %c0_i32_0 = arith.constant 0 : i32
    return %c0_i32, %arg1 : i32, i32
  }
  func.func @transform_3(%arg0: i32, %arg1: i32, %arg2: i32) -> (i32, i32) {
    %c0_i32 = arith.constant 0 : i32
    %c0_i32_0 = arith.constant 0 : i32
    return %c0_i32, %arg1 : i32, i32
  }
  func.func @transform_4(%arg0: i32, %arg1: i32, %arg2: i32) -> (i32, i32) {
    %c0_i32 = arith.constant 0 : i32
    return %arg0, %arg1 : i32, i32
  }
}

module attributes {stable_mosaic.version = 11 : i64} {
  func.func @_maxpool_kernel(%arg0: i32, %arg1: memref<128x64xbf16, #tpu.memory_space<vmem>>, %arg2: memref<128x64xbf16, #tpu.memory_space<vmem>>, %arg3: memref<128x64xbf16, #tpu.memory_space<vmem>>, %arg4: memref<128x64xbf16, #tpu.memory_space<vmem>>, %arg5: memref<128x64xbf16, #tpu.memory_space<vmem>>, %arg6: memref<128x64xbf16, #tpu.memory_space<vmem>>, %arg7: memref<128x64xbf16, #tpu.memory_space<vmem>>, %arg8: memref<128x64xbf16, #tpu.memory_space<vmem>>, %arg9: memref<128x64xbf16, #tpu.memory_space<vmem>>, %arg10: memref<128x64xbf16, #tpu.memory_space<vmem>>) attributes {dimension_semantics = [#tpu.dimension_semantics<parallel>], iteration_bounds = array<i64: 1>, scalar_prefetch = 0 : i64, scratch_operands = 0 : i64, tpu.core_type = #tpu.core_type<tc>, window_params = [{transform_indices = @transform_0, window_bounds = array<i64: 128, 64>}, {transform_indices = @transform_1, window_bounds = array<i64: 128, 64>}, {transform_indices = @transform_2, window_bounds = array<i64: 128, 64>}, {transform_indices = @transform_3, window_bounds = array<i64: 128, 64>}, {transform_indices = @transform_4, window_bounds = array<i64: 128, 64>}, {transform_indices = @transform_5, window_bounds = array<i64: 128, 64>}, {transform_indices = @transform_6, window_bounds = array<i64: 128, 64>}, {transform_indices = @transform_7, window_bounds = array<i64: 128, 64>}, {transform_indices = @transform_8, window_bounds = array<i64: 128, 64>}, {transform_indices = @transform_9, window_bounds = array<i64: 128, 64>}]} {
    %c0 = arith.constant 0 : index
    %c0_0 = arith.constant 0 : index
    %0 = vector.load %arg1[%c0, %c0_0] : memref<128x64xbf16, #tpu.memory_space<vmem>>, vector<128x64xbf16>
    %c0_1 = arith.constant 0 : index
    %c0_2 = arith.constant 0 : index
    %1 = vector.load %arg2[%c0_1, %c0_2] : memref<128x64xbf16, #tpu.memory_space<vmem>>, vector<128x64xbf16>
    %2 = arith.maximumf %0, %1 : vector<128x64xbf16>
    %c0_3 = arith.constant 0 : index
    %c0_4 = arith.constant 0 : index
    %3 = vector.load %arg3[%c0_3, %c0_4] : memref<128x64xbf16, #tpu.memory_space<vmem>>, vector<128x64xbf16>
    %4 = arith.maximumf %2, %3 : vector<128x64xbf16>
    %c0_5 = arith.constant 0 : index
    %c0_6 = arith.constant 0 : index
    %5 = vector.load %arg4[%c0_5, %c0_6] : memref<128x64xbf16, #tpu.memory_space<vmem>>, vector<128x64xbf16>
    %6 = arith.maximumf %4, %5 : vector<128x64xbf16>
    %c0_7 = arith.constant 0 : index
    %c0_8 = arith.constant 0 : index
    %7 = vector.load %arg5[%c0_7, %c0_8] : memref<128x64xbf16, #tpu.memory_space<vmem>>, vector<128x64xbf16>
    %8 = arith.maximumf %6, %7 : vector<128x64xbf16>
    %c0_9 = arith.constant 0 : index
    %c0_10 = arith.constant 0 : index
    %9 = vector.load %arg6[%c0_9, %c0_10] : memref<128x64xbf16, #tpu.memory_space<vmem>>, vector<128x64xbf16>
    %10 = arith.maximumf %8, %9 : vector<128x64xbf16>
    %c0_11 = arith.constant 0 : index
    %c0_12 = arith.constant 0 : index
    %11 = vector.load %arg7[%c0_11, %c0_12] : memref<128x64xbf16, #tpu.memory_space<vmem>>, vector<128x64xbf16>
    %12 = arith.maximumf %10, %11 : vector<128x64xbf16>
    %c0_13 = arith.constant 0 : index
    %c0_14 = arith.constant 0 : index
    %13 = vector.load %arg8[%c0_13, %c0_14] : memref<128x64xbf16, #tpu.memory_space<vmem>>, vector<128x64xbf16>
    %14 = arith.maximumf %12, %13 : vector<128x64xbf16>
    %c0_15 = arith.constant 0 : index
    %c0_16 = arith.constant 0 : index
    %15 = vector.load %arg9[%c0_15, %c0_16] : memref<128x64xbf16, #tpu.memory_space<vmem>>, vector<128x64xbf16>
    %16 = arith.maximumf %14, %15 : vector<128x64xbf16>
    %c0_17 = arith.constant 0 : index
    %c0_18 = arith.constant 0 : index
    %17 = vector.load %arg10[%c0_17, %c0_18] : memref<128x64xbf16, #tpu.memory_space<vmem>>, vector<128x64xbf16>
    tpu.vector_store %arg10[%c0_17, %c0_18], %16 {strides = array<i32>} : memref<128x64xbf16, #tpu.memory_space<vmem>>, vector<128x64xbf16>,
    return
  }
  func.func @transform_0(%arg0: i32) -> (i32, i32) {
    %c0_i32 = arith.constant 0 : i32
    %c0_i32_0 = arith.constant 0 : i32
    return %arg0, %c0_i32 : i32, i32
  }
  func.func @transform_1(%arg0: i32) -> (i32, i32) {
    %c0_i32 = arith.constant 0 : i32
    %c0_i32_0 = arith.constant 0 : i32
    return %arg0, %c0_i32 : i32, i32
  }
  func.func @transform_2(%arg0: i32) -> (i32, i32) {
    %c0_i32 = arith.constant 0 : i32
    %c0_i32_0 = arith.constant 0 : i32
    return %arg0, %c0_i32 : i32, i32
  }
  func.func @transform_3(%arg0: i32) -> (i32, i32) {
    %c0_i32 = arith.constant 0 : i32
    %c0_i32_0 = arith.constant 0 : i32
    return %arg0, %c0_i32 : i32, i32
  }
  func.func @transform_4(%arg0: i32) -> (i32, i32) {
    %c0_i32 = arith.constant 0 : i32
    %c0_i32_0 = arith.constant 0 : i32
    return %arg0, %c0_i32 : i32, i32
  }
  func.func @transform_5(%arg0: i32) -> (i32, i32) {
    %c0_i32 = arith.constant 0 : i32
    %c0_i32_0 = arith.constant 0 : i32
    return %arg0, %c0_i32 : i32, i32
  }
  func.func @transform_6(%arg0: i32) -> (i32, i32) {
    %c0_i32 = arith.constant 0 : i32
    %c0_i32_0 = arith.constant 0 : i32
    return %arg0, %c0_i32 : i32, i32
  }
  func.func @transform_7(%arg0: i32) -> (i32, i32) {
    %c0_i32 = arith.constant 0 : i32
    %c0_i32_0 = arith.constant 0 : i32
    return %arg0, %c0_i32 : i32, i32
  }
  func.func @transform_8(%arg0: i32) -> (i32, i32) {
    %c0_i32 = arith.constant 0 : i32
    %c0_i32_0 = arith.constant 0 : i32
    return %arg0, %c0_i32 : i32, i32
  }
  func.func @transform_9(%arg0: i32) -> (i32, i32) {
    %c0_i32 = arith.constant 0 : i32
    %c0_i32_0 = arith.constant 0 : i32
    return %arg0, %c0_i32 : i32, i32
  }
}

module attributes {stable_mosaic.version = 11 : i64} {
  func.func @kernel(%arg0: i32, %arg1: i32, %arg2: i32, %arg3: memref<128x576xbf16, #tpu.memory_space<vmem>>, %arg4: memref<576x128xbf16, #tpu.memory_space<vmem>>, %arg5: memref<1x128xf32, #tpu.memory_space<vmem>>, %arg6: memref<1x128xf32, #tpu.memory_space<vmem>>, %arg7: memref<128x128xbf16, #tpu.memory_space<vmem>>, %arg8: memref<128x128xf32, #tpu.memory_space<vmem>>) attributes {dimension_semantics = [#tpu.dimension_semantics<parallel>, #tpu.dimension_semantics<parallel>, #tpu.dimension_semantics<arbitrary>], iteration_bounds = array<i64: 1, 1, 1>, scalar_prefetch = 0 : i64, scratch_operands = 1 : i64, tpu.core_type = #tpu.core_type<tc>, window_params = [{transform_indices = @transform_0, window_bounds = array<i64: 128, 576>}, {transform_indices = @transform_1, window_bounds = array<i64: 576, 128>}, {transform_indices = @transform_2, window_bounds = array<i64: 1, 128>}, {transform_indices = @transform_3, window_bounds = array<i64: 1, 128>}, {transform_indices = @transform_4, window_bounds = array<i64: 128, 128>}]} {
    %c0_i32 = arith.constant 0 : i32
    %0 = arith.cmpi eq, %arg2, %c0_i32 : i32
    %1 = arith.extui %0 : i1 to i32
    %c0_i32_0 = arith.constant 0 : i32
    %2 = arith.cmpi ne, %1, %c0_i32_0 : i32
    scf.if %2 {
      %cst_10 = arith.constant 0.000000e+00 : f32
      %12 = vector.broadcast %cst_10 : f32 to vector<128x128xf32>
      %c0_11 = arith.constant 0 : index
      %c0_12 = arith.constant 0 : index
      %13 = vector.load %arg8[%c0_11, %c0_12] : memref<128x128xf32, #tpu.memory_space<vmem>>, vector<128x128xf32>
      tpu.vector_store %arg8[%c0_11, %c0_12], %12 {strides = array<i32>} : memref<128x128xf32, #tpu.memory_space<vmem>>, vector<128x128xf32>,
    } else {
    }
    %c0 = arith.constant 0 : index
    %c0_1 = arith.constant 0 : index
    %3 = vector.load %arg8[%c0, %c0_1] : memref<128x128xf32, #tpu.memory_space<vmem>>, vector<128x128xf32>
    %c0_2 = arith.constant 0 : index
    %c0_3 = arith.constant 0 : index
    %4 = vector.load %arg3[%c0_2, %c0_3] : memref<128x576xbf16, #tpu.memory_space<vmem>>, vector<128x576xbf16>
    %c0_4 = arith.constant 0 : index
    %c0_5 = arith.constant 0 : index
    %5 = vector.load %arg4[%c0_4, %c0_5] : memref<576x128xbf16, #tpu.memory_space<vmem>>, vector<576x128xbf16>
    %cst = arith.constant dense<0.000000e+00> : vector<128x128xf32>
    %6 = tpu.matmul %4, %5, %cst {dimension_numbers = #tpu.dot_dimension_numbers<[1], [0], [0], [1], [0, 0, 1, 1], [], []>} : vector<128x576xbf16>, vector<576x128xbf16>, vector<128x128xf32> -> vector<128x128xf32>
    %7 = arith.addf %3, %6 : vector<128x128xf32>
    %c0_6 = arith.constant 0 : index
    %c0_7 = arith.constant 0 : index
    %8 = vector.load %arg8[%c0_6, %c0_7] : memref<128x128xf32, #tpu.memory_space<vmem>>, vector<128x128xf32>
    tpu.vector_store %arg8[%c0_6, %c0_7], %7 {strides = array<i32>} : memref<128x128xf32, #tpu.memory_space<vmem>>, vector<128x128xf32>,
    %c0_i32_8 = arith.constant 0 : i32
    %9 = arith.cmpi eq, %arg2, %c0_i32_8 : i32
    %10 = arith.extui %9 : i1 to i32
    %c0_i32_9 = arith.constant 0 : i32
    %11 = arith.cmpi ne, %10, %c0_i32_9 : i32
    scf.if %11 {
      %c0_10 = arith.constant 0 : index
      %c0_11 = arith.constant 0 : index
      %12 = vector.load %arg8[%c0_10, %c0_11] : memref<128x128xf32, #tpu.memory_space<vmem>>, vector<128x128xf32>
      %c0_12 = arith.constant 0 : index
      %c0_13 = arith.constant 0 : index
      %13 = vector.load %arg5[%c0_12, %c0_13] : memref<1x128xf32, #tpu.memory_space<vmem>>, vector<1x128xf32>
      %14 = vector.broadcast %13 : vector<1x128xf32> to vector<128x128xf32>
      %15 = arith.mulf %12, %14 : vector<128x128xf32>
      %c0_14 = arith.constant 0 : index
      %c0_15 = arith.constant 0 : index
      %16 = vector.load %arg6[%c0_14, %c0_15] : memref<1x128xf32, #tpu.memory_space<vmem>>, vector<1x128xf32>
      %17 = vector.broadcast %16 : vector<1x128xf32> to vector<128x128xf32>
      %18 = arith.addf %15, %17 : vector<128x128xf32>
      %cst_16 = arith.constant 0.000000e+00 : f32
      %19 = vector.broadcast %cst_16 : f32 to vector<128x128xf32>
      %20 = arith.maximumf %18, %19 : vector<128x128xf32>
      %21 = arith.truncf %20 : vector<128x128xf32> to vector<128x128xbf16>
      %c0_17 = arith.constant 0 : index
      %c0_18 = arith.constant 0 : index
      %22 = vector.load %arg7[%c0_17, %c0_18] : memref<128x128xbf16, #tpu.memory_space<vmem>>, vector<128x128xbf16>
      tpu.vector_store %arg7[%c0_17, %c0_18], %21 {strides = array<i32>} : memref<128x128xbf16, #tpu.memory_space<vmem>>, vector<128x128xbf16>,
    } else {
    }
    return
  }
  func.func @transform_0(%arg0: i32, %arg1: i32, %arg2: i32) -> (i32, i32) {
    %c0_i32 = arith.constant 0 : i32
    return %arg0, %arg2 : i32, i32
  }
  func.func @transform_1(%arg0: i32, %arg1: i32, %arg2: i32) -> (i32, i32) {
    %c0_i32 = arith.constant 0 : i32
    return %arg2, %arg1 : i32, i32
  }
  func.func @transform_2(%arg0: i32, %arg1: i32, %arg2: i32) -> (i32, i32) {
    %c0_i32 = arith.constant 0 : i32
    %c0_i32_0 = arith.constant 0 : i32
    return %c0_i32, %arg1 : i32, i32
  }
  func.func @transform_3(%arg0: i32, %arg1: i32, %arg2: i32) -> (i32, i32) {
    %c0_i32 = arith.constant 0 : i32
    %c0_i32_0 = arith.constant 0 : i32
    return %c0_i32, %arg1 : i32, i32
  }
  func.func @transform_4(%arg0: i32, %arg1: i32, %arg2: i32) -> (i32, i32) {
    %c0_i32 = arith.constant 0 : i32
    return %arg0, %arg1 : i32, i32
  }
}

module attributes {stable_mosaic.version = 11 : i64} {
  func.func @kernel(%arg0: i32, %arg1: i32, %arg2: i32, %arg3: memref<128x576xbf16, #tpu.memory_space<vmem>>, %arg4: memref<576x128xbf16, #tpu.memory_space<vmem>>, %arg5: memref<1x128xf32, #tpu.memory_space<vmem>>, %arg6: memref<1x128xf32, #tpu.memory_space<vmem>>, %arg7: memref<128x128xbf16, #tpu.memory_space<vmem>>, %arg8: memref<128x128xbf16, #tpu.memory_space<vmem>>, %arg9: memref<128x128xf32, #tpu.memory_space<vmem>>) attributes {dimension_semantics = [#tpu.dimension_semantics<parallel>, #tpu.dimension_semantics<parallel>, #tpu.dimension_semantics<arbitrary>], iteration_bounds = array<i64: 1, 1, 1>, scalar_prefetch = 0 : i64, scratch_operands = 1 : i64, tpu.core_type = #tpu.core_type<tc>, window_params = [{transform_indices = @transform_0, window_bounds = array<i64: 128, 576>}, {transform_indices = @transform_1, window_bounds = array<i64: 576, 128>}, {transform_indices = @transform_2, window_bounds = array<i64: 1, 128>}, {transform_indices = @transform_3, window_bounds = array<i64: 1, 128>}, {transform_indices = @transform_4, window_bounds = array<i64: 128, 128>}, {transform_indices = @transform_5, window_bounds = array<i64: 128, 128>}]} {
    %c0_i32 = arith.constant 0 : i32
    %0 = arith.cmpi eq, %arg2, %c0_i32 : i32
    %1 = arith.extui %0 : i1 to i32
    %c0_i32_0 = arith.constant 0 : i32
    %2 = arith.cmpi ne, %1, %c0_i32_0 : i32
    scf.if %2 {
      %cst_10 = arith.constant 0.000000e+00 : f32
      %12 = vector.broadcast %cst_10 : f32 to vector<128x128xf32>
      %c0_11 = arith.constant 0 : index
      %c0_12 = arith.constant 0 : index
      %13 = vector.load %arg9[%c0_11, %c0_12] : memref<128x128xf32, #tpu.memory_space<vmem>>, vector<128x128xf32>
      tpu.vector_store %arg9[%c0_11, %c0_12], %12 {strides = array<i32>} : memref<128x128xf32, #tpu.memory_space<vmem>>, vector<128x128xf32>,
    } else {
    }
    %c0 = arith.constant 0 : index
    %c0_1 = arith.constant 0 : index
    %3 = vector.load %arg9[%c0, %c0_1] : memref<128x128xf32, #tpu.memory_space<vmem>>, vector<128x128xf32>
    %c0_2 = arith.constant 0 : index
    %c0_3 = arith.constant 0 : index
    %4 = vector.load %arg3[%c0_2, %c0_3] : memref<128x576xbf16, #tpu.memory_space<vmem>>, vector<128x576xbf16>
    %c0_4 = arith.constant 0 : index
    %c0_5 = arith.constant 0 : index
    %5 = vector.load %arg4[%c0_4, %c0_5] : memref<576x128xbf16, #tpu.memory_space<vmem>>, vector<576x128xbf16>
    %cst = arith.constant dense<0.000000e+00> : vector<128x128xf32>
    %6 = tpu.matmul %4, %5, %cst {dimension_numbers = #tpu.dot_dimension_numbers<[1], [0], [0], [1], [0, 0, 1, 1], [], []>} : vector<128x576xbf16>, vector<576x128xbf16>, vector<128x128xf32> -> vector<128x128xf32>
    %7 = arith.addf %3, %6 : vector<128x128xf32>
    %c0_6 = arith.constant 0 : index
    %c0_7 = arith.constant 0 : index
    %8 = vector.load %arg9[%c0_6, %c0_7] : memref<128x128xf32, #tpu.memory_space<vmem>>, vector<128x128xf32>
    tpu.vector_store %arg9[%c0_6, %c0_7], %7 {strides = array<i32>} : memref<128x128xf32, #tpu.memory_space<vmem>>, vector<128x128xf32>,
    %c0_i32_8 = arith.constant 0 : i32
    %9 = arith.cmpi eq, %arg2, %c0_i32_8 : i32
    %10 = arith.extui %9 : i1 to i32
    %c0_i32_9 = arith.constant 0 : i32
    %11 = arith.cmpi ne, %10, %c0_i32_9 : i32
    scf.if %11 {
      %c0_10 = arith.constant 0 : index
      %c0_11 = arith.constant 0 : index
      %12 = vector.load %arg9[%c0_10, %c0_11] : memref<128x128xf32, #tpu.memory_space<vmem>>, vector<128x128xf32>
      %c0_12 = arith.constant 0 : index
      %c0_13 = arith.constant 0 : index
      %13 = vector.load %arg5[%c0_12, %c0_13] : memref<1x128xf32, #tpu.memory_space<vmem>>, vector<1x128xf32>
      %14 = vector.broadcast %13 : vector<1x128xf32> to vector<128x128xf32>
      %15 = arith.mulf %12, %14 : vector<128x128xf32>
      %c0_14 = arith.constant 0 : index
      %c0_15 = arith.constant 0 : index
      %16 = vector.load %arg6[%c0_14, %c0_15] : memref<1x128xf32, #tpu.memory_space<vmem>>, vector<1x128xf32>
      %17 = vector.broadcast %16 : vector<1x128xf32> to vector<128x128xf32>
      %18 = arith.addf %15, %17 : vector<128x128xf32>
      %c0_16 = arith.constant 0 : index
      %c0_17 = arith.constant 0 : index
      %19 = vector.load %arg7[%c0_16, %c0_17] : memref<128x128xbf16, #tpu.memory_space<vmem>>, vector<128x128xbf16>
      %20 = arith.extf %19 : vector<128x128xbf16> to vector<128x128xf32>
      %21 = arith.addf %18, %20 : vector<128x128xf32>
      %cst_18 = arith.constant 0.000000e+00 : f32
      %22 = vector.broadcast %cst_18 : f32 to vector<128x128xf32>
      %23 = arith.maximumf %21, %22 : vector<128x128xf32>
      %24 = arith.truncf %23 : vector<128x128xf32> to vector<128x128xbf16>
      %c0_19 = arith.constant 0 : index
      %c0_20 = arith.constant 0 : index
      %25 = vector.load %arg8[%c0_19, %c0_20] : memref<128x128xbf16, #tpu.memory_space<vmem>>, vector<128x128xbf16>
      tpu.vector_store %arg8[%c0_19, %c0_20], %24 {strides = array<i32>} : memref<128x128xbf16, #tpu.memory_space<vmem>>, vector<128x128xbf16>,
    } else {
    }
    return
  }
  func.func @transform_0(%arg0: i32, %arg1: i32, %arg2: i32) -> (i32, i32) {
    %c0_i32 = arith.constant 0 : i32
    return %arg0, %arg2 : i32, i32
  }
  func.func @transform_1(%arg0: i32, %arg1: i32, %arg2: i32) -> (i32, i32) {
    %c0_i32 = arith.constant 0 : i32
    return %arg2, %arg1 : i32, i32
  }
  func.func @transform_2(%arg0: i32, %arg1: i32, %arg2: i32) -> (i32, i32) {
    %c0_i32 = arith.constant 0 : i32
    %c0_i32_0 = arith.constant 0 : i32
    return %c0_i32, %arg1 : i32, i32
  }
  func.func @transform_3(%arg0: i32, %arg1: i32, %arg2: i32) -> (i32, i32) {
    %c0_i32 = arith.constant 0 : i32
    %c0_i32_0 = arith.constant 0 : i32
    return %c0_i32, %arg1 : i32, i32
  }
  func.func @transform_4(%arg0: i32, %arg1: i32, %arg2: i32) -> (i32, i32) {
    %c0_i32 = arith.constant 0 : i32
    return %arg0, %arg1 : i32, i32
  }
  func.func @transform_5(%arg0: i32, %arg1: i32, %arg2: i32) -> (i32, i32) {
    %c0_i32 = arith.constant 0 : i32
    return %arg0, %arg1 : i32, i32
  }
}

module attributes {stable_mosaic.version = 11 : i64} {
  func.func @kernel(%arg0: i32, %arg1: i32, %arg2: i32, %arg3: memref<32x576xbf16, #tpu.memory_space<vmem>>, %arg4: memref<576x128xbf16, #tpu.memory_space<vmem>>, %arg5: memref<1x128xf32, #tpu.memory_space<vmem>>, %arg6: memref<1x128xf32, #tpu.memory_space<vmem>>, %arg7: memref<32x128xbf16, #tpu.memory_space<vmem>>, %arg8: memref<32x128xf32, #tpu.memory_space<vmem>>) attributes {dimension_semantics = [#tpu.dimension_semantics<parallel>, #tpu.dimension_semantics<parallel>, #tpu.dimension_semantics<arbitrary>], iteration_bounds = array<i64: 1, 1, 1>, scalar_prefetch = 0 : i64, scratch_operands = 1 : i64, tpu.core_type = #tpu.core_type<tc>, window_params = [{transform_indices = @transform_0, window_bounds = array<i64: 32, 576>}, {transform_indices = @transform_1, window_bounds = array<i64: 576, 128>}, {transform_indices = @transform_2, window_bounds = array<i64: 1, 128>}, {transform_indices = @transform_3, window_bounds = array<i64: 1, 128>}, {transform_indices = @transform_4, window_bounds = array<i64: 32, 128>}]} {
    %c0_i32 = arith.constant 0 : i32
    %0 = arith.cmpi eq, %arg2, %c0_i32 : i32
    %1 = arith.extui %0 : i1 to i32
    %c0_i32_0 = arith.constant 0 : i32
    %2 = arith.cmpi ne, %1, %c0_i32_0 : i32
    scf.if %2 {
      %cst_10 = arith.constant 0.000000e+00 : f32
      %12 = vector.broadcast %cst_10 : f32 to vector<32x128xf32>
      %c0_11 = arith.constant 0 : index
      %c0_12 = arith.constant 0 : index
      %13 = vector.load %arg8[%c0_11, %c0_12] : memref<32x128xf32, #tpu.memory_space<vmem>>, vector<32x128xf32>
      tpu.vector_store %arg8[%c0_11, %c0_12], %12 {strides = array<i32>} : memref<32x128xf32, #tpu.memory_space<vmem>>, vector<32x128xf32>,
    } else {
    }
    %c0 = arith.constant 0 : index
    %c0_1 = arith.constant 0 : index
    %3 = vector.load %arg8[%c0, %c0_1] : memref<32x128xf32, #tpu.memory_space<vmem>>, vector<32x128xf32>
    %c0_2 = arith.constant 0 : index
    %c0_3 = arith.constant 0 : index
    %4 = vector.load %arg3[%c0_2, %c0_3] : memref<32x576xbf16, #tpu.memory_space<vmem>>, vector<32x576xbf16>
    %c0_4 = arith.constant 0 : index
    %c0_5 = arith.constant 0 : index
    %5 = vector.load %arg4[%c0_4, %c0_5] : memref<576x128xbf16, #tpu.memory_space<vmem>>, vector<576x128xbf16>
    %cst = arith.constant dense<0.000000e+00> : vector<32x128xf32>
    %6 = tpu.matmul %4, %5, %cst {dimension_numbers = #tpu.dot_dimension_numbers<[1], [0], [0], [1], [0, 0, 1, 1], [], []>} : vector<32x576xbf16>, vector<576x128xbf16>, vector<32x128xf32> -> vector<32x128xf32>
    %7 = arith.addf %3, %6 : vector<32x128xf32>
    %c0_6 = arith.constant 0 : index
    %c0_7 = arith.constant 0 : index
    %8 = vector.load %arg8[%c0_6, %c0_7] : memref<32x128xf32, #tpu.memory_space<vmem>>, vector<32x128xf32>
    tpu.vector_store %arg8[%c0_6, %c0_7], %7 {strides = array<i32>} : memref<32x128xf32, #tpu.memory_space<vmem>>, vector<32x128xf32>,
    %c0_i32_8 = arith.constant 0 : i32
    %9 = arith.cmpi eq, %arg2, %c0_i32_8 : i32
    %10 = arith.extui %9 : i1 to i32
    %c0_i32_9 = arith.constant 0 : i32
    %11 = arith.cmpi ne, %10, %c0_i32_9 : i32
    scf.if %11 {
      %c0_10 = arith.constant 0 : index
      %c0_11 = arith.constant 0 : index
      %12 = vector.load %arg8[%c0_10, %c0_11] : memref<32x128xf32, #tpu.memory_space<vmem>>, vector<32x128xf32>
      %c0_12 = arith.constant 0 : index
      %c0_13 = arith.constant 0 : index
      %13 = vector.load %arg5[%c0_12, %c0_13] : memref<1x128xf32, #tpu.memory_space<vmem>>, vector<1x128xf32>
      %14 = vector.broadcast %13 : vector<1x128xf32> to vector<32x128xf32>
      %15 = arith.mulf %12, %14 : vector<32x128xf32>
      %c0_14 = arith.constant 0 : index
      %c0_15 = arith.constant 0 : index
      %16 = vector.load %arg6[%c0_14, %c0_15] : memref<1x128xf32, #tpu.memory_space<vmem>>, vector<1x128xf32>
      %17 = vector.broadcast %16 : vector<1x128xf32> to vector<32x128xf32>
      %18 = arith.addf %15, %17 : vector<32x128xf32>
      %cst_16 = arith.constant 0.000000e+00 : f32
      %19 = vector.broadcast %cst_16 : f32 to vector<32x128xf32>
      %20 = arith.maximumf %18, %19 : vector<32x128xf32>
      %21 = arith.truncf %20 : vector<32x128xf32> to vector<32x128xbf16>
      %c0_17 = arith.constant 0 : index
      %c0_18 = arith.constant 0 : index
      %22 = vector.load %arg7[%c0_17, %c0_18] : memref<32x128xbf16, #tpu.memory_space<vmem>>, vector<32x128xbf16>
      tpu.vector_store %arg7[%c0_17, %c0_18], %21 {strides = array<i32>} : memref<32x128xbf16, #tpu.memory_space<vmem>>, vector<32x128xbf16>,
    } else {
    }
    return
  }
  func.func @transform_0(%arg0: i32, %arg1: i32, %arg2: i32) -> (i32, i32) {
    %c0_i32 = arith.constant 0 : i32
    return %arg0, %arg2 : i32, i32
  }
  func.func @transform_1(%arg0: i32, %arg1: i32, %arg2: i32) -> (i32, i32) {
    %c0_i32 = arith.constant 0 : i32
    return %arg2, %arg1 : i32, i32
  }
  func.func @transform_2(%arg0: i32, %arg1: i32, %arg2: i32) -> (i32, i32) {
    %c0_i32 = arith.constant 0 : i32
    %c0_i32_0 = arith.constant 0 : i32
    return %c0_i32, %arg1 : i32, i32
  }
  func.func @transform_3(%arg0: i32, %arg1: i32, %arg2: i32) -> (i32, i32) {
    %c0_i32 = arith.constant 0 : i32
    %c0_i32_0 = arith.constant 0 : i32
    return %c0_i32, %arg1 : i32, i32
  }
  func.func @transform_4(%arg0: i32, %arg1: i32, %arg2: i32) -> (i32, i32) {
    %c0_i32 = arith.constant 0 : i32
    return %arg0, %arg1 : i32, i32
  }
}

module attributes {stable_mosaic.version = 11 : i64} {
  func.func @kernel(%arg0: i32, %arg1: i32, %arg2: i32, %arg3: memref<32x64xbf16, #tpu.memory_space<vmem>>, %arg4: memref<64x128xbf16, #tpu.memory_space<vmem>>, %arg5: memref<1x128xf32, #tpu.memory_space<vmem>>, %arg6: memref<1x128xf32, #tpu.memory_space<vmem>>, %arg7: memref<32x128xbf16, #tpu.memory_space<vmem>>, %arg8: memref<32x128xf32, #tpu.memory_space<vmem>>) attributes {dimension_semantics = [#tpu.dimension_semantics<parallel>, #tpu.dimension_semantics<parallel>, #tpu.dimension_semantics<arbitrary>], iteration_bounds = array<i64: 1, 1, 1>, scalar_prefetch = 0 : i64, scratch_operands = 1 : i64, tpu.core_type = #tpu.core_type<tc>, window_params = [{transform_indices = @transform_0, window_bounds = array<i64: 32, 64>}, {transform_indices = @transform_1, window_bounds = array<i64: 64, 128>}, {transform_indices = @transform_2, window_bounds = array<i64: 1, 128>}, {transform_indices = @transform_3, window_bounds = array<i64: 1, 128>}, {transform_indices = @transform_4, window_bounds = array<i64: 32, 128>}]} {
    %c0_i32 = arith.constant 0 : i32
    %0 = arith.cmpi eq, %arg2, %c0_i32 : i32
    %1 = arith.extui %0 : i1 to i32
    %c0_i32_0 = arith.constant 0 : i32
    %2 = arith.cmpi ne, %1, %c0_i32_0 : i32
    scf.if %2 {
      %cst_10 = arith.constant 0.000000e+00 : f32
      %12 = vector.broadcast %cst_10 : f32 to vector<32x128xf32>
      %c0_11 = arith.constant 0 : index
      %c0_12 = arith.constant 0 : index
      %13 = vector.load %arg8[%c0_11, %c0_12] : memref<32x128xf32, #tpu.memory_space<vmem>>, vector<32x128xf32>
      tpu.vector_store %arg8[%c0_11, %c0_12], %12 {strides = array<i32>} : memref<32x128xf32, #tpu.memory_space<vmem>>, vector<32x128xf32>,
    } else {
    }
    %c0 = arith.constant 0 : index
    %c0_1 = arith.constant 0 : index
    %3 = vector.load %arg8[%c0, %c0_1] : memref<32x128xf32, #tpu.memory_space<vmem>>, vector<32x128xf32>
    %c0_2 = arith.constant 0 : index
    %c0_3 = arith.constant 0 : index
    %4 = vector.load %arg3[%c0_2, %c0_3] : memref<32x64xbf16, #tpu.memory_space<vmem>>, vector<32x64xbf16>
    %c0_4 = arith.constant 0 : index
    %c0_5 = arith.constant 0 : index
    %5 = vector.load %arg4[%c0_4, %c0_5] : memref<64x128xbf16, #tpu.memory_space<vmem>>, vector<64x128xbf16>
    %cst = arith.constant dense<0.000000e+00> : vector<32x128xf32>
    %6 = tpu.matmul %4, %5, %cst {dimension_numbers = #tpu.dot_dimension_numbers<[1], [0], [0], [1], [0, 0, 1, 1], [], []>} : vector<32x64xbf16>, vector<64x128xbf16>, vector<32x128xf32> -> vector<32x128xf32>
    %7 = arith.addf %3, %6 : vector<32x128xf32>
    %c0_6 = arith.constant 0 : index
    %c0_7 = arith.constant 0 : index
    %8 = vector.load %arg8[%c0_6, %c0_7] : memref<32x128xf32, #tpu.memory_space<vmem>>, vector<32x128xf32>
    tpu.vector_store %arg8[%c0_6, %c0_7], %7 {strides = array<i32>} : memref<32x128xf32, #tpu.memory_space<vmem>>, vector<32x128xf32>,
    %c0_i32_8 = arith.constant 0 : i32
    %9 = arith.cmpi eq, %arg2, %c0_i32_8 : i32
    %10 = arith.extui %9 : i1 to i32
    %c0_i32_9 = arith.constant 0 : i32
    %11 = arith.cmpi ne, %10, %c0_i32_9 : i32
    scf.if %11 {
      %c0_10 = arith.constant 0 : index
      %c0_11 = arith.constant 0 : index
      %12 = vector.load %arg8[%c0_10, %c0_11] : memref<32x128xf32, #tpu.memory_space<vmem>>, vector<32x128xf32>
      %c0_12 = arith.constant 0 : index
      %c0_13 = arith.constant 0 : index
      %13 = vector.load %arg5[%c0_12, %c0_13] : memref<1x128xf32, #tpu.memory_space<vmem>>, vector<1x128xf32>
      %14 = vector.broadcast %13 : vector<1x128xf32> to vector<32x128xf32>
      %15 = arith.mulf %12, %14 : vector<32x128xf32>
      %c0_14 = arith.constant 0 : index
      %c0_15 = arith.constant 0 : index
      %16 = vector.load %arg6[%c0_14, %c0_15] : memref<1x128xf32, #tpu.memory_space<vmem>>, vector<1x128xf32>
      %17 = vector.broadcast %16 : vector<1x128xf32> to vector<32x128xf32>
      %18 = arith.addf %15, %17 : vector<32x128xf32>
      %19 = arith.truncf %18 : vector<32x128xf32> to vector<32x128xbf16>
      %c0_16 = arith.constant 0 : index
      %c0_17 = arith.constant 0 : index
      %20 = vector.load %arg7[%c0_16, %c0_17] : memref<32x128xbf16, #tpu.memory_space<vmem>>, vector<32x128xbf16>
      tpu.vector_store %arg7[%c0_16, %c0_17], %19 {strides = array<i32>} : memref<32x128xbf16, #tpu.memory_space<vmem>>, vector<32x128xbf16>,
    } else {
    }
    return
  }
  func.func @transform_0(%arg0: i32, %arg1: i32, %arg2: i32) -> (i32, i32) {
    %c0_i32 = arith.constant 0 : i32
    return %arg0, %arg2 : i32, i32
  }
  func.func @transform_1(%arg0: i32, %arg1: i32, %arg2: i32) -> (i32, i32) {
    %c0_i32 = arith.constant 0 : i32
    return %arg2, %arg1 : i32, i32
  }
  func.func @transform_2(%arg0: i32, %arg1: i32, %arg2: i32) -> (i32, i32) {
    %c0_i32 = arith.constant 0 : i32
    %c0_i32_0 = arith.constant 0 : i32
    return %c0_i32, %arg1 : i32, i32
  }
  func.func @transform_3(%arg0: i32, %arg1: i32, %arg2: i32) -> (i32, i32) {
    %c0_i32 = arith.constant 0 : i32
    %c0_i32_0 = arith.constant 0 : i32
    return %c0_i32, %arg1 : i32, i32
  }
  func.func @transform_4(%arg0: i32, %arg1: i32, %arg2: i32) -> (i32, i32) {
    %c0_i32 = arith.constant 0 : i32
    return %arg0, %arg1 : i32, i32
  }
}

module attributes {stable_mosaic.version = 11 : i64} {
  func.func @kernel(%arg0: i32, %arg1: i32, %arg2: i32, %arg3: memref<32x384xbf16, #tpu.memory_space<vmem>>, %arg4: memref<384x128xbf16, #tpu.memory_space<vmem>>, %arg5: memref<1x128xf32, #tpu.memory_space<vmem>>, %arg6: memref<1x128xf32, #tpu.memory_space<vmem>>, %arg7: memref<32x128xbf16, #tpu.memory_space<vmem>>, %arg8: memref<32x128xbf16, #tpu.memory_space<vmem>>, %arg9: memref<32x128xf32, #tpu.memory_space<vmem>>) attributes {dimension_semantics = [#tpu.dimension_semantics<parallel>, #tpu.dimension_semantics<parallel>, #tpu.dimension_semantics<arbitrary>], iteration_bounds = array<i64: 1, 1, 3>, scalar_prefetch = 0 : i64, scratch_operands = 1 : i64, tpu.core_type = #tpu.core_type<tc>, window_params = [{transform_indices = @transform_0, window_bounds = array<i64: 32, 384>}, {transform_indices = @transform_1, window_bounds = array<i64: 384, 128>}, {transform_indices = @transform_2, window_bounds = array<i64: 1, 128>}, {transform_indices = @transform_3, window_bounds = array<i64: 1, 128>}, {transform_indices = @transform_4, window_bounds = array<i64: 32, 128>}, {transform_indices = @transform_5, window_bounds = array<i64: 32, 128>}]} {
    %c0_i32 = arith.constant 0 : i32
    %0 = arith.cmpi eq, %arg2, %c0_i32 : i32
    %1 = arith.extui %0 : i1 to i32
    %c0_i32_0 = arith.constant 0 : i32
    %2 = arith.cmpi ne, %1, %c0_i32_0 : i32
    scf.if %2 {
      %cst_9 = arith.constant 0.000000e+00 : f32
      %12 = vector.broadcast %cst_9 : f32 to vector<32x128xf32>
      %c0_10 = arith.constant 0 : index
      %c0_11 = arith.constant 0 : index
      %13 = vector.load %arg9[%c0_10, %c0_11] : memref<32x128xf32, #tpu.memory_space<vmem>>, vector<32x128xf32>
      tpu.vector_store %arg9[%c0_10, %c0_11], %12 {strides = array<i32>} : memref<32x128xf32, #tpu.memory_space<vmem>>, vector<32x128xf32>,
    } else {
    }
    %c0 = arith.constant 0 : index
    %c0_1 = arith.constant 0 : index
    %3 = vector.load %arg9[%c0, %c0_1] : memref<32x128xf32, #tpu.memory_space<vmem>>, vector<32x128xf32>
    %c0_2 = arith.constant 0 : index
    %c0_3 = arith.constant 0 : index
    %4 = vector.load %arg3[%c0_2, %c0_3] : memref<32x384xbf16, #tpu.memory_space<vmem>>, vector<32x384xbf16>
    %c0_4 = arith.constant 0 : index
    %c0_5 = arith.constant 0 : index
    %5 = vector.load %arg4[%c0_4, %c0_5] : memref<384x128xbf16, #tpu.memory_space<vmem>>, vector<384x128xbf16>
    %cst = arith.constant dense<0.000000e+00> : vector<32x128xf32>
    %6 = tpu.matmul %4, %5, %cst {dimension_numbers = #tpu.dot_dimension_numbers<[1], [0], [0], [1], [0, 0, 1, 1], [], []>} : vector<32x384xbf16>, vector<384x128xbf16>, vector<32x128xf32> -> vector<32x128xf32>
    %7 = arith.addf %3, %6 : vector<32x128xf32>
    %c0_6 = arith.constant 0 : index
    %c0_7 = arith.constant 0 : index
    %8 = vector.load %arg9[%c0_6, %c0_7] : memref<32x128xf32, #tpu.memory_space<vmem>>, vector<32x128xf32>
    tpu.vector_store %arg9[%c0_6, %c0_7], %7 {strides = array<i32>} : memref<32x128xf32, #tpu.memory_space<vmem>>, vector<32x128xf32>,
    %c2_i32 = arith.constant 2 : i32
    %9 = arith.cmpi eq, %arg2, %c2_i32 : i32
    %10 = arith.extui %9 : i1 to i32
    %c0_i32_8 = arith.constant 0 : i32
    %11 = arith.cmpi ne, %10, %c0_i32_8 : i32
    scf.if %11 {
      %c0_9 = arith.constant 0 : index
      %c0_10 = arith.constant 0 : index
      %12 = vector.load %arg9[%c0_9, %c0_10] : memref<32x128xf32, #tpu.memory_space<vmem>>, vector<32x128xf32>
      %c0_11 = arith.constant 0 : index
      %c0_12 = arith.constant 0 : index
      %13 = vector.load %arg5[%c0_11, %c0_12] : memref<1x128xf32, #tpu.memory_space<vmem>>, vector<1x128xf32>
      %14 = vector.broadcast %13 : vector<1x128xf32> to vector<32x128xf32>
      %15 = arith.mulf %12, %14 : vector<32x128xf32>
      %c0_13 = arith.constant 0 : index
      %c0_14 = arith.constant 0 : index
      %16 = vector.load %arg6[%c0_13, %c0_14] : memref<1x128xf32, #tpu.memory_space<vmem>>, vector<1x128xf32>
      %17 = vector.broadcast %16 : vector<1x128xf32> to vector<32x128xf32>
      %18 = arith.addf %15, %17 : vector<32x128xf32>
      %c0_15 = arith.constant 0 : index
      %c0_16 = arith.constant 0 : index
      %19 = vector.load %arg7[%c0_15, %c0_16] : memref<32x128xbf16, #tpu.memory_space<vmem>>, vector<32x128xbf16>
      %20 = arith.extf %19 : vector<32x128xbf16> to vector<32x128xf32>
      %21 = arith.addf %18, %20 : vector<32x128xf32>
      %cst_17 = arith.constant 0.000000e+00 : f32
      %22 = vector.broadcast %cst_17 : f32 to vector<32x128xf32>
      %23 = arith.maximumf %21, %22 : vector<32x128xf32>
      %24 = arith.truncf %23 : vector<32x128xf32> to vector<32x128xbf16>
      %c0_18 = arith.constant 0 : index
      %c0_19 = arith.constant 0 : index
      %25 = vector.load %arg8[%c0_18, %c0_19] : memref<32x128xbf16, #tpu.memory_space<vmem>>, vector<32x128xbf16>
      tpu.vector_store %arg8[%c0_18, %c0_19], %24 {strides = array<i32>} : memref<32x128xbf16, #tpu.memory_space<vmem>>, vector<32x128xbf16>,
    } else {
    }
    return
  }
  func.func @transform_0(%arg0: i32, %arg1: i32, %arg2: i32) -> (i32, i32) {
    %c0_i32 = arith.constant 0 : i32
    return %arg0, %arg2 : i32, i32
  }
  func.func @transform_1(%arg0: i32, %arg1: i32, %arg2: i32) -> (i32, i32) {
    %c0_i32 = arith.constant 0 : i32
    return %arg2, %arg1 : i32, i32
  }
  func.func @transform_2(%arg0: i32, %arg1: i32, %arg2: i32) -> (i32, i32) {
    %c0_i32 = arith.constant 0 : i32
    %c0_i32_0 = arith.constant 0 : i32
    return %c0_i32, %arg1 : i32, i32
  }
  func.func @transform_3(%arg0: i32, %arg1: i32, %arg2: i32) -> (i32, i32) {
    %c0_i32 = arith.constant 0 : i32
    %c0_i32_0 = arith.constant 0 : i32
    return %c0_i32, %arg1 : i32, i32
  }
  func.func @transform_4(%arg0: i32, %arg1: i32, %arg2: i32) -> (i32, i32) {
    %c0_i32 = arith.constant 0 : i32
    return %arg0, %arg1 : i32, i32
  }
  func.func @transform_5(%arg0: i32, %arg1: i32, %arg2: i32) -> (i32, i32) {
    %c0_i32 = arith.constant 0 : i32
    return %arg0, %arg1 : i32, i32
  }
}

module attributes {stable_mosaic.version = 11 : i64} {
  func.func @kernel(%arg0: i32, %arg1: i32, %arg2: i32, %arg3: memref<8x384xbf16, #tpu.memory_space<vmem>>, %arg4: memref<384x256xbf16, #tpu.memory_space<vmem>>, %arg5: memref<1x256xf32, #tpu.memory_space<vmem>>, %arg6: memref<1x256xf32, #tpu.memory_space<vmem>>, %arg7: memref<8x256xbf16, #tpu.memory_space<vmem>>, %arg8: memref<8x256xf32, #tpu.memory_space<vmem>>) attributes {dimension_semantics = [#tpu.dimension_semantics<parallel>, #tpu.dimension_semantics<parallel>, #tpu.dimension_semantics<arbitrary>], iteration_bounds = array<i64: 1, 1, 3>, scalar_prefetch = 0 : i64, scratch_operands = 1 : i64, tpu.core_type = #tpu.core_type<tc>, window_params = [{transform_indices = @transform_0, window_bounds = array<i64: 8, 384>}, {transform_indices = @transform_1, window_bounds = array<i64: 384, 256>}, {transform_indices = @transform_2, window_bounds = array<i64: 1, 256>}, {transform_indices = @transform_3, window_bounds = array<i64: 1, 256>}, {transform_indices = @transform_4, window_bounds = array<i64: 8, 256>}]} {
    %c0_i32 = arith.constant 0 : i32
    %0 = arith.cmpi eq, %arg2, %c0_i32 : i32
    %1 = arith.extui %0 : i1 to i32
    %c0_i32_0 = arith.constant 0 : i32
    %2 = arith.cmpi ne, %1, %c0_i32_0 : i32
    scf.if %2 {
      %cst_9 = arith.constant 0.000000e+00 : f32
      %12 = vector.broadcast %cst_9 : f32 to vector<8x256xf32>
      %c0_10 = arith.constant 0 : index
      %c0_11 = arith.constant 0 : index
      %13 = vector.load %arg8[%c0_10, %c0_11] : memref<8x256xf32, #tpu.memory_space<vmem>>, vector<8x256xf32>
      tpu.vector_store %arg8[%c0_10, %c0_11], %12 {strides = array<i32>} : memref<8x256xf32, #tpu.memory_space<vmem>>, vector<8x256xf32>,
    } else {
    }
    %c0 = arith.constant 0 : index
    %c0_1 = arith.constant 0 : index
    %3 = vector.load %arg8[%c0, %c0_1] : memref<8x256xf32, #tpu.memory_space<vmem>>, vector<8x256xf32>
    %c0_2 = arith.constant 0 : index
    %c0_3 = arith.constant 0 : index
    %4 = vector.load %arg3[%c0_2, %c0_3] : memref<8x384xbf16, #tpu.memory_space<vmem>>, vector<8x384xbf16>
    %c0_4 = arith.constant 0 : index
    %c0_5 = arith.constant 0 : index
    %5 = vector.load %arg4[%c0_4, %c0_5] : memref<384x256xbf16, #tpu.memory_space<vmem>>, vector<384x256xbf16>
    %cst = arith.constant dense<0.000000e+00> : vector<8x256xf32>
    %6 = tpu.matmul %4, %5, %cst {dimension_numbers = #tpu.dot_dimension_numbers<[1], [0], [0], [1], [0, 0, 1, 1], [], []>} : vector<8x384xbf16>, vector<384x256xbf16>, vector<8x256xf32> -> vector<8x256xf32>
    %7 = arith.addf %3, %6 : vector<8x256xf32>
    %c0_6 = arith.constant 0 : index
    %c0_7 = arith.constant 0 : index
    %8 = vector.load %arg8[%c0_6, %c0_7] : memref<8x256xf32, #tpu.memory_space<vmem>>, vector<8x256xf32>
    tpu.vector_store %arg8[%c0_6, %c0_7], %7 {strides = array<i32>} : memref<8x256xf32, #tpu.memory_space<vmem>>, vector<8x256xf32>,
    %c2_i32 = arith.constant 2 : i32
    %9 = arith.cmpi eq, %arg2, %c2_i32 : i32
    %10 = arith.extui %9 : i1 to i32
    %c0_i32_8 = arith.constant 0 : i32
    %11 = arith.cmpi ne, %10, %c0_i32_8 : i32
    scf.if %11 {
      %c0_9 = arith.constant 0 : index
      %c0_10 = arith.constant 0 : index
      %12 = vector.load %arg8[%c0_9, %c0_10] : memref<8x256xf32, #tpu.memory_space<vmem>>, vector<8x256xf32>
      %c0_11 = arith.constant 0 : index
      %c0_12 = arith.constant 0 : index
      %13 = vector.load %arg5[%c0_11, %c0_12] : memref<1x256xf32, #tpu.memory_space<vmem>>, vector<1x256xf32>
      %14 = vector.broadcast %13 : vector<1x256xf32> to vector<8x256xf32>
      %15 = arith.mulf %12, %14 : vector<8x256xf32>
      %c0_13 = arith.constant 0 : index
      %c0_14 = arith.constant 0 : index
      %16 = vector.load %arg6[%c0_13, %c0_14] : memref<1x256xf32, #tpu.memory_space<vmem>>, vector<1x256xf32>
      %17 = vector.broadcast %16 : vector<1x256xf32> to vector<8x256xf32>
      %18 = arith.addf %15, %17 : vector<8x256xf32>
      %cst_15 = arith.constant 0.000000e+00 : f32
      %19 = vector.broadcast %cst_15 : f32 to vector<8x256xf32>
      %20 = arith.maximumf %18, %19 : vector<8x256xf32>
      %21 = arith.truncf %20 : vector<8x256xf32> to vector<8x256xbf16>
      %c0_16 = arith.constant 0 : index
      %c0_17 = arith.constant 0 : index
      %22 = vector.load %arg7[%c0_16, %c0_17] : memref<8x256xbf16, #tpu.memory_space<vmem>>, vector<8x256xbf16>
      tpu.vector_store %arg7[%c0_16, %c0_17], %21 {strides = array<i32>} : memref<8x256xbf16, #tpu.memory_space<vmem>>, vector<8x256xbf16>,
    } else {
    }
    return
  }
  func.func @transform_0(%arg0: i32, %arg1: i32, %arg2: i32) -> (i32, i32) {
    %c0_i32 = arith.constant 0 : i32
    return %arg0, %arg2 : i32, i32
  }
  func.func @transform_1(%arg0: i32, %arg1: i32, %arg2: i32) -> (i32, i32) {
    %c0_i32 = arith.constant 0 : i32
    return %arg2, %arg1 : i32, i32
  }
  func.func @transform_2(%arg0: i32, %arg1: i32, %arg2: i32) -> (i32, i32) {
    %c0_i32 = arith.constant 0 : i32
    %c0_i32_0 = arith.constant 0 : i32
    return %c0_i32, %arg1 : i32, i32
  }
  func.func @transform_3(%arg0: i32, %arg1: i32, %arg2: i32) -> (i32, i32) {
    %c0_i32 = arith.constant 0 : i32
    %c0_i32_0 = arith.constant 0 : i32
    return %c0_i32, %arg1 : i32, i32
  }
  func.func @transform_4(%arg0: i32, %arg1: i32, %arg2: i32) -> (i32, i32) {
    %c0_i32 = arith.constant 0 : i32
    return %arg0, %arg1 : i32, i32
  }
}

module attributes {stable_mosaic.version = 11 : i64} {
  func.func @kernel(%arg0: i32, %arg1: i32, %arg2: i32, %arg3: memref<8x128xbf16, #tpu.memory_space<vmem>>, %arg4: memref<128x256xbf16, #tpu.memory_space<vmem>>, %arg5: memref<1x256xf32, #tpu.memory_space<vmem>>, %arg6: memref<1x256xf32, #tpu.memory_space<vmem>>, %arg7: memref<8x256xbf16, #tpu.memory_space<vmem>>, %arg8: memref<8x256xf32, #tpu.memory_space<vmem>>) attributes {dimension_semantics = [#tpu.dimension_semantics<parallel>, #tpu.dimension_semantics<parallel>, #tpu.dimension_semantics<arbitrary>], iteration_bounds = array<i64: 1, 1, 1>, scalar_prefetch = 0 : i64, scratch_operands = 1 : i64, tpu.core_type = #tpu.core_type<tc>, window_params = [{transform_indices = @transform_0, window_bounds = array<i64: 8, 128>}, {transform_indices = @transform_1, window_bounds = array<i64: 128, 256>}, {transform_indices = @transform_2, window_bounds = array<i64: 1, 256>}, {transform_indices = @transform_3, window_bounds = array<i64: 1, 256>}, {transform_indices = @transform_4, window_bounds = array<i64: 8, 256>}]} {
    %c0_i32 = arith.constant 0 : i32
    %0 = arith.cmpi eq, %arg2, %c0_i32 : i32
    %1 = arith.extui %0 : i1 to i32
    %c0_i32_0 = arith.constant 0 : i32
    %2 = arith.cmpi ne, %1, %c0_i32_0 : i32
    scf.if %2 {
      %cst_10 = arith.constant 0.000000e+00 : f32
      %12 = vector.broadcast %cst_10 : f32 to vector<8x256xf32>
      %c0_11 = arith.constant 0 : index
      %c0_12 = arith.constant 0 : index
      %13 = vector.load %arg8[%c0_11, %c0_12] : memref<8x256xf32, #tpu.memory_space<vmem>>, vector<8x256xf32>
      tpu.vector_store %arg8[%c0_11, %c0_12], %12 {strides = array<i32>} : memref<8x256xf32, #tpu.memory_space<vmem>>, vector<8x256xf32>,
    } else {
    }
    %c0 = arith.constant 0 : index
    %c0_1 = arith.constant 0 : index
    %3 = vector.load %arg8[%c0, %c0_1] : memref<8x256xf32, #tpu.memory_space<vmem>>, vector<8x256xf32>
    %c0_2 = arith.constant 0 : index
    %c0_3 = arith.constant 0 : index
    %4 = vector.load %arg3[%c0_2, %c0_3] : memref<8x128xbf16, #tpu.memory_space<vmem>>, vector<8x128xbf16>
    %c0_4 = arith.constant 0 : index
    %c0_5 = arith.constant 0 : index
    %5 = vector.load %arg4[%c0_4, %c0_5] : memref<128x256xbf16, #tpu.memory_space<vmem>>, vector<128x256xbf16>
    %cst = arith.constant dense<0.000000e+00> : vector<8x256xf32>
    %6 = tpu.matmul %4, %5, %cst {dimension_numbers = #tpu.dot_dimension_numbers<[1], [0], [0], [1], [0, 0, 1, 1], [], []>} : vector<8x128xbf16>, vector<128x256xbf16>, vector<8x256xf32> -> vector<8x256xf32>
    %7 = arith.addf %3, %6 : vector<8x256xf32>
    %c0_6 = arith.constant 0 : index
    %c0_7 = arith.constant 0 : index
    %8 = vector.load %arg8[%c0_6, %c0_7] : memref<8x256xf32, #tpu.memory_space<vmem>>, vector<8x256xf32>
    tpu.vector_store %arg8[%c0_6, %c0_7], %7 {strides = array<i32>} : memref<8x256xf32, #tpu.memory_space<vmem>>, vector<8x256xf32>,
    %c0_i32_8 = arith.constant 0 : i32
    %9 = arith.cmpi eq, %arg2, %c0_i32_8 : i32
    %10 = arith.extui %9 : i1 to i32
    %c0_i32_9 = arith.constant 0 : i32
    %11 = arith.cmpi ne, %10, %c0_i32_9 : i32
    scf.if %11 {
      %c0_10 = arith.constant 0 : index
      %c0_11 = arith.constant 0 : index
      %12 = vector.load %arg8[%c0_10, %c0_11] : memref<8x256xf32, #tpu.memory_space<vmem>>, vector<8x256xf32>
      %c0_12 = arith.constant 0 : index
      %c0_13 = arith.constant 0 : index
      %13 = vector.load %arg5[%c0_12, %c0_13] : memref<1x256xf32, #tpu.memory_space<vmem>>, vector<1x256xf32>
      %14 = vector.broadcast %13 : vector<1x256xf32> to vector<8x256xf32>
      %15 = arith.mulf %12, %14 : vector<8x256xf32>
      %c0_14 = arith.constant 0 : index
      %c0_15 = arith.constant 0 : index
      %16 = vector.load %arg6[%c0_14, %c0_15] : memref<1x256xf32, #tpu.memory_space<vmem>>, vector<1x256xf32>
      %17 = vector.broadcast %16 : vector<1x256xf32> to vector<8x256xf32>
      %18 = arith.addf %15, %17 : vector<8x256xf32>
      %19 = arith.truncf %18 : vector<8x256xf32> to vector<8x256xbf16>
      %c0_16 = arith.constant 0 : index
      %c0_17 = arith.constant 0 : index
      %20 = vector.load %arg7[%c0_16, %c0_17] : memref<8x256xbf16, #tpu.memory_space<vmem>>, vector<8x256xbf16>
      tpu.vector_store %arg7[%c0_16, %c0_17], %19 {strides = array<i32>} : memref<8x256xbf16, #tpu.memory_space<vmem>>, vector<8x256xbf16>,
    } else {
    }
    return
  }
  func.func @transform_0(%arg0: i32, %arg1: i32, %arg2: i32) -> (i32, i32) {
    %c0_i32 = arith.constant 0 : i32
    return %arg0, %arg2 : i32, i32
  }
  func.func @transform_1(%arg0: i32, %arg1: i32, %arg2: i32) -> (i32, i32) {
    %c0_i32 = arith.constant 0 : i32
    return %arg2, %arg1 : i32, i32
  }
  func.func @transform_2(%arg0: i32, %arg1: i32, %arg2: i32) -> (i32, i32) {
    %c0_i32 = arith.constant 0 : i32
    %c0_i32_0 = arith.constant 0 : i32
    return %c0_i32, %arg1 : i32, i32
  }
  func.func @transform_3(%arg0: i32, %arg1: i32, %arg2: i32) -> (i32, i32) {
    %c0_i32 = arith.constant 0 : i32
    %c0_i32_0 = arith.constant 0 : i32
    return %c0_i32, %arg1 : i32, i32
  }
  func.func @transform_4(%arg0: i32, %arg1: i32, %arg2: i32) -> (i32, i32) {
    %c0_i32 = arith.constant 0 : i32
    return %arg0, %arg1 : i32, i32
  }
}

module attributes {stable_mosaic.version = 11 : i64} {
  func.func @kernel(%arg0: i32, %arg1: i32, %arg2: i32, %arg3: memref<8x384xbf16, #tpu.memory_space<vmem>>, %arg4: memref<384x256xbf16, #tpu.memory_space<vmem>>, %arg5: memref<1x256xf32, #tpu.memory_space<vmem>>, %arg6: memref<1x256xf32, #tpu.memory_space<vmem>>, %arg7: memref<8x256xbf16, #tpu.memory_space<vmem>>, %arg8: memref<8x256xbf16, #tpu.memory_space<vmem>>, %arg9: memref<8x256xf32, #tpu.memory_space<vmem>>) attributes {dimension_semantics = [#tpu.dimension_semantics<parallel>, #tpu.dimension_semantics<parallel>, #tpu.dimension_semantics<arbitrary>], iteration_bounds = array<i64: 1, 1, 6>, scalar_prefetch = 0 : i64, scratch_operands = 1 : i64, tpu.core_type = #tpu.core_type<tc>, window_params = [{transform_indices = @transform_0, window_bounds = array<i64: 8, 384>}, {transform_indices = @transform_1, window_bounds = array<i64: 384, 256>}, {transform_indices = @transform_2, window_bounds = array<i64: 1, 256>}, {transform_indices = @transform_3, window_bounds = array<i64: 1, 256>}, {transform_indices = @transform_4, window_bounds = array<i64: 8, 256>}, {transform_indices = @transform_5, window_bounds = array<i64: 8, 256>}]} {
    %c0_i32 = arith.constant 0 : i32
    %0 = arith.cmpi eq, %arg2, %c0_i32 : i32
    %1 = arith.extui %0 : i1 to i32
    %c0_i32_0 = arith.constant 0 : i32
    %2 = arith.cmpi ne, %1, %c0_i32_0 : i32
    scf.if %2 {
      %cst_9 = arith.constant 0.000000e+00 : f32
      %12 = vector.broadcast %cst_9 : f32 to vector<8x256xf32>
      %c0_10 = arith.constant 0 : index
      %c0_11 = arith.constant 0 : index
      %13 = vector.load %arg9[%c0_10, %c0_11] : memref<8x256xf32, #tpu.memory_space<vmem>>, vector<8x256xf32>
      tpu.vector_store %arg9[%c0_10, %c0_11], %12 {strides = array<i32>} : memref<8x256xf32, #tpu.memory_space<vmem>>, vector<8x256xf32>,
    } else {
    }
    %c0 = arith.constant 0 : index
    %c0_1 = arith.constant 0 : index
    %3 = vector.load %arg9[%c0, %c0_1] : memref<8x256xf32, #tpu.memory_space<vmem>>, vector<8x256xf32>
    %c0_2 = arith.constant 0 : index
    %c0_3 = arith.constant 0 : index
    %4 = vector.load %arg3[%c0_2, %c0_3] : memref<8x384xbf16, #tpu.memory_space<vmem>>, vector<8x384xbf16>
    %c0_4 = arith.constant 0 : index
    %c0_5 = arith.constant 0 : index
    %5 = vector.load %arg4[%c0_4, %c0_5] : memref<384x256xbf16, #tpu.memory_space<vmem>>, vector<384x256xbf16>
    %cst = arith.constant dense<0.000000e+00> : vector<8x256xf32>
    %6 = tpu.matmul %4, %5, %cst {dimension_numbers = #tpu.dot_dimension_numbers<[1], [0], [0], [1], [0, 0, 1, 1], [], []>} : vector<8x384xbf16>, vector<384x256xbf16>, vector<8x256xf32> -> vector<8x256xf32>
    %7 = arith.addf %3, %6 : vector<8x256xf32>
    %c0_6 = arith.constant 0 : index
    %c0_7 = arith.constant 0 : index
    %8 = vector.load %arg9[%c0_6, %c0_7] : memref<8x256xf32, #tpu.memory_space<vmem>>, vector<8x256xf32>
    tpu.vector_store %arg9[%c0_6, %c0_7], %7 {strides = array<i32>} : memref<8x256xf32, #tpu.memory_space<vmem>>, vector<8x256xf32>,
    %c5_i32 = arith.constant 5 : i32
    %9 = arith.cmpi eq, %arg2, %c5_i32 : i32
    %10 = arith.extui %9 : i1 to i32
    %c0_i32_8 = arith.constant 0 : i32
    %11 = arith.cmpi ne, %10, %c0_i32_8 : i32
    scf.if %11 {
      %c0_9 = arith.constant 0 : index
      %c0_10 = arith.constant 0 : index
      %12 = vector.load %arg9[%c0_9, %c0_10] : memref<8x256xf32, #tpu.memory_space<vmem>>, vector<8x256xf32>
      %c0_11 = arith.constant 0 : index
      %c0_12 = arith.constant 0 : index
      %13 = vector.load %arg5[%c0_11, %c0_12] : memref<1x256xf32, #tpu.memory_space<vmem>>, vector<1x256xf32>
      %14 = vector.broadcast %13 : vector<1x256xf32> to vector<8x256xf32>
      %15 = arith.mulf %12, %14 : vector<8x256xf32>
      %c0_13 = arith.constant 0 : index
      %c0_14 = arith.constant 0 : index
      %16 = vector.load %arg6[%c0_13, %c0_14] : memref<1x256xf32, #tpu.memory_space<vmem>>, vector<1x256xf32>
      %17 = vector.broadcast %16 : vector<1x256xf32> to vector<8x256xf32>
      %18 = arith.addf %15, %17 : vector<8x256xf32>
      %c0_15 = arith.constant 0 : index
      %c0_16 = arith.constant 0 : index
      %19 = vector.load %arg7[%c0_15, %c0_16] : memref<8x256xbf16, #tpu.memory_space<vmem>>, vector<8x256xbf16>
      %20 = arith.extf %19 : vector<8x256xbf16> to vector<8x256xf32>
      %21 = arith.addf %18, %20 : vector<8x256xf32>
      %cst_17 = arith.constant 0.000000e+00 : f32
      %22 = vector.broadcast %cst_17 : f32 to vector<8x256xf32>
      %23 = arith.maximumf %21, %22 : vector<8x256xf32>
      %24 = arith.truncf %23 : vector<8x256xf32> to vector<8x256xbf16>
      %c0_18 = arith.constant 0 : index
      %c0_19 = arith.constant 0 : index
      %25 = vector.load %arg8[%c0_18, %c0_19] : memref<8x256xbf16, #tpu.memory_space<vmem>>, vector<8x256xbf16>
      tpu.vector_store %arg8[%c0_18, %c0_19], %24 {strides = array<i32>} : memref<8x256xbf16, #tpu.memory_space<vmem>>, vector<8x256xbf16>,
    } else {
    }
    return
  }
  func.func @transform_0(%arg0: i32, %arg1: i32, %arg2: i32) -> (i32, i32) {
    %c0_i32 = arith.constant 0 : i32
    return %arg0, %arg2 : i32, i32
  }
  func.func @transform_1(%arg0: i32, %arg1: i32, %arg2: i32) -> (i32, i32) {
    %c0_i32 = arith.constant 0 : i32
    return %arg2, %arg1 : i32, i32
  }
  func.func @transform_2(%arg0: i32, %arg1: i32, %arg2: i32) -> (i32, i32) {
    %c0_i32 = arith.constant 0 : i32
    %c0_i32_0 = arith.constant 0 : i32
    return %c0_i32, %arg1 : i32, i32
  }
  func.func @transform_3(%arg0: i32, %arg1: i32, %arg2: i32) -> (i32, i32) {
    %c0_i32 = arith.constant 0 : i32
    %c0_i32_0 = arith.constant 0 : i32
    return %c0_i32, %arg1 : i32, i32
  }
  func.func @transform_4(%arg0: i32, %arg1: i32, %arg2: i32) -> (i32, i32) {
    %c0_i32 = arith.constant 0 : i32
    return %arg0, %arg1 : i32, i32
  }
  func.func @transform_5(%arg0: i32, %arg1: i32, %arg2: i32) -> (i32, i32) {
    %c0_i32 = arith.constant 0 : i32
    return %arg0, %arg1 : i32, i32
  }
}

module attributes {stable_mosaic.version = 11 : i64} {
  func.func @kernel(%arg0: i32, %arg1: i32, %arg2: i32, %arg3: memref<8x384xbf16, #tpu.memory_space<vmem>>, %arg4: memref<384x256xbf16, #tpu.memory_space<vmem>>, %arg5: memref<1x256xf32, #tpu.memory_space<vmem>>, %arg6: memref<1x256xf32, #tpu.memory_space<vmem>>, %arg7: memref<8x256xbf16, #tpu.memory_space<vmem>>, %arg8: memref<8x256xf32, #tpu.memory_space<vmem>>) attributes {dimension_semantics = [#tpu.dimension_semantics<parallel>, #tpu.dimension_semantics<parallel>, #tpu.dimension_semantics<arbitrary>], iteration_bounds = array<i64: 1, 2, 6>, scalar_prefetch = 0 : i64, scratch_operands = 1 : i64, tpu.core_type = #tpu.core_type<tc>, window_params = [{transform_indices = @transform_0, window_bounds = array<i64: 8, 384>}, {transform_indices = @transform_1, window_bounds = array<i64: 384, 256>}, {transform_indices = @transform_2, window_bounds = array<i64: 1, 256>}, {transform_indices = @transform_3, window_bounds = array<i64: 1, 256>}, {transform_indices = @transform_4, window_bounds = array<i64: 8, 256>}]} {
    %c0_i32 = arith.constant 0 : i32
    %0 = arith.cmpi eq, %arg2, %c0_i32 : i32
    %1 = arith.extui %0 : i1 to i32
    %c0_i32_0 = arith.constant 0 : i32
    %2 = arith.cmpi ne, %1, %c0_i32_0 : i32
    scf.if %2 {
      %cst_9 = arith.constant 0.000000e+00 : f32
      %12 = vector.broadcast %cst_9 : f32 to vector<8x256xf32>
      %c0_10 = arith.constant 0 : index
      %c0_11 = arith.constant 0 : index
      %13 = vector.load %arg8[%c0_10, %c0_11] : memref<8x256xf32, #tpu.memory_space<vmem>>, vector<8x256xf32>
      tpu.vector_store %arg8[%c0_10, %c0_11], %12 {strides = array<i32>} : memref<8x256xf32, #tpu.memory_space<vmem>>, vector<8x256xf32>,
    } else {
    }
    %c0 = arith.constant 0 : index
    %c0_1 = arith.constant 0 : index
    %3 = vector.load %arg8[%c0, %c0_1] : memref<8x256xf32, #tpu.memory_space<vmem>>, vector<8x256xf32>
    %c0_2 = arith.constant 0 : index
    %c0_3 = arith.constant 0 : index
    %4 = vector.load %arg3[%c0_2, %c0_3] : memref<8x384xbf16, #tpu.memory_space<vmem>>, vector<8x384xbf16>
    %c0_4 = arith.constant 0 : index
    %c0_5 = arith.constant 0 : index
    %5 = vector.load %arg4[%c0_4, %c0_5] : memref<384x256xbf16, #tpu.memory_space<vmem>>, vector<384x256xbf16>
    %cst = arith.constant dense<0.000000e+00> : vector<8x256xf32>
    %6 = tpu.matmul %4, %5, %cst {dimension_numbers = #tpu.dot_dimension_numbers<[1], [0], [0], [1], [0, 0, 1, 1], [], []>} : vector<8x384xbf16>, vector<384x256xbf16>, vector<8x256xf32> -> vector<8x256xf32>
    %7 = arith.addf %3, %6 : vector<8x256xf32>
    %c0_6 = arith.constant 0 : index
    %c0_7 = arith.constant 0 : index
    %8 = vector.load %arg8[%c0_6, %c0_7] : memref<8x256xf32, #tpu.memory_space<vmem>>, vector<8x256xf32>
    tpu.vector_store %arg8[%c0_6, %c0_7], %7 {strides = array<i32>} : memref<8x256xf32, #tpu.memory_space<vmem>>, vector<8x256xf32>,
    %c5_i32 = arith.constant 5 : i32
    %9 = arith.cmpi eq, %arg2, %c5_i32 : i32
    %10 = arith.extui %9 : i1 to i32
    %c0_i32_8 = arith.constant 0 : i32
    %11 = arith.cmpi ne, %10, %c0_i32_8 : i32
    scf.if %11 {
      %c0_9 = arith.constant 0 : index
      %c0_10 = arith.constant 0 : index
      %12 = vector.load %arg8[%c0_9, %c0_10] : memref<8x256xf32, #tpu.memory_space<vmem>>, vector<8x256xf32>
      %c0_11 = arith.constant 0 : index
      %c0_12 = arith.constant 0 : index
      %13 = vector.load %arg5[%c0_11, %c0_12] : memref<1x256xf32, #tpu.memory_space<vmem>>, vector<1x256xf32>
      %14 = vector.broadcast %13 : vector<1x256xf32> to vector<8x256xf32>
      %15 = arith.mulf %12, %14 : vector<8x256xf32>
      %c0_13 = arith.constant 0 : index
      %c0_14 = arith.constant 0 : index
      %16 = vector.load %arg6[%c0_13, %c0_14] : memref<1x256xf32, #tpu.memory_space<vmem>>, vector<1x256xf32>
      %17 = vector.broadcast %16 : vector<1x256xf32> to vector<8x256xf32>
      %18 = arith.addf %15, %17 : vector<8x256xf32>
      %cst_15 = arith.constant 0.000000e+00 : f32
      %19 = vector.broadcast %cst_15 : f32 to vector<8x256xf32>
      %20 = arith.maximumf %18, %19 : vector<8x256xf32>
      %21 = arith.truncf %20 : vector<8x256xf32> to vector<8x256xbf16>
      %c0_16 = arith.constant 0 : index
      %c0_17 = arith.constant 0 : index
      %22 = vector.load %arg7[%c0_16, %c0_17] : memref<8x256xbf16, #tpu.memory_space<vmem>>, vector<8x256xbf16>
      tpu.vector_store %arg7[%c0_16, %c0_17], %21 {strides = array<i32>} : memref<8x256xbf16, #tpu.memory_space<vmem>>, vector<8x256xbf16>,
    } else {
    }
    return
  }
  func.func @transform_0(%arg0: i32, %arg1: i32, %arg2: i32) -> (i32, i32) {
    %c0_i32 = arith.constant 0 : i32
    return %arg0, %arg2 : i32, i32
  }
  func.func @transform_1(%arg0: i32, %arg1: i32, %arg2: i32) -> (i32, i32) {
    %c0_i32 = arith.constant 0 : i32
    return %arg2, %arg1 : i32, i32
  }
  func.func @transform_2(%arg0: i32, %arg1: i32, %arg2: i32) -> (i32, i32) {
    %c0_i32 = arith.constant 0 : i32
    %c0_i32_0 = arith.constant 0 : i32
    return %c0_i32, %arg1 : i32, i32
  }
  func.func @transform_3(%arg0: i32, %arg1: i32, %arg2: i32) -> (i32, i32) {
    %c0_i32 = arith.constant 0 : i32
    %c0_i32_0 = arith.constant 0 : i32
    return %c0_i32, %arg1 : i32, i32
  }
  func.func @transform_4(%arg0: i32, %arg1: i32, %arg2: i32) -> (i32, i32) {
    %c0_i32 = arith.constant 0 : i32
    return %arg0, %arg1 : i32, i32
  }
}

module attributes {stable_mosaic.version = 11 : i64} {
  func.func @kernel(%arg0: i32, %arg1: i32, %arg2: i32, %arg3: memref<8x256xbf16, #tpu.memory_space<vmem>>, %arg4: memref<256x256xbf16, #tpu.memory_space<vmem>>, %arg5: memref<1x256xf32, #tpu.memory_space<vmem>>, %arg6: memref<1x256xf32, #tpu.memory_space<vmem>>, %arg7: memref<8x256xbf16, #tpu.memory_space<vmem>>, %arg8: memref<8x256xf32, #tpu.memory_space<vmem>>) attributes {dimension_semantics = [#tpu.dimension_semantics<parallel>, #tpu.dimension_semantics<parallel>, #tpu.dimension_semantics<arbitrary>], iteration_bounds = array<i64: 1, 2, 1>, scalar_prefetch = 0 : i64, scratch_operands = 1 : i64, tpu.core_type = #tpu.core_type<tc>, window_params = [{transform_indices = @transform_0, window_bounds = array<i64: 8, 256>}, {transform_indices = @transform_1, window_bounds = array<i64: 256, 256>}, {transform_indices = @transform_2, window_bounds = array<i64: 1, 256>}, {transform_indices = @transform_3, window_bounds = array<i64: 1, 256>}, {transform_indices = @transform_4, window_bounds = array<i64: 8, 256>}]} {
    %c0_i32 = arith.constant 0 : i32
    %0 = arith.cmpi eq, %arg2, %c0_i32 : i32
    %1 = arith.extui %0 : i1 to i32
    %c0_i32_0 = arith.constant 0 : i32
    %2 = arith.cmpi ne, %1, %c0_i32_0 : i32
    scf.if %2 {
      %cst_10 = arith.constant 0.000000e+00 : f32
      %12 = vector.broadcast %cst_10 : f32 to vector<8x256xf32>
      %c0_11 = arith.constant 0 : index
      %c0_12 = arith.constant 0 : index
      %13 = vector.load %arg8[%c0_11, %c0_12] : memref<8x256xf32, #tpu.memory_space<vmem>>, vector<8x256xf32>
      tpu.vector_store %arg8[%c0_11, %c0_12], %12 {strides = array<i32>} : memref<8x256xf32, #tpu.memory_space<vmem>>, vector<8x256xf32>,
    } else {
    }
    %c0 = arith.constant 0 : index
    %c0_1 = arith.constant 0 : index
    %3 = vector.load %arg8[%c0, %c0_1] : memref<8x256xf32, #tpu.memory_space<vmem>>, vector<8x256xf32>
    %c0_2 = arith.constant 0 : index
    %c0_3 = arith.constant 0 : index
    %4 = vector.load %arg3[%c0_2, %c0_3] : memref<8x256xbf16, #tpu.memory_space<vmem>>, vector<8x256xbf16>
    %c0_4 = arith.constant 0 : index
    %c0_5 = arith.constant 0 : index
    %5 = vector.load %arg4[%c0_4, %c0_5] : memref<256x256xbf16, #tpu.memory_space<vmem>>, vector<256x256xbf16>
    %cst = arith.constant dense<0.000000e+00> : vector<8x256xf32>
    %6 = tpu.matmul %4, %5, %cst {dimension_numbers = #tpu.dot_dimension_numbers<[1], [0], [0], [1], [0, 0, 1, 1], [], []>} : vector<8x256xbf16>, vector<256x256xbf16>, vector<8x256xf32> -> vector<8x256xf32>
    %7 = arith.addf %3, %6 : vector<8x256xf32>
    %c0_6 = arith.constant 0 : index
    %c0_7 = arith.constant 0 : index
    %8 = vector.load %arg8[%c0_6, %c0_7] : memref<8x256xf32, #tpu.memory_space<vmem>>, vector<8x256xf32>
    tpu.vector_store %arg8[%c0_6, %c0_7], %7 {strides = array<i32>} : memref<8x256xf32, #tpu.memory_space<vmem>>, vector<8x256xf32>,
    %c0_i32_8 = arith.constant 0 : i32
    %9 = arith.cmpi eq, %arg2, %c0_i32_8 : i32
    %10 = arith.extui %9 : i1 to i32
    %c0_i32_9 = arith.constant 0 : i32
    %11 = arith.cmpi ne, %10, %c0_i32_9 : i32
    scf.if %11 {
      %c0_10 = arith.constant 0 : index
      %c0_11 = arith.constant 0 : index
      %12 = vector.load %arg8[%c0_10, %c0_11] : memref<8x256xf32, #tpu.memory_space<vmem>>, vector<8x256xf32>
      %c0_12 = arith.constant 0 : index
      %c0_13 = arith.constant 0 : index
      %13 = vector.load %arg5[%c0_12, %c0_13] : memref<1x256xf32, #tpu.memory_space<vmem>>, vector<1x256xf32>
      %14 = vector.broadcast %13 : vector<1x256xf32> to vector<8x256xf32>
      %15 = arith.mulf %12, %14 : vector<8x256xf32>
      %c0_14 = arith.constant 0 : index
      %c0_15 = arith.constant 0 : index
      %16 = vector.load %arg6[%c0_14, %c0_15] : memref<1x256xf32, #tpu.memory_space<vmem>>, vector<1x256xf32>
      %17 = vector.broadcast %16 : vector<1x256xf32> to vector<8x256xf32>
      %18 = arith.addf %15, %17 : vector<8x256xf32>
      %19 = arith.truncf %18 : vector<8x256xf32> to vector<8x256xbf16>
      %c0_16 = arith.constant 0 : index
      %c0_17 = arith.constant 0 : index
      %20 = vector.load %arg7[%c0_16, %c0_17] : memref<8x256xbf16, #tpu.memory_space<vmem>>, vector<8x256xbf16>
      tpu.vector_store %arg7[%c0_16, %c0_17], %19 {strides = array<i32>} : memref<8x256xbf16, #tpu.memory_space<vmem>>, vector<8x256xbf16>,
    } else {
    }
    return
  }
  func.func @transform_0(%arg0: i32, %arg1: i32, %arg2: i32) -> (i32, i32) {
    %c0_i32 = arith.constant 0 : i32
    return %arg0, %arg2 : i32, i32
  }
  func.func @transform_1(%arg0: i32, %arg1: i32, %arg2: i32) -> (i32, i32) {
    %c0_i32 = arith.constant 0 : i32
    return %arg2, %arg1 : i32, i32
  }
  func.func @transform_2(%arg0: i32, %arg1: i32, %arg2: i32) -> (i32, i32) {
    %c0_i32 = arith.constant 0 : i32
    %c0_i32_0 = arith.constant 0 : i32
    return %c0_i32, %arg1 : i32, i32
  }
  func.func @transform_3(%arg0: i32, %arg1: i32, %arg2: i32) -> (i32, i32) {
    %c0_i32 = arith.constant 0 : i32
    %c0_i32_0 = arith.constant 0 : i32
    return %c0_i32, %arg1 : i32, i32
  }
  func.func @transform_4(%arg0: i32, %arg1: i32, %arg2: i32) -> (i32, i32) {
    %c0_i32 = arith.constant 0 : i32
    return %arg0, %arg1 : i32, i32
  }
}

module attributes {stable_mosaic.version = 11 : i64} {
  func.func @kernel(%arg0: i32, %arg1: i32, %arg2: i32, %arg3: memref<8x512xbf16, #tpu.memory_space<vmem>>, %arg4: memref<512x256xbf16, #tpu.memory_space<vmem>>, %arg5: memref<1x256xf32, #tpu.memory_space<vmem>>, %arg6: memref<1x256xf32, #tpu.memory_space<vmem>>, %arg7: memref<8x256xbf16, #tpu.memory_space<vmem>>, %arg8: memref<8x256xbf16, #tpu.memory_space<vmem>>, %arg9: memref<8x256xf32, #tpu.memory_space<vmem>>) attributes {dimension_semantics = [#tpu.dimension_semantics<parallel>, #tpu.dimension_semantics<parallel>, #tpu.dimension_semantics<arbitrary>], iteration_bounds = array<i64: 1, 2, 9>, scalar_prefetch = 0 : i64, scratch_operands = 1 : i64, tpu.core_type = #tpu.core_type<tc>, window_params = [{transform_indices = @transform_0, window_bounds = array<i64: 8, 512>}, {transform_indices = @transform_1, window_bounds = array<i64: 512, 256>}, {transform_indices = @transform_2, window_bounds = array<i64: 1, 256>}, {transform_indices = @transform_3, window_bounds = array<i64: 1, 256>}, {transform_indices = @transform_4, window_bounds = array<i64: 8, 256>}, {transform_indices = @transform_5, window_bounds = array<i64: 8, 256>}]} {
    %c0_i32 = arith.constant 0 : i32
    %0 = arith.cmpi eq, %arg2, %c0_i32 : i32
    %1 = arith.extui %0 : i1 to i32
    %c0_i32_0 = arith.constant 0 : i32
    %2 = arith.cmpi ne, %1, %c0_i32_0 : i32
    scf.if %2 {
      %cst_9 = arith.constant 0.000000e+00 : f32
      %12 = vector.broadcast %cst_9 : f32 to vector<8x256xf32>
      %c0_10 = arith.constant 0 : index
      %c0_11 = arith.constant 0 : index
      %13 = vector.load %arg9[%c0_10, %c0_11] : memref<8x256xf32, #tpu.memory_space<vmem>>, vector<8x256xf32>
      tpu.vector_store %arg9[%c0_10, %c0_11], %12 {strides = array<i32>} : memref<8x256xf32, #tpu.memory_space<vmem>>, vector<8x256xf32>,
    } else {
    }
    %c0 = arith.constant 0 : index
    %c0_1 = arith.constant 0 : index
    %3 = vector.load %arg9[%c0, %c0_1] : memref<8x256xf32, #tpu.memory_space<vmem>>, vector<8x256xf32>
    %c0_2 = arith.constant 0 : index
    %c0_3 = arith.constant 0 : index
    %4 = vector.load %arg3[%c0_2, %c0_3] : memref<8x512xbf16, #tpu.memory_space<vmem>>, vector<8x512xbf16>
    %c0_4 = arith.constant 0 : index
    %c0_5 = arith.constant 0 : index
    %5 = vector.load %arg4[%c0_4, %c0_5] : memref<512x256xbf16, #tpu.memory_space<vmem>>, vector<512x256xbf16>
    %cst = arith.constant dense<0.000000e+00> : vector<8x256xf32>
    %6 = tpu.matmul %4, %5, %cst {dimension_numbers = #tpu.dot_dimension_numbers<[1], [0], [0], [1], [0, 0, 1, 1], [], []>} : vector<8x512xbf16>, vector<512x256xbf16>, vector<8x256xf32> -> vector<8x256xf32>
    %7 = arith.addf %3, %6 : vector<8x256xf32>
    %c0_6 = arith.constant 0 : index
    %c0_7 = arith.constant 0 : index
    %8 = vector.load %arg9[%c0_6, %c0_7] : memref<8x256xf32, #tpu.memory_space<vmem>>, vector<8x256xf32>
    tpu.vector_store %arg9[%c0_6, %c0_7], %7 {strides = array<i32>} : memref<8x256xf32, #tpu.memory_space<vmem>>, vector<8x256xf32>,
    %c8_i32 = arith.constant 8 : i32
    %9 = arith.cmpi eq, %arg2, %c8_i32 : i32
    %10 = arith.extui %9 : i1 to i32
    %c0_i32_8 = arith.constant 0 : i32
    %11 = arith.cmpi ne, %10, %c0_i32_8 : i32
    scf.if %11 {
      %c0_9 = arith.constant 0 : index
      %c0_10 = arith.constant 0 : index
      %12 = vector.load %arg9[%c0_9, %c0_10] : memref<8x256xf32, #tpu.memory_space<vmem>>, vector<8x256xf32>
      %c0_11 = arith.constant 0 : index
      %c0_12 = arith.constant 0 : index
      %13 = vector.load %arg5[%c0_11, %c0_12] : memref<1x256xf32, #tpu.memory_space<vmem>>, vector<1x256xf32>
      %14 = vector.broadcast %13 : vector<1x256xf32> to vector<8x256xf32>
      %15 = arith.mulf %12, %14 : vector<8x256xf32>
      %c0_13 = arith.constant 0 : index
      %c0_14 = arith.constant 0 : index
      %16 = vector.load %arg6[%c0_13, %c0_14] : memref<1x256xf32, #tpu.memory_space<vmem>>, vector<1x256xf32>
      %17 = vector.broadcast %16 : vector<1x256xf32> to vector<8x256xf32>
      %18 = arith.addf %15, %17 : vector<8x256xf32>
      %c0_15 = arith.constant 0 : index
      %c0_16 = arith.constant 0 : index
      %19 = vector.load %arg7[%c0_15, %c0_16] : memref<8x256xbf16, #tpu.memory_space<vmem>>, vector<8x256xbf16>
      %20 = arith.extf %19 : vector<8x256xbf16> to vector<8x256xf32>
      %21 = arith.addf %18, %20 : vector<8x256xf32>
      %cst_17 = arith.constant 0.000000e+00 : f32
      %22 = vector.broadcast %cst_17 : f32 to vector<8x256xf32>
      %23 = arith.maximumf %21, %22 : vector<8x256xf32>
      %24 = arith.truncf %23 : vector<8x256xf32> to vector<8x256xbf16>
      %c0_18 = arith.constant 0 : index
      %c0_19 = arith.constant 0 : index
      %25 = vector.load %arg8[%c0_18, %c0_19] : memref<8x256xbf16, #tpu.memory_space<vmem>>, vector<8x256xbf16>
      tpu.vector_store %arg8[%c0_18, %c0_19], %24 {strides = array<i32>} : memref<8x256xbf16, #tpu.memory_space<vmem>>, vector<8x256xbf16>,
    } else {
    }
    return
  }
  func.func @transform_0(%arg0: i32, %arg1: i32, %arg2: i32) -> (i32, i32) {
    %c0_i32 = arith.constant 0 : i32
    return %arg0, %arg2 : i32, i32
  }
  func.func @transform_1(%arg0: i32, %arg1: i32, %arg2: i32) -> (i32, i32) {
    %c0_i32 = arith.constant 0 : i32
    return %arg2, %arg1 : i32, i32
  }
  func.func @transform_2(%arg0: i32, %arg1: i32, %arg2: i32) -> (i32, i32) {
    %c0_i32 = arith.constant 0 : i32
    %c0_i32_0 = arith.constant 0 : i32
    return %c0_i32, %arg1 : i32, i32
  }
  func.func @transform_3(%arg0: i32, %arg1: i32, %arg2: i32) -> (i32, i32) {
    %c0_i32 = arith.constant 0 : i32
    %c0_i32_0 = arith.constant 0 : i32
    return %c0_i32, %arg1 : i32, i32
  }
  func.func @transform_4(%arg0: i32, %arg1: i32, %arg2: i32) -> (i32, i32) {
    %c0_i32 = arith.constant 0 : i32
    return %arg0, %arg1 : i32, i32
  }
  func.func @transform_5(%arg0: i32, %arg1: i32, %arg2: i32) -> (i32, i32) {
    %c0_i32 = arith.constant 0 : i32
    return %arg0, %arg1 : i32, i32
  }
}

module attributes {stable_mosaic.version = 11 : i64} {
  func.func @_gap_fc_kernel(%arg0: memref<2x1x512xbf16, #tpu.memory_space<vmem>>, %arg1: memref<512x128xf32, #tpu.memory_space<vmem>>, %arg2: memref<1x128xf32, #tpu.memory_space<vmem>>, %arg3: memref<2x128xf32, #tpu.memory_space<vmem>>) attributes {dimension_semantics = [], scalar_prefetch = 0 : i64, scratch_operands = 0 : i64, tpu.core_type = #tpu.core_type<tc>} {
    %c0 = arith.constant 0 : index
    %c0_0 = arith.constant 0 : index
    %c0_1 = arith.constant 0 : index
    %0 = vector.load %arg0[%c0, %c0_0, %c0_1] : memref<2x1x512xbf16, #tpu.memory_space<vmem>>, vector<2x1x512xbf16>
    %1 = arith.extf %0 : vector<2x1x512xbf16> to vector<2x1x512xf32>
    %cst = arith.constant dense<0.000000e+00> : vector<2x512xf32>
    %2 = vector.multi_reduction <add>, %1, %cst [1] : vector<2x1x512xf32> to vector<2x512xf32>
    %cst_2 = arith.constant 1.000000e+00 : f32
    %3 = vector.broadcast %cst_2 : f32 to vector<2x512xf32>
    %4 = arith.divf %2, %3 : vector<2x512xf32>
    %c0_3 = arith.constant 0 : index
    %c0_4 = arith.constant 0 : index
    %5 = vector.load %arg1[%c0_3, %c0_4] : memref<512x128xf32, #tpu.memory_space<vmem>>, vector<512x128xf32>
    %cst_5 = arith.constant dense<0.000000e+00> : vector<2x128xf32>
    %6 = tpu.matmul %4, %5, %cst_5 {dimension_numbers = #tpu.dot_dimension_numbers<[1], [0], [0], [1], [0, 0, 1, 1], [], []>} : vector<2x512xf32>, vector<512x128xf32>, vector<2x128xf32> -> vector<2x128xf32>
    %c0_6 = arith.constant 0 : index
    %c0_7 = arith.constant 0 : index
    %7 = vector.load %arg2[%c0_6, %c0_7] : memref<1x128xf32, #tpu.memory_space<vmem>>, vector<1x128xf32>
    %8 = vector.broadcast %7 : vector<1x128xf32> to vector<2x128xf32>
    %9 = arith.addf %6, %8 : vector<2x128xf32>
    %c0_8 = arith.constant 0 : index
    %c0_9 = arith.constant 0 : index
    %10 = vector.load %arg3[%c0_8, %c0_9] : memref<2x128xf32, #tpu.memory_space<vmem>>, vector<2x128xf32>
    tpu.vector_store %arg3[%c0_8, %c0_9], %9 {strides = array<i32>} : memref<2x128xf32, #tpu.memory_space<vmem>>, vector<2x128xf32>,
    return
  }
}

</mosaic_0001>

<bundles_post_ra>
// kernel: resnet_forward.15
= control target key start
LH: loop header
LB: loop body
LE: loop exit
PB: predicated region body
PF: predicated region fallthrough
CT: control target
= control target key end

     0   :  { %vm304_vm0 = vcmask 519168   ;;  %s871_s0 = inlined_call_operand.vmem [shape: bf16[128,64], index: 0, kind: input, shape index: {}]   ;;  %s872_s1 = inlined_call_operand.vmem [shape: bf16[128,64], index: 1, kind: input, shape index: {}]   ;;  %s873_s2 = inlined_call_operand.vmem [shape: bf16[128,64], index: 2, kind: input, shape index: {}]   ;;  %s874_s3 = inlined_call_operand.vmem [shape: bf16[128,64], index: 3, kind: input, shape index: {}]   ;;  %s875_s4 = inlined_call_operand.vmem [shape: bf16[128,64], index: 4, kind: input, shape index: {}]   ;;  %s876_s5 = inlined_call_operand.vmem [shape: bf16[128,64], index: 5, kind: input, shape index: {}]   ;;  %s877_s6 = inlined_call_operand.vmem [shape: bf16[128,64], index: 6, kind: input, shape index: {}]   ;;  %s878_s7 = inlined_call_operand.vmem [shape: bf16[128,64], index: 7, kind: input, shape index: {}]   ;;  %s879_s8 = inlined_call_operand.vmem [shape: bf16[128,64], index: 8, kind: input, shape index: {}]   ;;  %s880_s9 = inlined_call_operand.vmem [shape: bf16[128,64], index: 9, kind: output, shape index: {}]  }
   0x1   :  { %v32_v0 = vld [vmem:[%s871_s0] sm:$0xf]  ;;  %v33_v6 = vld [vmem:[%s871_s0 + $0x4] sm:$0xf]  ;;  %v34_v15 = vld [vmem:[%s871_s0 + $0x8] sm:$0xf] }
   0x2   :  { %v48_v1 = vld [vmem:[%s872_s1] sm:$0xf]  ;;  %v49_v7 = vld [vmem:[%s872_s1 + $0x4] sm:$0xf]  ;;  %v50_v16 = vld [vmem:[%s872_s1 + $0x8] sm:$0xf] }
   0x3   :  { %v80_v2 = vld [vmem:[%s873_s2] sm:$0xf]  ;;  %v64_v3 = vmax.bf16 %v48_v1, %v32_v0  ;;  %v81_v8 = vld [vmem:[%s873_s2 + $0x4] sm:$0xf]  ;;  %v65_v10 = vmax.bf16 %v49_v7, %v33_v6  ;;  %v82_v17 = vld [vmem:[%s873_s2 + $0x8] sm:$0xf]  ;;  %v66_v20 = vmax.bf16 %v50_v16, %v34_v15 }
   0x4   :  { %v112_v4 = vld [vmem:[%s874_s3] sm:$0xf]  ;;  %v113_v13 = vld [vmem:[%s874_s3 + $0x4] sm:$0xf]  ;;  %v114_v24 = vld [vmem:[%s874_s3 + $0x8] sm:$0xf] }
   0x5   :  { %v96_v5 = vmax.bf16 %v80_v2, %v64_v3  ;;  %v144_v9 = vld [vmem:[%s875_s4] sm:$0xf]  ;;  %v97_v14 = vmax.bf16 %v81_v8, %v65_v10  ;;  %v145_v19 = vld [vmem:[%s875_s4 + $0x4] sm:$0xf]  ;;  %v98_v26 = vmax.bf16 %v82_v17, %v66_v20  ;;  %v35_v27 = vld [vmem:[%s871_s0 + $0xc] sm:$0xf] }
   0x6   :  { %v176_v12 = vld [vmem:[%s876_s5] sm:$0xf]  ;;  %v177_v23 = vld [vmem:[%s876_s5 + $0x4] sm:$0xf]  ;;  %v51_v28 = vld [vmem:[%s872_s1 + $0xc] sm:$0xf] }
   0x7   :  { %v128_v11 = vmax.bf16 %v112_v4, %v96_v5  ;;  %v208_v21 = vld [vmem:[%s877_s6] sm:$0xf]  ;;  %v129_v22 = vmax.bf16 %v113_v13, %v97_v14  ;;  %v83_v29 = vld [vmem:[%s873_s2 + $0xc] sm:$0xf]  ;;  %v146_v33 = vld [vmem:[%s875_s4 + $0x8] sm:$0xf]  ;;  %v67_v34 = vmax.bf16 %v51_v28, %v35_v27  ;;  %v130_v37 = vmax.bf16 %v114_v24, %v98_v26 }
   0x8   :  { %v240_v30 = vld [vmem:[%s878_s7] sm:$0xf]  ;;  %v209_v36 = vld [vmem:[%s877_s6 + $0x4] sm:$0xf]  ;;  %v178_v38 = vld [vmem:[%s876_s5 + $0x8] sm:$0xf] }
   0x9   :  { %v160_v18 = vmax.bf16 %v144_v9, %v128_v11  ;;  %v272_v31 = vld [vmem:[%s879_s8] sm:$0xf]  ;;  %v161_v32 = vmax.bf16 %v145_v19, %v129_v22  ;;  %v115_v39 = vld [vmem:[%s874_s3 + $0xc] sm:$0xf]  ;;  %v99_v41 = vmax.bf16 %v83_v29, %v67_v34  ;;  %v36_v42 = vld [vmem:[%s871_s0 + $0x10] sm:$0xf]  ;;  %v162_v48 = vmax.bf16 %v146_v33, %v130_v37 }
   0xa   :  { %v52_v43 = vld [vmem:[%s872_s1 + $0x10] sm:$0xf]  ;;  %v241_v46 = vld [vmem:[%s878_s7 + $0x4] sm:$0xf]  ;;  %v147_v49 = vld [vmem:[%s875_s4 + $0xc] sm:$0xf] }
   0xb   :  { %v192_v25 = vmax.bf16 %v176_v12, %v160_v18  ;;  %v193_v40 = vmax.bf16 %v177_v23, %v161_v32  ;;  %v84_v44 = vld [vmem:[%s873_s2 + $0x10] sm:$0xf]  ;;  %v273_v47 = vld [vmem:[%s879_s8 + $0x4] sm:$0xf]  ;;  %v68_v50 = vmax.bf16 %v52_v43, %v36_v42  ;;  %v210_v52 = vld [vmem:[%s877_s6 + $0x8] sm:$0xf]  ;;  %v131_v53 = vmax.bf16 %v115_v39, %v99_v41 }
   0xc   :  { %v179_v54 = vld [vmem:[%s876_s5 + $0xc] sm:$0xf]  ;;  %v116_v55 = vld [vmem:[%s874_s3 + $0x10] sm:$0xf]  ;;  %v194_v57 = vmax.bf16 %v178_v38, %v162_v48  ;;  %v37_v59 = vld [vmem:[%s871_s0 + $0x14] sm:$0xf] }
   0xd   :  { %v224_v35 = vmax.bf16 %v208_v21, %v192_v25  ;;  %v225_v51 = vmax.bf16 %v209_v36, %v193_v40  ;;  %v100_v58 = vmax.bf16 %v84_v44, %v68_v50  ;;  %v53_v60 = vld [vmem:[%s872_s1 + $0x14] sm:$0xf]  ;;  %v242_v63 = vld [vmem:[%s878_s7 + $0x8] sm:$0xf]  ;;  %v163_v1 = vmax.bf16 %v147_v49, %v131_v53  ;;  %v148_v2 = vld [vmem:[%s875_s4 + $0x10] sm:$0xf] }
   0xe   :  { %v85_v61 = vld [vmem:[%s873_s2 + $0x14] sm:$0xf]  ;;  %v274_v0 = vld [vmem:[%s879_s8 + $0x8] sm:$0xf]  ;;  %v69_v3 = vmax.bf16 %v53_v60, %v37_v59  ;;  %v226_v4 = vmax.bf16 %v210_v52, %v194_v57  ;;  %v211_v5 = vld [vmem:[%s877_s6 + $0xc] sm:$0xf] }
   0xf   :  { %v256_v45 = vmax.bf16 %v240_v30, %v224_v35  ;;  %v257_v62 = vmax.bf16 %v241_v46, %v225_v51  ;;  %v132_v6 = vmax.bf16 %v116_v55, %v100_v58  ;;  %v180_v7 = vld [vmem:[%s876_s5 + $0x10] sm:$0xf]  ;;  %v117_v8 = vld [vmem:[%s874_s3 + $0x14] sm:$0xf]  ;;  %v195_v10 = vmax.bf16 %v179_v54, %v163_v1  ;;  %v38_v12 = vld [vmem:[%s871_s0 + $0x18] sm:$0xf] }
  0x10   :  { %v101_v11 = vmax.bf16 %v85_v61, %v69_v3  ;;  %v54_v13 = vld [vmem:[%s872_s1 + $0x18] sm:$0xf]  ;;  %v258_v15 = vmax.bf16 %v242_v63, %v226_v4  ;;  %v243_v16 = vld [vmem:[%s878_s7 + $0xc] sm:$0xf]  ;;  %v149_v19 = vld [vmem:[%s875_s4 + $0x14] sm:$0xf] }
  0x11   :  { %v288_v56 = vmax.bf16 %v272_v31, %v256_v45  ;;  %v289_v9 = vmax.bf16 %v273_v47, %v257_v62  ;;  %v86_v14 = vld [vmem:[%s873_s2 + $0x18] sm:$0xf]  ;;  %v275_v17 = vld [vmem:[%s879_s8 + $0xc] sm:$0xf]  ;;  %v164_v18 = vmax.bf16 %v148_v2, %v132_v6  ;;  %v70_v20 = vmax.bf16 %v54_v13, %v38_v12  ;;  %v212_v22 = vld [vmem:[%s877_s6 + $0x10] sm:$0xf] }
  0x12   :  { %v227_v21 = vmax.bf16 %v211_v5, %v195_v10  ;;  %v133_v23 = vmax.bf16 %v117_v8, %v101_v11  ;;  %v181_v24 = vld [vmem:[%s876_s5 + $0x14] sm:$0xf]  ;;  %v118_v25 = vld [vmem:[%s874_s3 + $0x18] sm:$0xf]  ;;  %v290_v26 = vmax.bf16 %v274_v0, %v258_v15  ;;  %v39_v29 = vld [vmem:[%s871_s0 + $0x1c] sm:$0xf] }
  0x13   :  { %305 = vst.msk [vmem:[%s880_s9] sm:$0xf] %vm304_vm0, %v288_v56  ;;  %306 = vst.msk [vmem:[%s880_s9 + $0x4] sm:$0xf] %vm304_vm0, %v289_v9  ;;  %v196_v27 = vmax.bf16 %v180_v7, %v164_v18  ;;  %v102_v28 = vmax.bf16 %v86_v14, %v70_v20  ;;  %v55_v30 = vld [vmem:[%s872_s1 + $0x1c] sm:$0xf] }
  0x14   :  { %v87_v31 = vld [vmem:[%s873_s2 + $0x1c] sm:$0xf]  ;;  %v259_v32 = vmax.bf16 %v243_v16, %v227_v21  ;;  %v244_v33 = vld [vmem:[%s878_s7 + $0x10] sm:$0xf]  ;;  %v165_v35 = vmax.bf16 %v149_v19, %v133_v23  ;;  %v150_v36 = vld [vmem:[%s875_s4 + $0x18] sm:$0xf]  ;;  %v71_v37 = vmax.bf16 %v55_v30, %v39_v29 }
  0x15   :  { %v276_v34 = vld [vmem:[%s879_s8 + $0x10] sm:$0xf]  ;;  %307 = vst.msk [vmem:[%s880_s9 + $0x8] sm:$0xf] %vm304_vm0, %v290_v26  ;;  %v228_v38 = vmax.bf16 %v212_v22, %v196_v27  ;;  %v213_v39 = vld [vmem:[%s877_s6 + $0x14] sm:$0xf]  ;;  %v134_v40 = vmax.bf16 %v118_v25, %v102_v28 }
  0x16   :  { %v182_v41 = vld [vmem:[%s876_s5 + $0x18] sm:$0xf]  ;;  %v119_v42 = vld [vmem:[%s874_s3 + $0x1c] sm:$0xf]  ;;  %v291_v43 = vmax.bf16 %v275_v17, %v259_v32  ;;  %v197_v44 = vmax.bf16 %v181_v24, %v165_v35  ;;  %v103_v45 = vmax.bf16 %v87_v31, %v71_v37  ;;  %v40_v46 = vld [vmem:[%s871_s0 + $0x20] sm:$0xf] }
  0x17   :  { %v56_v47 = vld [vmem:[%s872_s1 + $0x20] sm:$0xf]  ;;  %v260_v49 = vmax.bf16 %v244_v33, %v228_v38  ;;  %v245_v50 = vld [vmem:[%s878_s7 + $0x14] sm:$0xf]  ;;  %v166_v52 = vmax.bf16 %v150_v36, %v134_v40  ;;  %v151_v53 = vld [vmem:[%s875_s4 + $0x1c] sm:$0xf] }
  0x18   :  { %v88_v48 = vld [vmem:[%s873_s2 + $0x20] sm:$0xf]  ;;  %v277_v51 = vld [vmem:[%s879_s8 + $0x14] sm:$0xf]  ;;  %v72_v54 = vmax.bf16 %v56_v47, %v40_v46  ;;  %308 = vst.msk [vmem:[%s880_s9 + $0xc] sm:$0xf] %vm304_vm0, %v291_v43  ;;  %v229_v55 = vmax.bf16 %v213_v39, %v197_v44  ;;  %v135_v57 = vmax.bf16 %v119_v42, %v103_v45 }
  0x19   :  { %v214_v56 = vld [vmem:[%s877_s6 + $0x18] sm:$0xf]  ;;  %v183_v58 = vld [vmem:[%s876_s5 + $0x1c] sm:$0xf]  ;;  %v120_v59 = vld [vmem:[%s874_s3 + $0x20] sm:$0xf]  ;;  %v292_v60 = vmax.bf16 %v276_v34, %v260_v49  ;;  %v198_v61 = vmax.bf16 %v182_v41, %v166_v52 }
  0x1a   :  { %v104_v62 = vmax.bf16 %v88_v48, %v72_v54  ;;  %v41_v63 = vld [vmem:[%s871_s0 + $0x24] sm:$0xf]  ;;  %v261_v2 = vmax.bf16 %v245_v50, %v229_v55  ;;  %v246_v3 = vld [vmem:[%s878_s7 + $0x18] sm:$0xf]  ;;  %v167_v5 = vmax.bf16 %v151_v53, %v135_v57  ;;  %v152_v6 = vld [vmem:[%s875_s4 + $0x20] sm:$0xf] }
  0x1b   :  { %v57_v0 = vld [vmem:[%s872_s1 + $0x24] sm:$0xf]  ;;  %v278_v4 = vld [vmem:[%s879_s8 + $0x18] sm:$0xf]  ;;  %309 = vst.msk [vmem:[%s880_s9 + $0x10] sm:$0xf] %vm304_vm0, %v292_v60  ;;  %v230_v8 = vmax.bf16 %v214_v56, %v198_v61 }
  0x1c   :  { %v89_v1 = vld [vmem:[%s873_s2 + $0x24] sm:$0xf]  ;;  %v73_v7 = vmax.bf16 %v57_v0, %v41_v63  ;;  %v215_v9 = vld [vmem:[%s877_s6 + $0x1c] sm:$0xf]  ;;  %v136_v10 = vmax.bf16 %v120_v59, %v104_v62  ;;  %v184_v11 = vld [vmem:[%s876_s5 + $0x20] sm:$0xf]  ;;  %v293_v13 = vmax.bf16 %v277_v51, %v261_v2  ;;  %v199_v14 = vmax.bf16 %v183_v58, %v167_v5 }
  0x1d   :  { %v121_v12 = vld [vmem:[%s874_s3 + $0x24] sm:$0xf]  ;;  %v42_v16 = vld [vmem:[%s871_s0 + $0x28] sm:$0xf]  ;;  %v262_v19 = vmax.bf16 %v246_v3, %v230_v8  ;;  %v247_v20 = vld [vmem:[%s878_s7 + $0x1c] sm:$0xf] }
  0x1e   :  { %v105_v15 = vmax.bf16 %v89_v1, %v73_v7  ;;  %v58_v17 = vld [vmem:[%s872_s1 + $0x28] sm:$0xf]  ;;  %v279_v21 = vld [vmem:[%s879_s8 + $0x1c] sm:$0xf]  ;;  %v168_v22 = vmax.bf16 %v152_v6, %v136_v10  ;;  %v153_v23 = vld [vmem:[%s875_s4 + $0x24] sm:$0xf]  ;;  %v231_v25 = vmax.bf16 %v215_v9, %v199_v14 }
  0x1f   :  { %v90_v18 = vld [vmem:[%s873_s2 + $0x28] sm:$0xf]  ;;  %v74_v24 = vmax.bf16 %v58_v17, %v42_v16  ;;  %310 = vst.msk [vmem:[%s880_s9 + $0x14] sm:$0xf] %vm304_vm0, %v293_v13  ;;  %v216_v26 = vld [vmem:[%s877_s6 + $0x20] sm:$0xf]  ;;  %v294_v30 = vmax.bf16 %v278_v4, %v262_v19 }
  0x20   :  { %v137_v27 = vmax.bf16 %v121_v12, %v105_v15  ;;  %v185_v28 = vld [vmem:[%s876_s5 + $0x24] sm:$0xf]  ;;  %v122_v29 = vld [vmem:[%s874_s3 + $0x28] sm:$0xf]  ;;  %v200_v31 = vmax.bf16 %v184_v11, %v168_v22  ;;  %v43_v33 = vld [vmem:[%s871_s0 + $0x2c] sm:$0xf]  ;;  %v263_v36 = vmax.bf16 %v247_v20, %v231_v25 }
  0x21   :  { %v106_v32 = vmax.bf16 %v90_v18, %v74_v24  ;;  %v59_v34 = vld [vmem:[%s872_s1 + $0x2c] sm:$0xf]  ;;  %v248_v37 = vld [vmem:[%s878_s7 + $0x20] sm:$0xf]  ;;  %v154_v40 = vld [vmem:[%s875_s4 + $0x28] sm:$0xf] }
  0x22   :  { %v91_v35 = vld [vmem:[%s873_s2 + $0x2c] sm:$0xf]  ;;  %v280_v38 = vld [vmem:[%s879_s8 + $0x20] sm:$0xf]  ;;  %v169_v39 = vmax.bf16 %v153_v23, %v137_v27  ;;  %v75_v41 = vmax.bf16 %v59_v34, %v43_v33  ;;  %311 = vst.msk [vmem:[%s880_s9 + $0x18] sm:$0xf] %vm304_vm0, %v294_v30  ;;  %v232_v42 = vmax.bf16 %v216_v26, %v200_v31  ;;  %v295_v47 = vmax.bf16 %v279_v21, %v263_v36 }
  0x23   :  { %v217_v43 = vld [vmem:[%s877_s6 + $0x24] sm:$0xf]  ;;  %v138_v44 = vmax.bf16 %v122_v29, %v106_v32  ;;  %v186_v45 = vld [vmem:[%s876_s5 + $0x28] sm:$0xf]  ;;  %v123_v46 = vld [vmem:[%s874_s3 + $0x2c] sm:$0xf] }
  0x24   :  { %v201_v48 = vmax.bf16 %v185_v28, %v169_v39  ;;  %v107_v49 = vmax.bf16 %v91_v35, %v75_v41  ;;  %v44_v50 = vld [vmem:[%s871_s0 + $0x30] sm:$0xf]  ;;  %v264_v53 = vmax.bf16 %v248_v37, %v232_v42  ;;  %v249_v54 = vld [vmem:[%s878_s7 + $0x24] sm:$0xf]  ;;  %v155_v57 = vld [vmem:[%s875_s4 + $0x2c] sm:$0xf] }
  0x25   :  { %v60_v51 = vld [vmem:[%s872_s1 + $0x30] sm:$0xf]  ;;  %v281_v55 = vld [vmem:[%s879_s8 + $0x24] sm:$0xf]  ;;  %v170_v56 = vmax.bf16 %v154_v40, %v138_v44  ;;  %312 = vst.msk [vmem:[%s880_s9 + $0x1c] sm:$0xf] %vm304_vm0, %v295_v47 }
  0x26   :  { %v92_v52 = vld [vmem:[%s873_s2 + $0x30] sm:$0xf]  ;;  %v76_v58 = vmax.bf16 %v60_v51, %v44_v50  ;;  %v233_v59 = vmax.bf16 %v217_v43, %v201_v48  ;;  %v218_v60 = vld [vmem:[%s877_s6 + $0x28] sm:$0xf]  ;;  %v139_v61 = vmax.bf16 %v123_v46, %v107_v49  ;;  %v187_v62 = vld [vmem:[%s876_s5 + $0x2c] sm:$0xf]  ;;  %v296_v0 = vmax.bf16 %v280_v38, %v264_v53 }
  0x27   :  { %v124_v63 = vld [vmem:[%s874_s3 + $0x30] sm:$0xf]  ;;  %v202_v1 = vmax.bf16 %v186_v45, %v170_v56  ;;  %v45_v3 = vld [vmem:[%s871_s0 + $0x34] sm:$0xf]  ;;  %v250_v7 = vld [vmem:[%s878_s7 + $0x28] sm:$0xf] }
  0x28   :  { %v108_v2 = vmax.bf16 %v92_v52, %v76_v58  ;;  %v61_v4 = vld [vmem:[%s872_s1 + $0x34] sm:$0xf]  ;;  %v265_v6 = vmax.bf16 %v249_v54, %v233_v59  ;;  %v282_v8 = vld [vmem:[%s879_s8 + $0x28] sm:$0xf]  ;;  %v171_v9 = vmax.bf16 %v155_v57, %v139_v61  ;;  %v156_v10 = vld [vmem:[%s875_s4 + $0x30] sm:$0xf] }
  0x29   :  { %v93_v5 = vld [vmem:[%s873_s2 + $0x34] sm:$0xf]  ;;  %v77_v11 = vmax.bf16 %v61_v4, %v45_v3  ;;  %313 = vst.msk [vmem:[%s880_s9 + $0x20] sm:$0xf] %vm304_vm0, %v296_v0  ;;  %v234_v12 = vmax.bf16 %v218_v60, %v202_v1  ;;  %v219_v13 = vld [vmem:[%s877_s6 + $0x2c] sm:$0xf] }
  0x2a   :  { %v140_v14 = vmax.bf16 %v124_v63, %v108_v2  ;;  %v188_v15 = vld [vmem:[%s876_s5 + $0x30] sm:$0xf]  ;;  %v125_v16 = vld [vmem:[%s874_s3 + $0x34] sm:$0xf]  ;;  %v297_v17 = vmax.bf16 %v281_v55, %v265_v6  ;;  %v203_v18 = vmax.bf16 %v187_v62, %v171_v9  ;;  %v46_v20 = vld [vmem:[%s871_s0 + $0x38] sm:$0xf] }
  0x2b   :  { %v109_v19 = vmax.bf16 %v93_v5, %v77_v11  ;;  %v62_v21 = vld [vmem:[%s872_s1 + $0x38] sm:$0xf]  ;;  %v266_v23 = vmax.bf16 %v250_v7, %v234_v12  ;;  %v251_v24 = vld [vmem:[%s878_s7 + $0x2c] sm:$0xf]  ;;  %v157_v27 = vld [vmem:[%s875_s4 + $0x34] sm:$0xf] }
  0x2c   :  { %v94_v22 = vld [vmem:[%s873_s2 + $0x38] sm:$0xf]  ;;  %v283_v25 = vld [vmem:[%s879_s8 + $0x2c] sm:$0xf]  ;;  %v172_v26 = vmax.bf16 %v156_v10, %v140_v14  ;;  %v78_v28 = vmax.bf16 %v62_v21, %v46_v20  ;;  %314 = vst.msk [vmem:[%s880_s9 + $0x24] sm:$0xf] %vm304_vm0, %v297_v17  ;;  %v235_v29 = vmax.bf16 %v219_v13, %v203_v18 }
  0x2d   :  { %v220_v30 = vld [vmem:[%s877_s6 + $0x30] sm:$0xf]  ;;  %v141_v31 = vmax.bf16 %v125_v16, %v109_v19  ;;  %v189_v32 = vld [vmem:[%s876_s5 + $0x34] sm:$0xf]  ;;  %v126_v33 = vld [vmem:[%s874_s3 + $0x38] sm:$0xf]  ;;  %v298_v34 = vmax.bf16 %v282_v8, %v266_v23 }
  0x2e   :  { %v204_v35 = vmax.bf16 %v188_v15, %v172_v26  ;;  %v110_v36 = vmax.bf16 %v94_v22, %v78_v28  ;;  %v47_v37 = vld [vmem:[%s871_s0 + $0x3c] sm:$0xf]  ;;  %v267_v40 = vmax.bf16 %v251_v24, %v235_v29  ;;  %v252_v41 = vld [vmem:[%s878_s7 + $0x30] sm:$0xf]  ;;  %v158_v43 = vld [vmem:[%s875_s4 + $0x38] sm:$0xf] }
  0x2f   :  { %v63_v38 = vld [vmem:[%s872_s1 + $0x3c] sm:$0xf]  ;;  %v173_v42 = vmax.bf16 %v157_v27, %v141_v31  ;;  %315 = vst.msk [vmem:[%s880_s9 + $0x28] sm:$0xf] %vm304_vm0, %v298_v34  ;;  %v221_v46 = vld [vmem:[%s877_s6 + $0x34] sm:$0xf] }
  0x30   :  { %v95_v39 = vld [vmem:[%s873_s2 + $0x3c] sm:$0xf]  ;;  %v79_v44 = vmax.bf16 %v63_v38, %v47_v37  ;;  %v236_v45 = vmax.bf16 %v220_v30, %v204_v35  ;;  %v142_v47 = vmax.bf16 %v126_v33, %v110_v36  ;;  %v299_v49 = vmax.bf16 %v283_v25, %v267_v40  ;;  %v284_v50 = vld [vmem:[%s879_s8 + $0x30] sm:$0xf]  ;;  %v190_v52 = vld [vmem:[%s876_s5 + $0x38] sm:$0xf] }
  0x31   :  { %v127_v48 = vld [vmem:[%s874_s3 + $0x3c] sm:$0xf]  ;;  %v205_v51 = vmax.bf16 %v189_v32, %v173_v42  ;;  %v253_v55 = vld [vmem:[%s878_s7 + $0x34] sm:$0xf]  ;;  %v222_v59 = vld [vmem:[%s877_s6 + $0x38] sm:$0xf] }
  0x32   :  { %v111_v53 = vmax.bf16 %v95_v39, %v79_v44  ;;  %v268_v54 = vmax.bf16 %v252_v41, %v236_v45  ;;  %v174_v56 = vmax.bf16 %v158_v43, %v142_v47  ;;  %v159_v57 = vld [vmem:[%s875_s4 + $0x3c] sm:$0xf]  ;;  %316 = vst.msk [vmem:[%s880_s9 + $0x2c] sm:$0xf] %vm304_vm0, %v299_v49  ;;  %v285_v62 = vld [vmem:[%s879_s8 + $0x34] sm:$0xf] }
  0x33   :  { %v237_v58 = vmax.bf16 %v221_v46, %v205_v51  ;;  %v191_v0 = vld [vmem:[%s876_s5 + $0x3c] sm:$0xf]  ;;  %v254_v2 = vld [vmem:[%s878_s7 + $0x38] sm:$0xf] }
  0x34   :  { %v143_v60 = vmax.bf16 %v127_v48, %v111_v53  ;;  %v300_v61 = vmax.bf16 %v284_v50, %v268_v54  ;;  %v206_v63 = vmax.bf16 %v190_v52, %v174_v56  ;;  %v223_v5 = vld [vmem:[%s877_s6 + $0x3c] sm:$0xf]  ;;  %v286_v7 = vld [vmem:[%s879_s8 + $0x38] sm:$0xf] }
  0x35   :  { %v269_v1 = vmax.bf16 %v253_v55, %v237_v58  ;;  %v255_v10 = vld [vmem:[%s878_s7 + $0x3c] sm:$0xf] }
  0x36   :  { %v175_v3 = vmax.bf16 %v159_v57, %v143_v60  ;;  %317 = vst.msk [vmem:[%s880_s9 + $0x30] sm:$0xf] %vm304_vm0, %v300_v61  ;;  %v238_v4 = vmax.bf16 %v222_v59, %v206_v63  ;;  %v287_v13 = vld [vmem:[%s879_s8 + $0x3c] sm:$0xf] }
  0x37   :  { %v301_v6 = vmax.bf16 %v285_v62, %v269_v1 }
  0x38   :  { %v207_v8 = vmax.bf16 %v191_v0, %v175_v3  ;;  %v270_v9 = vmax.bf16 %v254_v2, %v238_v4 }
  0x39   :  { %318 = vst.msk [vmem:[%s880_s9 + $0x34] sm:$0xf] %vm304_vm0, %v301_v6 }
  0x3a   :  { %v239_v11 = vmax.bf16 %v223_v5, %v207_v8  ;;  %v302_v12 = vmax.bf16 %v286_v7, %v270_v9 }
  0x3c   :  { %v271_v14 = vmax.bf16 %v255_v10, %v239_v11  ;;  %319 = vst.msk [vmem:[%s880_s9 + $0x38] sm:$0xf] %vm304_vm0, %v302_v12 }
  0x3e   :  { %v303_v15 = vmax.bf16 %v287_v13, %v271_v14 }
  0x40   :  { %320 = vst.msk [vmem:[%s880_s9 + $0x3c] sm:$0xf] %vm304_vm0, %v303_v15 }

// kernel: resnet_forward.14
= control target key start
LH: loop header
LB: loop body
LE: loop exit
PB: predicated region body
PF: predicated region fallthrough
CT: control target
= control target key end

     0   :  { %v2251_v0 = vmov 0   ;;  %vm578_vm0 = vcmask 154624   ;;  %vm675_vm1 = vcmask 1040384   ;;  %vm676_vm2 = vcmask 1041408   ;;  %s2766_s1 = inlined_call_operand.vmem [shape: bf16[147,128], index: 1, kind: input, shape index: {}]   ;;  %s2767_s0 = inlined_call_operand.vmem [shape: bf16[512,147], index: 0, kind: input, shape index: {}]   ;;  %s2768_s2 = inlined_call_operand.vmem [shape: f32[1,128], index: 2, kind: input, shape index: {}]   ;;  %s2769_s3 = inlined_call_operand.vmem [shape: f32[1,128], index: 3, kind: input, shape index: {}]   ;;  %s2770_s4 = inlined_call_operand.vmem [shape: bf16[512,128], index: 4, kind: output, shape index: {}]  }
   0x1   :  { %682 = vmatprep.subr.bf16.mxu0 %v2251_v0  ;;  %2123 = vmatprep.subr.bf16.mxu1 %v2251_v0  ;;  %v2145_v1 = vld [vmem:[%s2766_s1 + $0x38] sm:$0xff]   ;;  %v2146_v2 = vld [vmem:[%s2766_s1 + $0x30] sm:$0xff]   ;;  %v2147_v3 = vld [vmem:[%s2766_s1 + $0x28] sm:$0xff]   ;;  %v2252_v10 = vmov 65535  }
   0x2   :  { %683 = vmatpush1.bf16.msra.mxu0 %v2145_v1  ;;  %2133 = vmatpush1.bf16.msra.mxu1 %v2145_v1  ;;  %v2148_v4 = vld [vmem:[%s2766_s1 + $0x20] sm:$0xff]   ;;  %v2149_v7 = vld [vmem:[%s2766_s1 + $0x18] sm:$0xff]   ;;  %v2150_v8 = vld [vmem:[%s2766_s1 + $0x10] sm:$0xff]   ;;  %v677_v11 = vsel %vm675_vm1, 4294967295, %v2252_v10 }
   0x3   :  { %684 = vmatprep.subr.bf16.mxu0 %v2251_v0  ;;  %2124 = vmatprep.subr.bf16.mxu1 %v2251_v0  ;;  %v2157_v5 = vld [vmem:[%s2767_s0 + $0x4] ss:$8 sps:$4 sm:$0xff]   ;;  %v2153_v13 = vld [vmem:[%s2766_s1 + $0x48] ss:$0 sps:$4 sm:$0x33]   ;;  %v678_v14 = vsel %vm676_vm2, %v677_v11, 0 }
   0x4   :  { %1770 = vmatprep.mubr.msk.bf16.mxu0 %vm578_vm0, %v2157_v5  ;;  %v2160_v6 = vld [vmem:[%s2767_s0 + $0x104] ss:$8 sps:$4 sm:$0xff]   ;;  %v680_v15 = vand.u32 %v2153_v13, %v678_v14  ;;  %v2155_v17 = vld [vmem:[%s2767_s0] ss:$8 sps:$4 sm:$0xff]   ;;  %v2161_v19 = vld [vmem:[%s2767_s0 + $0x14] ss:$8 sps:$4 sm:$0xff]  }
   0x5   :  { %1786 = vmatprep.mubr.msk.bf16.mxu1 %vm578_vm0, %v2160_v6  ;;  %v2151_v9 = vld [vmem:[%s2766_s1 + $0x8] sm:$0xff]   ;;  %v2152_v12 = vld [vmem:[%s2766_s1] sm:$0xff]   ;;  %v2163_v20 = vld [vmem:[%s2767_s0 + $0x114] ss:$8 sps:$4 sm:$0xff]  }
   0x6   :  { %685 = vmatpush1.bf16.msra.mxu0 %v2146_v2  ;;  %2134 = vmatpush1.bf16.msra.mxu1 %v2146_v2  ;;  %v2154_v16 = vld [vmem:[%s2766_s1 + $0x40] sm:$0xff]   ;;  %v2165_v21 = vld [vmem:[%s2767_s0 + $0x10] ss:$8 sps:$4 sm:$0xff]   ;;  %v2173_v27 = vld [vmem:[%s2767_s0 + $0x34] ss:$8 sps:$4 sm:$0xff]  }
   0x7   :  { %686 = vmatprep.subr.bf16.mxu0 %v2251_v0  ;;  %2125 = vmatprep.subr.bf16.mxu1 %v2251_v0  ;;  %v2158_v18 = vld [vmem:[%s2767_s0 + $0x100] ss:$8 sps:$4 sm:$0xff]   ;;  %v2166_v22 = vld [vmem:[%s2767_s0 + $0x110] ss:$8 sps:$4 sm:$0xff]   ;;  %v2167_v23 = vld [vmem:[%s2767_s0 + $0x24] ss:$8 sps:$4 sm:$0xff]  }
   0x8   :  { %v2169_v24 = vld [vmem:[%s2767_s0 + $0x124] ss:$8 sps:$4 sm:$0xff]   ;;  %v2171_v25 = vld [vmem:[%s2767_s0 + $0x20] ss:$8 sps:$4 sm:$0xff]   ;;  %v2175_v28 = vld [vmem:[%s2767_s0 + $0x134] ss:$8 sps:$4 sm:$0xff]  }
   0x9   :  { %v2172_v26 = vld [vmem:[%s2767_s0 + $0x120] ss:$8 sps:$4 sm:$0xff]   ;;  %v2177_v29 = vld [vmem:[%s2767_s0 + $0x30] ss:$8 sps:$4 sm:$0xff]   ;;  %v2179_v31 = vld [vmem:[%s2767_s0 + $0x44] ss:$8 sps:$4 sm:$0xff]  }
   0xa   :  { %687 = vmatpush1.bf16.msra.mxu0 %v2147_v3  ;;  %2135 = vmatpush1.bf16.msra.mxu1 %v2147_v3  ;;  %v2178_v30 = vld [vmem:[%s2767_s0 + $0x130] ss:$8 sps:$4 sm:$0xff]   ;;  %v2181_v32 = vld [vmem:[%s2767_s0 + $0x144] ss:$8 sps:$4 sm:$0xff]   ;;  %v2183_v33 = vld [vmem:[%s2767_s0 + $0x40] ss:$8 sps:$4 sm:$0xff]  }
   0xb   :  { %688 = vmatprep.subr.bf16.mxu0 %v2251_v0  ;;  %2126 = vmatprep.subr.bf16.mxu1 %v2251_v0  ;;  %v2184_v34 = vld [vmem:[%s2767_s0 + $0x140] ss:$8 sps:$4 sm:$0xff]   ;;  %v2185_v35 = vld [vmem:[%s2767_s0 + $0x54] ss:$8 sps:$4 sm:$0xff]   ;;  %v2189_v37 = vld [vmem:[%s2767_s0 + $0x50] ss:$8 sps:$4 sm:$0xff]  }
   0xc   :  { %v2187_v36 = vld [vmem:[%s2767_s0 + $0x154] ss:$8 sps:$4 sm:$0xff]   ;;  %v2190_v38 = vld [vmem:[%s2767_s0 + $0x150] ss:$8 sps:$4 sm:$0xff]   ;;  %v2191_v39 = vld [vmem:[%s2767_s0 + $0x64] ss:$8 sps:$4 sm:$0xff]  }
   0xd   :  { %v2193_v40 = vld [vmem:[%s2767_s0 + $0x164] ss:$8 sps:$4 sm:$0xff]   ;;  %v2195_v41 = vld [vmem:[%s2767_s0 + $0x60] ss:$8 sps:$4 sm:$0xff]   ;;  %v2197_v43 = vld [vmem:[%s2767_s0 + $0x74] ss:$8 sps:$4 sm:$0xff]  }
   0xe   :  { %689 = vmatpush1.bf16.msra.mxu0 %v2148_v4  ;;  %2136 = vmatpush1.bf16.msra.mxu1 %v2148_v4  ;;  %v2196_v42 = vld [vmem:[%s2767_s0 + $0x160] ss:$8 sps:$4 sm:$0xff]   ;;  %v2199_v44 = vld [vmem:[%s2767_s0 + $0x174] ss:$8 sps:$4 sm:$0xff]   ;;  %v2201_v45 = vld [vmem:[%s2767_s0 + $0x70] ss:$8 sps:$4 sm:$0xff]  }
   0xf   :  { %690 = vmatprep.subr.bf16.mxu0 %v2251_v0  ;;  %2127 = vmatprep.subr.bf16.mxu1 %v2251_v0  ;;  %v2202_v46 = vld [vmem:[%s2767_s0 + $0x170] ss:$8 sps:$4 sm:$0xff]   ;;  %v2203_v47 = vld [vmem:[%s2767_s0 + $0x84] ss:$8 sps:$4 sm:$0xff]   ;;  %v2207_v49 = vld [vmem:[%s2767_s0 + $0x80] ss:$8 sps:$4 sm:$0xff]  }
  0x10   :  { %v2205_v48 = vld [vmem:[%s2767_s0 + $0x184] ss:$8 sps:$4 sm:$0xff]   ;;  %v2208_v50 = vld [vmem:[%s2767_s0 + $0x180] ss:$8 sps:$4 sm:$0xff]   ;;  %v2209_v51 = vld [vmem:[%s2767_s0 + $0x94] ss:$8 sps:$4 sm:$0xff]  }
  0x11   :  { %v2211_v52 = vld [vmem:[%s2767_s0 + $0x194] ss:$8 sps:$4 sm:$0xff]   ;;  %v2213_v53 = vld [vmem:[%s2767_s0 + $0x90] ss:$8 sps:$4 sm:$0xff]   ;;  %v2215_v55 = vld [vmem:[%s2767_s0 + $0xa4] ss:$8 sps:$4 sm:$0xff]  }
  0x12   :  { %691 = vmatpush1.bf16.msra.mxu0 %v2149_v7  ;;  %2137 = vmatpush1.bf16.msra.mxu1 %v2149_v7  ;;  %v2214_v54 = vld [vmem:[%s2767_s0 + $0x190] ss:$8 sps:$4 sm:$0xff]   ;;  %v2217_v56 = vld [vmem:[%s2767_s0 + $0x1a4] ss:$8 sps:$4 sm:$0xff]   ;;  %v2219_v57 = vld [vmem:[%s2767_s0 + $0xa0] ss:$8 sps:$4 sm:$0xff]  }
  0x13   :  { %692 = vmatprep.subr.bf16.mxu0 %v2251_v0  ;;  %2128 = vmatprep.subr.bf16.mxu1 %v2251_v0  ;;  %v2220_v58 = vld [vmem:[%s2767_s0 + $0x1a0] ss:$8 sps:$4 sm:$0xff]   ;;  %v2221_v59 = vld [vmem:[%s2767_s0 + $0xb4] ss:$8 sps:$4 sm:$0xff]   ;;  %v2225_v61 = vld [vmem:[%s2767_s0 + $0xb0] ss:$8 sps:$4 sm:$0xff]  }
  0x14   :  { %v2223_v60 = vld [vmem:[%s2767_s0 + $0x1b4] ss:$8 sps:$4 sm:$0xff]   ;;  %v2226_v62 = vld [vmem:[%s2767_s0 + $0x1b0] ss:$8 sps:$4 sm:$0xff]   ;;  %v2227_v63 = vld [vmem:[%s2767_s0 + $0xc4] ss:$8 sps:$4 sm:$0xff]  }
  0x15   :  { %v2231_v1 = vld [vmem:[%s2767_s0 + $0xc0] ss:$8 sps:$4 sm:$0xff]   ;;  %v2233_v3 = vld [vmem:[%s2767_s0 + $0xd4] ss:$8 sps:$4 sm:$0xff]   ;;  %v2237_v5 = vld [vmem:[%s2767_s0 + $0xd0] ss:$8 sps:$4 sm:$0xff]  }
  0x16   :  { %693 = vmatpush1.bf16.msra.mxu0 %v2150_v8  ;;  %2138 = vmatpush1.bf16.msra.mxu1 %v2150_v8  ;;  %v2232_v2 = vld [vmem:[%s2767_s0 + $0x1c0] ss:$8 sps:$4 sm:$0xff]   ;;  %v2235_v4 = vld [vmem:[%s2767_s0 + $0x1d4] ss:$8 sps:$4 sm:$0xff]   ;;  %v2238_v6 = vld [vmem:[%s2767_s0 + $0x1d0] ss:$8 sps:$4 sm:$0xff]  }
  0x17   :  { %694 = vmatprep.subr.bf16.mxu0 %v2251_v0  ;;  %2129 = vmatprep.subr.bf16.mxu1 %v2251_v0  ;;  %v2239_v7 = vld [vmem:[%s2767_s0 + $0xe4] ss:$8 sps:$4 sm:$0xff]   ;;  %v2244_v10 = vld [vmem:[%s2767_s0 + $0x1e0] ss:$8 sps:$4 sm:$0xff]   ;;  %v2245_v11 = vld [vmem:[%s2767_s0 + $0xf4] ss:$8 sps:$4 sm:$0xff]  }
  0x18   :  { %v2241_v8 = vld [vmem:[%s2767_s0 + $0x1e4] ss:$8 sps:$4 sm:$0xff]   ;;  %v2249_v13 = vld [vmem:[%s2767_s0 + $0xf0] ss:$8 sps:$4 sm:$0xff]  }
  0x19   :  { %v2250_v14 = vld [vmem:[%s2767_s0 + $0x1f0] ss:$8 sps:$4 sm:$0xff]  }
  0x1a   :  { %695 = vmatpush1.bf16.msra.mxu0 %v2151_v9  ;;  %2139 = vmatpush1.bf16.msra.mxu1 %v2151_v9  ;;  %v2243_v9 = vld [vmem:[%s2767_s0 + $0xe0] ss:$8 sps:$4 sm:$0xff]  }
  0x1b   :  { %696 = vmatprep.subr.bf16.mxu0 %v2251_v0  ;;  %2130 = vmatprep.subr.bf16.mxu1 %v2251_v0 }
  0x1e   :  { %697 = vmatpush1.bf16.msra.mxu0 %v2152_v12  ;;  %2140 = vmatpush1.bf16.msra.mxu1 %v2152_v12  ;;  %v2247_v12 = vld [vmem:[%s2767_s0 + $0x1f4] ss:$8 sps:$4 sm:$0xff]  }
  0x1f   :  { %710 = vmatprep.subr.bf16.mxu0 %v2251_v0  ;;  %2131 = vmatprep.subr.bf16.mxu1 %v2251_v0 }
  0x22   :  { %711 = vmatpush2.bf16.msra.mxu0 %v680_v15  ;;  %2141 = vmatpush2.bf16.msra.mxu1 %v680_v15  ;;  %v2535_v15 = vld [vmem:[%s2768_s2] ss:$0 sm:$0xff] }
  0x23   :  { %712 = vmatprep.subr.bf16.mxu0 %v2251_v0  ;;  %2132 = vmatprep.subr.bf16.mxu1 %v2251_v0  ;;  %v2229_v0 = vld [vmem:[%s2767_s0 + $0x1c4] ss:$8 sps:$4 sm:$0xff]  }
  0x26   :  { %713 = vmatpush2.bf16.msra.mxu0 %v2154_v16  ;;  %2142 = vmatpush2.bf16.msra.mxu1 %v2154_v16 }
  0x29   :  { %715 = vmatmul.mubr.bf16.vlgmr.msra.gmra.mxu0 %v2155_v17  ;;  %843 = vmatmul.mubr.bf16.vlgmr.msra.gmra.mxu1 %v2158_v18 }
  0x2a   :  { %1771 = vmatprep.mubr.msk.bf16.mxu0 %vm578_vm0, %v2161_v19  ;;  %1787 = vmatprep.mubr.msk.bf16.mxu1 %vm578_vm0, %v2163_v20  ;;  %v2541_v19 = vld [vmem:[%s2769_s3] ss:$0 sm:$0xff] }
  0x31   :  { %723 = vmatmul.mubr.bf16.gmra.mxu0 %v2165_v21  ;;  %851 = vmatmul.mubr.bf16.gmra.mxu1 %v2166_v22 }
  0x32   :  { %1772 = vmatprep.mubr.msk.bf16.mxu0 %vm578_vm0, %v2167_v23  ;;  %1788 = vmatprep.mubr.msk.bf16.mxu1 %vm578_vm0, %v2169_v24 }
  0x39   :  { %731 = vmatmul.mubr.bf16.gmra.mxu0 %v2171_v25  ;;  %859 = vmatmul.mubr.bf16.gmra.mxu1 %v2172_v26 }
  0x3a   :  { %1773 = vmatprep.mubr.msk.bf16.mxu0 %vm578_vm0, %v2173_v27  ;;  %1789 = vmatprep.mubr.msk.bf16.mxu1 %vm578_vm0, %v2175_v28 }
  0x41   :  { %739 = vmatmul.mubr.bf16.gmra.mxu0 %v2177_v29  ;;  %867 = vmatmul.mubr.bf16.gmra.mxu1 %v2178_v30 }
  0x42   :  { %1774 = vmatprep.mubr.msk.bf16.mxu0 %vm578_vm0, %v2179_v31  ;;  %1790 = vmatprep.mubr.msk.bf16.mxu1 %vm578_vm0, %v2181_v32 }
  0x49   :  { %747 = vmatmul.mubr.bf16.gmra.mxu0 %v2183_v33  ;;  %875 = vmatmul.mubr.bf16.gmra.mxu1 %v2184_v34 }
  0x4a   :  { %1775 = vmatprep.mubr.msk.bf16.mxu0 %vm578_vm0, %v2185_v35  ;;  %1791 = vmatprep.mubr.msk.bf16.mxu1 %vm578_vm0, %v2187_v36 }
  0x51   :  { %755 = vmatmul.mubr.bf16.gmra.mxu0 %v2189_v37  ;;  %883 = vmatmul.mubr.bf16.gmra.mxu1 %v2190_v38 }
  0x52   :  { %1776 = vmatprep.mubr.msk.bf16.mxu0 %vm578_vm0, %v2191_v39  ;;  %1792 = vmatprep.mubr.msk.bf16.mxu1 %vm578_vm0, %v2193_v40 }
  0x59   :  { %763 = vmatmul.mubr.bf16.gmra.mxu0 %v2195_v41  ;;  %891 = vmatmul.mubr.bf16.gmra.mxu1 %v2196_v42 }
  0x5a   :  { %1777 = vmatprep.mubr.msk.bf16.mxu0 %vm578_vm0, %v2197_v43  ;;  %1793 = vmatprep.mubr.msk.bf16.mxu1 %vm578_vm0, %v2199_v44 }
  0x61   :  { %771 = vmatmul.mubr.bf16.gmra.mxu0 %v2201_v45  ;;  %899 = vmatmul.mubr.bf16.gmra.mxu1 %v2202_v46 }
  0x62   :  { %1778 = vmatprep.mubr.msk.bf16.mxu0 %vm578_vm0, %v2203_v47  ;;  %1794 = vmatprep.mubr.msk.bf16.mxu1 %vm578_vm0, %v2205_v48 }
  0x69   :  { %779 = vmatmul.mubr.bf16.gmra.mxu0 %v2207_v49  ;;  %907 = vmatmul.mubr.bf16.gmra.mxu1 %v2208_v50 }
  0x6a   :  { %1779 = vmatprep.mubr.msk.bf16.mxu0 %vm578_vm0, %v2209_v51  ;;  %1795 = vmatprep.mubr.msk.bf16.mxu1 %vm578_vm0, %v2211_v52 }
  0x71   :  { %787 = vmatmul.mubr.bf16.gmra.mxu0 %v2213_v53  ;;  %915 = vmatmul.mubr.bf16.gmra.mxu1 %v2214_v54 }
  0x72   :  { %1780 = vmatprep.mubr.msk.bf16.mxu0 %vm578_vm0, %v2215_v55  ;;  %1796 = vmatprep.mubr.msk.bf16.mxu1 %vm578_vm0, %v2217_v56 }
  0x79   :  { %795 = vmatmul.mubr.bf16.gmra.mxu0 %v2219_v57  ;;  %923 = vmatmul.mubr.bf16.gmra.mxu1 %v2220_v58 }
  0x7a   :  { %1781 = vmatprep.mubr.msk.bf16.mxu0 %vm578_vm0, %v2221_v59  ;;  %1797 = vmatprep.mubr.msk.bf16.mxu1 %vm578_vm0, %v2223_v60 }
  0x81   :  { %803 = vmatmul.mubr.bf16.gmra.mxu0 %v2225_v61  ;;  %931 = vmatmul.mubr.bf16.gmra.mxu1 %v2226_v62 }
  0x82   :  { %1782 = vmatprep.mubr.msk.bf16.mxu0 %vm578_vm0, %v2227_v63  ;;  %1798 = vmatprep.mubr.msk.bf16.mxu1 %vm578_vm0, %v2229_v0 }
  0x89   :  { %811 = vmatmul.mubr.bf16.gmra.mxu0 %v2231_v1  ;;  %939 = vmatmul.mubr.bf16.gmra.mxu1 %v2232_v2 }
  0x8a   :  { %1783 = vmatprep.mubr.msk.bf16.mxu0 %vm578_vm0, %v2233_v3  ;;  %1799 = vmatprep.mubr.msk.bf16.mxu1 %vm578_vm0, %v2235_v4 }
  0x91   :  { %819 = vmatmul.mubr.bf16.gmra.mxu0 %v2237_v5  ;;  %947 = vmatmul.mubr.bf16.gmra.mxu1 %v2238_v6 }
  0x92   :  { %1784 = vmatprep.mubr.msk.bf16.mxu0 %vm578_vm0, %v2239_v7  ;;  %1800 = vmatprep.mubr.msk.bf16.mxu1 %vm578_vm0, %v2241_v8 }
  0x99   :  { %827 = vmatmul.mubr.bf16.gmra.mxu0 %v2243_v9  ;;  %955 = vmatmul.mubr.bf16.gmra.mxu1 %v2244_v10 }
  0x9a   :  { %1785 = vmatprep.mubr.msk.bf16.mxu0 %vm578_vm0, %v2245_v11  ;;  %1801 = vmatprep.mubr.msk.bf16.mxu1 %vm578_vm0, %v2247_v12 }
  0xa1   :  { %835 = vmatmul.mubr.bf16.gmra.mxu0 %v2249_v13  ;;  %963 = vmatmul.mubr.bf16.gmra.mxu1 %v2250_v14 }
  0xe9   :  { %v716_v16 = vpop.f32.mrf.mxu0  ;;  %v844_v17 = vpop.f32.mrf.mxu1 }
  0xea   :  { %v1173_v18 = vmul.f32 %v2535_v15, %v716_v16  ;;  %v1205_v20 = vmul.f32 %v2535_v15, %v844_v17 }
  0xeb   :  { %v718_v21 = vpop.f32.mrf.mxu0  ;;  %v846_v22 = vpop.f32.mrf.mxu1 }
  0xec   :  { %v1244_v23 = vadd.f32 %v2541_v19, %v1173_v18  ;;  %v1276_v24 = vadd.f32 %v2541_v19, %v1205_v20 }
  0xed   :  { %v719_v25 = vpop.f32.mrf.mxu0  ;;  %v847_v26 = vpop.f32.mrf.mxu1 }
  0xee   :  { %v1174_v27 = vmul.f32 %v2535_v15, %v719_v25  ;;  %v1206_v28 = vmul.f32 %v2535_v15, %v847_v26  ;;  %v1308_v33 = vmax.f32 %v1244_v23, 0.0  ;;  %v1340_v34 = vmax.f32 %v1276_v24, 0.0 }
  0xef   :  { %v721_v29 = vpop.f32.mrf.mxu0  ;;  %v849_v30 = vpop.f32.mrf.mxu1 }
  0xf0   :  { %v1245_v31 = vadd.f32 %v2541_v19, %v1174_v27  ;;  %v1277_v32 = vadd.f32 %v2541_v19, %v1206_v28 }
  0xf1   :  { %v724_v35 = vpop.f32.mrf.mxu0  ;;  %v852_v36 = vpop.f32.mrf.mxu1 }
  0xf2   :  { %v1309_v37 = vmax.f32 %v1245_v31, 0.0  ;;  %v1341_v38 = vmax.f32 %v1277_v32, 0.0  ;;  %v1175_v39 = vmul.f32 %v2535_v15, %v724_v35  ;;  %v1207_v40 = vmul.f32 %v2535_v15, %v852_v36 }
  0xf3   :  { %v726_v41 = vpop.f32.mrf.mxu0  ;;  %v854_v42 = vpop.f32.mrf.mxu1 }
  0xf4   :  { %v1935_v43 = vpack.c.bf16 %v1309_v37, %v1308_v33  ;;  %v2015_v44 = vpack.c.bf16 %v1341_v38, %v1340_v34  ;;  %v1246_v45 = vadd.f32 %v2541_v19, %v1175_v39  ;;  %v1278_v46 = vadd.f32 %v2541_v19, %v1207_v40 }
  0xf5   :  { %v727_v47 = vpop.f32.mrf.mxu0  ;;  %v855_v48 = vpop.f32.mrf.mxu1 }
  0xf6   :  { %1936 = vst [vmem:[%s2770_s4] sm:$0xff] %v1935_v43   ;;  %2107 = vst [vmem:[%s2770_s4 + $0x80] sm:$0xff] %v2015_v44   ;;  %v1176_v49 = vmul.f32 %v2535_v15, %v727_v47  ;;  %v1208_v50 = vmul.f32 %v2535_v15, %v855_v48  ;;  %v1310_v55 = vmax.f32 %v1246_v45, 0.0  ;;  %v1342_v56 = vmax.f32 %v1278_v46, 0.0 }
  0xf7   :  { %v729_v51 = vpop.f32.mrf.mxu0  ;;  %v857_v52 = vpop.f32.mrf.mxu1 }
  0xf8   :  { %v1247_v53 = vadd.f32 %v2541_v19, %v1176_v49  ;;  %v1279_v54 = vadd.f32 %v2541_v19, %v1208_v50 }
  0xf9   :  { %v732_v57 = vpop.f32.mrf.mxu0  ;;  %v860_v58 = vpop.f32.mrf.mxu1 }
  0xfa   :  { %v1311_v59 = vmax.f32 %v1247_v53, 0.0  ;;  %v1343_v60 = vmax.f32 %v1279_v54, 0.0  ;;  %v1177_v61 = vmul.f32 %v2535_v15, %v732_v57  ;;  %v1209_v62 = vmul.f32 %v2535_v15, %v860_v58 }
  0xfb   :  { %v734_v63 = vpop.f32.mrf.mxu0  ;;  %v862_v0 = vpop.f32.mrf.mxu1 }
  0xfc   :  { %v1940_v1 = vpack.c.bf16 %v1311_v59, %v1310_v55  ;;  %v2020_v2 = vpack.c.bf16 %v1343_v60, %v1342_v56  ;;  %v1248_v3 = vadd.f32 %v2541_v19, %v1177_v61  ;;  %v1280_v4 = vadd.f32 %v2541_v19, %v1209_v62 }
  0xfd   :  { %v735_v5 = vpop.f32.mrf.mxu0  ;;  %v863_v6 = vpop.f32.mrf.mxu1 }
  0xfe   :  { %2092 = vst [vmem:[%s2770_s4 + $0x8] sm:$0xff] %v1940_v1   ;;  %2108 = vst [vmem:[%s2770_s4 + $0x88] sm:$0xff] %v2020_v2   ;;  %v1178_v7 = vmul.f32 %v2535_v15, %v735_v5  ;;  %v1210_v8 = vmul.f32 %v2535_v15, %v863_v6  ;;  %v1312_v13 = vmax.f32 %v1248_v3, 0.0  ;;  %v1344_v14 = vmax.f32 %v1280_v4, 0.0 }
  0xff   :  { %v737_v9 = vpop.f32.mrf.mxu0  ;;  %v865_v10 = vpop.f32.mrf.mxu1 }
 0x100   :  { %v1249_v11 = vadd.f32 %v2541_v19, %v1178_v7  ;;  %v1281_v12 = vadd.f32 %v2541_v19, %v1210_v8 }
 0x101   :  { %v740_v16 = vpop.f32.mrf.mxu0  ;;  %v868_v17 = vpop.f32.mrf.mxu1 }
 0x102   :  { %v1313_v18 = vmax.f32 %v1249_v11, 0.0  ;;  %v1345_v20 = vmax.f32 %v1281_v12, 0.0  ;;  %v1179_v21 = vmul.f32 %v2535_v15, %v740_v16  ;;  %v1211_v22 = vmul.f32 %v2535_v15, %v868_v17 }
 0x103   :  { %v742_v23 = vpop.f32.mrf.mxu0  ;;  %v870_v24 = vpop.f32.mrf.mxu1 }
 0x104   :  { %v1945_v25 = vpack.c.bf16 %v1313_v18, %v1312_v13  ;;  %v2025_v26 = vpack.c.bf16 %v1345_v20, %v1344_v14  ;;  %v1250_v27 = vadd.f32 %v2541_v19, %v1179_v21  ;;  %v1282_v28 = vadd.f32 %v2541_v19, %v1211_v22 }
 0x105   :  { %v743_v29 = vpop.f32.mrf.mxu0  ;;  %v871_v30 = vpop.f32.mrf.mxu1 }
 0x106   :  { %2093 = vst [vmem:[%s2770_s4 + $0x10] sm:$0xff] %v1945_v25   ;;  %2109 = vst [vmem:[%s2770_s4 + $0x90] sm:$0xff] %v2025_v26   ;;  %v1180_v31 = vmul.f32 %v2535_v15, %v743_v29  ;;  %v1212_v32 = vmul.f32 %v2535_v15, %v871_v30  ;;  %v1314_v37 = vmax.f32 %v1250_v27, 0.0  ;;  %v1346_v38 = vmax.f32 %v1282_v28, 0.0 }
 0x107   :  { %v745_v33 = vpop.f32.mrf.mxu0  ;;  %v873_v34 = vpop.f32.mrf.mxu1 }
 0x108   :  { %v1251_v35 = vadd.f32 %v2541_v19, %v1180_v31  ;;  %v1283_v36 = vadd.f32 %v2541_v19, %v1212_v32 }
 0x109   :  { %v748_v39 = vpop.f32.mrf.mxu0  ;;  %v876_v40 = vpop.f32.mrf.mxu1 }
 0x10a   :  { %v1315_v41 = vmax.f32 %v1251_v35, 0.0  ;;  %v1347_v42 = vmax.f32 %v1283_v36, 0.0  ;;  %v1181_v43 = vmul.f32 %v2535_v15, %v748_v39  ;;  %v1213_v44 = vmul.f32 %v2535_v15, %v876_v40 }
 0x10b   :  { %v750_v45 = vpop.f32.mrf.mxu0  ;;  %v878_v46 = vpop.f32.mrf.mxu1 }
 0x10c   :  { %v1950_v47 = vpack.c.bf16 %v1315_v41, %v1314_v37  ;;  %v2030_v48 = vpack.c.bf16 %v1347_v42, %v1346_v38  ;;  %v1252_v49 = vadd.f32 %v2541_v19, %v1181_v43  ;;  %v1284_v50 = vadd.f32 %v2541_v19, %v1213_v44 }
 0x10d   :  { %v751_v51 = vpop.f32.mrf.mxu0  ;;  %v879_v52 = vpop.f32.mrf.mxu1 }
 0x10e   :  { %2094 = vst [vmem:[%s2770_s4 + $0x18] sm:$0xff] %v1950_v47   ;;  %2110 = vst [vmem:[%s2770_s4 + $0x98] sm:$0xff] %v2030_v48   ;;  %v1182_v53 = vmul.f32 %v2535_v15, %v751_v51  ;;  %v1214_v54 = vmul.f32 %v2535_v15, %v879_v52  ;;  %v1316_v59 = vmax.f32 %v1252_v49, 0.0  ;;  %v1348_v60 = vmax.f32 %v1284_v50, 0.0 }
 0x10f   :  { %v753_v55 = vpop.f32.mrf.mxu0  ;;  %v881_v56 = vpop.f32.mrf.mxu1 }
 0x110   :  { %v1253_v57 = vadd.f32 %v2541_v19, %v1182_v53  ;;  %v1285_v58 = vadd.f32 %v2541_v19, %v1214_v54 }
 0x111   :  { %v756_v61 = vpop.f32.mrf.mxu0  ;;  %v884_v62 = vpop.f32.mrf.mxu1 }
 0x112   :  { %v1317_v63 = vmax.f32 %v1253_v57, 0.0  ;;  %v1349_v0 = vmax.f32 %v1285_v58, 0.0  ;;  %v1183_v1 = vmul.f32 %v2535_v15, %v756_v61  ;;  %v1215_v2 = vmul.f32 %v2535_v15, %v884_v62 }
 0x113   :  { %v758_v3 = vpop.f32.mrf.mxu0  ;;  %v886_v4 = vpop.f32.mrf.mxu1 }
 0x114   :  { %v1955_v5 = vpack.c.bf16 %v1317_v63, %v1316_v59  ;;  %v2035_v6 = vpack.c.bf16 %v1349_v0, %v1348_v60  ;;  %v1254_v7 = vadd.f32 %v2541_v19, %v1183_v1  ;;  %v1286_v8 = vadd.f32 %v2541_v19, %v1215_v2 }
 0x115   :  { %v759_v9 = vpop.f32.mrf.mxu0  ;;  %v887_v10 = vpop.f32.mrf.mxu1 }
 0x116   :  { %2095 = vst [vmem:[%s2770_s4 + $0x20] sm:$0xff] %v1955_v5   ;;  %2111 = vst [vmem:[%s2770_s4 + $0xa0] sm:$0xff] %v2035_v6   ;;  %v1184_v11 = vmul.f32 %v2535_v15, %v759_v9  ;;  %v1216_v12 = vmul.f32 %v2535_v15, %v887_v10  ;;  %v1318_v18 = vmax.f32 %v1254_v7, 0.0  ;;  %v1350_v20 = vmax.f32 %v1286_v8, 0.0 }
 0x117   :  { %v761_v13 = vpop.f32.mrf.mxu0  ;;  %v889_v14 = vpop.f32.mrf.mxu1 }
 0x118   :  { %v1255_v16 = vadd.f32 %v2541_v19, %v1184_v11  ;;  %v1287_v17 = vadd.f32 %v2541_v19, %v1216_v12 }
 0x119   :  { %v764_v21 = vpop.f32.mrf.mxu0  ;;  %v892_v22 = vpop.f32.mrf.mxu1 }
 0x11a   :  { %v1319_v23 = vmax.f32 %v1255_v16, 0.0  ;;  %v1351_v24 = vmax.f32 %v1287_v17, 0.0  ;;  %v1185_v25 = vmul.f32 %v2535_v15, %v764_v21  ;;  %v1217_v26 = vmul.f32 %v2535_v15, %v892_v22 }
 0x11b   :  { %v766_v27 = vpop.f32.mrf.mxu0  ;;  %v894_v28 = vpop.f32.mrf.mxu1 }
 0x11c   :  { %v1960_v29 = vpack.c.bf16 %v1319_v23, %v1318_v18  ;;  %v2040_v30 = vpack.c.bf16 %v1351_v24, %v1350_v20  ;;  %v1256_v31 = vadd.f32 %v2541_v19, %v1185_v25  ;;  %v1288_v32 = vadd.f32 %v2541_v19, %v1217_v26 }
 0x11d   :  { %v767_v33 = vpop.f32.mrf.mxu0  ;;  %v895_v34 = vpop.f32.mrf.mxu1 }
 0x11e   :  { %2096 = vst [vmem:[%s2770_s4 + $0x28] sm:$0xff] %v1960_v29   ;;  %2112 = vst [vmem:[%s2770_s4 + $0xa8] sm:$0xff] %v2040_v30   ;;  %v1186_v35 = vmul.f32 %v2535_v15, %v767_v33  ;;  %v1218_v36 = vmul.f32 %v2535_v15, %v895_v34  ;;  %v1320_v41 = vmax.f32 %v1256_v31, 0.0  ;;  %v1352_v42 = vmax.f32 %v1288_v32, 0.0 }
 0x11f   :  { %v769_v37 = vpop.f32.mrf.mxu0  ;;  %v897_v38 = vpop.f32.mrf.mxu1 }
 0x120   :  { %v1257_v39 = vadd.f32 %v2541_v19, %v1186_v35  ;;  %v1289_v40 = vadd.f32 %v2541_v19, %v1218_v36 }
 0x121   :  { %v772_v43 = vpop.f32.mrf.mxu0  ;;  %v900_v44 = vpop.f32.mrf.mxu1 }
 0x122   :  { %v1321_v45 = vmax.f32 %v1257_v39, 0.0  ;;  %v1353_v46 = vmax.f32 %v1289_v40, 0.0  ;;  %v1187_v47 = vmul.f32 %v2535_v15, %v772_v43  ;;  %v1219_v48 = vmul.f32 %v2535_v15, %v900_v44 }
 0x123   :  { %v774_v49 = vpop.f32.mrf.mxu0  ;;  %v902_v50 = vpop.f32.mrf.mxu1 }
 0x124   :  { %v1965_v51 = vpack.c.bf16 %v1321_v45, %v1320_v41  ;;  %v2045_v52 = vpack.c.bf16 %v1353_v46, %v1352_v42  ;;  %v1258_v53 = vadd.f32 %v2541_v19, %v1187_v47  ;;  %v1290_v54 = vadd.f32 %v2541_v19, %v1219_v48 }
 0x125   :  { %v775_v55 = vpop.f32.mrf.mxu0  ;;  %v903_v56 = vpop.f32.mrf.mxu1 }
 0x126   :  { %2097 = vst [vmem:[%s2770_s4 + $0x30] sm:$0xff] %v1965_v51   ;;  %2113 = vst [vmem:[%s2770_s4 + $0xb0] sm:$0xff] %v2045_v52   ;;  %v1188_v57 = vmul.f32 %v2535_v15, %v775_v55  ;;  %v1220_v58 = vmul.f32 %v2535_v15, %v903_v56  ;;  %v1322_v63 = vmax.f32 %v1258_v53, 0.0  ;;  %v1354_v0 = vmax.f32 %v1290_v54, 0.0 }
 0x127   :  { %v777_v59 = vpop.f32.mrf.mxu0  ;;  %v905_v60 = vpop.f32.mrf.mxu1 }
 0x128   :  { %v1259_v61 = vadd.f32 %v2541_v19, %v1188_v57  ;;  %v1291_v62 = vadd.f32 %v2541_v19, %v1220_v58 }
 0x129   :  { %v780_v1 = vpop.f32.mrf.mxu0  ;;  %v908_v2 = vpop.f32.mrf.mxu1 }
 0x12a   :  { %v1323_v3 = vmax.f32 %v1259_v61, 0.0  ;;  %v1355_v4 = vmax.f32 %v1291_v62, 0.0  ;;  %v1189_v5 = vmul.f32 %v2535_v15, %v780_v1  ;;  %v1221_v6 = vmul.f32 %v2535_v15, %v908_v2 }
 0x12b   :  { %v782_v7 = vpop.f32.mrf.mxu0  ;;  %v910_v8 = vpop.f32.mrf.mxu1 }
 0x12c   :  { %v1970_v9 = vpack.c.bf16 %v1323_v3, %v1322_v63  ;;  %v2050_v10 = vpack.c.bf16 %v1355_v4, %v1354_v0  ;;  %v1260_v11 = vadd.f32 %v2541_v19, %v1189_v5  ;;  %v1292_v12 = vadd.f32 %v2541_v19, %v1221_v6 }
 0x12d   :  { %v783_v13 = vpop.f32.mrf.mxu0  ;;  %v911_v14 = vpop.f32.mrf.mxu1 }
 0x12e   :  { %2098 = vst [vmem:[%s2770_s4 + $0x38] sm:$0xff] %v1970_v9   ;;  %2114 = vst [vmem:[%s2770_s4 + $0xb8] sm:$0xff] %v2050_v10   ;;  %v1190_v16 = vmul.f32 %v2535_v15, %v783_v13  ;;  %v1222_v17 = vmul.f32 %v2535_v15, %v911_v14  ;;  %v1324_v23 = vmax.f32 %v1260_v11, 0.0  ;;  %v1356_v24 = vmax.f32 %v1292_v12, 0.0 }
 0x12f   :  { %v785_v18 = vpop.f32.mrf.mxu0  ;;  %v913_v20 = vpop.f32.mrf.mxu1 }
 0x130   :  { %v1261_v21 = vadd.f32 %v2541_v19, %v1190_v16  ;;  %v1293_v22 = vadd.f32 %v2541_v19, %v1222_v17 }
 0x131   :  { %v788_v25 = vpop.f32.mrf.mxu0  ;;  %v916_v26 = vpop.f32.mrf.mxu1 }
 0x132   :  { %v1325_v27 = vmax.f32 %v1261_v21, 0.0  ;;  %v1357_v28 = vmax.f32 %v1293_v22, 0.0  ;;  %v1191_v29 = vmul.f32 %v2535_v15, %v788_v25  ;;  %v1223_v30 = vmul.f32 %v2535_v15, %v916_v26 }
 0x133   :  { %v790_v31 = vpop.f32.mrf.mxu0  ;;  %v918_v32 = vpop.f32.mrf.mxu1 }
 0x134   :  { %v1975_v33 = vpack.c.bf16 %v1325_v27, %v1324_v23  ;;  %v2055_v34 = vpack.c.bf16 %v1357_v28, %v1356_v24  ;;  %v1262_v35 = vadd.f32 %v2541_v19, %v1191_v29  ;;  %v1294_v36 = vadd.f32 %v2541_v19, %v1223_v30 }
 0x135   :  { %v791_v37 = vpop.f32.mrf.mxu0  ;;  %v919_v38 = vpop.f32.mrf.mxu1 }
 0x136   :  { %2099 = vst [vmem:[%s2770_s4 + $0x40] sm:$0xff] %v1975_v33   ;;  %2115 = vst [vmem:[%s2770_s4 + $0xc0] sm:$0xff] %v2055_v34   ;;  %v1192_v39 = vmul.f32 %v2535_v15, %v791_v37  ;;  %v1224_v40 = vmul.f32 %v2535_v15, %v919_v38  ;;  %v1326_v45 = vmax.f32 %v1262_v35, 0.0  ;;  %v1358_v46 = vmax.f32 %v1294_v36, 0.0 }
 0x137   :  { %v793_v41 = vpop.f32.mrf.mxu0  ;;  %v921_v42 = vpop.f32.mrf.mxu1 }
 0x138   :  { %v1263_v43 = vadd.f32 %v2541_v19, %v1192_v39  ;;  %v1295_v44 = vadd.f32 %v2541_v19, %v1224_v40 }
 0x139   :  { %v796_v47 = vpop.f32.mrf.mxu0  ;;  %v924_v48 = vpop.f32.mrf.mxu1 }
 0x13a   :  { %v1327_v49 = vmax.f32 %v1263_v43, 0.0  ;;  %v1359_v50 = vmax.f32 %v1295_v44, 0.0  ;;  %v1193_v51 = vmul.f32 %v2535_v15, %v796_v47  ;;  %v1225_v52 = vmul.f32 %v2535_v15, %v924_v48 }
 0x13b   :  { %v798_v53 = vpop.f32.mrf.mxu0  ;;  %v926_v54 = vpop.f32.mrf.mxu1 }
 0x13c   :  { %v1980_v55 = vpack.c.bf16 %v1327_v49, %v1326_v45  ;;  %v2060_v56 = vpack.c.bf16 %v1359_v50, %v1358_v46  ;;  %v1264_v57 = vadd.f32 %v2541_v19, %v1193_v51  ;;  %v1296_v58 = vadd.f32 %v2541_v19, %v1225_v52 }
 0x13d   :  { %v799_v59 = vpop.f32.mrf.mxu0  ;;  %v927_v60 = vpop.f32.mrf.mxu1 }
 0x13e   :  { %2100 = vst [vmem:[%s2770_s4 + $0x48] sm:$0xff] %v1980_v55   ;;  %2116 = vst [vmem:[%s2770_s4 + $0xc8] sm:$0xff] %v2060_v56   ;;  %v1194_v61 = vmul.f32 %v2535_v15, %v799_v59  ;;  %v1226_v62 = vmul.f32 %v2535_v15, %v927_v60  ;;  %v1328_v3 = vmax.f32 %v1264_v57, 0.0  ;;  %v1360_v4 = vmax.f32 %v1296_v58, 0.0 }
 0x13f   :  { %v801_v63 = vpop.f32.mrf.mxu0  ;;  %v929_v0 = vpop.f32.mrf.mxu1 }
 0x140   :  { %v1265_v1 = vadd.f32 %v2541_v19, %v1194_v61  ;;  %v1297_v2 = vadd.f32 %v2541_v19, %v1226_v62 }
 0x141   :  { %v804_v5 = vpop.f32.mrf.mxu0  ;;  %v932_v6 = vpop.f32.mrf.mxu1 }
 0x142   :  { %v1329_v7 = vmax.f32 %v1265_v1, 0.0  ;;  %v1361_v8 = vmax.f32 %v1297_v2, 0.0  ;;  %v1195_v9 = vmul.f32 %v2535_v15, %v804_v5  ;;  %v1227_v10 = vmul.f32 %v2535_v15, %v932_v6 }
 0x143   :  { %v806_v11 = vpop.f32.mrf.mxu0  ;;  %v934_v12 = vpop.f32.mrf.mxu1 }
 0x144   :  { %v1985_v13 = vpack.c.bf16 %v1329_v7, %v1328_v3  ;;  %v2065_v14 = vpack.c.bf16 %v1361_v8, %v1360_v4  ;;  %v1266_v16 = vadd.f32 %v2541_v19, %v1195_v9  ;;  %v1298_v17 = vadd.f32 %v2541_v19, %v1227_v10 }
 0x145   :  { %v807_v18 = vpop.f32.mrf.mxu0  ;;  %v935_v20 = vpop.f32.mrf.mxu1 }
 0x146   :  { %2101 = vst [vmem:[%s2770_s4 + $0x50] sm:$0xff] %v1985_v13   ;;  %2117 = vst [vmem:[%s2770_s4 + $0xd0] sm:$0xff] %v2065_v14   ;;  %v1196_v21 = vmul.f32 %v2535_v15, %v807_v18  ;;  %v1228_v22 = vmul.f32 %v2535_v15, %v935_v20  ;;  %v1330_v27 = vmax.f32 %v1266_v16, 0.0  ;;  %v1362_v28 = vmax.f32 %v1298_v17, 0.0 }
 0x147   :  { %v809_v23 = vpop.f32.mrf.mxu0  ;;  %v937_v24 = vpop.f32.mrf.mxu1 }
 0x148   :  { %v1267_v25 = vadd.f32 %v2541_v19, %v1196_v21  ;;  %v1299_v26 = vadd.f32 %v2541_v19, %v1228_v22 }
 0x149   :  { %v812_v29 = vpop.f32.mrf.mxu0  ;;  %v940_v30 = vpop.f32.mrf.mxu1 }
 0x14a   :  { %v1331_v31 = vmax.f32 %v1267_v25, 0.0  ;;  %v1363_v32 = vmax.f32 %v1299_v26, 0.0  ;;  %v1197_v33 = vmul.f32 %v2535_v15, %v812_v29  ;;  %v1229_v34 = vmul.f32 %v2535_v15, %v940_v30 }
 0x14b   :  { %v814_v35 = vpop.f32.mrf.mxu0  ;;  %v942_v36 = vpop.f32.mrf.mxu1 }
 0x14c   :  { %v1990_v37 = vpack.c.bf16 %v1331_v31, %v1330_v27  ;;  %v2070_v38 = vpack.c.bf16 %v1363_v32, %v1362_v28  ;;  %v1268_v39 = vadd.f32 %v2541_v19, %v1197_v33  ;;  %v1300_v40 = vadd.f32 %v2541_v19, %v1229_v34 }
 0x14d   :  { %v815_v41 = vpop.f32.mrf.mxu0  ;;  %v943_v42 = vpop.f32.mrf.mxu1 }
 0x14e   :  { %2102 = vst [vmem:[%s2770_s4 + $0x58] sm:$0xff] %v1990_v37   ;;  %2118 = vst [vmem:[%s2770_s4 + $0xd8] sm:$0xff] %v2070_v38   ;;  %v1198_v43 = vmul.f32 %v2535_v15, %v815_v41  ;;  %v1230_v44 = vmul.f32 %v2535_v15, %v943_v42  ;;  %v1332_v49 = vmax.f32 %v1268_v39, 0.0  ;;  %v1364_v50 = vmax.f32 %v1300_v40, 0.0 }
 0x14f   :  { %v817_v45 = vpop.f32.mrf.mxu0  ;;  %v945_v46 = vpop.f32.mrf.mxu1 }
 0x150   :  { %v1269_v47 = vadd.f32 %v2541_v19, %v1198_v43  ;;  %v1301_v48 = vadd.f32 %v2541_v19, %v1230_v44 }
 0x151   :  { %v820_v51 = vpop.f32.mrf.mxu0  ;;  %v948_v52 = vpop.f32.mrf.mxu1 }
 0x152   :  { %v1333_v53 = vmax.f32 %v1269_v47, 0.0  ;;  %v1365_v54 = vmax.f32 %v1301_v48, 0.0  ;;  %v1199_v55 = vmul.f32 %v2535_v15, %v820_v51  ;;  %v1231_v56 = vmul.f32 %v2535_v15, %v948_v52 }
 0x153   :  { %v822_v57 = vpop.f32.mrf.mxu0  ;;  %v950_v58 = vpop.f32.mrf.mxu1 }
 0x154   :  { %v1995_v59 = vpack.c.bf16 %v1333_v53, %v1332_v49  ;;  %v2075_v60 = vpack.c.bf16 %v1365_v54, %v1364_v50  ;;  %v1270_v61 = vadd.f32 %v2541_v19, %v1199_v55  ;;  %v1302_v62 = vadd.f32 %v2541_v19, %v1231_v56 }
 0x155   :  { %v823_v63 = vpop.f32.mrf.mxu0  ;;  %v951_v0 = vpop.f32.mrf.mxu1 }
 0x156   :  { %2103 = vst [vmem:[%s2770_s4 + $0x60] sm:$0xff] %v1995_v59   ;;  %2119 = vst [vmem:[%s2770_s4 + $0xe0] sm:$0xff] %v2075_v60   ;;  %v1200_v1 = vmul.f32 %v2535_v15, %v823_v63  ;;  %v1232_v2 = vmul.f32 %v2535_v15, %v951_v0  ;;  %v1334_v7 = vmax.f32 %v1270_v61, 0.0  ;;  %v1366_v8 = vmax.f32 %v1302_v62, 0.0 }
 0x157   :  { %v825_v3 = vpop.f32.mrf.mxu0  ;;  %v953_v4 = vpop.f32.mrf.mxu1 }
 0x158   :  { %v1271_v5 = vadd.f32 %v2541_v19, %v1200_v1  ;;  %v1303_v6 = vadd.f32 %v2541_v19, %v1232_v2 }
 0x159   :  { %v828_v9 = vpop.f32.mrf.mxu0  ;;  %v956_v10 = vpop.f32.mrf.mxu1 }
 0x15a   :  { %v1335_v11 = vmax.f32 %v1271_v5, 0.0  ;;  %v1367_v12 = vmax.f32 %v1303_v6, 0.0  ;;  %v1201_v13 = vmul.f32 %v2535_v15, %v828_v9  ;;  %v1233_v14 = vmul.f32 %v2535_v15, %v956_v10 }
 0x15b   :  { %v830_v16 = vpop.f32.mrf.mxu0  ;;  %v958_v17 = vpop.f32.mrf.mxu1 }
 0x15c   :  { %v2000_v18 = vpack.c.bf16 %v1335_v11, %v1334_v7  ;;  %v2080_v20 = vpack.c.bf16 %v1367_v12, %v1366_v8  ;;  %v1272_v21 = vadd.f32 %v2541_v19, %v1201_v13  ;;  %v1304_v22 = vadd.f32 %v2541_v19, %v1233_v14 }
 0x15d   :  { %v831_v23 = vpop.f32.mrf.mxu0  ;;  %v959_v24 = vpop.f32.mrf.mxu1 }
 0x15e   :  { %2104 = vst [vmem:[%s2770_s4 + $0x68] sm:$0xff] %v2000_v18   ;;  %2120 = vst [vmem:[%s2770_s4 + $0xe8] sm:$0xff] %v2080_v20   ;;  %v1202_v25 = vmul.f32 %v2535_v15, %v831_v23  ;;  %v1234_v26 = vmul.f32 %v2535_v15, %v959_v24  ;;  %v1336_v31 = vmax.f32 %v1272_v21, 0.0  ;;  %v1368_v32 = vmax.f32 %v1304_v22, 0.0 }
 0x15f   :  { %v833_v27 = vpop.f32.mrf.mxu0  ;;  %v961_v28 = vpop.f32.mrf.mxu1 }
 0x160   :  { %v1273_v29 = vadd.f32 %v2541_v19, %v1202_v25  ;;  %v1305_v30 = vadd.f32 %v2541_v19, %v1234_v26 }
 0x161   :  { %v836_v33 = vpop.f32.mrf.mxu0  ;;  %v964_v34 = vpop.f32.mrf.mxu1 }
 0x162   :  { %v1337_v35 = vmax.f32 %v1273_v29, 0.0  ;;  %v1369_v36 = vmax.f32 %v1305_v30, 0.0  ;;  %v1203_v37 = vmul.f32 %v2535_v15, %v836_v33  ;;  %v1235_v38 = vmul.f32 %v2535_v15, %v964_v34 }
 0x163   :  { %v838_v39 = vpop.f32.mrf.mxu0  ;;  %v966_v40 = vpop.f32.mrf.mxu1 }
 0x164   :  { %v2005_v41 = vpack.c.bf16 %v1337_v35, %v1336_v31  ;;  %v2085_v42 = vpack.c.bf16 %v1369_v36, %v1368_v32  ;;  %v1274_v45 = vadd.f32 %v2541_v19, %v1203_v37  ;;  %v1306_v46 = vadd.f32 %v2541_v19, %v1235_v38 }
 0x165   :  { %v839_v43 = vpop.f32.mrf.mxu0  ;;  %v967_v44 = vpop.f32.mrf.mxu1 }
 0x166   :  { %2105 = vst [vmem:[%s2770_s4 + $0x70] sm:$0xff] %v2005_v41   ;;  %2121 = vst [vmem:[%s2770_s4 + $0xf0] sm:$0xff] %v2085_v42   ;;  %v1204_v47 = vmul.f32 %v2535_v15, %v839_v43  ;;  %v1236_v48 = vmul.f32 %v2535_v15, %v967_v44  ;;  %v1338_v53 = vmax.f32 %v1274_v45, 0.0  ;;  %v1370_v54 = vmax.f32 %v1306_v46, 0.0 }
 0x167   :  { %v841_v49 = vpop.f32.mrf.mxu0  ;;  %v969_v50 = vpop.f32.mrf.mxu1 }
 0x168   :  { %v1275_v51 = vadd.f32 %v2541_v19, %v1204_v47  ;;  %v1307_v52 = vadd.f32 %v2541_v19, %v1236_v48 }
 0x16a   :  { %v1339_v55 = vmax.f32 %v1275_v51, 0.0  ;;  %v1371_v56 = vmax.f32 %v1307_v52, 0.0 }
 0x16c   :  { %v2010_v57 = vpack.c.bf16 %v1339_v55, %v1338_v53  ;;  %v2090_v58 = vpack.c.bf16 %v1371_v56, %v1370_v54 }
 0x16e   :  { %2106 = vst [vmem:[%s2770_s4 + $0x78] sm:$0xff] %v2010_v57   ;;  %2122 = vst [vmem:[%s2770_s4 + $0xf8] sm:$0xff] %v2090_v58  }

// kernel: resnet_forward.16
= control target key start
LH: loop header
LB: loop body
LE: loop exit
PB: predicated region body
PF: predicated region fallthrough
CT: control target
= control target key end

     0   :  { %vm590_vm0 = vcmask 523264   ;;  %s1880_s1 = inlined_call_operand.vmem [shape: bf16[576,128], index: 1, kind: input, shape index: {}]   ;;  %s1881_s0 = inlined_call_operand.vmem [shape: bf16[128,576], index: 0, kind: input, shape index: {}]   ;;  %s1882_s2 = inlined_call_operand.vmem [shape: f32[1,128], index: 2, kind: input, shape index: {}]   ;;  %s1883_s3 = inlined_call_operand.vmem [shape: f32[1,128], index: 3, kind: input, shape index: {}]   ;;  %s1884_s4 = inlined_call_operand.vmem [shape: bf16[128,128], index: 4, kind: output, shape index: {}]  }
   0x1   :  { %v1440_v0 = vld [vmem:[%s1880_s1 + $0x78] sm:$0xff]   ;;  %v1444_v4 = vld [vmem:[%s1880_s1 + $0x70] sm:$0xff]   ;;  %v1448_v8 = vld [vmem:[%s1880_s1 + $0x68] sm:$0xff]  }
   0x2   :  { %v1441_v1 = vld [vmem:[%s1880_s1 + $0xf8] sm:$0xff]   ;;  %1268 = vmatprep.subr.bf16.mxu0 %v1440_v0  ;;  %v1445_v5 = vld [vmem:[%s1880_s1 + $0xf0] sm:$0xff]   ;;  %v1449_v9 = vld [vmem:[%s1880_s1 + $0xe8] sm:$0xff]  }
   0x3   :  { %v1442_v2 = vld [vmem:[%s1880_s1 + $0x38] sm:$0xff]   ;;  %1332 = vmatprep.subr.bf16.mxu1 %v1441_v1  ;;  %v1446_v6 = vld [vmem:[%s1880_s1 + $0x30] sm:$0xff]   ;;  %v1450_v10 = vld [vmem:[%s1880_s1 + $0x28] sm:$0xff]  }
   0x4   :  { %v1443_v3 = vld [vmem:[%s1880_s1 + $0xb8] sm:$0xff]   ;;  %1269 = vmatpush3.bf16.msra.mxu0 %v1442_v2  ;;  %v1447_v7 = vld [vmem:[%s1880_s1 + $0xb0] sm:$0xff]   ;;  %v1451_v11 = vld [vmem:[%s1880_s1 + $0xa8] sm:$0xff]  }
   0x5   :  { %1333 = vmatpush3.bf16.msra.mxu1 %v1443_v3  ;;  %1270 = vmatprep.subr.bf16.mxu0 %v1444_v4  ;;  %v1452_v12 = vld [vmem:[%s1880_s1 + $0x60] sm:$0xff]   ;;  %v1456_v16 = vld [vmem:[%s1880_s1 + $0x58] sm:$0xff]   ;;  %v1460_v20 = vld [vmem:[%s1880_s1 + $0x50] sm:$0xff]  }
   0x6   :  { %1334 = vmatprep.subr.bf16.mxu1 %v1445_v5  ;;  %v1453_v13 = vld [vmem:[%s1880_s1 + $0xe0] sm:$0xff]   ;;  %v1457_v17 = vld [vmem:[%s1880_s1 + $0xd8] sm:$0xff]   ;;  %v1461_v21 = vld [vmem:[%s1880_s1 + $0xd0] sm:$0xff]  }
   0x7   :  { %v1454_v14 = vld [vmem:[%s1880_s1 + $0x20] sm:$0xff]   ;;  %v1458_v18 = vld [vmem:[%s1880_s1 + $0x18] sm:$0xff]   ;;  %v1462_v22 = vld [vmem:[%s1880_s1 + $0x10] sm:$0xff]  }
   0x8   :  { %1271 = vmatpush3.bf16.msra.mxu0 %v1446_v6  ;;  %v1455_v15 = vld [vmem:[%s1880_s1 + $0xa0] sm:$0xff]   ;;  %v1459_v19 = vld [vmem:[%s1880_s1 + $0x98] sm:$0xff]   ;;  %v1463_v23 = vld [vmem:[%s1880_s1 + $0x90] sm:$0xff]  }
   0x9   :  { %1335 = vmatpush3.bf16.msra.mxu1 %v1447_v7  ;;  %1272 = vmatprep.subr.bf16.mxu0 %v1448_v8  ;;  %v1464_v24 = vld [vmem:[%s1880_s1 + $0x48] sm:$0xff]   ;;  %v1468_v28 = vld [vmem:[%s1880_s1 + $0x40] sm:$0xff]   ;;  %v1478_v36 = vld [vmem:[%s1880_s1 + $0x118] sm:$0xff]  }
   0xa   :  { %1336 = vmatprep.subr.bf16.mxu1 %v1449_v9  ;;  %v1465_v25 = vld [vmem:[%s1880_s1 + $0xc8] sm:$0xff]   ;;  %v1469_v29 = vld [vmem:[%s1880_s1 + $0xc0] sm:$0xff]   ;;  %v1491_v42 = vld [vmem:[%s1880_s1 + $0x110] sm:$0xff]  }
   0xb   :  { %v1466_v26 = vld [vmem:[%s1880_s1 + $0x8] sm:$0xff]   ;;  %v1470_v30 = vld [vmem:[%s1880_s1] sm:$0xff]   ;;  %v1487_v43 = vld [vmem:[%s1881_s0 + $0x5c] ss:$20 sps:$4 sm:$0xff]  }
   0xc   :  { %1273 = vmatpush3.bf16.msra.mxu0 %v1450_v10  ;;  %v1467_v27 = vld [vmem:[%s1880_s1 + $0x88] sm:$0xff]   ;;  %v1471_v31 = vld [vmem:[%s1880_s1 + $0x80] sm:$0xff]   ;;  %v1492_v47 = vld [vmem:[%s1881_s0 + $0x7c] ss:$20 sps:$4 sm:$0xff]  }
   0xd   :  { %1337 = vmatpush3.bf16.msra.mxu1 %v1451_v11  ;;  %1274 = vmatprep.subr.bf16.mxu0 %v1452_v12  ;;  %v1472_v32 = vld [vmem:[%s1881_s0] ss:$20 sps:$4 sm:$0xff]   ;;  %v1474_v33 = vld [vmem:[%s1881_s0 + $0x4] ss:$20 sps:$4 sm:$0xff]   ;;  %v1475_v34 = vld [vmem:[%s1881_s0 + $0x8] ss:$20 sps:$4 sm:$0xff]  }
   0xe   :  { %1338 = vmatprep.subr.bf16.mxu1 %v1453_v13  ;;  %v1477_v35 = vld [vmem:[%s1881_s0 + $0xc] ss:$20 sps:$4 sm:$0xff]   ;;  %647 = vmatprep.mubr.bf16.mxu0 %v1474_v33  ;;  %v1481_v38 = vld [vmem:[%s1881_s0 + $0x34] ss:$20 sps:$4 sm:$0xff]   ;;  %v1484_v40 = vld [vmem:[%s1881_s0 + $0x30] ss:$20 sps:$4 sm:$0xff]  }
   0xf   :  { %744 = vmatprep.mubr.bf16.mxu1 %v1477_v35  ;;  %v1479_v37 = vld [vmem:[%s1881_s0 + $0x2c] ss:$20 sps:$4 sm:$0xff]   ;;  %v1483_v39 = vld [vmem:[%s1881_s0 + $0x28] ss:$20 sps:$4 sm:$0xff]   ;;  %v1489_v44 = vld [vmem:[%s1881_s0 + $0x50] ss:$20 sps:$4 sm:$0xff]  }
  0x10   :  { %1275 = vmatpush3.bf16.msra.mxu0 %v1454_v14  ;;  %v1485_v41 = vld [vmem:[%s1881_s0 + $0x54] ss:$20 sps:$4 sm:$0xff]   ;;  %v1490_v45 = vld [vmem:[%s1881_s0 + $0x58] ss:$20 sps:$4 sm:$0xff]   ;;  %v1517_v49 = vld [vmem:[%s1880_s1 + $0x100] sm:$0xff]  }
  0x11   :  { %1339 = vmatpush3.bf16.msra.mxu1 %v1455_v15  ;;  %1276 = vmatprep.subr.bf16.mxu0 %v1456_v16  ;;  %v1504_v46 = vld [vmem:[%s1880_s1 + $0x108] sm:$0xff]   ;;  %v1494_v48 = vld [vmem:[%s1881_s0 + $0x84] ss:$20 sps:$4 sm:$0xff]   ;;  %v1497_v51 = vld [vmem:[%s1881_s0 + $0x80] ss:$20 sps:$4 sm:$0xff]  }
  0x12   :  { %1340 = vmatprep.subr.bf16.mxu1 %v1457_v17  ;;  %v1496_v50 = vld [vmem:[%s1881_s0 + $0x78] ss:$20 sps:$4 sm:$0xff]   ;;  %v1502_v54 = vld [vmem:[%s1881_s0 + $0xa0] ss:$20 sps:$4 sm:$0xff]   ;;  %v1503_v55 = vld [vmem:[%s1881_s0 + $0xa8] ss:$20 sps:$4 sm:$0xff]  }
  0x13   :  { %v1498_v52 = vld [vmem:[%s1881_s0 + $0xa4] ss:$20 sps:$4 sm:$0xff]   ;;  %v1500_v53 = vld [vmem:[%s1881_s0 + $0xac] ss:$20 sps:$4 sm:$0xff]   ;;  %v1507_v57 = vld [vmem:[%s1881_s0 + $0xd4] ss:$20 sps:$4 sm:$0xff]  }
  0x14   :  { %1277 = vmatpush3.bf16.msra.mxu0 %v1458_v18  ;;  %v1505_v56 = vld [vmem:[%s1881_s0 + $0xcc] ss:$20 sps:$4 sm:$0xff]   ;;  %v1509_v58 = vld [vmem:[%s1881_s0 + $0xc8] ss:$20 sps:$4 sm:$0xff]   ;;  %v1510_v59 = vld [vmem:[%s1881_s0 + $0xd0] ss:$20 sps:$4 sm:$0xff]  }
  0x15   :  { %1341 = vmatpush3.bf16.msra.mxu1 %v1459_v19  ;;  %1278 = vmatprep.subr.bf16.mxu0 %v1460_v20  ;;  %v1511_v60 = vld [vmem:[%s1881_s0 + $0xf4] ss:$20 sps:$4 sm:$0xff]   ;;  %v1513_v61 = vld [vmem:[%s1881_s0 + $0xfc] ss:$20 sps:$4 sm:$0xff]   ;;  %v1516_v63 = vld [vmem:[%s1881_s0 + $0xf8] ss:$20 sps:$4 sm:$0xff]  }
  0x16   :  { %1342 = vmatprep.subr.bf16.mxu1 %v1461_v21  ;;  %v1515_v62 = vld [vmem:[%s1881_s0 + $0xf0] ss:$20 sps:$4 sm:$0xff]   ;;  %v1522_v2 = vld [vmem:[%s1881_s0 + $0x118] ss:$20 sps:$4 sm:$0xff]   ;;  %v1523_v3 = vld [vmem:[%s1881_s0 + $0x120] ss:$20 sps:$4 sm:$0xff]  }
  0x17   :  { %v1518_v0 = vld [vmem:[%s1881_s0 + $0x11c] ss:$20 sps:$4 sm:$0xff]   ;;  %v1520_v1 = vld [vmem:[%s1881_s0 + $0x124] ss:$20 sps:$4 sm:$0xff]   ;;  %v1528_v8 = vld [vmem:[%s1881_s0 + $0x60] ss:$20 sps:$4 sm:$0xff]  }
  0x18   :  { %1279 = vmatpush3.bf16.msra.mxu0 %v1462_v22  ;;  %v1524_v4 = vld [vmem:[%s1881_s0 + $0x10] ss:$20 sps:$4 sm:$0xff]   ;;  %v1526_v6 = vld [vmem:[%s1881_s0 + $0x38] ss:$20 sps:$4 sm:$0xff]   ;;  %v1529_v9 = vld [vmem:[%s1881_s0 + $0x100] ss:$20 sps:$4 sm:$0xff]  }
  0x19   :  { %1343 = vmatpush3.bf16.msra.mxu1 %v1463_v23  ;;  %1280 = vmatprep.subr.bf16.mxu0 %v1464_v24  ;;  %v1525_v5 = vld [vmem:[%s1881_s0 + $0xb0] ss:$20 sps:$4 sm:$0xff]   ;;  %v1527_v7 = vld [vmem:[%s1881_s0 + $0xd8] ss:$20 sps:$4 sm:$0xff]   ;;  %v1530_v10 = vld [vmem:[%s1881_s0 + $0x88] ss:$20 sps:$4 sm:$0xff]  }
  0x1a   :  { %1344 = vmatprep.subr.bf16.mxu1 %v1465_v25  ;;  %v1531_v11 = vld [vmem:[%s1881_s0 + $0x128] ss:$20 sps:$4 sm:$0xff]  }
  0x1c   :  { %1281 = vmatpush3.bf16.msra.mxu0 %v1466_v26 }
  0x1d   :  { %1345 = vmatpush3.bf16.msra.mxu1 %v1467_v27  ;;  %1282 = vmatprep.subr.bf16.mxu0 %v1468_v28 }
  0x1e   :  { %1346 = vmatprep.subr.bf16.mxu1 %v1469_v29 }
  0x20   :  { %1283 = vmatpush3.bf16.msra.mxu0 %v1470_v30 }
  0x21   :  { %1347 = vmatpush3.bf16.msra.mxu1 %v1471_v31  ;;  %1408 = vmatprep.subr.bf16.mxu0 %v1478_v36 }
  0x22   :  { %1432 = vmatprep.subr.bf16.mxu1 %v1478_v36 }
  0x23   :  { %648 = vmatmul.mubr.bf16.vlgmr.msra.gmra.mxu0 %v1472_v32 }
  0x24   :  { %745 = vmatmul.mubr.bf16.vlgmr.msra.gmra.mxu1 %v1475_v34  ;;  %1409 = vmatpush3.bf16.msra.mxu0 %v1478_v36 }
  0x25   :  { %1436 = vmatpush3.bf16.msra.mxu1 %v1478_v36  ;;  %655 = vmatprep.mubr.bf16.mxu0 %v1479_v37 }
  0x26   :  { %752 = vmatprep.mubr.bf16.mxu1 %v1481_v38  ;;  %1410 = vmatprep.subr.bf16.mxu0 %v1491_v42 }
  0x27   :  { %1433 = vmatprep.subr.bf16.mxu1 %v1491_v42 }
  0x28   :  { %1411 = vmatpush3.bf16.msra.mxu0 %v1491_v42 }
  0x29   :  { %1437 = vmatpush3.bf16.msra.mxu1 %v1491_v42  ;;  %1412 = vmatprep.subr.bf16.mxu0 %v1504_v46 }
  0x2a   :  { %1434 = vmatprep.subr.bf16.mxu1 %v1504_v46 }
  0x2b   :  { %656 = vmatmul.mubr.bf16.gmra.mxu0 %v1483_v39 }
  0x2c   :  { %753 = vmatmul.mubr.bf16.gmra.mxu1 %v1484_v40  ;;  %663 = vmatprep.mubr.bf16.mxu0 %v1485_v41 }
  0x2d   :  { %760 = vmatprep.mubr.bf16.mxu1 %v1487_v43  ;;  %1413 = vmatpush3.bf16.msra.mxu0 %v1504_v46 }
  0x2e   :  { %1438 = vmatpush3.bf16.msra.mxu1 %v1504_v46  ;;  %1414 = vmatprep.subr.bf16.mxu0 %v1517_v49 }
  0x2f   :  { %1435 = vmatprep.subr.bf16.mxu1 %v1517_v49 }
  0x31   :  { %1415 = vmatpush3.bf16.msra.mxu0 %v1517_v49 }
  0x32   :  { %1439 = vmatpush3.bf16.msra.mxu1 %v1517_v49 }
  0x33   :  { %664 = vmatmul.mubr.bf16.gmra.mxu0 %v1489_v44 }
  0x34   :  { %761 = vmatmul.mubr.bf16.gmra.mxu1 %v1490_v45  ;;  %671 = vmatprep.mubr.bf16.mxu0 %v1492_v47 }
  0x35   :  { %768 = vmatprep.mubr.bf16.mxu1 %v1494_v48 }
  0x3b   :  { %672 = vmatmul.mubr.bf16.gmra.mxu0 %v1496_v50 }
  0x3c   :  { %769 = vmatmul.mubr.bf16.gmra.mxu1 %v1497_v51  ;;  %679 = vmatprep.mubr.bf16.mxu0 %v1498_v52 }
  0x3d   :  { %776 = vmatprep.mubr.bf16.mxu1 %v1500_v53 }
  0x43   :  { %680 = vmatmul.mubr.bf16.gmra.mxu0 %v1502_v54 }
  0x44   :  { %777 = vmatmul.mubr.bf16.gmra.mxu1 %v1503_v55  ;;  %687 = vmatprep.mubr.bf16.mxu0 %v1505_v56 }
  0x45   :  { %784 = vmatprep.mubr.bf16.mxu1 %v1507_v57 }
  0x4b   :  { %688 = vmatmul.mubr.bf16.gmra.mxu0 %v1509_v58 }
  0x4c   :  { %785 = vmatmul.mubr.bf16.gmra.mxu1 %v1510_v59  ;;  %695 = vmatprep.mubr.bf16.mxu0 %v1511_v60 }
  0x4d   :  { %792 = vmatprep.mubr.bf16.mxu1 %v1513_v61 }
  0x53   :  { %696 = vmatmul.mubr.bf16.gmra.mxu0 %v1515_v62 }
  0x54   :  { %793 = vmatmul.mubr.bf16.gmra.mxu1 %v1516_v63  ;;  %703 = vmatprep.mubr.bf16.mxu0 %v1518_v0 }
  0x55   :  { %800 = vmatprep.mubr.bf16.mxu1 %v1520_v1 }
  0x5b   :  { %704 = vmatmul.mubr.bf16.gmra.mxu0 %v1522_v2 }
  0x5c   :  { %801 = vmatmul.mubr.bf16.gmra.mxu1 %v1523_v3  ;;  %1416 = vmatprep.mubr.msk.bf16.mxu0 %vm590_vm0, %v1524_v4 }
  0x5d   :  { %1424 = vmatprep.mubr.msk.bf16.mxu1 %vm590_vm0, %v1525_v5 }
  0x63   :  { %1417 = vmatmul.mubr.msk.bf16.vlgmr.msra.gmra.mxu0 %vm590_vm0, %v1526_v6 }
  0x64   :  { %1425 = vmatmul.mubr.msk.bf16.vlgmr.msra.gmra.mxu1 %vm590_vm0, %v1527_v7  ;;  %1420 = vmatprep.mubr.msk.bf16.mxu0 %vm590_vm0, %v1528_v8 }
  0x65   :  { %1428 = vmatprep.mubr.msk.bf16.mxu1 %vm590_vm0, %v1529_v9 }
  0x6b   :  { %1421 = vmatmul.mubr.msk.bf16.gmra.mxu0 %vm590_vm0, %v1530_v10 }
  0x6c   :  { %1429 = vmatmul.mubr.msk.bf16.gmra.mxu1 %vm590_vm0, %v1531_v11 }
  0xe3   :  { %v1284_v12 = vpop.f32.mrf.mxu0 }
  0xe4   :  { %v1348_v13 = vpop.f32.mrf.mxu1 }
  0xe5   :  { %v1285_v14 = vpop.f32.mrf.mxu0 }
  0xe6   :  { %v1286_v15 = vadd.f32 %v1285_v14, %v1284_v12  ;;  %v1349_v16 = vpop.f32.mrf.mxu1 }
  0xe7   :  { %v1350_v17 = vadd.f32 %v1349_v16, %v1348_v13  ;;  %v1287_v18 = vpop.f32.mrf.mxu0 }
  0xe8   :  { %v1351_v19 = vpop.f32.mrf.mxu1 }
  0xe9   :  { %v1288_v20 = vpop.f32.mrf.mxu0  ;;  %v1793_v21 = vadd.f32 %v1350_v17, %v1286_v15 }
  0xea   :  { %v1352_v22 = vpop.f32.mrf.mxu1  ;;  %v1289_v8 = vadd.f32 %v1288_v20, %v1287_v18 }
  0xeb   :  { %1885 = vst [vmem:[#allocation3_spill] sm:$0xff] %v1793_v21  ;;  %v1290_v23 = vpop.f32.mrf.mxu0  ;;  %v1353_v9 = vadd.f32 %v1352_v22, %v1351_v19 }
  0xec   :  { %v1354_v24 = vpop.f32.mrf.mxu1 }
  0xed   :  { %v1291_v25 = vpop.f32.mrf.mxu0 }
  0xee   :  { %v1355_v26 = vpop.f32.mrf.mxu1  ;;  %v1292_v11 = vadd.f32 %v1291_v25, %v1290_v23 }
  0xef   :  { %v1293_v27 = vpop.f32.mrf.mxu0  ;;  %v1356_v12 = vadd.f32 %v1355_v26, %v1354_v24 }
  0xf0   :  { %v1357_v28 = vpop.f32.mrf.mxu1 }
  0xf1   :  { %v1294_v29 = vpop.f32.mrf.mxu0 }
  0xf2   :  { %v1358_v30 = vpop.f32.mrf.mxu1  ;;  %v1295_v13 = vadd.f32 %v1294_v29, %v1293_v27 }
  0xf3   :  { %v1296_v31 = vpop.f32.mrf.mxu0  ;;  %v1359_v14 = vadd.f32 %v1358_v30, %v1357_v28 }
  0xf4   :  { %v1360_v32 = vpop.f32.mrf.mxu1 }
  0xf5   :  { %v1297_v33 = vpop.f32.mrf.mxu0 }
  0xf6   :  { %v1361_v34 = vpop.f32.mrf.mxu1  ;;  %v1298_v16 = vadd.f32 %v1297_v33, %v1296_v31 }
  0xf7   :  { %v1299_v35 = vpop.f32.mrf.mxu0  ;;  %v1362_v17 = vadd.f32 %v1361_v34, %v1360_v32  ;;  %v755_v32 = vadd.f32 %v1356_v12, %v1292_v11  ;;  %v758_v34 = vadd.f32 %v1359_v14, %v1295_v13 }
  0xf8   :  { %v1363_v36 = vpop.f32.mrf.mxu1 }
  0xf9   :  { %v1300_v37 = vpop.f32.mrf.mxu0 }
  0xfa   :  { %v1364_v38 = vpop.f32.mrf.mxu1  ;;  %v1301_v21 = vadd.f32 %v1300_v37, %v1299_v35  ;;  %v750_v35 = vadd.f32 %v1353_v9, %v1289_v8  ;;  %v1806_v37 = vld [vmem:[%s1882_s2] ss:$0 sm:$0xff] }
  0xfb   :  { %v1302_v39 = vpop.f32.mrf.mxu0 }
  0xfc   :  { %v1366_v40 = vpop.f32.mrf.mxu1 }
  0xfd   :  { %v1303_v41 = vpop.f32.mrf.mxu0 }
  0xfe   :  { %v1367_v42 = vpop.f32.mrf.mxu1 }
  0xff   :  { %v1305_v43 = vpop.f32.mrf.mxu0 }
 0x100   :  { %v1369_v44 = vpop.f32.mrf.mxu1 }
 0x101   :  { %v1306_v45 = vpop.f32.mrf.mxu0 }
 0x102   :  { %v1370_v46 = vpop.f32.mrf.mxu1  ;;  %v1307_v22 = vadd.f32 %v1306_v45, %v1305_v43 }
 0x103   :  { %v1308_v47 = vpop.f32.mrf.mxu0  ;;  %v1371_v23 = vadd.f32 %v1370_v46, %v1369_v44 }
 0x104   :  { %v1372_v48 = vpop.f32.mrf.mxu1 }
 0x105   :  { %v1309_v49 = vpop.f32.mrf.mxu0  ;;  %v1810_v46 = vadd.f32 %v1371_v23, %v1307_v22 }
 0x106   :  { %v1373_v50 = vpop.f32.mrf.mxu1  ;;  %v1310_v25 = vadd.f32 %v1309_v49, %v1308_v47 }
 0x107   :  { %v1311_v51 = vpop.f32.mrf.mxu0  ;;  %v1374_v24 = vadd.f32 %v1373_v50, %v1372_v48 }
 0x108   :  { %v1375_v52 = vpop.f32.mrf.mxu1 }
 0x109   :  { %v1312_v53 = vpop.f32.mrf.mxu0  ;;  %v779_v49 = vadd.f32 %v1374_v24, %v1310_v25 }
 0x10a   :  { %v1376_v54 = vpop.f32.mrf.mxu1  ;;  %v1313_v27 = vadd.f32 %v1312_v53, %v1311_v51 }
 0x10b   :  { %v1314_v55 = vpop.f32.mrf.mxu0  ;;  %v1377_v29 = vadd.f32 %v1376_v54, %v1375_v52 }
 0x10c   :  { %v1378_v56 = vpop.f32.mrf.mxu1 }
 0x10d   :  { %v1315_v57 = vpop.f32.mrf.mxu0  ;;  %v782_v51 = vadd.f32 %v1377_v29, %v1313_v27 }
 0x10e   :  { %v1379_v58 = vpop.f32.mrf.mxu1  ;;  %v1316_v18 = vadd.f32 %v1315_v57, %v1314_v55  ;;  %v1890_v55 = vld [vmem:[#allocation3_spill] sm:$0xff] }
 0x10f   :  { %v1317_v59 = vpop.f32.mrf.mxu0  ;;  %v1380_v20 = vadd.f32 %v1379_v58, %v1378_v56 }
 0x110   :  { %v1381_v60 = vpop.f32.mrf.mxu1 }
 0x111   :  { %v1318_v61 = vpop.f32.mrf.mxu0 }
 0x112   :  { %v1382_v62 = vpop.f32.mrf.mxu1  ;;  %v1319_v28 = vadd.f32 %v1318_v61, %v1317_v59 }
 0x113   :  { %v1320_v63 = vpop.f32.mrf.mxu0  ;;  %v1383_v30 = vadd.f32 %v1382_v62, %v1381_v60 }
 0x114   :  { %v1384_v0 = vpop.f32.mrf.mxu1 }
 0x115   :  { %v1321_v1 = vpop.f32.mrf.mxu0  ;;  %v790_v50 = vadd.f32 %v1383_v30, %v1319_v28 }
 0x116   :  { %v1385_v2 = vpop.f32.mrf.mxu1 }
 0x117   :  { %v1795_v3 = vpop.f32.mrf.mxu0  ;;  %v1386_v43 = vadd.f32 %v1385_v2, %v1384_v0 }
 0x118   :  { %1886 = vst [vmem:[#allocation4_spill] sm:$0xff] %v1795_v3  ;;  %v1797_v4 = vpop.f32.mrf.mxu1  ;;  %v1365_v3 = vadd.f32 %v1364_v38, %v1363_v36  ;;  %v787_v38 = vadd.f32 %v1380_v20, %v1316_v18 }
 0x119   :  { %1887 = vst [vmem:[#allocation5_spill] sm:$0xff] %v1797_v4  ;;  %v1799_v5 = vpop.f32.mrf.mxu0 }
 0x11a   :  { %1888 = vst [vmem:[#allocation6_spill] sm:$0xff] %v1799_v5  ;;  %v1801_v6 = vpop.f32.mrf.mxu1  ;;  %v1304_v5 = vadd.f32 %v1303_v41, %v1302_v39  ;;  %v1808_v41 = vadd.f32 %v1365_v3, %v1301_v21  ;;  %v1816_v21 = vld [vmem:[%s1883_s3] ss:$0 sm:$0xff] }
 0x11b   :  { %1889 = vst [vmem:[#allocation7_spill] sm:$0xff] %v1801_v6  ;;  %v1326_v7 = vpop.f32.mrf.mxu0  ;;  %v1368_v6 = vadd.f32 %v1367_v42, %v1366_v40  ;;  %v763_v40 = vadd.f32 %v1362_v17, %v1298_v16  ;;  %v1322_v42 = vadd.f32 %v1321_v1, %v1320_v63 }
 0x11c   :  { %v1390_v10 = vpop.f32.mrf.mxu1 }
 0x11d   :  { %v1327_v15 = vpop.f32.mrf.mxu0  ;;  %v771_v39 = vadd.f32 %v1368_v6, %v1304_v5  ;;  %v795_v5 = vadd.f32 %v1386_v43, %v1322_v42 }
 0x11e   :  { %v1391_v4 = vpop.f32.mrf.mxu1  ;;  %v1328_v52 = vadd.f32 %v1327_v15, %v1326_v7 }
 0x11f   :  { %v1329_v19 = vpop.f32.mrf.mxu0  ;;  %v1392_v53 = vadd.f32 %v1391_v4, %v1390_v10  ;;  %v1891_v63 = vld [vmem:[#allocation4_spill] sm:$0xff] }
 0x120   :  { %v1393_v26 = vpop.f32.mrf.mxu1  ;;  %v1893_v6 = vld [vmem:[#allocation5_spill] sm:$0xff] }
 0x121   :  { %v1330_v31 = vpop.f32.mrf.mxu0  ;;  %v1892_v0 = vld [vmem:[#allocation6_spill] sm:$0xff]  ;;  %v803_v17 = vadd.f32 %v1392_v53, %v1328_v52 }
 0x122   :  { %v1394_v33 = vpop.f32.mrf.mxu1  ;;  %v1331_v58 = vadd.f32 %v1330_v31, %v1329_v19  ;;  %v1325_v1 = vadd.f32 %v1892_v0, %v1891_v63  ;;  %v1894_v7 = vld [vmem:[#allocation7_spill] sm:$0xff] }
 0x123   :  { %v1418_v36 = vpop.f32.mrf.mxu0  ;;  %v1395_v59 = vadd.f32 %v1394_v33, %v1393_v26  ;;  %v1389_v8 = vadd.f32 %v1894_v7, %v1893_v6 }
 0x124   :  { %v852_v44 = vadd.f32 %v1418_v36, %v755_v32  ;;  %v1426_v45 = vpop.f32.mrf.mxu1 }
 0x125   :  { %v884_v47 = vadd.f32 %v1426_v45, %v787_v38  ;;  %v843_v48 = vpop.f32.mrf.mxu0  ;;  %v806_v23 = vadd.f32 %v1395_v59, %v1331_v58 }
 0x126   :  { %v966_v54 = vmul.f32 %v1806_v37, %v852_v44  ;;  %v844_v56 = vadd.f32 %v843_v48, %v1890_v55  ;;  %v875_v57 = vpop.f32.mrf.mxu1 }
 0x127   :  { %v974_v60 = vmul.f32 %v1806_v37, %v884_v47  ;;  %v876_v61 = vadd.f32 %v875_v57, %v779_v49  ;;  %v1419_v62 = vpop.f32.mrf.mxu0 }
 0x128   :  { %v964_v2 = vmul.f32 %v1806_v37, %v844_v56  ;;  %v855_v3 = vadd.f32 %v1419_v62, %v758_v34  ;;  %v1427_v4 = vpop.f32.mrf.mxu1  ;;  %v989_v9 = vadd.f32 %v1816_v21, %v966_v54 }
 0x129   :  { %v972_v10 = vmul.f32 %v1806_v37, %v876_v61  ;;  %v887_v11 = vadd.f32 %v1427_v4, %v790_v50  ;;  %v846_v12 = vpop.f32.mrf.mxu0  ;;  %v997_v13 = vadd.f32 %v1816_v21, %v974_v60  ;;  %v798_v60 = vadd.f32 %v1389_v8, %v1325_v1 }
 0x12a   :  { %v967_v14 = vmul.f32 %v1806_v37, %v855_v3  ;;  %v847_v15 = vadd.f32 %v846_v12, %v750_v35  ;;  %v878_v16 = vpop.f32.mrf.mxu1  ;;  %v987_v18 = vadd.f32 %v1816_v21, %v964_v2  ;;  %v1005_v28 = vmax.f32 %v989_v9, 0.0 }
 0x12b   :  { %v975_v20 = vmul.f32 %v1806_v37, %v887_v11  ;;  %v879_v19 = vadd.f32 %v878_v16, %v782_v51  ;;  %v1422_v22 = vpop.f32.mrf.mxu0  ;;  %v995_v25 = vadd.f32 %v1816_v21, %v972_v10  ;;  %v1013_v34 = vmax.f32 %v997_v13, 0.0 }
 0x12c   :  { %v990_v24 = vadd.f32 %v1816_v21, %v967_v14  ;;  %v965_v26 = vmul.f32 %v1806_v37, %v847_v15  ;;  %v868_v27 = vadd.f32 %v1422_v22, %v771_v39  ;;  %v1430_v29 = vpop.f32.mrf.mxu1  ;;  %v1003_v43 = vmax.f32 %v987_v18, 0.0 }
 0x12d   :  { %v998_v30 = vadd.f32 %v1816_v21, %v975_v20  ;;  %v973_v31 = vmul.f32 %v1806_v37, %v879_v19  ;;  %v900_v33 = vadd.f32 %v1430_v29, %v803_v17  ;;  %v859_v32 = vpop.f32.mrf.mxu0  ;;  %v1011_v48 = vmax.f32 %v995_v25, 0.0 }
 0x12e   :  { %v1006_v35 = vmax.f32 %v990_v24, 0.0  ;;  %v988_v36 = vadd.f32 %v1816_v21, %v965_v26  ;;  %v860_v38 = vadd.f32 %v859_v32, %v763_v40  ;;  %v891_v42 = vpop.f32.mrf.mxu1  ;;  %v970_v51 = vmul.f32 %v1806_v37, %v868_v27 }
 0x12f   :  { %v1014_v44 = vmax.f32 %v998_v30, 0.0  ;;  %v996_v45 = vadd.f32 %v1816_v21, %v973_v31  ;;  %v892_v47 = vadd.f32 %v891_v42, %v795_v5  ;;  %v1423_v39 = vpop.f32.mrf.mxu0  ;;  %v978_v55 = vmul.f32 %v1806_v37, %v900_v33 }
 0x130   :  { %v1229_v49 = vpack.c.bf16 %v1006_v35, %v1005_v28  ;;  %v1004_v50 = vmax.f32 %v988_v36, 0.0  ;;  %v1431_v52 = vpop.f32.mrf.mxu1  ;;  %v968_v56 = vmul.f32 %v1806_v37, %v860_v38  ;;  %v871_v59 = vadd.f32 %v1423_v39, %v1810_v46 }
 0x131   :  { %v1249_v53 = vpack.c.bf16 %v1014_v44, %v1013_v34  ;;  %v1012_v54 = vmax.f32 %v996_v45, 0.0  ;;  %v862_v40 = vpop.f32.mrf.mxu0  ;;  %v976_v58 = vmul.f32 %v1806_v37, %v892_v47  ;;  %v903_v63 = vadd.f32 %v1431_v52, %v806_v23 }
 0x132   :  { %1261 = vst [vmem:[%s1884_s4 + $0x8] sm:$0xff] %v1229_v49   ;;  %v1224_v57 = vpack.c.bf16 %v1004_v50, %v1003_v43  ;;  %v894_v61 = vpop.f32.mrf.mxu1  ;;  %v993_v0 = vadd.f32 %v1816_v21, %v970_v51  ;;  %v971_v2 = vmul.f32 %v1806_v37, %v871_v59  ;;  %v863_v3 = vadd.f32 %v862_v40, %v1808_v41 }
 0x133   :  { %1265 = vst [vmem:[%s1884_s4 + $0x28] sm:$0xff] %v1249_v53   ;;  %v1244_v62 = vpack.c.bf16 %v1012_v54, %v1011_v48  ;;  %v895_v4 = vadd.f32 %v894_v61, %v798_v60  ;;  %v1001_v46 = vadd.f32 %v1816_v21, %v978_v55  ;;  %v991_v1 = vadd.f32 %v1816_v21, %v968_v56 }
 0x134   :  { %1225 = vst [vmem:[%s1884_s4] sm:$0xff] %v1224_v57   ;;  %v979_v5 = vmul.f32 %v1806_v37, %v903_v63  ;;  %v999_v6 = vadd.f32 %v1816_v21, %v976_v58  ;;  %v994_v7 = vadd.f32 %v1816_v21, %v971_v2  ;;  %v969_v8 = vmul.f32 %v1806_v37, %v863_v3 }
 0x135   :  { %1264 = vst [vmem:[%s1884_s4 + $0x20] sm:$0xff] %v1244_v62   ;;  %v977_v9 = vmul.f32 %v1806_v37, %v895_v4  ;;  %v1009_v10 = vmax.f32 %v993_v0, 0.0  ;;  %v1017_v14 = vmax.f32 %v1001_v46, 0.0  ;;  %v1007_v15 = vmax.f32 %v991_v1, 0.0 }
 0x136   :  { %v1002_v41 = vadd.f32 %v1816_v21, %v979_v5  ;;  %v1010_v11 = vmax.f32 %v994_v7, 0.0  ;;  %v992_v12 = vadd.f32 %v1816_v21, %v969_v8  ;;  %v1015_v17 = vmax.f32 %v999_v6, 0.0 }
 0x137   :  { %v1000_v13 = vadd.f32 %v1816_v21, %v977_v9 }
 0x138   :  { %v1018_v16 = vmax.f32 %v1002_v41, 0.0  ;;  %v1239_v18 = vpack.c.bf16 %v1010_v11, %v1009_v10  ;;  %v1008_v20 = vmax.f32 %v992_v12, 0.0 }
 0x139   :  { %v1016_v19 = vmax.f32 %v1000_v13, 0.0 }
 0x13a   :  { %v1259_v22 = vpack.c.bf16 %v1018_v16, %v1017_v14  ;;  %1263 = vst [vmem:[%s1884_s4 + $0x18] sm:$0xff] %v1239_v18   ;;  %v1234_v37 = vpack.c.bf16 %v1008_v20, %v1007_v15 }
 0x13b   :  { %v1254_v23 = vpack.c.bf16 %v1016_v19, %v1015_v17 }
 0x13c   :  { %1267 = vst [vmem:[%s1884_s4 + $0x38] sm:$0xff] %v1259_v22   ;;  %1262 = vst [vmem:[%s1884_s4 + $0x10] sm:$0xff] %v1234_v37  }
 0x13d   :  { %1266 = vst [vmem:[%s1884_s4 + $0x30] sm:$0xff] %v1254_v23  }

// kernel: resnet_forward.17
= control target key start
LH: loop header
LB: loop body
LE: loop exit
PB: predicated region body
PF: predicated region fallthrough
CT: control target
= control target key end

     0   :  { %vm593_vm0 = vcmask 523264   ;;  %s2133_s1 = inlined_call_operand.vmem [shape: bf16[576,128], index: 1, kind: input, shape index: {}]   ;;  %s2134_s0 = inlined_call_operand.vmem [shape: bf16[128,576], index: 0, kind: input, shape index: {}]   ;;  %s2135_s4 = inlined_call_operand.vmem [shape: bf16[128,128], index: 4, kind: input, shape index: {}]   ;;  %s2136_s2 = inlined_call_operand.vmem [shape: f32[1,128], index: 2, kind: input, shape index: {}]   ;;  %s2137_s3 = inlined_call_operand.vmem [shape: f32[1,128], index: 3, kind: input, shape index: {}]   ;;  %s2138_s5 = inlined_call_operand.vmem [shape: bf16[128,128], index: 5, kind: output, shape index: {}]  }
   0x1   :  { %v1530_v0 = vld [vmem:[%s2133_s1 + $0x78] sm:$0xff]   ;;  %v1534_v4 = vld [vmem:[%s2133_s1 + $0x70] sm:$0xff]   ;;  %v1538_v8 = vld [vmem:[%s2133_s1 + $0x68] sm:$0xff]  }
   0x2   :  { %v1531_v1 = vld [vmem:[%s2133_s1 + $0xf8] sm:$0xff]   ;;  %1358 = vmatprep.subr.bf16.mxu0 %v1530_v0  ;;  %v1535_v5 = vld [vmem:[%s2133_s1 + $0xf0] sm:$0xff]   ;;  %v1539_v9 = vld [vmem:[%s2133_s1 + $0xe8] sm:$0xff]  }
   0x3   :  { %v1532_v2 = vld [vmem:[%s2133_s1 + $0x38] sm:$0xff]   ;;  %1422 = vmatprep.subr.bf16.mxu1 %v1531_v1  ;;  %v1536_v6 = vld [vmem:[%s2133_s1 + $0x30] sm:$0xff]   ;;  %v1540_v10 = vld [vmem:[%s2133_s1 + $0x28] sm:$0xff]  }
   0x4   :  { %v1533_v3 = vld [vmem:[%s2133_s1 + $0xb8] sm:$0xff]   ;;  %1359 = vmatpush3.bf16.msra.mxu0 %v1532_v2  ;;  %v1537_v7 = vld [vmem:[%s2133_s1 + $0xb0] sm:$0xff]   ;;  %v1541_v11 = vld [vmem:[%s2133_s1 + $0xa8] sm:$0xff]  }
   0x5   :  { %1423 = vmatpush3.bf16.msra.mxu1 %v1533_v3  ;;  %1360 = vmatprep.subr.bf16.mxu0 %v1534_v4  ;;  %v1542_v12 = vld [vmem:[%s2133_s1 + $0x60] sm:$0xff]   ;;  %v1546_v16 = vld [vmem:[%s2133_s1 + $0x58] sm:$0xff]   ;;  %v1550_v20 = vld [vmem:[%s2133_s1 + $0x50] sm:$0xff]  }
   0x6   :  { %1424 = vmatprep.subr.bf16.mxu1 %v1535_v5  ;;  %v1543_v13 = vld [vmem:[%s2133_s1 + $0xe0] sm:$0xff]   ;;  %v1547_v17 = vld [vmem:[%s2133_s1 + $0xd8] sm:$0xff]   ;;  %v1551_v21 = vld [vmem:[%s2133_s1 + $0xd0] sm:$0xff]  }
   0x7   :  { %v1544_v14 = vld [vmem:[%s2133_s1 + $0x20] sm:$0xff]   ;;  %v1548_v18 = vld [vmem:[%s2133_s1 + $0x18] sm:$0xff]   ;;  %v1552_v22 = vld [vmem:[%s2133_s1 + $0x10] sm:$0xff]  }
   0x8   :  { %1361 = vmatpush3.bf16.msra.mxu0 %v1536_v6  ;;  %v1545_v15 = vld [vmem:[%s2133_s1 + $0xa0] sm:$0xff]   ;;  %v1549_v19 = vld [vmem:[%s2133_s1 + $0x98] sm:$0xff]   ;;  %v1553_v23 = vld [vmem:[%s2133_s1 + $0x90] sm:$0xff]  }
   0x9   :  { %1425 = vmatpush3.bf16.msra.mxu1 %v1537_v7  ;;  %1362 = vmatprep.subr.bf16.mxu0 %v1538_v8  ;;  %v1554_v24 = vld [vmem:[%s2133_s1 + $0x48] sm:$0xff]   ;;  %v1558_v28 = vld [vmem:[%s2133_s1 + $0x40] sm:$0xff]   ;;  %v1568_v36 = vld [vmem:[%s2133_s1 + $0x118] sm:$0xff]  }
   0xa   :  { %1426 = vmatprep.subr.bf16.mxu1 %v1539_v9  ;;  %v1555_v25 = vld [vmem:[%s2133_s1 + $0xc8] sm:$0xff]   ;;  %v1559_v29 = vld [vmem:[%s2133_s1 + $0xc0] sm:$0xff]   ;;  %v1581_v42 = vld [vmem:[%s2133_s1 + $0x110] sm:$0xff]  }
   0xb   :  { %v1556_v26 = vld [vmem:[%s2133_s1 + $0x8] sm:$0xff]   ;;  %v1560_v30 = vld [vmem:[%s2133_s1] sm:$0xff]   ;;  %v1577_v43 = vld [vmem:[%s2134_s0 + $0x5c] ss:$20 sps:$4 sm:$0xff]  }
   0xc   :  { %1363 = vmatpush3.bf16.msra.mxu0 %v1540_v10  ;;  %v1557_v27 = vld [vmem:[%s2133_s1 + $0x88] sm:$0xff]   ;;  %v1561_v31 = vld [vmem:[%s2133_s1 + $0x80] sm:$0xff]   ;;  %v1582_v47 = vld [vmem:[%s2134_s0 + $0x7c] ss:$20 sps:$4 sm:$0xff]  }
   0xd   :  { %1427 = vmatpush3.bf16.msra.mxu1 %v1541_v11  ;;  %1364 = vmatprep.subr.bf16.mxu0 %v1542_v12  ;;  %v1562_v32 = vld [vmem:[%s2134_s0] ss:$20 sps:$4 sm:$0xff]   ;;  %v1564_v33 = vld [vmem:[%s2134_s0 + $0x4] ss:$20 sps:$4 sm:$0xff]   ;;  %v1565_v34 = vld [vmem:[%s2134_s0 + $0x8] ss:$20 sps:$4 sm:$0xff]  }
   0xe   :  { %1428 = vmatprep.subr.bf16.mxu1 %v1543_v13  ;;  %v1567_v35 = vld [vmem:[%s2134_s0 + $0xc] ss:$20 sps:$4 sm:$0xff]   ;;  %650 = vmatprep.mubr.bf16.mxu0 %v1564_v33  ;;  %v1571_v38 = vld [vmem:[%s2134_s0 + $0x34] ss:$20 sps:$4 sm:$0xff]   ;;  %v1574_v40 = vld [vmem:[%s2134_s0 + $0x30] ss:$20 sps:$4 sm:$0xff]  }
   0xf   :  { %747 = vmatprep.mubr.bf16.mxu1 %v1567_v35  ;;  %v1569_v37 = vld [vmem:[%s2134_s0 + $0x2c] ss:$20 sps:$4 sm:$0xff]   ;;  %v1573_v39 = vld [vmem:[%s2134_s0 + $0x28] ss:$20 sps:$4 sm:$0xff]   ;;  %v1579_v44 = vld [vmem:[%s2134_s0 + $0x50] ss:$20 sps:$4 sm:$0xff]  }
  0x10   :  { %1365 = vmatpush3.bf16.msra.mxu0 %v1544_v14  ;;  %v1575_v41 = vld [vmem:[%s2134_s0 + $0x54] ss:$20 sps:$4 sm:$0xff]   ;;  %v1580_v45 = vld [vmem:[%s2134_s0 + $0x58] ss:$20 sps:$4 sm:$0xff]   ;;  %v1607_v49 = vld [vmem:[%s2133_s1 + $0x100] sm:$0xff]  }
  0x11   :  { %1429 = vmatpush3.bf16.msra.mxu1 %v1545_v15  ;;  %1366 = vmatprep.subr.bf16.mxu0 %v1546_v16  ;;  %v1594_v46 = vld [vmem:[%s2133_s1 + $0x108] sm:$0xff]   ;;  %v1584_v48 = vld [vmem:[%s2134_s0 + $0x84] ss:$20 sps:$4 sm:$0xff]   ;;  %v1587_v51 = vld [vmem:[%s2134_s0 + $0x80] ss:$20 sps:$4 sm:$0xff]  }
  0x12   :  { %1430 = vmatprep.subr.bf16.mxu1 %v1547_v17  ;;  %v1586_v50 = vld [vmem:[%s2134_s0 + $0x78] ss:$20 sps:$4 sm:$0xff]   ;;  %v1592_v54 = vld [vmem:[%s2134_s0 + $0xa0] ss:$20 sps:$4 sm:$0xff]   ;;  %v1593_v55 = vld [vmem:[%s2134_s0 + $0xa8] ss:$20 sps:$4 sm:$0xff]  }
  0x13   :  { %v1588_v52 = vld [vmem:[%s2134_s0 + $0xa4] ss:$20 sps:$4 sm:$0xff]   ;;  %v1590_v53 = vld [vmem:[%s2134_s0 + $0xac] ss:$20 sps:$4 sm:$0xff]   ;;  %v1597_v57 = vld [vmem:[%s2134_s0 + $0xd4] ss:$20 sps:$4 sm:$0xff]  }
  0x14   :  { %1367 = vmatpush3.bf16.msra.mxu0 %v1548_v18  ;;  %v1595_v56 = vld [vmem:[%s2134_s0 + $0xcc] ss:$20 sps:$4 sm:$0xff]   ;;  %v1599_v58 = vld [vmem:[%s2134_s0 + $0xc8] ss:$20 sps:$4 sm:$0xff]   ;;  %v1600_v59 = vld [vmem:[%s2134_s0 + $0xd0] ss:$20 sps:$4 sm:$0xff]  }
  0x15   :  { %1431 = vmatpush3.bf16.msra.mxu1 %v1549_v19  ;;  %1368 = vmatprep.subr.bf16.mxu0 %v1550_v20  ;;  %v1601_v60 = vld [vmem:[%s2134_s0 + $0xf4] ss:$20 sps:$4 sm:$0xff]   ;;  %v1603_v61 = vld [vmem:[%s2134_s0 + $0xfc] ss:$20 sps:$4 sm:$0xff]   ;;  %v1606_v63 = vld [vmem:[%s2134_s0 + $0xf8] ss:$20 sps:$4 sm:$0xff]  }
  0x16   :  { %1432 = vmatprep.subr.bf16.mxu1 %v1551_v21  ;;  %v1605_v62 = vld [vmem:[%s2134_s0 + $0xf0] ss:$20 sps:$4 sm:$0xff]   ;;  %v1612_v2 = vld [vmem:[%s2134_s0 + $0x118] ss:$20 sps:$4 sm:$0xff]   ;;  %v1613_v3 = vld [vmem:[%s2134_s0 + $0x120] ss:$20 sps:$4 sm:$0xff]  }
  0x17   :  { %v1608_v0 = vld [vmem:[%s2134_s0 + $0x11c] ss:$20 sps:$4 sm:$0xff]   ;;  %v1610_v1 = vld [vmem:[%s2134_s0 + $0x124] ss:$20 sps:$4 sm:$0xff]   ;;  %v1618_v8 = vld [vmem:[%s2134_s0 + $0x60] ss:$20 sps:$4 sm:$0xff]  }
  0x18   :  { %1369 = vmatpush3.bf16.msra.mxu0 %v1552_v22  ;;  %v1614_v4 = vld [vmem:[%s2134_s0 + $0x10] ss:$20 sps:$4 sm:$0xff]   ;;  %v1616_v6 = vld [vmem:[%s2134_s0 + $0x38] ss:$20 sps:$4 sm:$0xff]   ;;  %v1619_v9 = vld [vmem:[%s2134_s0 + $0x100] ss:$20 sps:$4 sm:$0xff]  }
  0x19   :  { %1433 = vmatpush3.bf16.msra.mxu1 %v1553_v23  ;;  %1370 = vmatprep.subr.bf16.mxu0 %v1554_v24  ;;  %v1615_v5 = vld [vmem:[%s2134_s0 + $0xb0] ss:$20 sps:$4 sm:$0xff]   ;;  %v1617_v7 = vld [vmem:[%s2134_s0 + $0xd8] ss:$20 sps:$4 sm:$0xff]   ;;  %v1620_v10 = vld [vmem:[%s2134_s0 + $0x88] ss:$20 sps:$4 sm:$0xff]  }
  0x1a   :  { %1434 = vmatprep.subr.bf16.mxu1 %v1555_v25  ;;  %v1621_v11 = vld [vmem:[%s2134_s0 + $0x128] ss:$20 sps:$4 sm:$0xff]  }
  0x1c   :  { %1371 = vmatpush3.bf16.msra.mxu0 %v1556_v26 }
  0x1d   :  { %1435 = vmatpush3.bf16.msra.mxu1 %v1557_v27  ;;  %1372 = vmatprep.subr.bf16.mxu0 %v1558_v28 }
  0x1e   :  { %1436 = vmatprep.subr.bf16.mxu1 %v1559_v29 }
  0x20   :  { %1373 = vmatpush3.bf16.msra.mxu0 %v1560_v30 }
  0x21   :  { %1437 = vmatpush3.bf16.msra.mxu1 %v1561_v31  ;;  %1498 = vmatprep.subr.bf16.mxu0 %v1568_v36 }
  0x22   :  { %1522 = vmatprep.subr.bf16.mxu1 %v1568_v36 }
  0x23   :  { %651 = vmatmul.mubr.bf16.vlgmr.msra.gmra.mxu0 %v1562_v32 }
  0x24   :  { %748 = vmatmul.mubr.bf16.vlgmr.msra.gmra.mxu1 %v1565_v34  ;;  %1499 = vmatpush3.bf16.msra.mxu0 %v1568_v36 }
  0x25   :  { %1526 = vmatpush3.bf16.msra.mxu1 %v1568_v36  ;;  %658 = vmatprep.mubr.bf16.mxu0 %v1569_v37 }
  0x26   :  { %755 = vmatprep.mubr.bf16.mxu1 %v1571_v38  ;;  %1500 = vmatprep.subr.bf16.mxu0 %v1581_v42 }
  0x27   :  { %1523 = vmatprep.subr.bf16.mxu1 %v1581_v42 }
  0x28   :  { %1501 = vmatpush3.bf16.msra.mxu0 %v1581_v42 }
  0x29   :  { %1527 = vmatpush3.bf16.msra.mxu1 %v1581_v42  ;;  %1502 = vmatprep.subr.bf16.mxu0 %v1594_v46 }
  0x2a   :  { %1524 = vmatprep.subr.bf16.mxu1 %v1594_v46 }
  0x2b   :  { %659 = vmatmul.mubr.bf16.gmra.mxu0 %v1573_v39 }
  0x2c   :  { %756 = vmatmul.mubr.bf16.gmra.mxu1 %v1574_v40  ;;  %666 = vmatprep.mubr.bf16.mxu0 %v1575_v41 }
  0x2d   :  { %763 = vmatprep.mubr.bf16.mxu1 %v1577_v43  ;;  %1503 = vmatpush3.bf16.msra.mxu0 %v1594_v46 }
  0x2e   :  { %1528 = vmatpush3.bf16.msra.mxu1 %v1594_v46  ;;  %1504 = vmatprep.subr.bf16.mxu0 %v1607_v49 }
  0x2f   :  { %1525 = vmatprep.subr.bf16.mxu1 %v1607_v49 }
  0x31   :  { %1505 = vmatpush3.bf16.msra.mxu0 %v1607_v49 }
  0x32   :  { %1529 = vmatpush3.bf16.msra.mxu1 %v1607_v49 }
  0x33   :  { %667 = vmatmul.mubr.bf16.gmra.mxu0 %v1579_v44 }
  0x34   :  { %764 = vmatmul.mubr.bf16.gmra.mxu1 %v1580_v45  ;;  %674 = vmatprep.mubr.bf16.mxu0 %v1582_v47 }
  0x35   :  { %771 = vmatprep.mubr.bf16.mxu1 %v1584_v48 }
  0x3b   :  { %675 = vmatmul.mubr.bf16.gmra.mxu0 %v1586_v50 }
  0x3c   :  { %772 = vmatmul.mubr.bf16.gmra.mxu1 %v1587_v51  ;;  %682 = vmatprep.mubr.bf16.mxu0 %v1588_v52 }
  0x3d   :  { %779 = vmatprep.mubr.bf16.mxu1 %v1590_v53 }
  0x43   :  { %683 = vmatmul.mubr.bf16.gmra.mxu0 %v1592_v54 }
  0x44   :  { %780 = vmatmul.mubr.bf16.gmra.mxu1 %v1593_v55  ;;  %690 = vmatprep.mubr.bf16.mxu0 %v1595_v56 }
  0x45   :  { %787 = vmatprep.mubr.bf16.mxu1 %v1597_v57 }
  0x4b   :  { %691 = vmatmul.mubr.bf16.gmra.mxu0 %v1599_v58 }
  0x4c   :  { %788 = vmatmul.mubr.bf16.gmra.mxu1 %v1600_v59  ;;  %698 = vmatprep.mubr.bf16.mxu0 %v1601_v60 }
  0x4d   :  { %795 = vmatprep.mubr.bf16.mxu1 %v1603_v61 }
  0x53   :  { %699 = vmatmul.mubr.bf16.gmra.mxu0 %v1605_v62 }
  0x54   :  { %796 = vmatmul.mubr.bf16.gmra.mxu1 %v1606_v63  ;;  %706 = vmatprep.mubr.bf16.mxu0 %v1608_v0 }
  0x55   :  { %803 = vmatprep.mubr.bf16.mxu1 %v1610_v1 }
  0x5b   :  { %707 = vmatmul.mubr.bf16.gmra.mxu0 %v1612_v2 }
  0x5c   :  { %804 = vmatmul.mubr.bf16.gmra.mxu1 %v1613_v3  ;;  %1506 = vmatprep.mubr.msk.bf16.mxu0 %vm593_vm0, %v1614_v4  ;;  %v1937_v3 = vld [vmem:[%s2135_s4 + $0x8] sm:$0xff]  }
  0x5d   :  { %1514 = vmatprep.mubr.msk.bf16.mxu1 %vm593_vm0, %v1615_v5  ;;  %v1944_v5 = vld [vmem:[%s2135_s4 + $0x28] sm:$0xff]  }
  0x63   :  { %1507 = vmatmul.mubr.msk.bf16.vlgmr.msra.gmra.mxu0 %vm593_vm0, %v1616_v6  ;;  %v1949_v6 = vld [vmem:[%s2135_s4] sm:$0xff]  }
  0x64   :  { %1515 = vmatmul.mubr.msk.bf16.vlgmr.msra.gmra.mxu1 %vm593_vm0, %v1617_v7  ;;  %1510 = vmatprep.mubr.msk.bf16.mxu0 %vm593_vm0, %v1618_v8  ;;  %v1954_v7 = vld [vmem:[%s2135_s4 + $0x20] sm:$0xff]  }
  0x65   :  { %1518 = vmatprep.mubr.msk.bf16.mxu1 %vm593_vm0, %v1619_v9  ;;  %v1961_v9 = vld [vmem:[%s2135_s4 + $0x18] sm:$0xff]  }
  0x6b   :  { %1511 = vmatmul.mubr.msk.bf16.gmra.mxu0 %vm593_vm0, %v1620_v10 }
  0x6c   :  { %1519 = vmatmul.mubr.msk.bf16.gmra.mxu1 %vm593_vm0, %v1621_v11 }
  0xe3   :  { %v1374_v12 = vpop.f32.mrf.mxu0 }
  0xe4   :  { %v1438_v13 = vpop.f32.mrf.mxu1 }
  0xe5   :  { %v1375_v14 = vpop.f32.mrf.mxu0 }
  0xe6   :  { %v1376_v15 = vadd.f32 %v1375_v14, %v1374_v12  ;;  %v1439_v16 = vpop.f32.mrf.mxu1  ;;  %v1969_v12 = vld [vmem:[%s2135_s4 + $0x38] sm:$0xff]  }
  0xe7   :  { %v1440_v17 = vadd.f32 %v1439_v16, %v1438_v13  ;;  %v1888_v18 = vpop.f32.mrf.mxu0  ;;  %v1974_v13 = vld [vmem:[%s2135_s4 + $0x10] sm:$0xff]  }
  0xe8   :  { %v1890_v19 = vpop.f32.mrf.mxu1  ;;  %2146 = vst [vmem:[#allocation8_spill] sm:$0xff] %v1974_v13 }
  0xe9   :  { %v1892_v20 = vpop.f32.mrf.mxu0  ;;  %v1894_v21 = vadd.f32 %v1440_v17, %v1376_v15 }
  0xea   :  { %v1896_v22 = vpop.f32.mrf.mxu1 }
  0xeb   :  { %2141 = vst [vmem:[#allocation3_spill] sm:$0xff] %v1894_v21  ;;  %v1898_v23 = vpop.f32.mrf.mxu0  ;;  %v1443_v15 = vadd.f32 %v1896_v22, %v1890_v19 }
  0xec   :  { %v1900_v24 = vpop.f32.mrf.mxu1 }
  0xed   :  { %v1902_v25 = vpop.f32.mrf.mxu0 }
  0xee   :  { %v1904_v26 = vpop.f32.mrf.mxu1  ;;  %v1382_v21 = vadd.f32 %v1902_v25, %v1898_v23 }
  0xef   :  { %v1906_v27 = vpop.f32.mrf.mxu0 }
  0xf0   :  { %v1908_v28 = vpop.f32.mrf.mxu1 }
  0xf1   :  { %v1910_v29 = vpop.f32.mrf.mxu0 }
  0xf2   :  { %v1912_v30 = vpop.f32.mrf.mxu1 }
  0xf3   :  { %v1914_v31 = vpop.f32.mrf.mxu0 }
  0xf4   :  { %v1916_v32 = vpop.f32.mrf.mxu1 }
  0xf5   :  { %v1918_v33 = vpop.f32.mrf.mxu0 }
  0xf6   :  { %v1920_v34 = vpop.f32.mrf.mxu1  ;;  %v1388_v19 = vadd.f32 %v1918_v33, %v1914_v31 }
  0xf7   :  { %v1922_v35 = vpop.f32.mrf.mxu0  ;;  %v1452_v22 = vadd.f32 %v1920_v34, %v1916_v32 }
  0xf8   :  { %v1924_v36 = vpop.f32.mrf.mxu1 }
  0xf9   :  { %v1926_v37 = vpop.f32.mrf.mxu0 }
  0xfa   :  { %v1928_v38 = vpop.f32.mrf.mxu1 }
  0xfb   :  { %2142 = vst [vmem:[#allocation4_spill] sm:$0xff] %v1928_v38  ;;  %v1392_v39 = vpop.f32.mrf.mxu0  ;;  %v1385_v38 = vadd.f32 %v1910_v29, %v1906_v27  ;;  %v2007_v27 = vld [vmem:[%s2135_s4 + $0x30] sm:$0xff]  }
  0xfc   :  { %v1456_v40 = vpop.f32.mrf.mxu1 }
  0xfd   :  { %v1393_v41 = vpop.f32.mrf.mxu0 }
  0xfe   :  { %v1457_v42 = vpop.f32.mrf.mxu1  ;;  %v1394_v11 = vadd.f32 %v1393_v41, %v1392_v39 }
  0xff   :  { %v1395_v43 = vpop.f32.mrf.mxu0  ;;  %v1458_v17 = vadd.f32 %v1457_v42, %v1456_v40 }
 0x100   :  { %v1459_v44 = vpop.f32.mrf.mxu1 }
 0x101   :  { %v1396_v45 = vpop.f32.mrf.mxu0 }
 0x102   :  { %v1460_v46 = vpop.f32.mrf.mxu1  ;;  %v1397_v23 = vadd.f32 %v1396_v45, %v1395_v43 }
 0x103   :  { %v1930_v47 = vpop.f32.mrf.mxu0  ;;  %v1461_v25 = vadd.f32 %v1460_v46, %v1459_v44  ;;  %v1298_v46 = vunpack.c.l.bf16 %v2007_v27 }
 0x104   :  { %v1932_v48 = vpop.f32.mrf.mxu1 }
 0x105   :  { %v1399_v49 = vpop.f32.mrf.mxu0 }
 0x106   :  { %v1463_v50 = vpop.f32.mrf.mxu1 }
 0x107   :  { %v1401_v51 = vpop.f32.mrf.mxu0  ;;  %v1464_v29 = vadd.f32 %v1463_v50, %v1932_v48  ;;  %v2023_v50 = vld [vmem:[%s2136_s2] ss:$0 sm:$0xff] }
 0x108   :  { %v1465_v52 = vpop.f32.mrf.mxu1 }
 0x109   :  { %v1402_v53 = vpop.f32.mrf.mxu0 }
 0x10a   :  { %v1466_v54 = vpop.f32.mrf.mxu1 }
 0x10b   :  { %v1404_v55 = vpop.f32.mrf.mxu0  ;;  %v1467_v31 = vadd.f32 %v1466_v54, %v1465_v52  ;;  %v774_v54 = vadd.f32 %v1458_v17, %v1394_v11 }
 0x10c   :  { %v1468_v56 = vpop.f32.mrf.mxu1 }
 0x10d   :  { %v1405_v57 = vpop.f32.mrf.mxu0 }
 0x10e   :  { %v1469_v58 = vpop.f32.mrf.mxu1  ;;  %v1406_v13 = vadd.f32 %v1405_v57, %v1404_v55  ;;  %v2014_v55 = vadd.f32 %v1926_v37, %v1922_v35  ;;  %v2032_v35 = vld [vmem:[%s2137_s3] ss:$0 sm:$0xff] }
 0x10f   :  { %v1407_v59 = vpop.f32.mrf.mxu0 }
 0x110   :  { %v1471_v60 = vpop.f32.mrf.mxu1 }
 0x111   :  { %v1408_v61 = vpop.f32.mrf.mxu0 }
 0x112   :  { %v1472_v62 = vpop.f32.mrf.mxu1  ;;  %v1409_v33 = vadd.f32 %v1408_v61, %v1407_v59 }
 0x113   :  { %v1410_v63 = vpop.f32.mrf.mxu0  ;;  %v1473_v34 = vadd.f32 %v1472_v62, %v1471_v60 }
 0x114   :  { %v1474_v0 = vpop.f32.mrf.mxu1 }
 0x115   :  { %v1411_v1 = vpop.f32.mrf.mxu0  ;;  %v793_v57 = vadd.f32 %v1473_v34, %v1409_v33 }
 0x116   :  { %v1475_v2 = vpop.f32.mrf.mxu1  ;;  %v1412_v39 = vadd.f32 %v1411_v1, %v1410_v63  ;;  %v2151_v1 = vld [vmem:[#allocation3_spill] sm:$0xff] }
 0x117   :  { %v1939_v4 = vpop.f32.mrf.mxu0  ;;  %v1476_v40 = vadd.f32 %v1475_v2, %v1474_v0 }
 0x118   :  { %2143 = vst [vmem:[#allocation5_spill] sm:$0xff] %v1939_v4  ;;  %v1956_v8 = vpop.f32.mrf.mxu1 }
 0x119   :  { %2144 = vst [vmem:[#allocation6_spill] sm:$0xff] %v1956_v8  ;;  %v1963_v10 = vpop.f32.mrf.mxu0  ;;  %v798_v59 = vadd.f32 %v1476_v40, %v1412_v39  ;;  %v2155_v39 = vunpack.c.l.bf16 %v1944_v5 }
 0x11a   :  { %2145 = vst [vmem:[#allocation7_spill] sm:$0xff] %v1963_v10  ;;  %v1976_v14 = vpop.f32.mrf.mxu1  ;;  %v1446_v10 = vadd.f32 %v1904_v26, %v1900_v24  ;;  %v1470_v24 = vadd.f32 %v1469_v58, %v1468_v56  ;;  %v2027_v56 = vadd.f32 %v1461_v25, %v1397_v23 }
 0x11b   :  { %2147 = vst [vmem:[#allocation9_spill] sm:$0xff] %v1976_v14  ;;  %v1416_v8 = vpop.f32.mrf.mxu0  ;;  %v1379_v14 = vadd.f32 %v1892_v20, %v1888_v18  ;;  %v1449_v18 = vadd.f32 %v1912_v30, %v1908_v28  ;;  %v1400_v28 = vadd.f32 %v1399_v49, %v1930_v47  ;;  %v1403_v30 = vadd.f32 %v1402_v53, %v1401_v51  ;;  %v2148_v47 = vld [vmem:[#allocation4_spill] sm:$0xff] }
 0x11c   :  { %v1480_v16 = vpop.f32.mrf.mxu1  ;;  %v758_v43 = vadd.f32 %v1446_v10, %v1382_v21  ;;  %v2018_v48 = vadd.f32 %v2148_v47, %v1924_v36  ;;  %v790_v51 = vadd.f32 %v1470_v24, %v1406_v13  ;;  %v2025_v21 = vadd.f32 %v1452_v22, %v1388_v19 }
 0x11d   :  { %v1417_v20 = vpop.f32.mrf.mxu0  ;;  %v761_v44 = vadd.f32 %v1449_v18, %v1385_v38  ;;  %v753_v45 = vadd.f32 %v1443_v15, %v1379_v14  ;;  %v782_v53 = vadd.f32 %v1464_v29, %v1400_v28  ;;  %v785_v58 = vadd.f32 %v1467_v31, %v1403_v30 }
 0x11e   :  { %v1481_v4 = vpop.f32.mrf.mxu1  ;;  %v1418_v63 = vadd.f32 %v1417_v20, %v1416_v8  ;;  %v2154_v29 = vunpack.c.l.bf16 %v1937_v3 }
 0x11f   :  { %v1419_v26 = vpop.f32.mrf.mxu0  ;;  %v2149_v60 = vld [vmem:[#allocation5_spill] sm:$0xff]  ;;  %v1482_v11 = vadd.f32 %v1481_v4, %v1480_v16 }
 0x120   :  { %v1483_v32 = vpop.f32.mrf.mxu1  ;;  %v2152_v24 = vld [vmem:[#allocation6_spill] sm:$0xff] }
 0x121   :  { %v1420_v41 = vpop.f32.mrf.mxu0  ;;  %v2150_v61 = vld [vmem:[#allocation7_spill] sm:$0xff] }
 0x122   :  { %v1484_v42 = vpop.f32.mrf.mxu1  ;;  %v2036_v62 = vadd.f32 %v2150_v61, %v2149_v60  ;;  %v1421_v13 = vadd.f32 %v1420_v41, %v1419_v26  ;;  %v2153_v8 = vld [vmem:[#allocation9_spill] sm:$0xff] }
 0x123   :  { %v1508_v49 = vpop.f32.mrf.mxu0  ;;  %v1485_v18 = vadd.f32 %v1484_v42, %v1483_v32  ;;  %v2045_v20 = vadd.f32 %v2153_v8, %v2152_v24  ;;  %v2161_v8 = vunpack.c.h.bf16 %v1954_v7 }
 0x124   :  { %v855_v38 = vadd.f32 %v1508_v49, %v758_v43  ;;  %v1516_v52 = vpop.f32.mrf.mxu1 }
 0x125   :  { %v887_v36 = vadd.f32 %v1516_v52, %v790_v51  ;;  %v846_v37 = vpop.f32.mrf.mxu0  ;;  %v806_v51 = vadd.f32 %v1482_v11, %v1418_v63  ;;  %v809_v52 = vadd.f32 %v1485_v18, %v1421_v13  ;;  %v2158_v63 = vunpack.c.l.bf16 %v1954_v7 }
 0x126   :  { %v969_v0 = vmul.f32 %v2023_v50, %v855_v38  ;;  %v847_v2 = vadd.f32 %v846_v37, %v2151_v1  ;;  %v878_v10 = vpop.f32.mrf.mxu1  ;;  %v2159_v13 = vunpack.c.h.bf16 %v1944_v5 }
 0x127   :  { %v977_v14 = vmul.f32 %v2023_v50, %v887_v36  ;;  %v879_v15 = vadd.f32 %v878_v10, %v782_v53  ;;  %v1509_v17 = vpop.f32.mrf.mxu0 }
 0x128   :  { %v992_v19 = vadd.f32 %v2032_v35, %v969_v0  ;;  %v967_v22 = vmul.f32 %v2023_v50, %v847_v2  ;;  %v858_v23 = vadd.f32 %v1509_v17, %v761_v44  ;;  %v1517_v25 = vpop.f32.mrf.mxu1 }
 0x129   :  { %v1000_v28 = vadd.f32 %v2032_v35, %v977_v14  ;;  %v975_v4 = vmul.f32 %v2023_v50, %v879_v15  ;;  %v890_v16 = vadd.f32 %v1517_v25, %v793_v57  ;;  %v849_v26 = vpop.f32.mrf.mxu0 }
 0x12a   :  { %v1040_v30 = vadd.f32 %v2154_v29, %v992_v19  ;;  %v990_v31 = vadd.f32 %v2032_v35, %v967_v22  ;;  %v970_v32 = vmul.f32 %v2023_v50, %v858_v23  ;;  %v850_v33 = vadd.f32 %v849_v26, %v753_v45  ;;  %v881_v34 = vpop.f32.mrf.mxu1 }
 0x12b   :  { %v1048_v40 = vadd.f32 %v2155_v39, %v1000_v28  ;;  %v998_v41 = vadd.f32 %v2032_v35, %v975_v4  ;;  %v978_v42 = vmul.f32 %v2023_v50, %v890_v16  ;;  %v882_v43 = vadd.f32 %v881_v34, %v785_v58  ;;  %v1512_v44 = vpop.f32.mrf.mxu0 }
 0x12c   :  { %v993_v47 = vadd.f32 %v2032_v35, %v970_v32  ;;  %v968_v49 = vmul.f32 %v2023_v50, %v850_v33  ;;  %v1520_v38 = vpop.f32.mrf.mxu1  ;;  %v1056_v53 = vmax.f32 %v1040_v30, 0.0  ;;  %v2156_v45 = vunpack.c.l.bf16 %v1949_v6 }
 0x12d   :  { %v1001_v37 = vadd.f32 %v2032_v35, %v978_v42  ;;  %v976_v57 = vmul.f32 %v2023_v50, %v882_v43  ;;  %v862_v60 = vpop.f32.mrf.mxu0  ;;  %v1064_v61 = vmax.f32 %v1048_v40, 0.0  ;;  %v2157_v58 = vunpack.c.h.bf16 %v1937_v3 }
 0x12e   :  { %v1038_v36 = vadd.f32 %v2156_v45, %v990_v31  ;;  %v991_v1 = vadd.f32 %v2032_v35, %v968_v49  ;;  %v871_v2 = vadd.f32 %v1512_v44, %v774_v54  ;;  %v894_v10 = vpop.f32.mrf.mxu1  ;;  %v1046_v11 = vadd.f32 %v2158_v63, %v998_v41 }
 0x12f   :  { %v1041_v0 = vadd.f32 %v2157_v58, %v993_v47  ;;  %v1049_v14 = vadd.f32 %v2159_v13, %v1001_v37  ;;  %v999_v15 = vadd.f32 %v2032_v35, %v976_v57  ;;  %v903_v17 = vadd.f32 %v1520_v38, %v806_v51  ;;  %v1513_v18 = vpop.f32.mrf.mxu0 }
 0x130   :  { %v2160_v22 = vunpack.c.h.bf16 %v1949_v6  ;;  %v973_v3 = vmul.f32 %v2023_v50, %v871_v2  ;;  %v863_v25 = vadd.f32 %v862_v60, %v2025_v21  ;;  %v1521_v54 = vpop.f32.mrf.mxu1  ;;  %v895_v4 = vadd.f32 %v894_v10, %v798_v59 }
 0x131   :  { %v1057_v19 = vmax.f32 %v1041_v0, 0.0  ;;  %v1065_v24 = vmax.f32 %v1049_v14, 0.0  ;;  %v1047_v28 = vadd.f32 %v2161_v8, %v999_v15  ;;  %v981_v5 = vmul.f32 %v2023_v50, %v903_v17  ;;  %v865_v34 = vpop.f32.mrf.mxu0 }
 0x132   :  { %v1039_v23 = vadd.f32 %v2160_v22, %v991_v1  ;;  %v1054_v16 = vmax.f32 %v1038_v36, 0.0  ;;  %v971_v30 = vmul.f32 %v2023_v50, %v863_v25  ;;  %v1062_v31 = vmax.f32 %v1046_v11, 0.0  ;;  %v897_v40 = vpop.f32.mrf.mxu1  ;;  %v2163_v36 = vld [vmem:[#allocation8_spill] sm:$0xff] }
 0x133   :  { %v1312_v26 = vpack.c.bf16 %v1057_v19, %v1056_v53  ;;  %v1332_v6 = vpack.c.bf16 %v1065_v24, %v1064_v61  ;;  %v1063_v32 = vmax.f32 %v1047_v28, 0.0  ;;  %v979_v33 = vmul.f32 %v2023_v50, %v895_v4 }
 0x134   :  { %v1055_v29 = vmax.f32 %v1039_v23, 0.0  ;;  %v996_v21 = vadd.f32 %v2032_v35, %v973_v3  ;;  %v874_v59 = vadd.f32 %v1513_v18, %v2027_v56  ;;  %v769_v39 = vadd.f32 %v2018_v48, %v2014_v55 }
 0x135   :  { %1351 = vst [vmem:[%s2138_s5 + $0x8] sm:$0xff] %v1312_v26   ;;  %1355 = vst [vmem:[%s2138_s5 + $0x28] sm:$0xff] %v1332_v6   ;;  %v1327_v41 = vpack.c.bf16 %v1063_v32, %v1062_v31  ;;  %v1004_v42 = vadd.f32 %v2032_v35, %v981_v5  ;;  %v906_v43 = vadd.f32 %v1521_v54, %v809_v52  ;;  %v1287_v48 = vunpack.c.h.bf16 %v1961_v9 }
 0x136   :  { %v1307_v7 = vpack.c.bf16 %v1055_v29, %v1054_v16  ;;  %v801_v44 = vadd.f32 %v2045_v20, %v2036_v62  ;;  %v994_v56 = vadd.f32 %v2032_v35, %v971_v30  ;;  %v974_v55 = vmul.f32 %v2023_v50, %v874_v59 }
 0x137   :  { %v866_v47 = vadd.f32 %v865_v34, %v769_v39  ;;  %1354 = vst [vmem:[%s2138_s5 + $0x20] sm:$0xff] %v1327_v41   ;;  %v1002_v49 = vadd.f32 %v2032_v35, %v979_v33  ;;  %v982_v51 = vmul.f32 %v2023_v50, %v906_v43  ;;  %v1303_v62 = vunpack.c.h.bf16 %v1969_v12 }
 0x138   :  { %1308 = vst [vmem:[%s2138_s5] sm:$0xff] %v1307_v7   ;;  %v898_v20 = vadd.f32 %v897_v40, %v801_v44  ;;  %v2162_v38 = vunpack.c.l.bf16 %v1961_v9  ;;  %v997_v53 = vadd.f32 %v2032_v35, %v974_v55  ;;  %v1283_v37 = vunpack.c.h.bf16 %v2163_v36 }
 0x139   :  { %v972_v45 = vmul.f32 %v2023_v50, %v866_v47  ;;  %v2164_v57 = vunpack.c.l.bf16 %v1969_v12  ;;  %v1005_v61 = vadd.f32 %v2032_v35, %v982_v51  ;;  %v1299_v0 = vunpack.c.h.bf16 %v2007_v27 }
 0x13a   :  { %v1044_v52 = vadd.f32 %v2162_v38, %v996_v21  ;;  %v980_v58 = vmul.f32 %v2023_v50, %v898_v20  ;;  %v2165_v1 = vunpack.c.l.bf16 %v2163_v36  ;;  %v1045_v9 = vadd.f32 %v1287_v48, %v997_v53 }
 0x13b   :  { %v1052_v60 = vadd.f32 %v2164_v57, %v1004_v42  ;;  %v995_v10 = vadd.f32 %v2032_v35, %v972_v45  ;;  %v1050_v63 = vadd.f32 %v1298_v46, %v1002_v49  ;;  %v1053_v11 = vadd.f32 %v1303_v62, %v1005_v61 }
 0x13c   :  { %v1042_v2 = vadd.f32 %v2165_v1, %v994_v56  ;;  %v1003_v13 = vadd.f32 %v2032_v35, %v980_v58  ;;  %v1060_v12 = vmax.f32 %v1044_v52, 0.0  ;;  %v1061_v14 = vmax.f32 %v1045_v9, 0.0 }
 0x13d   :  { %v1043_v15 = vadd.f32 %v1283_v37, %v995_v10  ;;  %v1068_v17 = vmax.f32 %v1052_v60, 0.0  ;;  %v1069_v18 = vmax.f32 %v1053_v11, 0.0  ;;  %v1066_v3 = vmax.f32 %v1050_v63, 0.0 }
 0x13e   :  { %v1051_v50 = vadd.f32 %v1299_v0, %v1003_v13  ;;  %v1058_v19 = vmax.f32 %v1042_v2, 0.0  ;;  %v1322_v22 = vpack.c.bf16 %v1061_v14, %v1060_v12 }
 0x13f   :  { %v1059_v23 = vmax.f32 %v1043_v15, 0.0  ;;  %v1342_v25 = vpack.c.bf16 %v1069_v18, %v1068_v17 }
 0x140   :  { %v1067_v54 = vmax.f32 %v1051_v50, 0.0  ;;  %1353 = vst [vmem:[%s2138_s5 + $0x18] sm:$0xff] %v1322_v22  }
 0x141   :  { %v1317_v27 = vpack.c.bf16 %v1059_v23, %v1058_v19  ;;  %1357 = vst [vmem:[%s2138_s5 + $0x38] sm:$0xff] %v1342_v25  }
 0x142   :  { %v1337_v46 = vpack.c.bf16 %v1067_v54, %v1066_v3 }
 0x143   :  { %1352 = vst [vmem:[%s2138_s5 + $0x10] sm:$0xff] %v1317_v27  }
 0x144   :  { %1356 = vst [vmem:[%s2138_s5 + $0x30] sm:$0xff] %v1337_v46  }

// kernel: resnet_forward.18
= control target key start
LH: loop header
LB: loop body
LE: loop exit
PB: predicated region body
PF: predicated region fallthrough
CT: control target
= control target key end

     0   :  { %vm380_vm0 = vcmask 523264   ;;  %s967_s1 = inlined_call_operand.vmem [shape: bf16[576,128], index: 1, kind: input, shape index: {}]   ;;  %s968_s0 = inlined_call_operand.vmem [shape: bf16[32,576], index: 0, kind: input, shape index: {}]   ;;  %s969_s2 = inlined_call_operand.vmem [shape: f32[1,128], index: 2, kind: input, shape index: {}]   ;;  %s970_s3 = inlined_call_operand.vmem [shape: f32[1,128], index: 3, kind: input, shape index: {}]   ;;  %s971_s4 = inlined_call_operand.vmem [shape: bf16[32,128], index: 4, kind: output, shape index: {}]  }
   0x1   :  { %v742_v0 = vld [vmem:[%s967_s1 + $0x78] sm:$0xff]   ;;  %v746_v4 = vld [vmem:[%s967_s1 + $0x70] sm:$0xff]   ;;  %v750_v8 = vld [vmem:[%s967_s1 + $0x68] sm:$0xff]  }
   0x2   :  { %v743_v1 = vld [vmem:[%s967_s1 + $0xf8] sm:$0xff]   ;;  %668 = vmatprep.subr.bf16.mxu0 %v742_v0  ;;  %v747_v5 = vld [vmem:[%s967_s1 + $0xf0] sm:$0xff]   ;;  %v751_v9 = vld [vmem:[%s967_s1 + $0xe8] sm:$0xff]  }
   0x3   :  { %v744_v2 = vld [vmem:[%s967_s1 + $0x38] sm:$0xff]   ;;  %696 = vmatprep.subr.bf16.mxu1 %v743_v1  ;;  %v748_v6 = vld [vmem:[%s967_s1 + $0x30] sm:$0xff]   ;;  %v752_v10 = vld [vmem:[%s967_s1 + $0x28] sm:$0xff]  }
   0x4   :  { %v745_v3 = vld [vmem:[%s967_s1 + $0xb8] sm:$0xff]   ;;  %669 = vmatpush3.bf16.msra.mxu0 %v744_v2  ;;  %v749_v7 = vld [vmem:[%s967_s1 + $0xb0] sm:$0xff]   ;;  %v753_v11 = vld [vmem:[%s967_s1 + $0xa8] sm:$0xff]  }
   0x5   :  { %697 = vmatpush3.bf16.msra.mxu1 %v745_v3  ;;  %670 = vmatprep.subr.bf16.mxu0 %v746_v4  ;;  %v754_v12 = vld [vmem:[%s967_s1 + $0x60] sm:$0xff]   ;;  %v758_v16 = vld [vmem:[%s967_s1 + $0x58] sm:$0xff]   ;;  %v762_v20 = vld [vmem:[%s967_s1 + $0x50] sm:$0xff]  }
   0x6   :  { %698 = vmatprep.subr.bf16.mxu1 %v747_v5  ;;  %v755_v13 = vld [vmem:[%s967_s1 + $0xe0] sm:$0xff]   ;;  %v759_v17 = vld [vmem:[%s967_s1 + $0xd8] sm:$0xff]   ;;  %v763_v21 = vld [vmem:[%s967_s1 + $0xd0] sm:$0xff]  }
   0x7   :  { %v756_v14 = vld [vmem:[%s967_s1 + $0x20] sm:$0xff]   ;;  %v760_v18 = vld [vmem:[%s967_s1 + $0x18] sm:$0xff]   ;;  %v764_v22 = vld [vmem:[%s967_s1 + $0x10] sm:$0xff]  }
   0x8   :  { %671 = vmatpush3.bf16.msra.mxu0 %v748_v6  ;;  %v757_v15 = vld [vmem:[%s967_s1 + $0xa0] sm:$0xff]   ;;  %v761_v19 = vld [vmem:[%s967_s1 + $0x98] sm:$0xff]   ;;  %v765_v23 = vld [vmem:[%s967_s1 + $0x90] sm:$0xff]  }
   0x9   :  { %699 = vmatpush3.bf16.msra.mxu1 %v749_v7  ;;  %672 = vmatprep.subr.bf16.mxu0 %v750_v8  ;;  %v766_v24 = vld [vmem:[%s967_s1 + $0x48] sm:$0xff]   ;;  %v770_v28 = vld [vmem:[%s967_s1 + $0x40] sm:$0xff]   ;;  %v780_v36 = vld [vmem:[%s967_s1 + $0x118] sm:$0xff]  }
   0xa   :  { %700 = vmatprep.subr.bf16.mxu1 %v751_v9  ;;  %v767_v25 = vld [vmem:[%s967_s1 + $0xc8] sm:$0xff]   ;;  %v771_v29 = vld [vmem:[%s967_s1 + $0xc0] sm:$0xff]   ;;  %v781_v37 = vld [vmem:[%s967_s1 + $0x110] sm:$0xff]  }
   0xb   :  { %v768_v26 = vld [vmem:[%s967_s1 + $0x8] sm:$0xff]   ;;  %v772_v30 = vld [vmem:[%s967_s1] sm:$0xff]  }
   0xc   :  { %673 = vmatpush3.bf16.msra.mxu0 %v752_v10  ;;  %v769_v27 = vld [vmem:[%s967_s1 + $0x88] sm:$0xff]   ;;  %v773_v31 = vld [vmem:[%s967_s1 + $0x80] sm:$0xff]  }
   0xd   :  { %701 = vmatpush3.bf16.msra.mxu1 %v753_v11  ;;  %674 = vmatprep.subr.bf16.mxu0 %v754_v12  ;;  %v774_v32 = vld [vmem:[%s968_s0] ss:$20 sps:$4 sm:$0xff]   ;;  %v776_v33 = vld [vmem:[%s968_s0 + $0x4] ss:$20 sps:$4 sm:$0xff]   ;;  %v777_v34 = vld [vmem:[%s968_s0 + $0x8] ss:$20 sps:$4 sm:$0xff]  }
   0xe   :  { %702 = vmatprep.subr.bf16.mxu1 %v755_v13  ;;  %v779_v35 = vld [vmem:[%s968_s0 + $0xc] ss:$20 sps:$4 sm:$0xff]   ;;  %419 = vmatprep.mubr.bf16.mxu0 %v776_v33  ;;  %v784_v39 = vld [vmem:[%s968_s0 + $0x34] ss:$20 sps:$4 sm:$0xff]   ;;  %v787_v42 = vld [vmem:[%s968_s0 + $0x30] ss:$20 sps:$4 sm:$0xff]  }
   0xf   :  { %468 = vmatprep.mubr.bf16.mxu1 %v779_v35  ;;  %v782_v38 = vld [vmem:[%s968_s0 + $0x2c] ss:$20 sps:$4 sm:$0xff]   ;;  %v786_v40 = vld [vmem:[%s968_s0 + $0x28] ss:$20 sps:$4 sm:$0xff]   ;;  %v790_v43 = vld [vmem:[%s968_s0 + $0x10] ss:$20 sps:$4 sm:$0xff]  }
  0x10   :  { %675 = vmatpush3.bf16.msra.mxu0 %v756_v14  ;;  %v788_v41 = vld [vmem:[%s967_s1 + $0x108] sm:$0xff]   ;;  %v789_v44 = vld [vmem:[%s967_s1 + $0x100] sm:$0xff]  }
  0x11   :  { %703 = vmatpush3.bf16.msra.mxu1 %v757_v15  ;;  %676 = vmatprep.subr.bf16.mxu0 %v758_v16  ;;  %v791_v45 = vld [vmem:[%s968_s0 + $0x38] ss:$20 sps:$4 sm:$0xff]   ;;  %v647_v6 = vld [vmem:[%s969_s2] ss:$0 sm:$0xff] }
  0x12   :  { %704 = vmatprep.subr.bf16.mxu1 %v759_v17  ;;  %v648_v15 = vld [vmem:[%s970_s3] ss:$0 sm:$0xff] }
  0x14   :  { %677 = vmatpush3.bf16.msra.mxu0 %v760_v18 }
  0x15   :  { %705 = vmatpush3.bf16.msra.mxu1 %v761_v19  ;;  %678 = vmatprep.subr.bf16.mxu0 %v762_v20 }
  0x16   :  { %706 = vmatprep.subr.bf16.mxu1 %v763_v21 }
  0x18   :  { %679 = vmatpush3.bf16.msra.mxu0 %v764_v22 }
  0x19   :  { %707 = vmatpush3.bf16.msra.mxu1 %v765_v23  ;;  %680 = vmatprep.subr.bf16.mxu0 %v766_v24 }
  0x1a   :  { %708 = vmatprep.subr.bf16.mxu1 %v767_v25 }
  0x1c   :  { %681 = vmatpush3.bf16.msra.mxu0 %v768_v26 }
  0x1d   :  { %709 = vmatpush3.bf16.msra.mxu1 %v769_v27  ;;  %682 = vmatprep.subr.bf16.mxu0 %v770_v28 }
  0x1e   :  { %710 = vmatprep.subr.bf16.mxu1 %v771_v29 }
  0x20   :  { %683 = vmatpush3.bf16.msra.mxu0 %v772_v30 }
  0x21   :  { %711 = vmatpush3.bf16.msra.mxu1 %v773_v31  ;;  %730 = vmatprep.subr.bf16.mxu0 %v780_v36 }
  0x23   :  { %420 = vmatmul.mubr.bf16.vlgmr.msra.gmra.mxu0 %v774_v32 }
  0x24   :  { %469 = vmatmul.mubr.bf16.vlgmr.msra.gmra.mxu1 %v777_v34  ;;  %731 = vmatpush3.bf16.msra.mxu0 %v780_v36 }
  0x25   :  { %732 = vmatprep.subr.bf16.mxu0 %v781_v37  ;;  %427 = vmatprep.mubr.bf16.mxu0 %v782_v38 }
  0x26   :  { %476 = vmatprep.mubr.bf16.mxu1 %v784_v39 }
  0x28   :  { %733 = vmatpush3.bf16.msra.mxu0 %v781_v37 }
  0x29   :  { %734 = vmatprep.subr.bf16.mxu0 %v788_v41 }
  0x2b   :  { %428 = vmatmul.mubr.bf16.gmra.mxu0 %v786_v40 }
  0x2c   :  { %477 = vmatmul.mubr.bf16.gmra.mxu1 %v787_v42  ;;  %738 = vmatprep.mubr.msk.bf16.mxu0 %vm380_vm0, %v790_v43 }
  0x2d   :  { %735 = vmatpush3.bf16.msra.mxu0 %v788_v41 }
  0x2e   :  { %736 = vmatprep.subr.bf16.mxu0 %v789_v44 }
  0x31   :  { %737 = vmatpush3.bf16.msra.mxu0 %v789_v44 }
  0x34   :  { %739 = vmatmul.mubr.msk.bf16.vlgmr.msra.gmra.mxu0 %vm380_vm0, %v791_v45 }
  0xe3   :  { %v684_v46 = vpop.f32.mrf.mxu0 }
  0xe4   :  { %v712_v47 = vpop.f32.mrf.mxu1 }
  0xe5   :  { %v685_v48 = vpop.f32.mrf.mxu0 }
  0xe6   :  { %v713_v49 = vpop.f32.mrf.mxu1  ;;  %v686_v62 = vadd.f32 %v685_v48, %v684_v46 }
  0xe7   :  { %v687_v50 = vpop.f32.mrf.mxu0  ;;  %v714_v63 = vadd.f32 %v713_v49, %v712_v47 }
  0xe8   :  { %v715_v51 = vpop.f32.mrf.mxu1 }
  0xe9   :  { %v688_v52 = vpop.f32.mrf.mxu0  ;;  %v471_v10 = vadd.f32 %v714_v63, %v686_v62 }
  0xea   :  { %v716_v53 = vpop.f32.mrf.mxu1  ;;  %v689_v7 = vadd.f32 %v688_v52, %v687_v50 }
  0xeb   :  { %v690_v54 = vpop.f32.mrf.mxu0  ;;  %v717_v8 = vadd.f32 %v716_v53, %v715_v51 }
  0xec   :  { %v718_v55 = vpop.f32.mrf.mxu1 }
  0xed   :  { %v691_v56 = vpop.f32.mrf.mxu0  ;;  %v474_v19 = vadd.f32 %v717_v8, %v689_v7 }
  0xee   :  { %v719_v57 = vpop.f32.mrf.mxu1  ;;  %v692_v58 = vadd.f32 %v691_v56, %v690_v54 }
  0xef   :  { %v720_v59 = vadd.f32 %v719_v57, %v718_v55  ;;  %v693_v60 = vpop.f32.mrf.mxu0 }
  0xf0   :  { %v721_v61 = vpop.f32.mrf.mxu1 }
  0xf1   :  { %v694_v0 = vpop.f32.mrf.mxu0  ;;  %v479_v4 = vadd.f32 %v720_v59, %v692_v58 }
  0xf2   :  { %v722_v1 = vpop.f32.mrf.mxu1  ;;  %v695_v2 = vadd.f32 %v694_v0, %v693_v60 }
  0xf3   :  { %v723_v3 = vadd.f32 %v722_v1, %v721_v61 }
  0xf4   :  { %v740_v5 = vpop.f32.mrf.mxu0 }
  0xf5   :  { %v528_v9 = vadd.f32 %v740_v5, %v479_v4  ;;  %v482_v14 = vadd.f32 %v723_v3, %v695_v2 }
  0xf6   :  { %v519_v11 = vpop.f32.mrf.mxu0 }
  0xf7   :  { %v558_v12 = vmul.f32 %v647_v6, %v528_v9  ;;  %v520_v13 = vadd.f32 %v519_v11, %v471_v10 }
  0xf8   :  { %v741_v16 = vpop.f32.mrf.mxu0 }
  0xf9   :  { %v556_v17 = vmul.f32 %v647_v6, %v520_v13  ;;  %v531_v18 = vadd.f32 %v741_v16, %v482_v14  ;;  %v569_v21 = vadd.f32 %v648_v15, %v558_v12 }
  0xfa   :  { %v522_v20 = vpop.f32.mrf.mxu0 }
  0xfb   :  { %v559_v22 = vmul.f32 %v647_v6, %v531_v18  ;;  %v523_v23 = vadd.f32 %v522_v20, %v474_v19  ;;  %v567_v24 = vadd.f32 %v648_v15, %v556_v17  ;;  %v573_v27 = vmax.f32 %v569_v21, 0.0 }
  0xfd   :  { %v570_v25 = vadd.f32 %v648_v15, %v559_v22  ;;  %v557_v26 = vmul.f32 %v647_v6, %v523_v23  ;;  %v571_v30 = vmax.f32 %v567_v24, 0.0 }
  0xff   :  { %v574_v28 = vmax.f32 %v570_v25, 0.0  ;;  %v568_v29 = vadd.f32 %v648_v15, %v557_v26 }
 0x101   :  { %v665_v31 = vpack.c.bf16 %v574_v28, %v573_v27  ;;  %v572_v32 = vmax.f32 %v568_v29, 0.0 }
 0x103   :  { %667 = vst [vmem:[%s971_s4 + $0x8] sm:$0xff] %v665_v31   ;;  %v660_v33 = vpack.c.bf16 %v572_v32, %v571_v30 }
 0x105   :  { %661 = vst [vmem:[%s971_s4] sm:$0xff] %v660_v33  }

// kernel: resnet_forward.19
= control target key start
LH: loop header
LB: loop body
LE: loop exit
PB: predicated region body
PF: predicated region fallthrough
CT: control target
= control target key end

     0   :  { %vm76_vm0 = vcmask 523264   ;;  %s301_s1 = inlined_call_operand.vmem [shape: bf16[64,128], index: 1, kind: input, shape index: {}]   ;;  %s302_s0 = inlined_call_operand.vmem [shape: bf16[32,64], index: 0, kind: input, shape index: {}]   ;;  %s303_s2 = inlined_call_operand.vmem [shape: f32[1,128], index: 2, kind: input, shape index: {}]   ;;  %s304_s3 = inlined_call_operand.vmem [shape: f32[1,128], index: 3, kind: input, shape index: {}]   ;;  %s305_s4 = inlined_call_operand.vmem [shape: bf16[32,128], index: 4, kind: output, shape index: {}]  }
   0x1   :  { %v240_v0 = vld [vmem:[%s301_s1 + $0x18] sm:$0xff]   ;;  %v241_v1 = vld [vmem:[%s301_s1 + $0x10] sm:$0xff]   ;;  %v242_v2 = vld [vmem:[%s301_s1 + $0x8] sm:$0xff]  }
   0x2   :  { %228 = vmatprep.subr.bf16.mxu0 %v240_v0  ;;  %v244_v3 = vld [vmem:[%s302_s0] sm:$0xff]   ;;  %v245_v5 = vld [vmem:[%s302_s0 + $0x8] sm:$0xff]  }
   0x3   :  { %229 = vmatpush3.bf16.msra.mxu0 %v240_v0  ;;  %236 = vmatprep.mubr.msk.bf16.mxu0 %vm76_vm0, %v244_v3  ;;  %v243_v4 = vld [vmem:[%s301_s1] sm:$0xff]  }
   0x4   :  { %230 = vmatprep.subr.bf16.mxu0 %v241_v1  ;;  %v201_v7 = vld [vmem:[%s303_s2] ss:$0 sm:$0xff] }
   0x5   :  { %v202_v10 = vld [vmem:[%s304_s3] ss:$0 sm:$0xff] }
   0x7   :  { %231 = vmatpush3.bf16.msra.mxu0 %v241_v1 }
   0x8   :  { %232 = vmatprep.subr.bf16.mxu0 %v242_v2 }
   0xb   :  { %233 = vmatpush3.bf16.msra.mxu0 %v242_v2 }
   0xc   :  { %234 = vmatprep.subr.bf16.mxu0 %v243_v4 }
   0xf   :  { %235 = vmatpush3.bf16.msra.mxu0 %v243_v4 }
  0x12   :  { %237 = vmatmul.mubr.msk.bf16.vlgmr.msra.gmra.mxu0 %vm76_vm0, %v245_v5 }
  0xd2   :  { %v238_v6 = vpop.f32.mrf.mxu0 }
  0xd3   :  { %v156_v9 = vmul.f32 %v238_v6, %v201_v7 }
  0xd4   :  { %v117_v8 = vpop.f32.mrf.mxu0 }
  0xd5   :  { %v154_v12 = vmul.f32 %v201_v7, %v117_v8  ;;  %v167_v15 = vadd.f32 %v202_v10, %v156_v9 }
  0xd6   :  { %v239_v11 = vpop.f32.mrf.mxu0 }
  0xd7   :  { %v157_v13 = vmul.f32 %v239_v11, %v201_v7  ;;  %v165_v18 = vadd.f32 %v202_v10, %v154_v12 }
  0xd8   :  { %v120_v14 = vpop.f32.mrf.mxu0 }
  0xd9   :  { %v168_v16 = vadd.f32 %v202_v10, %v157_v13  ;;  %v155_v17 = vmul.f32 %v201_v7, %v120_v14 }
  0xdb   :  { %v219_v19 = vpack.c.bf16 %v168_v16, %v167_v15  ;;  %v166_v20 = vadd.f32 %v202_v10, %v155_v17 }
  0xdd   :  { %221 = vst [vmem:[%s305_s4 + $0x8] sm:$0xff] %v219_v19   ;;  %v214_v21 = vpack.c.bf16 %v166_v20, %v165_v18 }
  0xdf   :  { %215 = vst [vmem:[%s305_s4] sm:$0xff] %v214_v21  }

// kernel: resnet_forward.20
= control target key start
LH: loop header
LB: loop body
LE: loop exit
PB: predicated region body
PF: predicated region fallthrough
CT: control target
= control target key end

     0   :  { %s1248_s18 = smov 0   ;;  %s1250_s19 = smov 0   ;;  %s1367_s0 = inlined_call_operand.vmem [shape: bf16[32,1152], index: 0, kind: input, shape index: {}]   ;;  %s1368_s1 = inlined_call_operand.vmem [shape: bf16[1152,128], index: 1, kind: input, shape index: {}]   ;;  %s1369_s2 = inlined_call_operand.vmem [shape: f32[1,128], index: 2, kind: input, shape index: {}]   ;;  %s1370_s3 = inlined_call_operand.vmem [shape: f32[1,128], index: 3, kind: input, shape index: {}]   ;;  %s1371_s4 = inlined_call_operand.vmem [shape: bf16[32,128], index: 4, kind: input, shape index: {}]   ;;  %s1372_s5 = inlined_call_operand.vmem [shape: bf16[32,128], index: 5, kind: output, shape index: {}]  }
   0x1   :  { %s1252_s20 = smov 0   ;;  %s1254_s21 = smov 0  }
   0x2   :  { %s1256_s22 = smov 0  }
   0x3 LB: > { %s27_s23 = sadd.s32 1, %s1211_s21  ;;  %p50_p1 = scmp.ne.s32.totalorder %s1203_s19, %s1199_s18  ;;  %s1215_s22 = sphi %s1256_s22, %s15_s22   ;;  %s1211_s21 = sphi %s1254_s21, %s1376_s21   ;;  %s1207_s20 = sphi %s1252_s20, %s1375_s20   ;;  %s1203_s19 = sphi %s1250_s19, %s1374_s19   ;;  %s1199_s18 = sphi %s1248_s18, %s1373_s18  }
   0x4   : > { %p28_p0 = scmp.ge.s32.totalorder %s27_s23, 3  ;;  %p51_p2 = scmp.eq.s32.totalorder %s1215_s22, 0 }
   0x5   : > { %s43_s25 = sadd.s32 1, %s1203_s19  ;;  %p965_p5 = scmp.ge.s32.totalorder %s1215_s22, 3 }
   0x6   : > { %s1378_s23 = smov (%p28_p0, %s27_s23), 0  ;;  %p52_p3 = por %p51_p2, %p50_p1 }
   0x7   : > { %s39_s24 = ssub.s32 %s1211_s21, %s1378_s23  ;;  %236 = sbr.rel (%p965_p5) target bundleno = 21 (0x15), region = 28 }
   0x8   : > { %p41_p4 = scmp.eq.s32.totalorder %s39_s24, 0 }
   0xa   : > { %s1283_s26 = scalar_select %p41_p4, %s1203_s19, %s43_s25  }
   0xc   : > { %239 = sbr.rel (!%p52_p3) target bundleno = 21 (0x15), region = 32  ;;  %s241_s27 = sand.u32 (%p52_p3), 1, %s1203_s19  }
   0xd   : > { %s1019_s28 = smul.u32 (%p52_p3), 12, %s1211_s21 }
   0xe   : > { %s1102_s29 = smul.u32 (%p52_p3), 48, %s241_s27 }
   0xf   : > { %s249_s7 = scalar_lea.vmem (%p52_p3), %s1367_s0, %s1019_s28 }
  0x10   : > { %v264_v0 = vld [vmem:[%s249_s7] sm:$0xff] (%p52_p3)  ;;  %v268_v2 = vld [vmem:[%s249_s7 + $0x48] sm:$0xff] (%p52_p3)  ;;  %s243_s8 = scalar_lea.vmem (%p52_p3), [#allocation3], %s1102_s29  ;;  %v971_v6 = vld [vmem:[%s249_s7 + $0x50] sm:$0xf] (%p52_p3) }
  0x11   : > { %v266_v1 = vld [vmem:[%s249_s7 + $0x24] sm:$0xff]  ;;  %265 = vst [vmem:[%s243_s8] sm:$0xff] %v264_v0  ;;  %269 = vst [vmem:[%s243_s8 + $0x18] sm:$0xff] %v268_v2  ;;  %v270_v3 = vld [vmem:[%s249_s7 + $0x6c] sm:$0xff] }
  0x12   : > { %267 = vst [vmem:[%s243_s8 + $0xc] sm:$0xff] %v266_v1  ;;  %v967_v4 = vld [vmem:[%s249_s7 + $0x8] sm:$0xf]  ;;  %v969_v5 = vld [vmem:[%s249_s7 + $0x2c] sm:$0xf]  ;;  %271 = vst [vmem:[%s243_s8 + $0x24] sm:$0xff] %v270_v3 }
  0x13   : > { %968 = vst [vmem:[%s243_s8 + $0x8] sm:$0xf] %v967_v4  ;;  %970 = vst [vmem:[%s243_s8 + $0x14] sm:$0xf] %v969_v5  ;;  %v973_v7 = vld [vmem:[%s249_s7 + $0x74] sm:$0xf] }
  0x14   : > { %972 = vst [vmem:[%s243_s8 + $0x20] sm:$0xf] %v971_v6  ;;  %974 = vst [vmem:[%s243_s8 + $0x2c] sm:$0xf] %v973_v7 }
  0x15 PF: > { %p975_p6 = scmp.ge.s32.totalorder %s1215_s22, 1  ;;  %p304_p7 = scmp.lt.s32.totalorder %s1215_s22, 4 }
  0x17   : > { %p305_p8 = pnand %p975_p6, %p304_p7 }
  0x18   : > { %s311_s9 = sand.u32 (!%p305_p8), 1, %s1199_s18   ;;  %s365_s10 = smul.u32 (!%p305_p8), 48, %s1207_s20 }
  0x19   : > { %308 = sbr.rel (%p305_p8) target bundleno = 303 (0x12f), region = 62  ;;  %p977_p10 = scmp.ne.s32.totalorder (!%p305_p8), %s1207_s20, 0 }
  0x1a   : > { %s1103_s11 = smul.u32 (!%p305_p8), 48, %s311_s9  ;;  %p366_p9 = scmp.lt.s32.totalorder (!%p305_p8), %s365_s10, 143 }
  0x1c   : > { %s1300_s16 = scalar_lea.vmem (!%p305_p8), [#allocation3], %s1103_s11 }
  0x1e   : > { %s1380_s10 = smov (!%p366_p9, %s365_s10), 143  ;;  %402 = sbr.rel (%p977_p10) target bundleno = 38 (0x26), region = 70 }
  0x1f   : > { %s976_s12 = sshll.u32 %s1380_s10, 2 }
  0x20   : > { %s1298_s15 = scalar_lea.vmem %s1368_s1, %s976_s12 }
  0x23   : > { %v1217_v8 = vmov 0.0  }
  0x24   : > { %403 = vst [vmem:[#allocation2 + $0x10] sm:$0xff] %v1217_v8  ;;  %404 = vst [vmem:[#allocation2] sm:$0xff] %v1217_v8 }
  0x25   : > { %405 = vst [vmem:[#allocation2 + $0x18] sm:$0xff] %v1217_v8  ;;  %406 = vst [vmem:[#allocation2 + $0x8] sm:$0xff] %v1217_v8 }
  0x26 PF: > { %v1145_v9 = vld [vmem:[%s1298_s15 + $0x78] sm:$0xff]   ;;  %v1148_v12 = vld [vmem:[%s1298_s15 + $0x70] sm:$0xff]   ;;  %v1151_v15 = vld [vmem:[%s1298_s15 + $0x68] sm:$0xff]   ;;  %p1008_p11 = scmp.ne.s32.totalorder %s1207_s20, 2 }
  0x27   : > { %v1146_v10 = vld [vmem:[%s1298_s15 + $0x38] sm:$0xff]   ;;  %1044 = vmatprep.subr.bf16.mxu0 %v1145_v9  ;;  %v1149_v13 = vld [vmem:[%s1298_s15 + $0x30] sm:$0xff]   ;;  %v1152_v16 = vld [vmem:[%s1298_s15 + $0x28] sm:$0xff]  }
  0x28   : > { %v1147_v11 = vld [vmem:[%s1298_s15 + $0xb8] sm:$0xff]   ;;  %1045 = vmatpush3.bf16.msra.mxu0 %v1146_v10  ;;  %v1150_v14 = vld [vmem:[%s1298_s15 + $0xb0] sm:$0xff]   ;;  %v1153_v17 = vld [vmem:[%s1298_s15 + $0xa8] sm:$0xff]  }
  0x29   : > { %1082 = vmatprep.subr.bf16.mxu1 %v1147_v11  ;;  %1046 = vmatprep.subr.bf16.mxu0 %v1148_v12  ;;  %v1154_v18 = vld [vmem:[%s1298_s15 + $0x60] sm:$0xff]   ;;  %v1157_v21 = vld [vmem:[%s1298_s15 + $0x58] sm:$0xff]   ;;  %v1160_v24 = vld [vmem:[%s1298_s15 + $0x50] sm:$0xff]  }
  0x2a   : > { %1083 = vmatpush3.bf16.msra.mxu1 %v1147_v11  ;;  %v1155_v19 = vld [vmem:[%s1298_s15 + $0x20] sm:$0xff]   ;;  %v1159_v22 = vld [vmem:[%s1298_s15 + $0x98] sm:$0xff]   ;;  %v1162_v25 = vld [vmem:[%s1298_s15 + $0x90] sm:$0xff]  }
  0x2b   : > { %1084 = vmatprep.subr.bf16.mxu1 %v1150_v14  ;;  %v1156_v20 = vld [vmem:[%s1298_s15 + $0xa0] sm:$0xff]   ;;  %v1158_v23 = vld [vmem:[%s1298_s15 + $0x18] sm:$0xff]   ;;  %v1161_v26 = vld [vmem:[%s1298_s15 + $0x10] sm:$0xff]  }
  0x2c   : > { %1047 = vmatpush3.bf16.msra.mxu0 %v1149_v13  ;;  %v1163_v27 = vld [vmem:[%s1298_s15 + $0x48] sm:$0xff]   ;;  %v1166_v30 = vld [vmem:[%s1298_s15 + $0x40] sm:$0xff]   ;;  %v407_v44 = vld [vmem:[#allocation2 + $0x10] sm:$0xff] }
  0x2d   : > { %1048 = vmatprep.subr.bf16.mxu0 %v1151_v15  ;;  %v1164_v28 = vld [vmem:[%s1298_s15 + $0x8] sm:$0xff]   ;;  %v1168_v31 = vld [vmem:[%s1298_s15 + $0x80] sm:$0xff]   ;;  %v409_v58 = vld [vmem:[#allocation2 + $0x18] sm:$0xff] }
  0x2e   : > { %1085 = vmatpush3.bf16.msra.mxu1 %v1150_v14  ;;  %v1165_v29 = vld [vmem:[%s1298_s15 + $0x88] sm:$0xff]   ;;  %v1171_v32 = vld [vmem:[%s1300_s16 + $0x4] ss:$12 sps:$4 sm:$0xff]  }
  0x2f   : > { %1086 = vmatprep.subr.bf16.mxu1 %v1153_v17  ;;  %v1172_v33 = vld [vmem:[%s1300_s16 + $0x8] ss:$12 sps:$4 sm:$0xff]   ;;  %675 = vmatprep.mubr.bf16.mxu0 %v1171_v32  ;;  %v1169_v35 = vld [vmem:[%s1300_s16] ss:$12 sps:$4 sm:$0xff]   ;;  %v1176_v38 = vld [vmem:[%s1300_s16 + $0x18] ss:$12 sps:$4 sm:$0xff]  }
  0x30   : > { %1049 = vmatpush3.bf16.msra.mxu0 %v1152_v16  ;;  %v1167_v34 = vld [vmem:[%s1298_s15] sm:$0xff]   ;;  %1098 = vmatprep.mubr.bf16.mxu1 %v1172_v33  ;;  %v1174_v36 = vld [vmem:[%s1300_s16 + $0x1c] ss:$12 sps:$4 sm:$0xff]  }
  0x31   : > { %1050 = vmatprep.subr.bf16.mxu0 %v1154_v18  ;;  %v1173_v37 = vld [vmem:[%s1300_s16 + $0x20] ss:$12 sps:$4 sm:$0xff]  }
  0x32   : > { %1087 = vmatpush3.bf16.msra.mxu1 %v1153_v17  ;;  %v408_v52 = vld [vmem:[#allocation2] sm:$0xff]  ;;  %v410_v0 = vld [vmem:[#allocation2 + $0x8] sm:$0xff] }
  0x33   : > { %1088 = vmatprep.subr.bf16.mxu1 %v1156_v20 }
  0x34   : > { %1051 = vmatpush3.bf16.msra.mxu0 %v1155_v19 }
  0x35   : > { %1052 = vmatprep.subr.bf16.mxu0 %v1157_v21 }
  0x36   : > { %1089 = vmatpush3.bf16.msra.mxu1 %v1156_v20 }
  0x37   : > { %1090 = vmatprep.subr.bf16.mxu1 %v1159_v22 }
  0x38   : > { %1053 = vmatpush3.bf16.msra.mxu0 %v1158_v23 }
  0x39   : > { %1054 = vmatprep.subr.bf16.mxu0 %v1160_v24 }
  0x3a   : > { %1091 = vmatpush3.bf16.msra.mxu1 %v1159_v22 }
  0x3b   : > { %1092 = vmatprep.subr.bf16.mxu1 %v1162_v25 }
  0x3c   : > { %1055 = vmatpush3.bf16.msra.mxu0 %v1161_v26 }
  0x3d   : > { %1056 = vmatprep.subr.bf16.mxu0 %v1163_v27 }
  0x3e   : > { %1093 = vmatpush3.bf16.msra.mxu1 %v1162_v25 }
  0x3f   : > { %1094 = vmatprep.subr.bf16.mxu1 %v1165_v29 }
  0x40   : > { %1057 = vmatpush3.bf16.msra.mxu0 %v1164_v28 }
  0x41   : > { %1058 = vmatprep.subr.bf16.mxu0 %v1166_v30 }
  0x42   : > { %1095 = vmatpush3.bf16.msra.mxu1 %v1165_v29 }
  0x43   : > { %1096 = vmatprep.subr.bf16.mxu1 %v1168_v31 }
  0x44   : > { %1059 = vmatpush3.bf16.msra.mxu0 %v1167_v34 }
  0x46   : > { %1097 = vmatpush3.bf16.msra.mxu1 %v1168_v31 }
  0x47   : > { %676 = vmatmul.mubr.bf16.vlgmr.msra.gmra.mxu0 %v1169_v35 }
  0x48   : > { %683 = vmatprep.mubr.bf16.mxu0 %v1174_v36 }
  0x49   : > { %1099 = vmatmul.mubr.bf16.vlgmr.msra.gmra.mxu1 %v1173_v37 }
  0x4f   : > { %684 = vmatmul.mubr.bf16.gmra.mxu0 %v1176_v38 }
 0x107   : > { %v1060_v39 = vpop.f32.mrf.mxu0 }
 0x109   : > { %v1061_v40 = vpop.f32.mrf.mxu0  ;;  %v1100_v41 = vpop.f32.mrf.mxu1 }
 0x10a   : > { %v1062_v42 = vadd.f32 %v1061_v40, %v1060_v39 }
 0x10b   : > { %v1063_v43 = vpop.f32.mrf.mxu0  ;;  %v726_v45 = vpop.f32.mrf.mxu1 }
 0x10c   : > { %v727_v46 = vadd.f32 %v1062_v42, %v726_v45 }
 0x10d   : > { %v1064_v47 = vpop.f32.mrf.mxu0  ;;  %v1101_v48 = vpop.f32.mrf.mxu1 }
 0x10e   : > { %v741_v49 = vadd.f32 %v727_v46, %v407_v44  ;;  %v1065_v50 = vadd.f32 %v1064_v47, %v1063_v43 }
 0x10f   : > { %v1066_v51 = vpop.f32.mrf.mxu0  ;;  %v729_v53 = vpop.f32.mrf.mxu1 }
 0x110   : > { %745 = vst [vmem:[#allocation2 + $0x10] sm:$0xff] %v741_v49  ;;  %v730_v54 = vadd.f32 %v1065_v50, %v729_v53 }
 0x111   : > { %v1067_v55 = vpop.f32.mrf.mxu0 }
 0x112   : > { %v742_v56 = vadd.f32 %v730_v54, %v408_v52  ;;  %v1068_v57 = vadd.f32 %v1067_v55, %v1066_v51 }
 0x113   : > { %v1069_v59 = vpop.f32.mrf.mxu0 }
 0x114   : > { %746 = vst [vmem:[#allocation2] sm:$0xff] %v742_v56  ;;  %v735_v60 = vadd.f32 %v1100_v41, %v1068_v57 }
 0x115   : > { %v1070_v61 = vpop.f32.mrf.mxu0 }
 0x116   : > { %v743_v62 = vadd.f32 %v735_v60, %v409_v58  ;;  %v1071_v63 = vadd.f32 %v1070_v61, %v1069_v59 }
 0x118   : > { %747 = vst [vmem:[#allocation2 + $0x18] sm:$0xff] %v743_v62  ;;  %v738_v1 = vadd.f32 %v1101_v48, %v1071_v63  ;;  %752 = sbr.rel (%p1008_p11) target bundleno = 303 (0x12f), region = 74 }
 0x11a   : > { %v744_v2 = vadd.f32 %v738_v1, %v410_v0 }
 0x11c   : > { %748 = vst [vmem:[#allocation2 + $0x8] sm:$0xff] %v744_v2 }
 0x11d   : > { %v753_v3 = vld [vmem:[#allocation2 + $0x10] sm:$0xff]  ;;  %v754_v4 = vld [vmem:[#allocation2] sm:$0xff]  ;;  %v1042_v15 = vld [vmem:[%s1371_s4 + $0x8] sm:$0xff]  }
 0x11e   : > { %v1009_v5 = vld [vmem:[%s1369_s2] ss:$0 sm:$0xff]  ;;  %v1030_v19 = vunpack.c.l.bf16 %v1042_v15  ;;  %v1031_v21 = vunpack.c.h.bf16 %v1042_v15 }
 0x11f   : > { %v764_v6 = vmul.f32 %v1009_v5, %v753_v3  ;;  %v765_v7 = vmul.f32 %v1009_v5, %v754_v4  ;;  %v1010_v8 = vld [vmem:[%s1370_s3] ss:$0 sm:$0xff]  ;;  %v755_v10 = vld [vmem:[#allocation2 + $0x18] sm:$0xff] }
 0x120   : > { %v1025_v9 = vld [vmem:[%s1371_s4] sm:$0xff]   ;;  %v766_v14 = vmul.f32 %v1009_v5, %v755_v10 }
 0x121   : > { %v1026_v11 = vunpack.c.l.bf16 %v1025_v9  ;;  %v1027_v12 = vunpack.c.h.bf16 %v1025_v9  ;;  %v775_v16 = vadd.f32 %v1010_v8, %v764_v6  ;;  %v776_v17 = vadd.f32 %v1010_v8, %v765_v7 }
 0x122   : > { %v777_v20 = vadd.f32 %v1010_v8, %v766_v14 }
 0x123   : > { %v756_v13 = vld [vmem:[#allocation2 + $0x8] sm:$0xff]  ;;  %v787_v22 = vadd.f32 %v1026_v11, %v775_v16  ;;  %v788_v23 = vadd.f32 %v1027_v12, %v776_v17 }
 0x124   : > { %v767_v18 = vmul.f32 %v1009_v5, %v756_v13  ;;  %v789_v25 = vadd.f32 %v1030_v19, %v777_v20 }
 0x125   : > { %v791_v26 = vmax.f32 %v787_v22, 0.0  ;;  %v792_v27 = vmax.f32 %v788_v23, 0.0 }
 0x126   : > { %v778_v24 = vadd.f32 %v1010_v8, %v767_v18  ;;  %v793_v29 = vmax.f32 %v789_v25, 0.0 }
 0x127   : > { %v1035_v30 = vpack.c.bf16 %v792_v27, %v791_v26 }
 0x128   : > { %v790_v28 = vadd.f32 %v1031_v21, %v778_v24 }
 0x129   : > { %1036 = vst [vmem:[%s1372_s5] sm:$0xff] %v1035_v30  }
 0x12a   : > { %v794_v31 = vmax.f32 %v790_v28, 0.0 }
 0x12c   : > { %v1040_v32 = vpack.c.bf16 %v794_v31, %v793_v29 }
 0x12e   : > { %1043 = vst [vmem:[%s1372_s5 + $0x8] sm:$0xff] %v1040_v32  }
 0x12f PF: > { %s15_s22 = sadd.s32 1, %s1215_s22   ;;  %s1373_s18 = smov %s1203_s19 }
 0x130   : > { %p12_p12 = scmp.ge.s32.totalorder %s15_s22, 5   ;;  %s1374_s19 = smov %s1283_s26 }
 0x131   : > { %s1375_s20 = smov %s1211_s21  ;;  %s1376_s21 = smov %s1378_s23 }
 0x132   :  { %14 = sbr.rel (!%p12_p12) target bundleno = 3 (0x3), region = 127 }

// kernel: resnet_forward.21
= control target key start
LH: loop header
LB: loop body
LE: loop exit
PB: predicated region body
PF: predicated region fallthrough
CT: control target
= control target key end

     0   :  { %s1114_s15 = smov 0   ;;  %s1116_s16 = smov 0   ;;  %s1216_s0 = inlined_call_operand.vmem [shape: bf16[8,1152], index: 0, kind: input, shape index: {}]   ;;  %s1217_s1 = inlined_call_operand.vmem [shape: bf16[1152,256], index: 1, kind: input, shape index: {}]   ;;  %s1218_s2 = inlined_call_operand.vmem [shape: f32[1,256], index: 2, kind: input, shape index: {}]   ;;  %s1219_s3 = inlined_call_operand.vmem [shape: f32[1,256], index: 3, kind: input, shape index: {}]   ;;  %s1220_s4 = inlined_call_operand.vmem [shape: bf16[8,256], index: 4, kind: output, shape index: {}]  }
   0x1   :  { %s1118_s17 = smov 0  }
   0x2 LB: > { %s26_s18 = sadd.s32 1, %s1081_s16  ;;  %p898_p0 = scmp.ge.s32.totalorder %s1085_s17, 1  ;;  %s1085_s17 = sphi %s1118_s17, %s14_s17   ;;  %s1081_s16 = sphi %s1116_s16, %s1222_s16   ;;  %s1077_s15 = sphi %s1114_s15, %s1221_s15  }
   0x3   : > { %p27_p1 = scmp.ge.s32.totalorder %s26_s18, 3  ;;  %p229_p2 = scmp.lt.s32.totalorder %s1085_s17, 4 }
   0x5   : > { %s1224_s18 = smov (%p27_p1, %s26_s18), 0  ;;  %p230_p3 = pnand %p898_p0, %p229_p2 }
   0x6   : > { %s281_s19 = smul.u32 (!%p230_p3), 3, %s1077_s15  ;;  %p902_p6 = scmp.ne.s32.totalorder (!%p230_p3), %s1077_s15, 0 }
   0x7   : > { %233 = sbr.rel (%p230_p3) target bundleno = 304 (0x130), region = 36 }
   0x8   : > { %s291_s20 = smul.u32 (!%p230_p3), 48, %s1077_s15  ;;  %p284_p4 = scmp.lt.s32.totalorder (!%p230_p3), %s281_s19, 8 }
   0xa   : > { %p293_p5 = scmp.lt.s32.totalorder (!%p230_p3), %s291_s20, 143 }
   0xc   : > { %s1226_s19 = smov (!%p284_p4, %s281_s19), 8  ;;  %s1228_s20 = smov (!%p293_p5, %s291_s20), 143 }
   0xd   : > { %s899_s21 = sshll.u32 %s1226_s19, 2  ;;  %s960_s25 = sshll.u32 %s1228_s20, 3 }
   0xe   : > { %s1139_s24 = scalar_lea.vmem %s1216_s0, %s899_s21  ;;  %s1144_s28 = scalar_lea.vmem %s1217_s1, %s960_s25 }
   0xf   : > { %327 = sbr.rel (%p902_p6) target bundleno = 22 (0x16), region = 40 }
  0x14   : > { %v1087_v0 = vmov 0.0  }
  0x15   : > { %328 = vst [vmem:[#allocation2] sm:$0xff] %v1087_v0  ;;  %329 = vst [vmem:[#allocation2 + $0x8] sm:$0xff] %v1087_v0 }
  0x16 PF: > { %v988_v1 = vld [vmem:[%s1144_s28 + $0x74] ss:$8 sps:$4 sm:$0xff]   ;;  %v990_v2 = vld [vmem:[%s1144_s28 + $0x70] ss:$8 sps:$4 sm:$0xff]   ;;  %v1088_v3 = vmov 0   ;;  %v332_v34 = vld [vmem:[%s1139_s24] sm:$0xff] }
  0x17   : > { %706 = vmatprep.mubr.bf16.mxu1 %v1088_v3  ;;  %633 = vmatprep.subr.bf16.mxu0 %v988_v1  ;;  %v991_v4 = vld [vmem:[%s1144_s28 + $0x64] ss:$8 sps:$4 sm:$0xff]   ;;  %v993_v5 = vld [vmem:[%s1144_s28 + $0x60] ss:$8 sps:$4 sm:$0xff]   ;;  %v994_v6 = vld [vmem:[%s1144_s28 + $0x54] ss:$8 sps:$4 sm:$0xff]   ;;  %v904_v36 = vcombine.high %v332_v34, %v332_v34  ;;  %v903_v53 = vcombine.low %v332_v34, %v332_v34 }
  0x18   : > { %634 = vmatpush1.bf16.msra.mxu0 %v990_v2  ;;  %v996_v7 = vld [vmem:[%s1144_s28 + $0x50] ss:$8 sps:$4 sm:$0xff]   ;;  %v997_v8 = vld [vmem:[%s1144_s28 + $0x44] ss:$8 sps:$4 sm:$0xff]   ;;  %v1009_v9 = vld [vmem:[%s1144_s28 + $0x174] ss:$8 sps:$4 sm:$0xff]  }
  0x19   : > { %635 = vmatprep.subr.bf16.mxu0 %v991_v4  ;;  %v1011_v10 = vld [vmem:[%s1144_s28 + $0x170] ss:$8 sps:$4 sm:$0xff]   ;;  %v999_v11 = vld [vmem:[%s1144_s28 + $0x40] ss:$8 sps:$4 sm:$0xff]   ;;  %v1000_v12 = vld [vmem:[%s1144_s28 + $0x34] ss:$8 sps:$4 sm:$0xff]   ;;  %674 = vmatprep.subr.bf16.mxu1 %v1009_v9 }
  0x1a   : > { %v1015_v13 = vld [vmem:[%s1144_s28 + $0x164] ss:$8 sps:$4 sm:$0xff]   ;;  %675 = vmatpush1.bf16.msra.mxu1 %v1011_v10  ;;  %v1017_v14 = vld [vmem:[%s1144_s28 + $0x160] ss:$8 sps:$4 sm:$0xff]   ;;  %v1002_v15 = vld [vmem:[%s1144_s28 + $0x30] ss:$8 sps:$4 sm:$0xff]   ;;  %665 = vmatprep.mubr.bf16.mxu0 %v904_v36 }
  0x1b   : > { %676 = vmatprep.subr.bf16.mxu1 %v1015_v13  ;;  %v1021_v16 = vld [vmem:[%s1144_s28 + $0x154] ss:$8 sps:$4 sm:$0xff]   ;;  %v1003_v17 = vld [vmem:[%s1144_s28 + $0x24] ss:$8 sps:$4 sm:$0xff]   ;;  %v1023_v18 = vld [vmem:[%s1144_s28 + $0x150] ss:$8 sps:$4 sm:$0xff]  }
  0x1c   : > { %636 = vmatpush1.bf16.msra.mxu0 %v993_v5  ;;  %v1027_v19 = vld [vmem:[%s1144_s28 + $0x144] ss:$8 sps:$4 sm:$0xff]   ;;  %v1005_v20 = vld [vmem:[%s1144_s28 + $0x20] ss:$8 sps:$4 sm:$0xff]   ;;  %v1006_v21 = vld [vmem:[%s1144_s28 + $0x14] ss:$8 sps:$4 sm:$0xff]  }
  0x1d   : > { %637 = vmatprep.subr.bf16.mxu0 %v994_v6  ;;  %v1029_v22 = vld [vmem:[%s1144_s28 + $0x140] ss:$8 sps:$4 sm:$0xff]   ;;  %v1033_v23 = vld [vmem:[%s1144_s28 + $0x134] ss:$8 sps:$4 sm:$0xff]   ;;  %v1008_v24 = vld [vmem:[%s1144_s28 + $0x10] ss:$8 sps:$4 sm:$0xff]  }
  0x1e   : > { %677 = vmatpush1.bf16.msra.mxu1 %v1017_v14  ;;  %v1012_v25 = vld [vmem:[%s1144_s28 + $0x4] ss:$8 sps:$4 sm:$0xff]   ;;  %v1035_v26 = vld [vmem:[%s1144_s28 + $0x130] ss:$8 sps:$4 sm:$0xff]   ;;  %v1014_v28 = vld [vmem:[%s1144_s28] ss:$8 sps:$4 sm:$0xff]  }
  0x1f   : > { %678 = vmatprep.subr.bf16.mxu1 %v1021_v16  ;;  %v1039_v27 = vld [vmem:[%s1144_s28 + $0x124] ss:$8 sps:$4 sm:$0xff]   ;;  %v1018_v29 = vld [vmem:[%s1144_s28 + $0xf4] ss:$8 sps:$4 sm:$0xff]   ;;  %v1041_v30 = vld [vmem:[%s1144_s28 + $0x120] ss:$8 sps:$4 sm:$0xff]  }
  0x20   : > { %638 = vmatpush1.bf16.msra.mxu0 %v996_v7  ;;  %v1045_v31 = vld [vmem:[%s1144_s28 + $0x114] ss:$8 sps:$4 sm:$0xff]   ;;  %v1020_v32 = vld [vmem:[%s1144_s28 + $0xf0] ss:$8 sps:$4 sm:$0xff]   ;;  %v1024_v33 = vld [vmem:[%s1144_s28 + $0xe4] ss:$8 sps:$4 sm:$0xff]  }
  0x21   : > { %639 = vmatprep.subr.bf16.mxu0 %v997_v8  ;;  %v1047_v35 = vld [vmem:[%s1144_s28 + $0x110] ss:$8 sps:$4 sm:$0xff]   ;;  %v1051_v37 = vld [vmem:[%s1144_s28 + $0x104] ss:$8 sps:$4 sm:$0xff]   ;;  %v1026_v38 = vld [vmem:[%s1144_s28 + $0xe0] ss:$8 sps:$4 sm:$0xff]  }
  0x22   : > { %679 = vmatpush1.bf16.msra.mxu1 %v1023_v18  ;;  %v1030_v39 = vld [vmem:[%s1144_s28 + $0xd4] ss:$8 sps:$4 sm:$0xff]   ;;  %v1053_v40 = vld [vmem:[%s1144_s28 + $0x100] ss:$8 sps:$4 sm:$0xff]   ;;  %v1032_v41 = vld [vmem:[%s1144_s28 + $0xd0] ss:$8 sps:$4 sm:$0xff]  }
  0x23   : > { %680 = vmatprep.subr.bf16.mxu1 %v1027_v19  ;;  %v1036_v42 = vld [vmem:[%s1144_s28 + $0xc4] ss:$8 sps:$4 sm:$0xff]   ;;  %v1057_v43 = vld [vmem:[%s1139_s24 + $0x8] ss:$0 sps:$4 sm:$0xff]   ;;  %v1042_v45 = vld [vmem:[%s1144_s28 + $0xb4] ss:$8 sps:$4 sm:$0xff]  }
  0x24   : > { %640 = vmatpush1.bf16.msra.mxu0 %v999_v11  ;;  %v1038_v44 = vld [vmem:[%s1144_s28 + $0xc0] ss:$8 sps:$4 sm:$0xff]   ;;  %v1044_v46 = vld [vmem:[%s1144_s28 + $0xb0] ss:$8 sps:$4 sm:$0xff]   ;;  %v1048_v47 = vld [vmem:[%s1144_s28 + $0xa4] ss:$8 sps:$4 sm:$0xff]  }
  0x25   : > { %641 = vmatprep.subr.bf16.mxu0 %v1000_v12  ;;  %v1050_v48 = vld [vmem:[%s1144_s28 + $0xa0] ss:$8 sps:$4 sm:$0xff]   ;;  %v1054_v49 = vld [vmem:[%s1144_s28 + $0x94] ss:$8 sps:$4 sm:$0xff]   ;;  %v1056_v50 = vld [vmem:[%s1144_s28 + $0x90] ss:$8 sps:$4 sm:$0xff]  }
  0x26   : > { %681 = vmatpush1.bf16.msra.mxu1 %v1029_v22  ;;  %v1058_v51 = vld [vmem:[%s1144_s28 + $0x84] ss:$8 sps:$4 sm:$0xff]   ;;  %v1060_v52 = vld [vmem:[%s1144_s28 + $0x80] ss:$8 sps:$4 sm:$0xff]   ;;  %p954_p7 = scmp.ne.s32.totalorder %s1077_s15, 2 }
  0x27   : > { %682 = vmatprep.subr.bf16.mxu1 %v1033_v23  ;;  %v330_v58 = vld [vmem:[#allocation2] sm:$0xff]  ;;  %v331_v61 = vld [vmem:[#allocation2 + $0x8] sm:$0xff] }
  0x28   : > { %642 = vmatpush1.bf16.msra.mxu0 %v1002_v15 }
  0x29   : > { %643 = vmatprep.subr.bf16.mxu0 %v1003_v17 }
  0x2a   : > { %683 = vmatpush1.bf16.msra.mxu1 %v1035_v26 }
  0x2b   : > { %684 = vmatprep.subr.bf16.mxu1 %v1039_v27 }
  0x2c   : > { %644 = vmatpush1.bf16.msra.mxu0 %v1005_v20 }
  0x2d   : > { %645 = vmatprep.subr.bf16.mxu0 %v1006_v21 }
  0x2e   : > { %685 = vmatpush1.bf16.msra.mxu1 %v1041_v30 }
  0x2f   : > { %686 = vmatprep.subr.bf16.mxu1 %v1045_v31 }
  0x30   : > { %646 = vmatpush1.bf16.msra.mxu0 %v1008_v24 }
  0x31   : > { %647 = vmatprep.subr.bf16.mxu0 %v1012_v25 }
  0x32   : > { %687 = vmatpush1.bf16.msra.mxu1 %v1047_v35 }
  0x33   : > { %688 = vmatprep.subr.bf16.mxu1 %v1051_v37 }
  0x34   : > { %648 = vmatpush1.bf16.msra.mxu0 %v1014_v28 }
  0x35   : > { %649 = vmatprep.subr.bf16.mxu0 %v1018_v29 }
  0x36   : > { %689 = vmatpush1.bf16.msra.mxu1 %v1053_v40 }
  0x38   : > { %650 = vmatpush2.bf16.msra.mxu0 %v1020_v32 }
  0x39   : > { %651 = vmatprep.subr.bf16.mxu0 %v1024_v33  ;;  %707 = vmatmul.mubr.bf16.vlgmr.msra.gmra.mxu1 %v1057_v43 }
  0x3c   : > { %652 = vmatpush2.bf16.msra.mxu0 %v1026_v38 }
  0x3d   : > { %653 = vmatprep.subr.bf16.mxu0 %v1030_v39 }
  0x40   : > { %654 = vmatpush2.bf16.msra.mxu0 %v1032_v41 }
  0x41   : > { %655 = vmatprep.subr.bf16.mxu0 %v1036_v42 }
  0x44   : > { %656 = vmatpush2.bf16.msra.mxu0 %v1038_v44 }
  0x45   : > { %657 = vmatprep.subr.bf16.mxu0 %v1042_v45 }
  0x48   : > { %658 = vmatpush2.bf16.msra.mxu0 %v1044_v46 }
  0x49   : > { %659 = vmatprep.subr.bf16.mxu0 %v1048_v47 }
  0x4c   : > { %660 = vmatpush2.bf16.msra.mxu0 %v1050_v48 }
  0x4d   : > { %661 = vmatprep.subr.bf16.mxu0 %v1054_v49 }
  0x50   : > { %662 = vmatpush2.bf16.msra.mxu0 %v1056_v50 }
  0x51   : > { %663 = vmatprep.subr.bf16.mxu0 %v1058_v51 }
  0x54   : > { %664 = vmatpush2.bf16.msra.mxu0 %v1060_v52 }
  0x57   : > { %666 = vmatmul.mubr.bf16.vlgmr.msra.gmra.mxu0 %v903_v53 }
  0xf9   : > { %v708_v54 = vpop.f32.mrf.mxu1 }
  0xfb   : > { %v710_v55 = vpop.f32.mrf.mxu1 }
  0xfd   : > { %v712_v56 = vpop.f32.mrf.mxu1 }
  0xff   : > { %v713_v57 = vpop.f32.mrf.mxu1 }
 0x117   : > { %v667_v59 = vpop.f32.mrf.mxu0 }
 0x118   : > { %v709_v60 = vadd.f32 %v708_v54, %v667_v59 }
 0x119   : > { %v669_v62 = vpop.f32.mrf.mxu0 }
 0x11a   : > { %v715_v63 = vadd.f32 %v709_v60, %v330_v58  ;;  %v711_v0 = vadd.f32 %v710_v55, %v669_v62  ;;  %722 = sbr.rel (%p954_p7) target bundleno = 304 (0x130), region = 44 }
 0x11b   : > { %v671_v1 = vpop.f32.mrf.mxu0 }
 0x11c   : > { %717 = vst [vmem:[#allocation2] sm:$0xff] %v715_v63  ;;  %v716_v2 = vadd.f32 %v711_v0, %v331_v61 }
 0x11d   : > { %v672_v3 = vpop.f32.mrf.mxu0 }
 0x11e   : > { %718 = vst [vmem:[#allocation2 + $0x8] sm:$0xff] %v716_v2 }
 0x11f   : > { %v727_v4 = vlaneseq  ;;  %v725_v6 = vld [vmem:[%s1218_s2] sm:$0x3] }
 0x120   : > { %v739_v7 = vld [vmem:[%s1219_s3] sm:$0x3] }
 0x121   : > { %v728_v5 = vshrl.u32 %v727_v4, 7 }
 0x123   : > { %v729_v8 = vsub.s32 0, %v728_v5  ;;  %v733_v9 = vsub.s32 1, %v728_v5  ;;  %v723_v10 = vld [vmem:[#allocation2] sm:$0xff] }
 0x125   : > { %v724_v11 = vld [vmem:[#allocation2 + $0x8] sm:$0xff]  ;;  %v730_v12 = vrot.slane %v725_v6, %v729_v8  ;;  %v734_v13 = vrot.slane %v725_v6, %v733_v9  ;;  %v744_v14 = vrot.slane %v739_v7, %v729_v8  ;;  %v748_v15 = vrot.slane %v739_v7, %v733_v9 }
 0x127   : > { %v737_v16 = vmul.f32 %v730_v12, %v723_v10  ;;  %v738_v17 = vmul.f32 %v734_v13, %v724_v11 }
 0x129   : > { %v751_v18 = vadd.f32 %v744_v14, %v737_v16  ;;  %v752_v19 = vadd.f32 %v748_v15, %v738_v17 }
 0x12b   : > { %v753_v20 = vmax.f32 %v751_v18, 0.0  ;;  %v754_v21 = vmax.f32 %v752_v19, 0.0 }
 0x12d   : > { %v961_v22 = vpack.c.bf16 %v754_v21, %v753_v20 }
 0x12f   : > { %763 = vst [vmem:[%s1220_s4] sm:$0xff] %v961_v22 }
 0x130 PF: > { %s14_s17 = sadd.s32 1, %s1085_s17   ;;  %s1221_s15 = smov %s1081_s16 }
 0x131   : > { %p11_p8 = scmp.ge.s32.totalorder %s14_s17, 5   ;;  %s1222_s16 = smov %s1224_s18 }
 0x133   :  { %13 = sbr.rel (!%p11_p8) target bundleno = 2 (0x2), region = 83 }

// kernel: resnet_forward.22
= control target key start
LH: loop header
LB: loop body
LE: loop exit
PB: predicated region body
PF: predicated region fallthrough
CT: control target
= control target key end

     0   :  { %v257_v1 = vmov 0   ;;  %v175_v18 = vlaneseq  ;;  %s343_s1 = inlined_call_operand.vmem [shape: bf16[128,256], index: 1, kind: input, shape index: {}]   ;;  %s344_s0 = inlined_call_operand.vmem [shape: bf16[8,128], index: 0, kind: input, shape index: {}]   ;;  %s345_s2 = inlined_call_operand.vmem [shape: f32[1,256], index: 2, kind: input, shape index: {}]   ;;  %s346_s3 = inlined_call_operand.vmem [shape: f32[1,256], index: 3, kind: input, shape index: {}]   ;;  %s347_s4 = inlined_call_operand.vmem [shape: bf16[8,256], index: 4, kind: output, shape index: {}]  }
   0x1   :  { %v233_v0 = vld [vmem:[%s343_s1 + $0x74] ss:$8 sps:$4 sm:$0xff]   ;;  %155 = vmatprep.mubr.bf16.mxu0 %v257_v1  ;;  %v235_v2 = vld [vmem:[%s343_s1 + $0x70] ss:$8 sps:$4 sm:$0xff]   ;;  %v236_v3 = vld [vmem:[%s343_s1 + $0x64] ss:$8 sps:$4 sm:$0xff]  }
   0x2   :  { %123 = vmatprep.subr.bf16.mxu0 %v233_v0  ;;  %v238_v4 = vld [vmem:[%s343_s1 + $0x60] ss:$8 sps:$4 sm:$0xff]   ;;  %v239_v5 = vld [vmem:[%s343_s1 + $0x54] ss:$8 sps:$4 sm:$0xff]   ;;  %v241_v6 = vld [vmem:[%s343_s1 + $0x50] ss:$8 sps:$4 sm:$0xff]  }
   0x3   :  { %124 = vmatpush1.bf16.msra.mxu0 %v235_v2  ;;  %v242_v7 = vld [vmem:[%s343_s1 + $0x44] ss:$8 sps:$4 sm:$0xff]   ;;  %v244_v8 = vld [vmem:[%s343_s1 + $0x40] ss:$8 sps:$4 sm:$0xff]   ;;  %v245_v9 = vld [vmem:[%s343_s1 + $0x34] ss:$8 sps:$4 sm:$0xff]  }
   0x4   :  { %125 = vmatprep.subr.bf16.mxu0 %v236_v3  ;;  %v247_v10 = vld [vmem:[%s343_s1 + $0x30] ss:$8 sps:$4 sm:$0xff]   ;;  %v248_v11 = vld [vmem:[%s343_s1 + $0x24] ss:$8 sps:$4 sm:$0xff]   ;;  %v250_v12 = vld [vmem:[%s343_s1 + $0x20] ss:$8 sps:$4 sm:$0xff]  }
   0x5   :  { %v251_v13 = vld [vmem:[%s343_s1 + $0x14] ss:$8 sps:$4 sm:$0xff]   ;;  %v253_v14 = vld [vmem:[%s343_s1 + $0x10] ss:$8 sps:$4 sm:$0xff]   ;;  %v254_v15 = vld [vmem:[%s343_s1 + $0x4] ss:$8 sps:$4 sm:$0xff]  }
   0x6   :  { %v256_v16 = vld [vmem:[%s343_s1] ss:$8 sps:$4 sm:$0xff]   ;;  %v176_v19 = vshrl.u32 %v175_v18, 7 }
   0x7   :  { %126 = vmatpush1.bf16.msra.mxu0 %v238_v4  ;;  %v26_v17 = vld [vmem:[%s344_s0] sm:$0xf] }
   0x8   :  { %127 = vmatprep.subr.bf16.mxu0 %v239_v5  ;;  %v177_v20 = vsub.s32 0, %v176_v19  ;;  %v173_v21 = vld [vmem:[%s345_s2] sm:$0x3]  ;;  %v181_v22 = vsub.s32 1, %v176_v19 }
   0x9   :  { %v187_v24 = vld [vmem:[%s346_s3] sm:$0x3] }
   0xa   :  { %v178_v23 = vrot.slane %v173_v21, %v177_v20  ;;  %v182_v25 = vrot.slane %v173_v21, %v181_v22  ;;  %v192_v28 = vrot.slane %v187_v24, %v177_v20  ;;  %v196_v29 = vrot.slane %v187_v24, %v181_v22 }
   0xb   :  { %128 = vmatpush1.bf16.msra.mxu0 %v241_v6 }
   0xc   :  { %129 = vmatprep.subr.bf16.mxu0 %v242_v7 }
   0xf   :  { %130 = vmatpush1.bf16.msra.mxu0 %v244_v8 }
  0x10   :  { %131 = vmatprep.subr.bf16.mxu0 %v245_v9 }
  0x13   :  { %132 = vmatpush1.bf16.msra.mxu0 %v247_v10 }
  0x14   :  { %133 = vmatprep.subr.bf16.mxu0 %v248_v11 }
  0x17   :  { %134 = vmatpush1.bf16.msra.mxu0 %v250_v12 }
  0x18   :  { %135 = vmatprep.subr.bf16.mxu0 %v251_v13 }
  0x1b   :  { %136 = vmatpush1.bf16.msra.mxu0 %v253_v14 }
  0x1c   :  { %137 = vmatprep.subr.bf16.mxu0 %v254_v15 }
  0x1f   :  { %138 = vmatpush1.bf16.msra.mxu0 %v256_v16 }
  0x22   :  { %156 = vmatmul.mubr.bf16.vlgmr.msra.gmra.mxu0 %v26_v17 }
  0xe2   :  { %v157_v26 = vpop.f32.mrf.mxu0 }
  0xe3   :  { %v185_v27 = vmul.f32 %v178_v23, %v157_v26 }
  0xe4   :  { %v159_v30 = vpop.f32.mrf.mxu0 }
  0xe5   :  { %v186_v31 = vmul.f32 %v182_v25, %v159_v30  ;;  %v199_v33 = vadd.f32 %v192_v28, %v185_v27 }
  0xe6   :  { %v161_v32 = vpop.f32.mrf.mxu0 }
  0xe7   :  { %v200_v34 = vadd.f32 %v196_v29, %v186_v31 }
  0xe8   :  { %v162_v35 = vpop.f32.mrf.mxu0 }
  0xe9   :  { %v231_v36 = vpack.c.bf16 %v200_v34, %v199_v33 }
  0xeb   :  { %209 = vst [vmem:[%s347_s4] sm:$0xff] %v231_v36 }

// kernel: resnet_forward.23
= control target key start
LH: loop header
LB: loop body
LE: loop exit
PB: predicated region body
PF: predicated region fallthrough
CT: control target
= control target key end

     0   :  { %s1209_s18 = smov 0   ;;  %s1211_s19 = smov 0   ;;  %s1314_s0 = inlined_call_operand.vmem [shape: bf16[8,2304], index: 0, kind: input, shape index: {}]   ;;  %s1315_s1 = inlined_call_operand.vmem [shape: bf16[2304,256], index: 1, kind: input, shape index: {}]   ;;  %s1316_s2 = inlined_call_operand.vmem [shape: f32[1,256], index: 2, kind: input, shape index: {}]   ;;  %s1317_s3 = inlined_call_operand.vmem [shape: f32[1,256], index: 3, kind: input, shape index: {}]   ;;  %s1318_s4 = inlined_call_operand.vmem [shape: bf16[8,256], index: 4, kind: input, shape index: {}]   ;;  %s1319_s5 = inlined_call_operand.vmem [shape: bf16[8,256], index: 5, kind: output, shape index: {}]  }
   0x1   :  { %s1213_s20 = smov 0  }
   0x2 LB: > { %s27_s21 = sadd.s32 1, %s1171_s19  ;;  %p988_p0 = scmp.ge.s32.totalorder %s1175_s20, 1  ;;  %s1175_s20 = sphi %s1213_s20, %s15_s20   ;;  %s1171_s19 = sphi %s1211_s19, %s1321_s19   ;;  %s1167_s18 = sphi %s1209_s18, %s1320_s18  }
   0x3   : > { %p28_p1 = scmp.ge.s32.totalorder %s27_s21, 6  ;;  %p271_p2 = scmp.lt.s32.totalorder %s1175_s20, 7 }
   0x5   : > { %s1323_s21 = smov (%p28_p1, %s27_s21), 0  ;;  %p272_p3 = pnand %p988_p0, %p271_p2 }
   0x6   : > { %s334_s22 = smul.u32 (!%p272_p3), 3, %s1167_s18  ;;  %p992_p6 = scmp.ne.s32.totalorder (!%p272_p3), %s1167_s18, 0 }
   0x7   : > { %275 = sbr.rel (%p272_p3) target bundleno = 306 (0x132), region = 40 }
   0x8   : > { %s344_s23 = smul.u32 (!%p272_p3), 48, %s1167_s18  ;;  %p337_p4 = scmp.lt.s32.totalorder (!%p272_p3), %s334_s22, 17 }
   0xa   : > { %p346_p5 = scmp.lt.s32.totalorder (!%p272_p3), %s344_s23, 287 }
   0xc   : > { %s1325_s22 = smov (!%p337_p4, %s334_s22), 17  ;;  %s1327_s23 = smov (!%p346_p5, %s344_s23), 287 }
   0xd   : > { %s989_s24 = sshll.u32 %s1325_s22, 2  ;;  %s1050_s28 = sshll.u32 %s1327_s23, 3 }
   0xe   : > { %s1234_s27 = scalar_lea.vmem %s1314_s0, %s989_s24  ;;  %s1239_s6 = scalar_lea.vmem %s1315_s1, %s1050_s28 }
   0xf   : > { %390 = sbr.rel (%p992_p6) target bundleno = 22 (0x16), region = 44 }
  0x14   : > { %v1177_v0 = vmov 0.0  }
  0x15   : > { %391 = vst [vmem:[#allocation2] sm:$0xff] %v1177_v0  ;;  %392 = vst [vmem:[#allocation2 + $0x8] sm:$0xff] %v1177_v0 }
  0x16 PF: > { %v1078_v1 = vld [vmem:[%s1239_s6 + $0x74] ss:$8 sps:$4 sm:$0xff]   ;;  %v1080_v2 = vld [vmem:[%s1239_s6 + $0x70] ss:$8 sps:$4 sm:$0xff]   ;;  %v1178_v3 = vmov 0   ;;  %v395_v34 = vld [vmem:[%s1234_s27] sm:$0xff] }
  0x17   : > { %769 = vmatprep.mubr.bf16.mxu1 %v1178_v3  ;;  %696 = vmatprep.subr.bf16.mxu0 %v1078_v1  ;;  %v1081_v4 = vld [vmem:[%s1239_s6 + $0x64] ss:$8 sps:$4 sm:$0xff]   ;;  %v1083_v5 = vld [vmem:[%s1239_s6 + $0x60] ss:$8 sps:$4 sm:$0xff]   ;;  %v1084_v6 = vld [vmem:[%s1239_s6 + $0x54] ss:$8 sps:$4 sm:$0xff]   ;;  %v994_v36 = vcombine.high %v395_v34, %v395_v34  ;;  %v993_v53 = vcombine.low %v395_v34, %v395_v34 }
  0x18   : > { %697 = vmatpush1.bf16.msra.mxu0 %v1080_v2  ;;  %v1086_v7 = vld [vmem:[%s1239_s6 + $0x50] ss:$8 sps:$4 sm:$0xff]   ;;  %v1087_v8 = vld [vmem:[%s1239_s6 + $0x44] ss:$8 sps:$4 sm:$0xff]   ;;  %v1099_v9 = vld [vmem:[%s1239_s6 + $0x174] ss:$8 sps:$4 sm:$0xff]  }
  0x19   : > { %698 = vmatprep.subr.bf16.mxu0 %v1081_v4  ;;  %v1101_v10 = vld [vmem:[%s1239_s6 + $0x170] ss:$8 sps:$4 sm:$0xff]   ;;  %v1089_v11 = vld [vmem:[%s1239_s6 + $0x40] ss:$8 sps:$4 sm:$0xff]   ;;  %v1090_v12 = vld [vmem:[%s1239_s6 + $0x34] ss:$8 sps:$4 sm:$0xff]   ;;  %737 = vmatprep.subr.bf16.mxu1 %v1099_v9 }
  0x1a   : > { %v1105_v13 = vld [vmem:[%s1239_s6 + $0x164] ss:$8 sps:$4 sm:$0xff]   ;;  %738 = vmatpush1.bf16.msra.mxu1 %v1101_v10  ;;  %v1107_v14 = vld [vmem:[%s1239_s6 + $0x160] ss:$8 sps:$4 sm:$0xff]   ;;  %v1092_v15 = vld [vmem:[%s1239_s6 + $0x30] ss:$8 sps:$4 sm:$0xff]   ;;  %728 = vmatprep.mubr.bf16.mxu0 %v994_v36 }
  0x1b   : > { %739 = vmatprep.subr.bf16.mxu1 %v1105_v13  ;;  %v1111_v16 = vld [vmem:[%s1239_s6 + $0x154] ss:$8 sps:$4 sm:$0xff]   ;;  %v1093_v17 = vld [vmem:[%s1239_s6 + $0x24] ss:$8 sps:$4 sm:$0xff]   ;;  %v1113_v18 = vld [vmem:[%s1239_s6 + $0x150] ss:$8 sps:$4 sm:$0xff]  }
  0x1c   : > { %699 = vmatpush1.bf16.msra.mxu0 %v1083_v5  ;;  %v1117_v19 = vld [vmem:[%s1239_s6 + $0x144] ss:$8 sps:$4 sm:$0xff]   ;;  %v1095_v20 = vld [vmem:[%s1239_s6 + $0x20] ss:$8 sps:$4 sm:$0xff]   ;;  %v1096_v21 = vld [vmem:[%s1239_s6 + $0x14] ss:$8 sps:$4 sm:$0xff]  }
  0x1d   : > { %700 = vmatprep.subr.bf16.mxu0 %v1084_v6  ;;  %v1119_v22 = vld [vmem:[%s1239_s6 + $0x140] ss:$8 sps:$4 sm:$0xff]   ;;  %v1123_v23 = vld [vmem:[%s1239_s6 + $0x134] ss:$8 sps:$4 sm:$0xff]   ;;  %v1098_v24 = vld [vmem:[%s1239_s6 + $0x10] ss:$8 sps:$4 sm:$0xff]  }
  0x1e   : > { %740 = vmatpush1.bf16.msra.mxu1 %v1107_v14  ;;  %v1102_v25 = vld [vmem:[%s1239_s6 + $0x4] ss:$8 sps:$4 sm:$0xff]   ;;  %v1125_v26 = vld [vmem:[%s1239_s6 + $0x130] ss:$8 sps:$4 sm:$0xff]   ;;  %v1104_v28 = vld [vmem:[%s1239_s6] ss:$8 sps:$4 sm:$0xff]  }
  0x1f   : > { %741 = vmatprep.subr.bf16.mxu1 %v1111_v16  ;;  %v1129_v27 = vld [vmem:[%s1239_s6 + $0x124] ss:$8 sps:$4 sm:$0xff]   ;;  %v1108_v29 = vld [vmem:[%s1239_s6 + $0xf4] ss:$8 sps:$4 sm:$0xff]   ;;  %v1131_v30 = vld [vmem:[%s1239_s6 + $0x120] ss:$8 sps:$4 sm:$0xff]  }
  0x20   : > { %701 = vmatpush1.bf16.msra.mxu0 %v1086_v7  ;;  %v1135_v31 = vld [vmem:[%s1239_s6 + $0x114] ss:$8 sps:$4 sm:$0xff]   ;;  %v1110_v32 = vld [vmem:[%s1239_s6 + $0xf0] ss:$8 sps:$4 sm:$0xff]   ;;  %v1114_v33 = vld [vmem:[%s1239_s6 + $0xe4] ss:$8 sps:$4 sm:$0xff]  }
  0x21   : > { %702 = vmatprep.subr.bf16.mxu0 %v1087_v8  ;;  %v1137_v35 = vld [vmem:[%s1239_s6 + $0x110] ss:$8 sps:$4 sm:$0xff]   ;;  %v1141_v37 = vld [vmem:[%s1239_s6 + $0x104] ss:$8 sps:$4 sm:$0xff]   ;;  %v1116_v38 = vld [vmem:[%s1239_s6 + $0xe0] ss:$8 sps:$4 sm:$0xff]  }
  0x22   : > { %742 = vmatpush1.bf16.msra.mxu1 %v1113_v18  ;;  %v1120_v39 = vld [vmem:[%s1239_s6 + $0xd4] ss:$8 sps:$4 sm:$0xff]   ;;  %v1143_v40 = vld [vmem:[%s1239_s6 + $0x100] ss:$8 sps:$4 sm:$0xff]   ;;  %v1122_v41 = vld [vmem:[%s1239_s6 + $0xd0] ss:$8 sps:$4 sm:$0xff]  }
  0x23   : > { %743 = vmatprep.subr.bf16.mxu1 %v1117_v19  ;;  %v1126_v42 = vld [vmem:[%s1239_s6 + $0xc4] ss:$8 sps:$4 sm:$0xff]   ;;  %v1147_v43 = vld [vmem:[%s1234_s27 + $0x8] ss:$0 sps:$4 sm:$0xff]   ;;  %v1132_v45 = vld [vmem:[%s1239_s6 + $0xb4] ss:$8 sps:$4 sm:$0xff]  }
  0x24   : > { %703 = vmatpush1.bf16.msra.mxu0 %v1089_v11  ;;  %v1128_v44 = vld [vmem:[%s1239_s6 + $0xc0] ss:$8 sps:$4 sm:$0xff]   ;;  %v1134_v46 = vld [vmem:[%s1239_s6 + $0xb0] ss:$8 sps:$4 sm:$0xff]   ;;  %v1138_v47 = vld [vmem:[%s1239_s6 + $0xa4] ss:$8 sps:$4 sm:$0xff]  }
  0x25   : > { %704 = vmatprep.subr.bf16.mxu0 %v1090_v12  ;;  %v1140_v48 = vld [vmem:[%s1239_s6 + $0xa0] ss:$8 sps:$4 sm:$0xff]   ;;  %v1144_v49 = vld [vmem:[%s1239_s6 + $0x94] ss:$8 sps:$4 sm:$0xff]   ;;  %v1146_v50 = vld [vmem:[%s1239_s6 + $0x90] ss:$8 sps:$4 sm:$0xff]  }
  0x26   : > { %744 = vmatpush1.bf16.msra.mxu1 %v1119_v22  ;;  %v1148_v51 = vld [vmem:[%s1239_s6 + $0x84] ss:$8 sps:$4 sm:$0xff]   ;;  %v1150_v52 = vld [vmem:[%s1239_s6 + $0x80] ss:$8 sps:$4 sm:$0xff]   ;;  %p1044_p7 = scmp.ne.s32.totalorder %s1167_s18, 5 }
  0x27   : > { %745 = vmatprep.subr.bf16.mxu1 %v1123_v23  ;;  %v393_v58 = vld [vmem:[#allocation2] sm:$0xff]  ;;  %v394_v61 = vld [vmem:[#allocation2 + $0x8] sm:$0xff] }
  0x28   : > { %705 = vmatpush1.bf16.msra.mxu0 %v1092_v15 }
  0x29   : > { %706 = vmatprep.subr.bf16.mxu0 %v1093_v17 }
  0x2a   : > { %746 = vmatpush1.bf16.msra.mxu1 %v1125_v26 }
  0x2b   : > { %747 = vmatprep.subr.bf16.mxu1 %v1129_v27 }
  0x2c   : > { %707 = vmatpush1.bf16.msra.mxu0 %v1095_v20 }
  0x2d   : > { %708 = vmatprep.subr.bf16.mxu0 %v1096_v21 }
  0x2e   : > { %748 = vmatpush1.bf16.msra.mxu1 %v1131_v30 }
  0x2f   : > { %749 = vmatprep.subr.bf16.mxu1 %v1135_v31 }
  0x30   : > { %709 = vmatpush1.bf16.msra.mxu0 %v1098_v24 }
  0x31   : > { %710 = vmatprep.subr.bf16.mxu0 %v1102_v25 }
  0x32   : > { %750 = vmatpush1.bf16.msra.mxu1 %v1137_v35 }
  0x33   : > { %751 = vmatprep.subr.bf16.mxu1 %v1141_v37 }
  0x34   : > { %711 = vmatpush1.bf16.msra.mxu0 %v1104_v28 }
  0x35   : > { %712 = vmatprep.subr.bf16.mxu0 %v1108_v29 }
  0x36   : > { %752 = vmatpush1.bf16.msra.mxu1 %v1143_v40 }
  0x38   : > { %713 = vmatpush2.bf16.msra.mxu0 %v1110_v32 }
  0x39   : > { %714 = vmatprep.subr.bf16.mxu0 %v1114_v33  ;;  %770 = vmatmul.mubr.bf16.vlgmr.msra.gmra.mxu1 %v1147_v43 }
  0x3c   : > { %715 = vmatpush2.bf16.msra.mxu0 %v1116_v38 }
  0x3d   : > { %716 = vmatprep.subr.bf16.mxu0 %v1120_v39 }
  0x40   : > { %717 = vmatpush2.bf16.msra.mxu0 %v1122_v41 }
  0x41   : > { %718 = vmatprep.subr.bf16.mxu0 %v1126_v42 }
  0x44   : > { %719 = vmatpush2.bf16.msra.mxu0 %v1128_v44 }
  0x45   : > { %720 = vmatprep.subr.bf16.mxu0 %v1132_v45 }
  0x48   : > { %721 = vmatpush2.bf16.msra.mxu0 %v1134_v46 }
  0x49   : > { %722 = vmatprep.subr.bf16.mxu0 %v1138_v47 }
  0x4c   : > { %723 = vmatpush2.bf16.msra.mxu0 %v1140_v48 }
  0x4d   : > { %724 = vmatprep.subr.bf16.mxu0 %v1144_v49 }
  0x50   : > { %725 = vmatpush2.bf16.msra.mxu0 %v1146_v50 }
  0x51   : > { %726 = vmatprep.subr.bf16.mxu0 %v1148_v51 }
  0x54   : > { %727 = vmatpush2.bf16.msra.mxu0 %v1150_v52 }
  0x57   : > { %729 = vmatmul.mubr.bf16.vlgmr.msra.gmra.mxu0 %v993_v53 }
  0xf9   : > { %v771_v54 = vpop.f32.mrf.mxu1 }
  0xfb   : > { %v773_v55 = vpop.f32.mrf.mxu1 }
  0xfd   : > { %v775_v56 = vpop.f32.mrf.mxu1 }
  0xff   : > { %v776_v57 = vpop.f32.mrf.mxu1 }
 0x117   : > { %v730_v59 = vpop.f32.mrf.mxu0 }
 0x118   : > { %v772_v60 = vadd.f32 %v771_v54, %v730_v59 }
 0x119   : > { %v732_v62 = vpop.f32.mrf.mxu0 }
 0x11a   : > { %v778_v63 = vadd.f32 %v772_v60, %v393_v58  ;;  %v774_v0 = vadd.f32 %v773_v55, %v732_v62  ;;  %785 = sbr.rel (%p1044_p7) target bundleno = 306 (0x132), region = 48 }
 0x11b   : > { %v734_v1 = vpop.f32.mrf.mxu0 }
 0x11c   : > { %780 = vst [vmem:[#allocation2] sm:$0xff] %v778_v63  ;;  %v779_v2 = vadd.f32 %v774_v0, %v394_v61 }
 0x11d   : > { %v735_v3 = vpop.f32.mrf.mxu0 }
 0x11e   : > { %781 = vst [vmem:[#allocation2 + $0x8] sm:$0xff] %v779_v2 }
 0x11f   : > { %v790_v4 = vlaneseq  ;;  %v788_v6 = vld [vmem:[%s1316_s2] sm:$0x3] }
 0x120   : > { %v802_v7 = vld [vmem:[%s1317_s3] sm:$0x3] }
 0x121   : > { %v791_v5 = vshrl.u32 %v790_v4, 7  ;;  %v816_v12 = vld [vmem:[%s1318_s4] sm:$0xff] }
 0x122   : > { %v817_v19 = vunpack.c.l.bf16 %v816_v12  ;;  %v818_v20 = vunpack.c.h.bf16 %v816_v12 }
 0x123   : > { %v792_v8 = vsub.s32 0, %v791_v5  ;;  %v796_v9 = vsub.s32 1, %v791_v5  ;;  %v786_v10 = vld [vmem:[#allocation2] sm:$0xff] }
 0x125   : > { %v787_v11 = vld [vmem:[#allocation2 + $0x8] sm:$0xff]  ;;  %v793_v13 = vrot.slane %v788_v6, %v792_v8  ;;  %v797_v14 = vrot.slane %v788_v6, %v796_v9  ;;  %v807_v15 = vrot.slane %v802_v7, %v792_v8  ;;  %v811_v16 = vrot.slane %v802_v7, %v796_v9 }
 0x127   : > { %v800_v17 = vmul.f32 %v793_v13, %v786_v10  ;;  %v801_v18 = vmul.f32 %v797_v14, %v787_v11 }
 0x129   : > { %v814_v21 = vadd.f32 %v807_v15, %v800_v17  ;;  %v815_v22 = vadd.f32 %v811_v16, %v801_v18 }
 0x12b   : > { %v819_v23 = vadd.f32 %v817_v19, %v814_v21  ;;  %v820_v24 = vadd.f32 %v818_v20, %v815_v22 }
 0x12d   : > { %v821_v25 = vmax.f32 %v819_v23, 0.0  ;;  %v822_v26 = vmax.f32 %v820_v24, 0.0 }
 0x12f   : > { %v1051_v27 = vpack.c.bf16 %v822_v26, %v821_v25 }
 0x131   : > { %831 = vst [vmem:[%s1319_s5] sm:$0xff] %v1051_v27 }
 0x132 PF: > { %s15_s20 = sadd.s32 1, %s1175_s20   ;;  %s1320_s18 = smov %s1171_s19 }
 0x133   : > { %p12_p8 = scmp.ge.s32.totalorder %s15_s20, 8   ;;  %s1321_s19 = smov %s1323_s21 }
 0x135   :  { %14 = sbr.rel (!%p12_p8) target bundleno = 2 (0x2), region = 90 }

// kernel: resnet_forward.24
= control target key start
LH: loop header
LB: loop body
LE: loop exit
PB: predicated region body
PF: predicated region fallthrough
CT: control target
= control target key end

     0   :  { %s1395_s15 = smov 0   ;;  %s1397_s16 = smov 0   ;;  %s1667_s0 = inlined_call_operand.vmem [shape: bf16[8,2304], index: 0, kind: input, shape index: {}]   ;;  %s1668_s1 = inlined_call_operand.vmem [shape: bf16[2304,512], index: 1, kind: input, shape index: {}]   ;;  %s1669_s2 = inlined_call_operand.vmem [shape: f32[1,512], index: 2, kind: input, shape index: {}]   ;;  %s1670_s3 = inlined_call_operand.vmem [shape: f32[1,512], index: 3, kind: input, shape index: {}]   ;;  %s1671_s4 = inlined_call_operand.vmem [shape: bf16[8,512], index: 4, kind: output, shape index: {}]  }
   0x1   :  { %s1399_s17 = smov 0   ;;  %s1401_s18 = smov 0  }
   0x2   :  { %s1403_s19 = smov 0   ;;  %s1405_s20 = smov 0  }
   0x3   :  { %s1407_s21 = smov 0  }
   0x4 LB: > { %s26_s22 = sadd.s32 1, %s1358_s19  ;;  %s29_s23 = sadd.s32 1, %s1362_s20  ;;  %s1366_s21 = sphi %s1407_s21, %s14_s21   ;;  %s1362_s20 = sphi %s1405_s20, %s1677_s20   ;;  %s1358_s19 = sphi %s1403_s19, %s1676_s19   ;;  %s1354_s18 = sphi %s1401_s18, %s1675_s18   ;;  %s1350_s17 = sphi %s1399_s17, %s1674_s17   ;;  %s1346_s16 = sphi %s1397_s16, %s1673_s16   ;;  %s1342_s15 = sphi %s1395_s15, %s1672_s15  }
   0x5   : > { %p27_p0 = scmp.ge.s32.totalorder %s26_s22, 6  ;;  %p77_p1 = scmp.ne.s32.totalorder %s1346_s16, %s1342_s15 }
   0x6   : > { %p78_p2 = scmp.eq.s32.totalorder %s1366_s21, 0  ;;  %s70_s27 = sadd.s32 1, %s1346_s16 }
   0x7   : > { %s1679_s22 = smov (%p27_p0, %s26_s22), 0  ;;  %s1681_s23 = smov (!%p27_p0, %s29_s23), %s1362_s20 }
   0x8   : > { %p79_p3 = por %p78_p2, %p77_p1  ;;  %p31_p4 = scmp.ge.s32.totalorder %s1681_s23, 2 }
   0x9   : > { %s65_s24 = ssub.s32 %s1358_s19, %s1679_s22  ;;  %p1109_p6 = scmp.ge.s32.totalorder %s1366_s21, 12 }
   0xa   : > { %s1683_s23 = smov (%p31_p4, %s1681_s23), 0 }
   0xb   : > { %s66_s25 = ssub.s32 %s1362_s20, %s1683_s23  ;;  %183 = sbr.rel (%p1109_p6) target bundleno = 48 (0x30), region = 16 }
   0xc   : > { %s67_s26 = sor.u32 %s66_s25, %s65_s24 }
   0xd   : > { %p68_p5 = scmp.eq.s32.totalorder %s67_s26, 0 }
   0xf   : > { %s1446_s28 = scalar_select %p68_p5, %s1346_s16, %s70_s27  }
  0x10   : > { %199 = sbr.rel (!%p79_p3) target bundleno = 48 (0x30), region = 24  ;;  %s201_s29 = sand.u32 (%p79_p3), 1, %s1346_s16  }
  0x11   : > { %s1177_s30 = smul.u32 (%p79_p3), 384, %s201_s29  ;;  %s1110_s5 = sshll.u32 (%p79_p3), %s1362_s20, 1 }
  0x12   : > { %s1175_s6 = smul.u32 (%p79_p3), 192, %s1358_s19 }
  0x13   : > { %s1460_s12 = scalar_lea.vmem (%p79_p3), [#allocation3], %s1177_s30 }
  0x14   : > { %s207_s7 = sadd.s32 (%p79_p3), %s1175_s6, %s1110_s5 }
  0x15   : > { %s1112_s8 = sshll.u32 %s207_s7, 2 }
  0x16   : > { %s1455_s11 = scalar_lea.vmem %s1668_s1, %s1112_s8 }
  0x17   : > { %v332_v0 = vld [vmem:[%s1455_s11] sm:$0xff]  ;;  %v334_v1 = vld [vmem:[%s1455_s11 + $0x10] sm:$0xff] }
  0x18   : > { %v336_v2 = vld [vmem:[%s1455_s11 + $0x20] sm:$0xff]  ;;  %333 = vst [vmem:[%s1460_s12] sm:$0xff] %v332_v0  ;;  %335 = vst [vmem:[%s1460_s12 + $0x8] sm:$0xff] %v334_v1  ;;  %v338_v3 = vld [vmem:[%s1455_s11 + $0x30] sm:$0xff] }
  0x19   : > { %337 = vst [vmem:[%s1460_s12 + $0x10] sm:$0xff] %v336_v2  ;;  %v340_v4 = vld [vmem:[%s1455_s11 + $0x40] sm:$0xff]  ;;  %v342_v5 = vld [vmem:[%s1455_s11 + $0x50] sm:$0xff]  ;;  %339 = vst [vmem:[%s1460_s12 + $0x18] sm:$0xff] %v338_v3 }
  0x1a   : > { %341 = vst [vmem:[%s1460_s12 + $0x20] sm:$0xff] %v340_v4  ;;  %343 = vst [vmem:[%s1460_s12 + $0x28] sm:$0xff] %v342_v5  ;;  %v344_v6 = vld [vmem:[%s1455_s11 + $0x60] sm:$0xff]  ;;  %v346_v7 = vld [vmem:[%s1455_s11 + $0x70] sm:$0xff] }
  0x1b   : > { %v348_v8 = vld [vmem:[%s1455_s11 + $0x80] sm:$0xff]  ;;  %345 = vst [vmem:[%s1460_s12 + $0x30] sm:$0xff] %v344_v6  ;;  %347 = vst [vmem:[%s1460_s12 + $0x38] sm:$0xff] %v346_v7  ;;  %v350_v9 = vld [vmem:[%s1455_s11 + $0x90] sm:$0xff] }
  0x1c   : > { %349 = vst [vmem:[%s1460_s12 + $0x40] sm:$0xff] %v348_v8  ;;  %v352_v10 = vld [vmem:[%s1455_s11 + $0xa0] sm:$0xff]  ;;  %v354_v11 = vld [vmem:[%s1455_s11 + $0xb0] sm:$0xff]  ;;  %351 = vst [vmem:[%s1460_s12 + $0x48] sm:$0xff] %v350_v9 }
  0x1d   : > { %353 = vst [vmem:[%s1460_s12 + $0x50] sm:$0xff] %v352_v10  ;;  %355 = vst [vmem:[%s1460_s12 + $0x58] sm:$0xff] %v354_v11  ;;  %v356_v12 = vld [vmem:[%s1455_s11 + $0xc0] sm:$0xff]  ;;  %v358_v13 = vld [vmem:[%s1455_s11 + $0xd0] sm:$0xff] }
  0x1e   : > { %v360_v14 = vld [vmem:[%s1455_s11 + $0xe0] sm:$0xff]  ;;  %357 = vst [vmem:[%s1460_s12 + $0x60] sm:$0xff] %v356_v12  ;;  %359 = vst [vmem:[%s1460_s12 + $0x68] sm:$0xff] %v358_v13  ;;  %v362_v15 = vld [vmem:[%s1455_s11 + $0xf0] sm:$0xff] }
  0x1f   : > { %361 = vst [vmem:[%s1460_s12 + $0x70] sm:$0xff] %v360_v14  ;;  %v364_v16 = vld [vmem:[%s1455_s11 + $0x100] sm:$0xff]  ;;  %v366_v17 = vld [vmem:[%s1455_s11 + $0x110] sm:$0xff]  ;;  %363 = vst [vmem:[%s1460_s12 + $0x78] sm:$0xff] %v362_v15 }
  0x20   : > { %365 = vst [vmem:[%s1460_s12 + $0x80] sm:$0xff] %v364_v16  ;;  %367 = vst [vmem:[%s1460_s12 + $0x88] sm:$0xff] %v366_v17  ;;  %v368_v18 = vld [vmem:[%s1455_s11 + $0x120] sm:$0xff]  ;;  %v370_v19 = vld [vmem:[%s1455_s11 + $0x130] sm:$0xff] }
  0x21   : > { %v372_v20 = vld [vmem:[%s1455_s11 + $0x140] sm:$0xff]  ;;  %369 = vst [vmem:[%s1460_s12 + $0x90] sm:$0xff] %v368_v18  ;;  %371 = vst [vmem:[%s1460_s12 + $0x98] sm:$0xff] %v370_v19  ;;  %v374_v21 = vld [vmem:[%s1455_s11 + $0x150] sm:$0xff] }
  0x22   : > { %373 = vst [vmem:[%s1460_s12 + $0xa0] sm:$0xff] %v372_v20  ;;  %v376_v22 = vld [vmem:[%s1455_s11 + $0x160] sm:$0xff]  ;;  %v378_v23 = vld [vmem:[%s1455_s11 + $0x170] sm:$0xff]  ;;  %375 = vst [vmem:[%s1460_s12 + $0xa8] sm:$0xff] %v374_v21 }
  0x23   : > { %377 = vst [vmem:[%s1460_s12 + $0xb0] sm:$0xff] %v376_v22  ;;  %379 = vst [vmem:[%s1460_s12 + $0xb8] sm:$0xff] %v378_v23  ;;  %v380_v24 = vld [vmem:[%s1455_s11 + $0x180] sm:$0xff]  ;;  %v382_v25 = vld [vmem:[%s1455_s11 + $0x190] sm:$0xff] }
  0x24   : > { %v384_v26 = vld [vmem:[%s1455_s11 + $0x1a0] sm:$0xff]  ;;  %381 = vst [vmem:[%s1460_s12 + $0xc0] sm:$0xff] %v380_v24  ;;  %383 = vst [vmem:[%s1460_s12 + $0xc8] sm:$0xff] %v382_v25  ;;  %v386_v27 = vld [vmem:[%s1455_s11 + $0x1b0] sm:$0xff] }
  0x25   : > { %385 = vst [vmem:[%s1460_s12 + $0xd0] sm:$0xff] %v384_v26  ;;  %v388_v28 = vld [vmem:[%s1455_s11 + $0x1c0] sm:$0xff]  ;;  %v390_v29 = vld [vmem:[%s1455_s11 + $0x1d0] sm:$0xff]  ;;  %387 = vst [vmem:[%s1460_s12 + $0xd8] sm:$0xff] %v386_v27 }
  0x26   : > { %389 = vst [vmem:[%s1460_s12 + $0xe0] sm:$0xff] %v388_v28  ;;  %391 = vst [vmem:[%s1460_s12 + $0xe8] sm:$0xff] %v390_v29  ;;  %v392_v30 = vld [vmem:[%s1455_s11 + $0x1e0] sm:$0xff]  ;;  %v394_v31 = vld [vmem:[%s1455_s11 + $0x1f0] sm:$0xff] }
  0x27   : > { %v396_v32 = vld [vmem:[%s1455_s11 + $0x200] sm:$0xff]  ;;  %393 = vst [vmem:[%s1460_s12 + $0xf0] sm:$0xff] %v392_v30  ;;  %395 = vst [vmem:[%s1460_s12 + $0xf8] sm:$0xff] %v394_v31  ;;  %v398_v33 = vld [vmem:[%s1455_s11 + $0x210] sm:$0xff] }
  0x28   : > { %397 = vst [vmem:[%s1460_s12 + $0x100] sm:$0xff] %v396_v32  ;;  %v400_v34 = vld [vmem:[%s1455_s11 + $0x220] sm:$0xff]  ;;  %v402_v35 = vld [vmem:[%s1455_s11 + $0x230] sm:$0xff]  ;;  %399 = vst [vmem:[%s1460_s12 + $0x108] sm:$0xff] %v398_v33 }
  0x29   : > { %401 = vst [vmem:[%s1460_s12 + $0x110] sm:$0xff] %v400_v34  ;;  %403 = vst [vmem:[%s1460_s12 + $0x118] sm:$0xff] %v402_v35  ;;  %v404_v36 = vld [vmem:[%s1455_s11 + $0x240] sm:$0xff]  ;;  %v406_v37 = vld [vmem:[%s1455_s11 + $0x250] sm:$0xff] }
  0x2a   : > { %v408_v38 = vld [vmem:[%s1455_s11 + $0x260] sm:$0xff]  ;;  %405 = vst [vmem:[%s1460_s12 + $0x120] sm:$0xff] %v404_v36  ;;  %407 = vst [vmem:[%s1460_s12 + $0x128] sm:$0xff] %v406_v37  ;;  %v410_v39 = vld [vmem:[%s1455_s11 + $0x270] sm:$0xff] }
  0x2b   : > { %409 = vst [vmem:[%s1460_s12 + $0x130] sm:$0xff] %v408_v38  ;;  %v412_v40 = vld [vmem:[%s1455_s11 + $0x280] sm:$0xff]  ;;  %v414_v41 = vld [vmem:[%s1455_s11 + $0x290] sm:$0xff]  ;;  %411 = vst [vmem:[%s1460_s12 + $0x138] sm:$0xff] %v410_v39 }
  0x2c   : > { %413 = vst [vmem:[%s1460_s12 + $0x140] sm:$0xff] %v412_v40  ;;  %415 = vst [vmem:[%s1460_s12 + $0x148] sm:$0xff] %v414_v41  ;;  %v416_v42 = vld [vmem:[%s1455_s11 + $0x2a0] sm:$0xff]  ;;  %v418_v43 = vld [vmem:[%s1455_s11 + $0x2b0] sm:$0xff] }
  0x2d   : > { %v420_v44 = vld [vmem:[%s1455_s11 + $0x2c0] sm:$0xff]  ;;  %417 = vst [vmem:[%s1460_s12 + $0x150] sm:$0xff] %v416_v42  ;;  %419 = vst [vmem:[%s1460_s12 + $0x158] sm:$0xff] %v418_v43  ;;  %v422_v45 = vld [vmem:[%s1455_s11 + $0x2d0] sm:$0xff] }
  0x2e   : > { %421 = vst [vmem:[%s1460_s12 + $0x160] sm:$0xff] %v420_v44  ;;  %v424_v46 = vld [vmem:[%s1455_s11 + $0x2e0] sm:$0xff]  ;;  %v426_v47 = vld [vmem:[%s1455_s11 + $0x2f0] sm:$0xff]  ;;  %423 = vst [vmem:[%s1460_s12 + $0x168] sm:$0xff] %v422_v45 }
  0x2f   : > { %425 = vst [vmem:[%s1460_s12 + $0x170] sm:$0xff] %v424_v46  ;;  %427 = vst [vmem:[%s1460_s12 + $0x178] sm:$0xff] %v426_v47 }
  0x30 PF: > { %p1113_p7 = scmp.ge.s32.totalorder %s1366_s21, 1  ;;  %p448_p8 = scmp.lt.s32.totalorder %s1366_s21, 13 }
  0x32   : > { %p449_p9 = pnand %p1113_p7, %p448_p8 }
  0x33   : > { %s455_s13 = sand.u32 (!%p449_p9), 1, %s1342_s15   ;;  %s501_s14 = smul.u32 (!%p449_p9), 3, %s1350_s17 }
  0x34   : > { %452 = sbr.rel (%p449_p9) target bundleno = 349 (0x15d), region = 70  ;;  %s1115_s25 = sshll.u32 (!%p449_p9), %s1354_s18, 1 }
  0x35   : > { %s1178_s24 = smul.u32 (!%p449_p9), 384, %s455_s13  ;;  %p504_p10 = scmp.lt.s32.totalorder (!%p449_p9), %s501_s14, 17 }
  0x36   : > { %p514_p11 = scmp.lt.s32.totalorder (!%p449_p9), %s1115_s25, 3  ;;  %p1119_p12 = scmp.ne.s32.totalorder (!%p449_p9), %s1350_s17, 0 }
  0x37   : > { %s1581_s13 = scalar_lea.vmem (!%p449_p9), [#allocation3], %s1178_s24 }
  0x39   : > { %s1685_s14 = smov (!%p504_p10, %s501_s14), 17  ;;  %s1687_s25 = smov (!%p514_p11, %s1115_s25), 3 }
  0x3a   : > { %s1114_s26 = sshll.u32 %s1685_s14, 2  ;;  %s516_s15 = scalar_lea.vmem %s1669_s2, %s1687_s25 }
  0x3b   : > { %s1565_s30 = scalar_lea.vmem %s1667_s0, %s1114_s26  ;;  %s521_s8 = scalar_lea.vmem %s1670_s3, %s1687_s25 }
  0x3c   : > { %s1118_s9 = sshll.u32 %s1687_s25, 2  ;;  %537 = sbr.rel (%p1119_p12) target bundleno = 67 (0x43), region = 78 }
  0x3d   : > { %s1579_s12 = scalar_lea.vmem %s1671_s4, %s1118_s9 }
  0x41   : > { %v1368_v48 = vmov 0.0  }
  0x42   : > { %538 = vst [vmem:[#allocation2] sm:$0xff] %v1368_v48  ;;  %539 = vst [vmem:[#allocation2 + $0x8] sm:$0xff] %v1368_v48 }
  0x43 PF: > { %v1237_v49 = vld [vmem:[%s1581_s13 + $0x74] ss:$8 sps:$4 sm:$0xff]   ;;  %v1239_v50 = vld [vmem:[%s1581_s13 + $0x70] ss:$8 sps:$4 sm:$0xff]   ;;  %v1369_v51 = vmov 0   ;;  %p1171_p13 = scmp.ne.s32.totalorder %s1350_s17, 5 }
  0x44   : > { %916 = vmatprep.mubr.bf16.mxu1 %v1369_v51  ;;  %843 = vmatprep.subr.bf16.mxu0 %v1237_v49  ;;  %v1240_v52 = vld [vmem:[%s1581_s13 + $0x64] ss:$8 sps:$4 sm:$0xff]   ;;  %v1242_v53 = vld [vmem:[%s1581_s13 + $0x60] ss:$8 sps:$4 sm:$0xff]   ;;  %v1243_v54 = vld [vmem:[%s1581_s13 + $0x54] ss:$8 sps:$4 sm:$0xff]  }
  0x45   : > { %844 = vmatpush1.bf16.msra.mxu0 %v1239_v50  ;;  %v1245_v55 = vld [vmem:[%s1581_s13 + $0x50] ss:$8 sps:$4 sm:$0xff]   ;;  %v1246_v56 = vld [vmem:[%s1581_s13 + $0x44] ss:$8 sps:$4 sm:$0xff]   ;;  %v1258_v57 = vld [vmem:[%s1581_s13 + $0x174] ss:$8 sps:$4 sm:$0xff]  }
  0x46   : > { %845 = vmatprep.subr.bf16.mxu0 %v1240_v52  ;;  %v1260_v58 = vld [vmem:[%s1581_s13 + $0x170] ss:$8 sps:$4 sm:$0xff]   ;;  %v1248_v59 = vld [vmem:[%s1581_s13 + $0x40] ss:$8 sps:$4 sm:$0xff]   ;;  %v1249_v60 = vld [vmem:[%s1581_s13 + $0x34] ss:$8 sps:$4 sm:$0xff]   ;;  %884 = vmatprep.subr.bf16.mxu1 %v1258_v57 }
  0x47   : > { %v1264_v61 = vld [vmem:[%s1581_s13 + $0x164] ss:$8 sps:$4 sm:$0xff]   ;;  %885 = vmatpush1.bf16.msra.mxu1 %v1260_v58  ;;  %v1266_v62 = vld [vmem:[%s1581_s13 + $0x160] ss:$8 sps:$4 sm:$0xff]   ;;  %v1251_v63 = vld [vmem:[%s1581_s13 + $0x30] ss:$8 sps:$4 sm:$0xff]  }
  0x48   : > { %886 = vmatprep.subr.bf16.mxu1 %v1264_v61  ;;  %v1270_v0 = vld [vmem:[%s1581_s13 + $0x154] ss:$8 sps:$4 sm:$0xff]   ;;  %v1252_v1 = vld [vmem:[%s1581_s13 + $0x24] ss:$8 sps:$4 sm:$0xff]   ;;  %v1272_v2 = vld [vmem:[%s1581_s13 + $0x150] ss:$8 sps:$4 sm:$0xff]  }
  0x49   : > { %846 = vmatpush1.bf16.msra.mxu0 %v1242_v53  ;;  %v1276_v3 = vld [vmem:[%s1581_s13 + $0x144] ss:$8 sps:$4 sm:$0xff]   ;;  %v1254_v4 = vld [vmem:[%s1581_s13 + $0x20] ss:$8 sps:$4 sm:$0xff]   ;;  %v1255_v5 = vld [vmem:[%s1581_s13 + $0x14] ss:$8 sps:$4 sm:$0xff]  }
  0x4a   : > { %847 = vmatprep.subr.bf16.mxu0 %v1243_v54  ;;  %v1278_v6 = vld [vmem:[%s1581_s13 + $0x140] ss:$8 sps:$4 sm:$0xff]   ;;  %v1282_v7 = vld [vmem:[%s1581_s13 + $0x134] ss:$8 sps:$4 sm:$0xff]   ;;  %v1257_v8 = vld [vmem:[%s1581_s13 + $0x10] ss:$8 sps:$4 sm:$0xff]  }
  0x4b   : > { %887 = vmatpush1.bf16.msra.mxu1 %v1266_v62  ;;  %v1261_v9 = vld [vmem:[%s1581_s13 + $0x4] ss:$8 sps:$4 sm:$0xff]   ;;  %v1284_v10 = vld [vmem:[%s1581_s13 + $0x130] ss:$8 sps:$4 sm:$0xff]   ;;  %v1263_v12 = vld [vmem:[%s1581_s13] ss:$8 sps:$4 sm:$0xff]  }
  0x4c   : > { %888 = vmatprep.subr.bf16.mxu1 %v1270_v0  ;;  %v1288_v11 = vld [vmem:[%s1581_s13 + $0x124] ss:$8 sps:$4 sm:$0xff]   ;;  %v1267_v13 = vld [vmem:[%s1581_s13 + $0xf4] ss:$8 sps:$4 sm:$0xff]   ;;  %v1290_v14 = vld [vmem:[%s1581_s13 + $0x120] ss:$8 sps:$4 sm:$0xff]  }
  0x4d   : > { %848 = vmatpush1.bf16.msra.mxu0 %v1245_v55  ;;  %v1294_v15 = vld [vmem:[%s1581_s13 + $0x114] ss:$8 sps:$4 sm:$0xff]   ;;  %v1269_v16 = vld [vmem:[%s1581_s13 + $0xf0] ss:$8 sps:$4 sm:$0xff]   ;;  %v1273_v17 = vld [vmem:[%s1581_s13 + $0xe4] ss:$8 sps:$4 sm:$0xff]  }
  0x4e   : > { %849 = vmatprep.subr.bf16.mxu0 %v1246_v56  ;;  %v542_v18 = vld [vmem:[%s1565_s30] sm:$0xff]  ;;  %v1300_v21 = vld [vmem:[%s1581_s13 + $0x104] ss:$8 sps:$4 sm:$0xff]   ;;  %v1275_v22 = vld [vmem:[%s1581_s13 + $0xe0] ss:$8 sps:$4 sm:$0xff]  }
  0x4f   : > { %889 = vmatpush1.bf16.msra.mxu1 %v1272_v2  ;;  %v1296_v19 = vld [vmem:[%s1581_s13 + $0x110] ss:$8 sps:$4 sm:$0xff]   ;;  %v1121_v20 = vcombine.high %v542_v18, %v542_v18  ;;  %v1279_v23 = vld [vmem:[%s1581_s13 + $0xd4] ss:$8 sps:$4 sm:$0xff]   ;;  %v1302_v24 = vld [vmem:[%s1581_s13 + $0x100] ss:$8 sps:$4 sm:$0xff]   ;;  %v1120_v37 = vcombine.low %v542_v18, %v542_v18 }
  0x50   : > { %890 = vmatprep.subr.bf16.mxu1 %v1276_v3  ;;  %v1281_v25 = vld [vmem:[%s1581_s13 + $0xd0] ss:$8 sps:$4 sm:$0xff]   ;;  %v1285_v26 = vld [vmem:[%s1581_s13 + $0xc4] ss:$8 sps:$4 sm:$0xff]   ;;  %v1287_v28 = vld [vmem:[%s1581_s13 + $0xc0] ss:$8 sps:$4 sm:$0xff]  }
  0x51   : > { %850 = vmatpush1.bf16.msra.mxu0 %v1248_v59  ;;  %875 = vmatprep.mubr.bf16.mxu0 %v1121_v20  ;;  %v1306_v27 = vld [vmem:[%s1565_s30 + $0x8] ss:$0 sps:$4 sm:$0xff]   ;;  %v1291_v29 = vld [vmem:[%s1581_s13 + $0xb4] ss:$8 sps:$4 sm:$0xff]   ;;  %v1297_v31 = vld [vmem:[%s1581_s13 + $0xa4] ss:$8 sps:$4 sm:$0xff]  }
  0x52   : > { %851 = vmatprep.subr.bf16.mxu0 %v1249_v60  ;;  %v1293_v30 = vld [vmem:[%s1581_s13 + $0xb0] ss:$8 sps:$4 sm:$0xff]   ;;  %v1299_v32 = vld [vmem:[%s1581_s13 + $0xa0] ss:$8 sps:$4 sm:$0xff]   ;;  %v1303_v33 = vld [vmem:[%s1581_s13 + $0x94] ss:$8 sps:$4 sm:$0xff]  }
  0x53   : > { %891 = vmatpush1.bf16.msra.mxu1 %v1278_v6  ;;  %v1305_v34 = vld [vmem:[%s1581_s13 + $0x90] ss:$8 sps:$4 sm:$0xff]   ;;  %v1307_v35 = vld [vmem:[%s1581_s13 + $0x84] ss:$8 sps:$4 sm:$0xff]   ;;  %v1309_v36 = vld [vmem:[%s1581_s13 + $0x80] ss:$8 sps:$4 sm:$0xff]  }
  0x54   : > { %892 = vmatprep.subr.bf16.mxu1 %v1282_v7  ;;  %v540_v42 = vld [vmem:[#allocation2] sm:$0xff]  ;;  %v541_v45 = vld [vmem:[#allocation2 + $0x8] sm:$0xff] }
  0x55   : > { %852 = vmatpush1.bf16.msra.mxu0 %v1251_v63 }
  0x56   : > { %853 = vmatprep.subr.bf16.mxu0 %v1252_v1 }
  0x57   : > { %893 = vmatpush1.bf16.msra.mxu1 %v1284_v10 }
  0x58   : > { %894 = vmatprep.subr.bf16.mxu1 %v1288_v11 }
  0x59   : > { %854 = vmatpush1.bf16.msra.mxu0 %v1254_v4 }
  0x5a   : > { %855 = vmatprep.subr.bf16.mxu0 %v1255_v5 }
  0x5b   : > { %895 = vmatpush1.bf16.msra.mxu1 %v1290_v14 }
  0x5c   : > { %896 = vmatprep.subr.bf16.mxu1 %v1294_v15 }
  0x5d   : > { %856 = vmatpush1.bf16.msra.mxu0 %v1257_v8 }
  0x5e   : > { %857 = vmatprep.subr.bf16.mxu0 %v1261_v9 }
  0x5f   : > { %897 = vmatpush1.bf16.msra.mxu1 %v1296_v19 }
  0x60   : > { %898 = vmatprep.subr.bf16.mxu1 %v1300_v21 }
  0x61   : > { %858 = vmatpush1.bf16.msra.mxu0 %v1263_v12 }
  0x62   : > { %859 = vmatprep.subr.bf16.mxu0 %v1267_v13 }
  0x63   : > { %899 = vmatpush1.bf16.msra.mxu1 %v1302_v24 }
  0x65   : > { %860 = vmatpush2.bf16.msra.mxu0 %v1269_v16 }
  0x66   : > { %861 = vmatprep.subr.bf16.mxu0 %v1273_v17  ;;  %917 = vmatmul.mubr.bf16.vlgmr.msra.gmra.mxu1 %v1306_v27 }
  0x69   : > { %862 = vmatpush2.bf16.msra.mxu0 %v1275_v22 }
  0x6a   : > { %863 = vmatprep.subr.bf16.mxu0 %v1279_v23 }
  0x6d   : > { %864 = vmatpush2.bf16.msra.mxu0 %v1281_v25 }
  0x6e   : > { %865 = vmatprep.subr.bf16.mxu0 %v1285_v26 }
  0x71   : > { %866 = vmatpush2.bf16.msra.mxu0 %v1287_v28 }
  0x72   : > { %867 = vmatprep.subr.bf16.mxu0 %v1291_v29 }
  0x75   : > { %868 = vmatpush2.bf16.msra.mxu0 %v1293_v30 }
  0x76   : > { %869 = vmatprep.subr.bf16.mxu0 %v1297_v31 }
  0x79   : > { %870 = vmatpush2.bf16.msra.mxu0 %v1299_v32 }
  0x7a   : > { %871 = vmatprep.subr.bf16.mxu0 %v1303_v33 }
  0x7d   : > { %872 = vmatpush2.bf16.msra.mxu0 %v1305_v34 }
  0x7e   : > { %873 = vmatprep.subr.bf16.mxu0 %v1307_v35 }
  0x81   : > { %874 = vmatpush2.bf16.msra.mxu0 %v1309_v36 }
  0x84   : > { %876 = vmatmul.mubr.bf16.vlgmr.msra.gmra.mxu0 %v1120_v37 }
 0x126   : > { %v918_v38 = vpop.f32.mrf.mxu1 }
 0x128   : > { %v920_v39 = vpop.f32.mrf.mxu1 }
 0x12a   : > { %v922_v40 = vpop.f32.mrf.mxu1 }
 0x12c   : > { %v923_v41 = vpop.f32.mrf.mxu1 }
 0x144   : > { %v877_v43 = vpop.f32.mrf.mxu0 }
 0x145   : > { %v919_v44 = vadd.f32 %v918_v38, %v877_v43 }
 0x146   : > { %v879_v46 = vpop.f32.mrf.mxu0 }
 0x147   : > { %v925_v47 = vadd.f32 %v919_v44, %v540_v42  ;;  %v921_v48 = vadd.f32 %v920_v39, %v879_v46  ;;  %932 = sbr.rel (%p1171_p13) target bundleno = 349 (0x15d), region = 82 }
 0x148   : > { %v881_v49 = vpop.f32.mrf.mxu0 }
 0x149   : > { %927 = vst [vmem:[#allocation2] sm:$0xff] %v925_v47  ;;  %v926_v50 = vadd.f32 %v921_v48, %v541_v45 }
 0x14a   : > { %v882_v51 = vpop.f32.mrf.mxu0 }
 0x14b   : > { %928 = vst [vmem:[#allocation2 + $0x8] sm:$0xff] %v926_v50 }
 0x14c   : > { %v937_v52 = vlaneseq  ;;  %v935_v54 = vld [vmem:[%s516_s15] sm:$0x3] }
 0x14d   : > { %v949_v55 = vld [vmem:[%s521_s8] sm:$0x3] }
 0x14e   : > { %v938_v53 = vshrl.u32 %v937_v52, 7 }
 0x150   : > { %v939_v56 = vsub.s32 0, %v938_v53  ;;  %v943_v57 = vsub.s32 1, %v938_v53  ;;  %v933_v58 = vld [vmem:[#allocation2] sm:$0xff] }
 0x152   : > { %v934_v59 = vld [vmem:[#allocation2 + $0x8] sm:$0xff]  ;;  %v940_v60 = vrot.slane %v935_v54, %v939_v56  ;;  %v944_v61 = vrot.slane %v935_v54, %v943_v57  ;;  %v954_v62 = vrot.slane %v949_v55, %v939_v56  ;;  %v958_v63 = vrot.slane %v949_v55, %v943_v57 }
 0x154   : > { %v947_v0 = vmul.f32 %v940_v60, %v933_v58  ;;  %v948_v1 = vmul.f32 %v944_v61, %v934_v59 }
 0x156   : > { %v961_v2 = vadd.f32 %v954_v62, %v947_v0  ;;  %v962_v3 = vadd.f32 %v958_v63, %v948_v1 }
 0x158   : > { %v963_v4 = vmax.f32 %v961_v2, 0.0  ;;  %v964_v5 = vmax.f32 %v962_v3, 0.0 }
 0x15a   : > { %v1176_v6 = vpack.c.bf16 %v964_v5, %v963_v4 }
 0x15c   : > { %973 = vst [vmem:[%s1579_s12] sm:$0xff] %v1176_v6 }
 0x15d PF: > { %s14_s21 = sadd.s32 1, %s1366_s21   ;;  %s1672_s15 = smov %s1346_s16 }
 0x15e   : > { %p11_p0 = scmp.ge.s32.totalorder %s14_s21, 14   ;;  %s1673_s16 = smov %s1446_s28 }
 0x15f   : > { %s1674_s17 = smov %s1358_s19  ;;  %s1675_s18 = smov %s1362_s20 }
 0x160   : > { %s1676_s19 = smov %s1679_s22  ;;  %s1677_s20 = smov %s1683_s23 }
 0x161   :  { %13 = sbr.rel (!%p11_p0) target bundleno = 4 (0x4), region = 126 }

// kernel: resnet_forward.25
= control target key start
LH: loop header
LB: loop body
LE: loop exit
PB: predicated region body
PF: predicated region fallthrough
CT: control target
= control target key end

     0   :  { %s1104_s15 = smov 0   ;;  %s1106_s16 = smov 0   ;;  %s1286_s0 = inlined_call_operand.vmem [shape: bf16[8,256], index: 0, kind: input, shape index: {}]   ;;  %s1287_s1 = inlined_call_operand.vmem [shape: bf16[256,512], index: 1, kind: input, shape index: {}]   ;;  %s1288_s2 = inlined_call_operand.vmem [shape: f32[1,512], index: 2, kind: input, shape index: {}]   ;;  %s1289_s3 = inlined_call_operand.vmem [shape: f32[1,512], index: 3, kind: input, shape index: {}]   ;;  %s1290_s4 = inlined_call_operand.vmem [shape: bf16[8,512], index: 4, kind: output, shape index: {}]  }
   0x1   :  { %s1108_s17 = smov 0   ;;  %s1110_s18 = smov 0  }
   0x2   :  { %s1112_s19 = smov 0  }
   0x3 LB: > { %s29_s20 = sadd.s32 1, %s1073_s18  ;;  %p77_p1 = scmp.ne.s32.totalorder %s1065_s16, %s1061_s15  ;;  %s1077_s19 = sphi %s1112_s19, %s14_s19   ;;  %s1073_s18 = sphi %s1110_s18, %s1294_s18   ;;  %s1069_s17 = sphi %s1108_s17, %s1293_s17   ;;  %s1065_s16 = sphi %s1106_s16, %s1292_s16   ;;  %s1061_s15 = sphi %s1104_s15, %s1291_s15  }
   0x4   : > { %p31_p0 = scmp.ge.s32.totalorder %s29_s20, 2  ;;  %p78_p2 = scmp.eq.s32.totalorder %s1077_s19, 0 }
   0x5   : > { %s70_s22 = sadd.s32 1, %s1065_s16  ;;  %p900_p5 = scmp.ge.s32.totalorder %s1077_s19, 2 }
   0x6   : > { %s1296_s20 = smov (%p31_p0, %s29_s20), 0  ;;  %p79_p3 = por %p78_p2, %p77_p1 }
   0x7   : > { %s66_s21 = ssub.s32 %s1073_s18, %s1296_s20  ;;  %196 = sbr.rel (%p900_p5) target bundleno = 32 (0x20), region = 20 }
   0x8   : > { %p68_p4 = scmp.eq.s32.totalorder %s66_s21, 0 }
   0xa   : > { %s1139_s23 = scalar_select %p68_p4, %s1065_s16, %s70_s22  }
   0xc   : > { %199 = sbr.rel (!%p79_p3) target bundleno = 32 (0x20), region = 24  ;;  %s201_s24 = sand.u32 (%p79_p3), 1, %s1065_s16  }
   0xd   : > { %s947_s25 = sshll.u32 (%p79_p3), %s1073_s18, 3  ;;  %s901_s26 = sshll.u32 (%p79_p3), %s201_s24, 8 }
   0xe   : > { %s1147_s29 = scalar_lea.vmem (%p79_p3), %s1287_s1, %s947_s25  ;;  %s1152_s30 = scalar_lea.vmem (%p79_p3), [#allocation3], %s901_s26 }
   0xf   : > { %v300_v0 = vld [vmem:[%s1147_s29] sm:$0xff] (%p79_p3)  ;;  %v302_v1 = vld [vmem:[%s1147_s29 + $0x10] sm:$0xff] (%p79_p3) }
  0x10   : > { %v304_v2 = vld [vmem:[%s1147_s29 + $0x20] sm:$0xff] (%p79_p3)  ;;  %301 = vst [vmem:[%s1152_s30] sm:$0xff] (%p79_p3), %v300_v0  ;;  %303 = vst [vmem:[%s1152_s30 + $0x8] sm:$0xff] (%p79_p3), %v302_v1  ;;  %v306_v3 = vld [vmem:[%s1147_s29 + $0x30] sm:$0xff] (%p79_p3) }
  0x11   : > { %305 = vst [vmem:[%s1152_s30 + $0x10] sm:$0xff] %v304_v2  ;;  %v308_v4 = vld [vmem:[%s1147_s29 + $0x40] sm:$0xff]  ;;  %v310_v5 = vld [vmem:[%s1147_s29 + $0x50] sm:$0xff]  ;;  %307 = vst [vmem:[%s1152_s30 + $0x18] sm:$0xff] %v306_v3 }
  0x12   : > { %309 = vst [vmem:[%s1152_s30 + $0x20] sm:$0xff] %v308_v4  ;;  %311 = vst [vmem:[%s1152_s30 + $0x28] sm:$0xff] %v310_v5  ;;  %v312_v6 = vld [vmem:[%s1147_s29 + $0x60] sm:$0xff]  ;;  %v314_v7 = vld [vmem:[%s1147_s29 + $0x70] sm:$0xff] }
  0x13   : > { %v316_v8 = vld [vmem:[%s1147_s29 + $0x80] sm:$0xff]  ;;  %313 = vst [vmem:[%s1152_s30 + $0x30] sm:$0xff] %v312_v6  ;;  %315 = vst [vmem:[%s1152_s30 + $0x38] sm:$0xff] %v314_v7  ;;  %v318_v9 = vld [vmem:[%s1147_s29 + $0x90] sm:$0xff] }
  0x14   : > { %317 = vst [vmem:[%s1152_s30 + $0x40] sm:$0xff] %v316_v8  ;;  %v320_v10 = vld [vmem:[%s1147_s29 + $0xa0] sm:$0xff]  ;;  %v322_v11 = vld [vmem:[%s1147_s29 + $0xb0] sm:$0xff]  ;;  %319 = vst [vmem:[%s1152_s30 + $0x48] sm:$0xff] %v318_v9 }
  0x15   : > { %321 = vst [vmem:[%s1152_s30 + $0x50] sm:$0xff] %v320_v10  ;;  %323 = vst [vmem:[%s1152_s30 + $0x58] sm:$0xff] %v322_v11  ;;  %v324_v12 = vld [vmem:[%s1147_s29 + $0xc0] sm:$0xff]  ;;  %v326_v13 = vld [vmem:[%s1147_s29 + $0xd0] sm:$0xff] }
  0x16   : > { %v328_v14 = vld [vmem:[%s1147_s29 + $0xe0] sm:$0xff]  ;;  %325 = vst [vmem:[%s1152_s30 + $0x60] sm:$0xff] %v324_v12  ;;  %327 = vst [vmem:[%s1152_s30 + $0x68] sm:$0xff] %v326_v13  ;;  %v330_v15 = vld [vmem:[%s1147_s29 + $0xf0] sm:$0xff] }
  0x17   : > { %329 = vst [vmem:[%s1152_s30 + $0x70] sm:$0xff] %v328_v14  ;;  %v332_v16 = vld [vmem:[%s1147_s29 + $0x100] sm:$0xff]  ;;  %v334_v17 = vld [vmem:[%s1147_s29 + $0x110] sm:$0xff]  ;;  %331 = vst [vmem:[%s1152_s30 + $0x78] sm:$0xff] %v330_v15 }
  0x18   : > { %333 = vst [vmem:[%s1152_s30 + $0x80] sm:$0xff] %v332_v16  ;;  %335 = vst [vmem:[%s1152_s30 + $0x88] sm:$0xff] %v334_v17  ;;  %v336_v18 = vld [vmem:[%s1147_s29 + $0x120] sm:$0xff]  ;;  %v338_v19 = vld [vmem:[%s1147_s29 + $0x130] sm:$0xff] }
  0x19   : > { %v340_v20 = vld [vmem:[%s1147_s29 + $0x140] sm:$0xff]  ;;  %337 = vst [vmem:[%s1152_s30 + $0x90] sm:$0xff] %v336_v18  ;;  %339 = vst [vmem:[%s1152_s30 + $0x98] sm:$0xff] %v338_v19  ;;  %v342_v21 = vld [vmem:[%s1147_s29 + $0x150] sm:$0xff] }
  0x1a   : > { %341 = vst [vmem:[%s1152_s30 + $0xa0] sm:$0xff] %v340_v20  ;;  %v344_v22 = vld [vmem:[%s1147_s29 + $0x160] sm:$0xff]  ;;  %v346_v23 = vld [vmem:[%s1147_s29 + $0x170] sm:$0xff]  ;;  %343 = vst [vmem:[%s1152_s30 + $0xa8] sm:$0xff] %v342_v21 }
  0x1b   : > { %345 = vst [vmem:[%s1152_s30 + $0xb0] sm:$0xff] %v344_v22  ;;  %347 = vst [vmem:[%s1152_s30 + $0xb8] sm:$0xff] %v346_v23  ;;  %v348_v24 = vld [vmem:[%s1147_s29 + $0x180] sm:$0xff]  ;;  %v350_v25 = vld [vmem:[%s1147_s29 + $0x190] sm:$0xff] }
  0x1c   : > { %v352_v26 = vld [vmem:[%s1147_s29 + $0x1a0] sm:$0xff]  ;;  %349 = vst [vmem:[%s1152_s30 + $0xc0] sm:$0xff] %v348_v24  ;;  %351 = vst [vmem:[%s1152_s30 + $0xc8] sm:$0xff] %v350_v25  ;;  %v354_v27 = vld [vmem:[%s1147_s29 + $0x1b0] sm:$0xff] }
  0x1d   : > { %353 = vst [vmem:[%s1152_s30 + $0xd0] sm:$0xff] %v352_v26  ;;  %v356_v28 = vld [vmem:[%s1147_s29 + $0x1c0] sm:$0xff]  ;;  %v358_v29 = vld [vmem:[%s1147_s29 + $0x1d0] sm:$0xff]  ;;  %355 = vst [vmem:[%s1152_s30 + $0xd8] sm:$0xff] %v354_v27 }
  0x1e   : > { %357 = vst [vmem:[%s1152_s30 + $0xe0] sm:$0xff] %v356_v28  ;;  %359 = vst [vmem:[%s1152_s30 + $0xe8] sm:$0xff] %v358_v29  ;;  %v360_v30 = vld [vmem:[%s1147_s29 + $0x1e0] sm:$0xff]  ;;  %v362_v31 = vld [vmem:[%s1147_s29 + $0x1f0] sm:$0xff] }
  0x1f   : > { %361 = vst [vmem:[%s1152_s30 + $0xf0] sm:$0xff] %v360_v30  ;;  %363 = vst [vmem:[%s1152_s30 + $0xf8] sm:$0xff] %v362_v31 }
  0x20 PF: > { %p904_p6 = scmp.ge.s32.totalorder %s1077_s19, 1  ;;  %p384_p7 = scmp.lt.s32.totalorder %s1077_s19, 3 }
  0x22   : > { %p385_p8 = pnand %p904_p6, %p384_p7 }
  0x23   : > { %s391_s5 = sand.u32 (!%p385_p8), 1, %s1061_s15   ;;  %s906_s10 = sshll.u32 (!%p385_p8), %s1069_s17, 1 }
  0x24   : > { %388 = sbr.rel (%p385_p8) target bundleno = 308 (0x134), region = 70  ;;  %s905_s8 = sshll.u32 (!%p385_p8), %s391_s5, 8 }
  0x25   : > { %s1225_s9 = scalar_lea.vmem (!%p385_p8), [#allocation3], %s905_s8  ;;  %p450_p9 = scmp.lt.s32.totalorder (!%p385_p8), %s906_s10, 3 }
  0x29   : > { %v1221_v32 = vld [vmem:[%s1286_s0] sm:$0xff]  ;;  %v989_v34 = vld [vmem:[%s1225_s9 + $0x74] ss:$8 sps:$4 sm:$0xff]   ;;  %v991_v35 = vld [vmem:[%s1225_s9 + $0x70] ss:$8 sps:$4 sm:$0xff]   ;;  %v729_v3 = vlaneseq  ;;  %s1298_s10 = smov (!%p450_p9, %s906_s10), 3 }
  0x2a   : > { %v911_v33 = vcombine.high %v1221_v32, %v1221_v32  ;;  %677 = vmatprep.subr.bf16.mxu0 %v989_v34  ;;  %v992_v36 = vld [vmem:[%s1225_s9 + $0x64] ss:$8 sps:$4 sm:$0xff]   ;;  %v994_v37 = vld [vmem:[%s1225_s9 + $0x60] ss:$8 sps:$4 sm:$0xff]   ;;  %v995_v38 = vld [vmem:[%s1225_s9 + $0x54] ss:$8 sps:$4 sm:$0xff]   ;;  %v910_v2 = vcombine.low %v1221_v32, %v1221_v32  ;;  %s452_s13 = scalar_lea.vmem %s1288_s2, %s1298_s10  ;;  %s457_s21 = scalar_lea.vmem %s1289_s3, %s1298_s10 }
  0x2b   : > { %678 = vmatpush1.bf16.msra.mxu0 %v991_v35  ;;  %v997_v39 = vld [vmem:[%s1225_s9 + $0x50] ss:$8 sps:$4 sm:$0xff]   ;;  %v998_v40 = vld [vmem:[%s1225_s9 + $0x44] ss:$8 sps:$4 sm:$0xff]   ;;  %v1000_v41 = vld [vmem:[%s1225_s9 + $0x40] ss:$8 sps:$4 sm:$0xff]  }
  0x2c   : > { %709 = vmatprep.mubr.bf16.mxu0 %v911_v33  ;;  %679 = vmatprep.subr.bf16.mxu0 %v992_v36  ;;  %v1001_v42 = vld [vmem:[%s1225_s9 + $0x34] ss:$8 sps:$4 sm:$0xff]   ;;  %v1003_v43 = vld [vmem:[%s1225_s9 + $0x30] ss:$8 sps:$4 sm:$0xff]   ;;  %v1004_v44 = vld [vmem:[%s1225_s9 + $0x24] ss:$8 sps:$4 sm:$0xff]  }
  0x2d   : > { %v1006_v45 = vld [vmem:[%s1225_s9 + $0x20] ss:$8 sps:$4 sm:$0xff]   ;;  %v1007_v46 = vld [vmem:[%s1225_s9 + $0x14] ss:$8 sps:$4 sm:$0xff]   ;;  %v1009_v47 = vld [vmem:[%s1225_s9 + $0x10] ss:$8 sps:$4 sm:$0xff]  }
  0x2e   : > { %v1010_v48 = vld [vmem:[%s1225_s9 + $0x4] ss:$8 sps:$4 sm:$0xff]   ;;  %v1012_v49 = vld [vmem:[%s1225_s9] ss:$8 sps:$4 sm:$0xff]   ;;  %v1013_v50 = vld [vmem:[%s1225_s9 + $0xf4] ss:$8 sps:$4 sm:$0xff]  }
  0x2f   : > { %680 = vmatpush1.bf16.msra.mxu0 %v994_v37  ;;  %v1015_v51 = vld [vmem:[%s1225_s9 + $0xf0] ss:$8 sps:$4 sm:$0xff]   ;;  %v1016_v52 = vld [vmem:[%s1225_s9 + $0xe4] ss:$8 sps:$4 sm:$0xff]   ;;  %v1018_v53 = vld [vmem:[%s1225_s9 + $0xe0] ss:$8 sps:$4 sm:$0xff]  }
  0x30   : > { %681 = vmatprep.subr.bf16.mxu0 %v995_v38  ;;  %v1019_v54 = vld [vmem:[%s1225_s9 + $0xd4] ss:$8 sps:$4 sm:$0xff]   ;;  %v1021_v55 = vld [vmem:[%s1225_s9 + $0xd0] ss:$8 sps:$4 sm:$0xff]   ;;  %v1022_v56 = vld [vmem:[%s1225_s9 + $0xc4] ss:$8 sps:$4 sm:$0xff]  }
  0x31   : > { %v1024_v57 = vld [vmem:[%s1225_s9 + $0xc0] ss:$8 sps:$4 sm:$0xff]   ;;  %v1025_v58 = vld [vmem:[%s1225_s9 + $0xb4] ss:$8 sps:$4 sm:$0xff]   ;;  %v1027_v59 = vld [vmem:[%s1225_s9 + $0xb0] ss:$8 sps:$4 sm:$0xff]  }
  0x32   : > { %v1028_v60 = vld [vmem:[%s1225_s9 + $0xa4] ss:$8 sps:$4 sm:$0xff]   ;;  %v1030_v61 = vld [vmem:[%s1225_s9 + $0xa0] ss:$8 sps:$4 sm:$0xff]   ;;  %v1031_v62 = vld [vmem:[%s1225_s9 + $0x94] ss:$8 sps:$4 sm:$0xff]  }
  0x33   : > { %682 = vmatpush1.bf16.msra.mxu0 %v997_v39  ;;  %v1033_v63 = vld [vmem:[%s1225_s9 + $0x90] ss:$8 sps:$4 sm:$0xff]   ;;  %v1034_v0 = vld [vmem:[%s1225_s9 + $0x84] ss:$8 sps:$4 sm:$0xff]   ;;  %v1036_v1 = vld [vmem:[%s1225_s9 + $0x80] ss:$8 sps:$4 sm:$0xff]  }
  0x34   : > { %683 = vmatprep.subr.bf16.mxu0 %v998_v40  ;;  %v730_v4 = vshrl.u32 %v729_v3, 7  ;;  %v727_v6 = vld [vmem:[%s452_s13] sm:$0x3]  ;;  %s909_s17 = sshll.u32 %s1298_s10, 2 }
  0x35   : > { %v741_v9 = vld [vmem:[%s457_s21] sm:$0x3]  ;;  %s467_s25 = scalar_lea.vmem %s1290_s4, %s909_s17 }
  0x36   : > { %v731_v5 = vsub.s32 0, %v730_v4  ;;  %v735_v7 = vsub.s32 1, %v730_v4 }
  0x37   : > { %684 = vmatpush1.bf16.msra.mxu0 %v1000_v41 }
  0x38   : > { %685 = vmatprep.subr.bf16.mxu0 %v1001_v42  ;;  %v732_v8 = vrot.slane %v727_v6, %v731_v5  ;;  %v736_v10 = vrot.slane %v727_v6, %v735_v7  ;;  %v746_v13 = vrot.slane %v741_v9, %v731_v5  ;;  %v750_v14 = vrot.slane %v741_v9, %v735_v7 }
  0x3b   : > { %686 = vmatpush1.bf16.msra.mxu0 %v1003_v43 }
  0x3c   : > { %687 = vmatprep.subr.bf16.mxu0 %v1004_v44 }
  0x3f   : > { %688 = vmatpush1.bf16.msra.mxu0 %v1006_v45 }
  0x40   : > { %689 = vmatprep.subr.bf16.mxu0 %v1007_v46 }
  0x43   : > { %690 = vmatpush1.bf16.msra.mxu0 %v1009_v47 }
  0x44   : > { %691 = vmatprep.subr.bf16.mxu0 %v1010_v48 }
  0x47   : > { %692 = vmatpush1.bf16.msra.mxu0 %v1012_v49 }
  0x48   : > { %693 = vmatprep.subr.bf16.mxu0 %v1013_v50 }
  0x4b   : > { %694 = vmatpush2.bf16.msra.mxu0 %v1015_v51 }
  0x4c   : > { %695 = vmatprep.subr.bf16.mxu0 %v1016_v52 }
  0x4f   : > { %696 = vmatpush2.bf16.msra.mxu0 %v1018_v53 }
  0x50   : > { %697 = vmatprep.subr.bf16.mxu0 %v1019_v54 }
  0x53   : > { %698 = vmatpush2.bf16.msra.mxu0 %v1021_v55 }
  0x54   : > { %699 = vmatprep.subr.bf16.mxu0 %v1022_v56 }
  0x57   : > { %700 = vmatpush2.bf16.msra.mxu0 %v1024_v57 }
  0x58   : > { %701 = vmatprep.subr.bf16.mxu0 %v1025_v58 }
  0x5b   : > { %702 = vmatpush2.bf16.msra.mxu0 %v1027_v59 }
  0x5c   : > { %703 = vmatprep.subr.bf16.mxu0 %v1028_v60 }
  0x5f   : > { %704 = vmatpush2.bf16.msra.mxu0 %v1030_v61 }
  0x60   : > { %705 = vmatprep.subr.bf16.mxu0 %v1031_v62 }
  0x63   : > { %706 = vmatpush2.bf16.msra.mxu0 %v1033_v63 }
  0x64   : > { %707 = vmatprep.subr.bf16.mxu0 %v1034_v0 }
  0x67   : > { %708 = vmatpush2.bf16.msra.mxu0 %v1036_v1 }
  0x6a   : > { %710 = vmatmul.mubr.bf16.vlgmr.msra.gmra.mxu0 %v910_v2 }
 0x12a   : > { %v711_v11 = vpop.f32.mrf.mxu0 }
 0x12b   : > { %v739_v12 = vmul.f32 %v732_v8, %v711_v11 }
 0x12c   : > { %v713_v15 = vpop.f32.mrf.mxu0 }
 0x12d   : > { %v740_v16 = vmul.f32 %v736_v10, %v713_v15  ;;  %v753_v18 = vadd.f32 %v746_v13, %v739_v12 }
 0x12e   : > { %v715_v17 = vpop.f32.mrf.mxu0 }
 0x12f   : > { %v754_v19 = vadd.f32 %v750_v14, %v740_v16 }
 0x130   : > { %v716_v20 = vpop.f32.mrf.mxu0 }
 0x131   : > { %v948_v21 = vpack.c.bf16 %v754_v19, %v753_v18 }
 0x133   : > { %763 = vst [vmem:[%s467_s25] sm:$0xff] %v948_v21 }
 0x134 PF: > { %s14_s19 = sadd.s32 1, %s1077_s19   ;;  %s1291_s15 = smov %s1065_s16 }
 0x135   : > { %p11_p10 = scmp.ge.s32.totalorder %s14_s19, 4   ;;  %s1292_s16 = smov %s1139_s23 }
 0x136   : > { %s1293_s17 = smov %s1073_s18  ;;  %s1294_s18 = smov %s1296_s20 }
 0x137   :  { %13 = sbr.rel (!%p11_p10) target bundleno = 3 (0x3), region = 126 }

// kernel: resnet_forward.26
= control target key start
LH: loop header
LB: loop body
LE: loop exit
PB: predicated region body
PF: predicated region fallthrough
CT: control target
= control target key end

     0   :  { %s1692_s18 = smov 0   ;;  %s1694_s19 = smov 0   ;;  %s2018_s0 = inlined_call_operand.vmem [shape: bf16[8,4608], index: 0, kind: input, shape index: {}]   ;;  %s2019_s1 = inlined_call_operand.vmem [shape: bf16[4608,512], index: 1, kind: input, shape index: {}]   ;;  %s2020_s2 = inlined_call_operand.vmem [shape: f32[1,512], index: 2, kind: input, shape index: {}]   ;;  %s2021_s3 = inlined_call_operand.vmem [shape: f32[1,512], index: 3, kind: input, shape index: {}]   ;;  %s2022_s4 = inlined_call_operand.vmem [shape: bf16[8,512], index: 4, kind: input, shape index: {}]   ;;  %s2023_s5 = inlined_call_operand.vmem [shape: bf16[8,512], index: 5, kind: output, shape index: {}]  }
   0x1   :  { %s1696_s20 = smov 0   ;;  %s1698_s21 = smov 0  }
   0x2   :  { %s1700_s22 = smov 0   ;;  %s1702_s23 = smov 0  }
   0x3   :  { %s1704_s24 = smov 0  }
   0x4 LB: > { %s27_s25 = sadd.s32 1, %s1651_s22  ;;  %s30_s26 = sadd.s32 1, %s1655_s23  ;;  %s1659_s24 = sphi %s1704_s24, %s15_s24   ;;  %s1655_s23 = sphi %s1702_s23, %s2029_s23   ;;  %s1651_s22 = sphi %s1700_s22, %s2028_s22   ;;  %s1647_s21 = sphi %s1698_s21, %s2027_s21   ;;  %s1643_s20 = sphi %s1696_s20, %s2026_s20   ;;  %s1639_s19 = sphi %s1694_s19, %s2025_s19   ;;  %s1635_s18 = sphi %s1692_s18, %s2024_s18  }
   0x5   : > { %p28_p0 = scmp.ge.s32.totalorder %s27_s25, 9  ;;  %p78_p1 = scmp.ne.s32.totalorder %s1639_s19, %s1635_s18 }
   0x6   : > { %p79_p2 = scmp.eq.s32.totalorder %s1659_s24, 0  ;;  %s71_s30 = sadd.s32 1, %s1639_s19 }
   0x7   : > { %s2031_s25 = smov (%p28_p0, %s27_s25), 0  ;;  %s2033_s26 = smov (!%p28_p0, %s30_s26), %s1655_s23 }
   0x8   : > { %p80_p3 = por %p79_p2, %p78_p1  ;;  %p32_p4 = scmp.ge.s32.totalorder %s2033_s26, 2 }
   0x9   : > { %s66_s27 = ssub.s32 %s1651_s22, %s2031_s25  ;;  %p1357_p6 = scmp.ge.s32.totalorder %s1659_s24, 18 }
   0xa   : > { %s2035_s26 = smov (%p32_p4, %s2033_s26), 0 }
   0xb   : > { %s67_s28 = ssub.s32 %s1655_s23, %s2035_s26  ;;  %212 = sbr.rel (%p1357_p6) target bundleno = 55 (0x37), region = 16 }
   0xc   : > { %s68_s29 = sor.u32 %s67_s28, %s66_s27 }
   0xd   : > { %p69_p5 = scmp.eq.s32.totalorder %s68_s29, 0 }
   0xf   : > { %s1743_s6 = scalar_select %p69_p5, %s1639_s19, %s71_s30  }
  0x10   : > { %228 = sbr.rel (!%p80_p3) target bundleno = 55 (0x37), region = 24  ;;  %s230_s7 = sand.u32 (%p80_p3), 1, %s1639_s19  }
  0x11   : > { %s1360_s8 = sshll.u32 (%p80_p3), %s1655_s23, 1  ;;  %s1358_s9 = sshll.u32 (%p80_p3), %s230_s7, 9 }
  0x12   : > { %s1446_s10 = sshll.u32 (%p80_p3), %s1651_s22, 8  ;;  %s1757_s16 = scalar_lea.vmem (%p80_p3), [#allocation3], %s1358_s9 }
  0x13   : > { %s236_s11 = sadd.s32 (%p80_p3), %s1446_s10, %s1360_s8 }
  0x14   : > { %s1362_s12 = sshll.u32 (%p80_p3), %s236_s11, 2 }
  0x15   : > { %s1752_s15 = scalar_lea.vmem %s2019_s1, %s1362_s12 }
  0x16   : > { %v393_v0 = vld [vmem:[%s1752_s15] sm:$0xff]  ;;  %v395_v1 = vld [vmem:[%s1752_s15 + $0x10] sm:$0xff] }
  0x17   : > { %v397_v2 = vld [vmem:[%s1752_s15 + $0x20] sm:$0xff]  ;;  %394 = vst [vmem:[%s1757_s16] sm:$0xff] %v393_v0  ;;  %396 = vst [vmem:[%s1757_s16 + $0x8] sm:$0xff] %v395_v1  ;;  %v399_v3 = vld [vmem:[%s1752_s15 + $0x30] sm:$0xff] }
  0x18   : > { %398 = vst [vmem:[%s1757_s16 + $0x10] sm:$0xff] %v397_v2  ;;  %v401_v4 = vld [vmem:[%s1752_s15 + $0x40] sm:$0xff]  ;;  %v403_v5 = vld [vmem:[%s1752_s15 + $0x50] sm:$0xff]  ;;  %400 = vst [vmem:[%s1757_s16 + $0x18] sm:$0xff] %v399_v3 }
  0x19   : > { %402 = vst [vmem:[%s1757_s16 + $0x20] sm:$0xff] %v401_v4  ;;  %404 = vst [vmem:[%s1757_s16 + $0x28] sm:$0xff] %v403_v5  ;;  %v405_v6 = vld [vmem:[%s1752_s15 + $0x60] sm:$0xff]  ;;  %v407_v7 = vld [vmem:[%s1752_s15 + $0x70] sm:$0xff] }
  0x1a   : > { %v409_v8 = vld [vmem:[%s1752_s15 + $0x80] sm:$0xff]  ;;  %406 = vst [vmem:[%s1757_s16 + $0x30] sm:$0xff] %v405_v6  ;;  %408 = vst [vmem:[%s1757_s16 + $0x38] sm:$0xff] %v407_v7  ;;  %v411_v9 = vld [vmem:[%s1752_s15 + $0x90] sm:$0xff] }
  0x1b   : > { %410 = vst [vmem:[%s1757_s16 + $0x40] sm:$0xff] %v409_v8  ;;  %v413_v10 = vld [vmem:[%s1752_s15 + $0xa0] sm:$0xff]  ;;  %v415_v11 = vld [vmem:[%s1752_s15 + $0xb0] sm:$0xff]  ;;  %412 = vst [vmem:[%s1757_s16 + $0x48] sm:$0xff] %v411_v9 }
  0x1c   : > { %414 = vst [vmem:[%s1757_s16 + $0x50] sm:$0xff] %v413_v10  ;;  %416 = vst [vmem:[%s1757_s16 + $0x58] sm:$0xff] %v415_v11  ;;  %v417_v12 = vld [vmem:[%s1752_s15 + $0xc0] sm:$0xff]  ;;  %v419_v13 = vld [vmem:[%s1752_s15 + $0xd0] sm:$0xff] }
  0x1d   : > { %v421_v14 = vld [vmem:[%s1752_s15 + $0xe0] sm:$0xff]  ;;  %418 = vst [vmem:[%s1757_s16 + $0x60] sm:$0xff] %v417_v12  ;;  %420 = vst [vmem:[%s1757_s16 + $0x68] sm:$0xff] %v419_v13  ;;  %v423_v15 = vld [vmem:[%s1752_s15 + $0xf0] sm:$0xff] }
  0x1e   : > { %422 = vst [vmem:[%s1757_s16 + $0x70] sm:$0xff] %v421_v14  ;;  %v425_v16 = vld [vmem:[%s1752_s15 + $0x100] sm:$0xff]  ;;  %v427_v17 = vld [vmem:[%s1752_s15 + $0x110] sm:$0xff]  ;;  %424 = vst [vmem:[%s1757_s16 + $0x78] sm:$0xff] %v423_v15 }
  0x1f   : > { %426 = vst [vmem:[%s1757_s16 + $0x80] sm:$0xff] %v425_v16  ;;  %428 = vst [vmem:[%s1757_s16 + $0x88] sm:$0xff] %v427_v17  ;;  %v429_v18 = vld [vmem:[%s1752_s15 + $0x120] sm:$0xff]  ;;  %v431_v19 = vld [vmem:[%s1752_s15 + $0x130] sm:$0xff] }
  0x20   : > { %v433_v20 = vld [vmem:[%s1752_s15 + $0x140] sm:$0xff]  ;;  %430 = vst [vmem:[%s1757_s16 + $0x90] sm:$0xff] %v429_v18  ;;  %432 = vst [vmem:[%s1757_s16 + $0x98] sm:$0xff] %v431_v19  ;;  %v435_v21 = vld [vmem:[%s1752_s15 + $0x150] sm:$0xff] }
  0x21   : > { %434 = vst [vmem:[%s1757_s16 + $0xa0] sm:$0xff] %v433_v20  ;;  %v437_v22 = vld [vmem:[%s1752_s15 + $0x160] sm:$0xff]  ;;  %v439_v23 = vld [vmem:[%s1752_s15 + $0x170] sm:$0xff]  ;;  %436 = vst [vmem:[%s1757_s16 + $0xa8] sm:$0xff] %v435_v21 }
  0x22   : > { %438 = vst [vmem:[%s1757_s16 + $0xb0] sm:$0xff] %v437_v22  ;;  %440 = vst [vmem:[%s1757_s16 + $0xb8] sm:$0xff] %v439_v23  ;;  %v441_v24 = vld [vmem:[%s1752_s15 + $0x180] sm:$0xff]  ;;  %v443_v25 = vld [vmem:[%s1752_s15 + $0x190] sm:$0xff] }
  0x23   : > { %v445_v26 = vld [vmem:[%s1752_s15 + $0x1a0] sm:$0xff]  ;;  %442 = vst [vmem:[%s1757_s16 + $0xc0] sm:$0xff] %v441_v24  ;;  %444 = vst [vmem:[%s1757_s16 + $0xc8] sm:$0xff] %v443_v25  ;;  %v447_v27 = vld [vmem:[%s1752_s15 + $0x1b0] sm:$0xff] }
  0x24   : > { %446 = vst [vmem:[%s1757_s16 + $0xd0] sm:$0xff] %v445_v26  ;;  %v449_v28 = vld [vmem:[%s1752_s15 + $0x1c0] sm:$0xff]  ;;  %v451_v29 = vld [vmem:[%s1752_s15 + $0x1d0] sm:$0xff]  ;;  %448 = vst [vmem:[%s1757_s16 + $0xd8] sm:$0xff] %v447_v27 }
  0x25   : > { %450 = vst [vmem:[%s1757_s16 + $0xe0] sm:$0xff] %v449_v28  ;;  %452 = vst [vmem:[%s1757_s16 + $0xe8] sm:$0xff] %v451_v29  ;;  %v453_v30 = vld [vmem:[%s1752_s15 + $0x1e0] sm:$0xff]  ;;  %v455_v31 = vld [vmem:[%s1752_s15 + $0x1f0] sm:$0xff] }
  0x26   : > { %v457_v32 = vld [vmem:[%s1752_s15 + $0x200] sm:$0xff]  ;;  %454 = vst [vmem:[%s1757_s16 + $0xf0] sm:$0xff] %v453_v30  ;;  %456 = vst [vmem:[%s1757_s16 + $0xf8] sm:$0xff] %v455_v31  ;;  %v459_v33 = vld [vmem:[%s1752_s15 + $0x210] sm:$0xff] }
  0x27   : > { %458 = vst [vmem:[%s1757_s16 + $0x100] sm:$0xff] %v457_v32  ;;  %v461_v34 = vld [vmem:[%s1752_s15 + $0x220] sm:$0xff]  ;;  %v463_v35 = vld [vmem:[%s1752_s15 + $0x230] sm:$0xff]  ;;  %460 = vst [vmem:[%s1757_s16 + $0x108] sm:$0xff] %v459_v33 }
  0x28   : > { %462 = vst [vmem:[%s1757_s16 + $0x110] sm:$0xff] %v461_v34  ;;  %464 = vst [vmem:[%s1757_s16 + $0x118] sm:$0xff] %v463_v35  ;;  %v465_v36 = vld [vmem:[%s1752_s15 + $0x240] sm:$0xff]  ;;  %v467_v37 = vld [vmem:[%s1752_s15 + $0x250] sm:$0xff] }
  0x29   : > { %v469_v38 = vld [vmem:[%s1752_s15 + $0x260] sm:$0xff]  ;;  %466 = vst [vmem:[%s1757_s16 + $0x120] sm:$0xff] %v465_v36  ;;  %468 = vst [vmem:[%s1757_s16 + $0x128] sm:$0xff] %v467_v37  ;;  %v471_v39 = vld [vmem:[%s1752_s15 + $0x270] sm:$0xff] }
  0x2a   : > { %470 = vst [vmem:[%s1757_s16 + $0x130] sm:$0xff] %v469_v38  ;;  %v473_v40 = vld [vmem:[%s1752_s15 + $0x280] sm:$0xff]  ;;  %v475_v41 = vld [vmem:[%s1752_s15 + $0x290] sm:$0xff]  ;;  %472 = vst [vmem:[%s1757_s16 + $0x138] sm:$0xff] %v471_v39 }
  0x2b   : > { %474 = vst [vmem:[%s1757_s16 + $0x140] sm:$0xff] %v473_v40  ;;  %476 = vst [vmem:[%s1757_s16 + $0x148] sm:$0xff] %v475_v41  ;;  %v477_v42 = vld [vmem:[%s1752_s15 + $0x2a0] sm:$0xff]  ;;  %v479_v43 = vld [vmem:[%s1752_s15 + $0x2b0] sm:$0xff] }
  0x2c   : > { %v481_v44 = vld [vmem:[%s1752_s15 + $0x2c0] sm:$0xff]  ;;  %478 = vst [vmem:[%s1757_s16 + $0x150] sm:$0xff] %v477_v42  ;;  %480 = vst [vmem:[%s1757_s16 + $0x158] sm:$0xff] %v479_v43  ;;  %v483_v45 = vld [vmem:[%s1752_s15 + $0x2d0] sm:$0xff] }
  0x2d   : > { %482 = vst [vmem:[%s1757_s16 + $0x160] sm:$0xff] %v481_v44  ;;  %v485_v46 = vld [vmem:[%s1752_s15 + $0x2e0] sm:$0xff]  ;;  %v487_v47 = vld [vmem:[%s1752_s15 + $0x2f0] sm:$0xff]  ;;  %484 = vst [vmem:[%s1757_s16 + $0x168] sm:$0xff] %v483_v45 }
  0x2e   : > { %486 = vst [vmem:[%s1757_s16 + $0x170] sm:$0xff] %v485_v46  ;;  %488 = vst [vmem:[%s1757_s16 + $0x178] sm:$0xff] %v487_v47  ;;  %v489_v48 = vld [vmem:[%s1752_s15 + $0x300] sm:$0xff]  ;;  %v491_v49 = vld [vmem:[%s1752_s15 + $0x310] sm:$0xff] }
  0x2f   : > { %v493_v50 = vld [vmem:[%s1752_s15 + $0x320] sm:$0xff]  ;;  %490 = vst [vmem:[%s1757_s16 + $0x180] sm:$0xff] %v489_v48  ;;  %492 = vst [vmem:[%s1757_s16 + $0x188] sm:$0xff] %v491_v49  ;;  %v495_v51 = vld [vmem:[%s1752_s15 + $0x330] sm:$0xff] }
  0x30   : > { %494 = vst [vmem:[%s1757_s16 + $0x190] sm:$0xff] %v493_v50  ;;  %v497_v52 = vld [vmem:[%s1752_s15 + $0x340] sm:$0xff]  ;;  %v499_v53 = vld [vmem:[%s1752_s15 + $0x350] sm:$0xff]  ;;  %496 = vst [vmem:[%s1757_s16 + $0x198] sm:$0xff] %v495_v51 }
  0x31   : > { %498 = vst [vmem:[%s1757_s16 + $0x1a0] sm:$0xff] %v497_v52  ;;  %500 = vst [vmem:[%s1757_s16 + $0x1a8] sm:$0xff] %v499_v53  ;;  %v501_v54 = vld [vmem:[%s1752_s15 + $0x360] sm:$0xff]  ;;  %v503_v55 = vld [vmem:[%s1752_s15 + $0x370] sm:$0xff] }
  0x32   : > { %v505_v56 = vld [vmem:[%s1752_s15 + $0x380] sm:$0xff]  ;;  %502 = vst [vmem:[%s1757_s16 + $0x1b0] sm:$0xff] %v501_v54  ;;  %504 = vst [vmem:[%s1757_s16 + $0x1b8] sm:$0xff] %v503_v55  ;;  %v507_v57 = vld [vmem:[%s1752_s15 + $0x390] sm:$0xff] }
  0x33   : > { %506 = vst [vmem:[%s1757_s16 + $0x1c0] sm:$0xff] %v505_v56  ;;  %v509_v58 = vld [vmem:[%s1752_s15 + $0x3a0] sm:$0xff]  ;;  %v511_v59 = vld [vmem:[%s1752_s15 + $0x3b0] sm:$0xff]  ;;  %508 = vst [vmem:[%s1757_s16 + $0x1c8] sm:$0xff] %v507_v57 }
  0x34   : > { %510 = vst [vmem:[%s1757_s16 + $0x1d0] sm:$0xff] %v509_v58  ;;  %512 = vst [vmem:[%s1757_s16 + $0x1d8] sm:$0xff] %v511_v59  ;;  %v513_v60 = vld [vmem:[%s1752_s15 + $0x3c0] sm:$0xff]  ;;  %v515_v61 = vld [vmem:[%s1752_s15 + $0x3d0] sm:$0xff] }
  0x35   : > { %v517_v62 = vld [vmem:[%s1752_s15 + $0x3e0] sm:$0xff]  ;;  %514 = vst [vmem:[%s1757_s16 + $0x1e0] sm:$0xff] %v513_v60  ;;  %516 = vst [vmem:[%s1757_s16 + $0x1e8] sm:$0xff] %v515_v61  ;;  %v519_v63 = vld [vmem:[%s1752_s15 + $0x3f0] sm:$0xff] }
  0x36   : > { %518 = vst [vmem:[%s1757_s16 + $0x1f0] sm:$0xff] %v517_v62  ;;  %520 = vst [vmem:[%s1757_s16 + $0x1f8] sm:$0xff] %v519_v63 }
  0x37 PF: > { %p1363_p7 = scmp.ge.s32.totalorder %s1659_s24, 1  ;;  %p554_p8 = scmp.lt.s32.totalorder %s1659_s24, 19 }
  0x39   : > { %p555_p9 = pnand %p1363_p7, %p554_p8 }
  0x3a   : > { %s561_s17 = sand.u32 (!%p555_p9), 1, %s1635_s18   ;;  %s1365_s27 = sshll.u32 (!%p555_p9), %s1643_s20, 2 }
  0x3b   : > { %558 = sbr.rel (%p555_p9) target bundleno = 359 (0x167), region = 74  ;;  %s1364_s28 = sshll.u32 (!%p555_p9), %s561_s17, 9 }
  0x3c   : > { %p621_p10 = scmp.lt.s32.totalorder (!%p555_p9), %s1365_s27, 35  ;;  %s1367_s29 = sshll.u32 (!%p555_p9), %s1647_s21, 1 }
  0x3d   : > { %p631_p11 = scmp.lt.s32.totalorder (!%p555_p9), %s1367_s29, 3  ;;  %s1915_s8 = scalar_lea.vmem (!%p555_p9), [#allocation3], %s1364_s28 }
  0x3e   : > { %p1373_p12 = scmp.ne.s32.totalorder (!%p555_p9), %s1643_s20, 0 }
  0x40   : > { %s2037_s27 = smov (!%p621_p10, %s1365_s27), 35  ;;  %s2039_s29 = smov (!%p631_p11, %s1367_s29), 3 }
  0x41   : > { %s1366_s30 = sshll.u32 %s2037_s27, 2  ;;  %s633_s18 = scalar_lea.vmem %s2020_s2, %s2039_s29 }
  0x42   : > { %s1892_s9 = scalar_lea.vmem %s2018_s0, %s1366_s30  ;;  %s638_s21 = scalar_lea.vmem %s2021_s3, %s2039_s29 }
  0x43   : > { %s1370_s14 = sshll.u32 %s2039_s29, 2  ;;  %663 = sbr.rel (%p1373_p12) target bundleno = 74 (0x4a), region = 82 }
  0x44   : > { %s1908_s17 = scalar_lea.vmem %s2022_s4, %s1370_s14  ;;  %s1913_s7 = scalar_lea.vmem %s2023_s5, %s1370_s14 }
  0x48   : > { %v1661_v0 = vmov 0.0  }
  0x49   : > { %664 = vst [vmem:[#allocation2] sm:$0xff] %v1661_v0  ;;  %665 = vst [vmem:[#allocation2 + $0x8] sm:$0xff] %v1661_v0 }
  0x4a PF: > { %v1505_v1 = vld [vmem:[%s1915_s8 + $0x74] ss:$8 sps:$4 sm:$0xff]   ;;  %v1509_v3 = vld [vmem:[%s1915_s8 + $0x70] ss:$8 sps:$4 sm:$0xff]   ;;  %v1511_v5 = vld [vmem:[%s1915_s8 + $0x64] ss:$8 sps:$4 sm:$0xff]  }
  0x4b   : > { %v1507_v2 = vld [vmem:[%s1915_s8 + $0x174] ss:$8 sps:$4 sm:$0xff]   ;;  %1068 = vmatprep.subr.bf16.mxu0 %v1505_v1  ;;  %v1510_v4 = vld [vmem:[%s1915_s8 + $0x170] ss:$8 sps:$4 sm:$0xff]   ;;  %v1513_v6 = vld [vmem:[%s1915_s8 + $0x164] ss:$8 sps:$4 sm:$0xff]  }
  0x4c   : > { %1109 = vmatprep.subr.bf16.mxu1 %v1507_v2  ;;  %1069 = vmatpush1.bf16.msra.mxu0 %v1509_v3  ;;  %v1515_v7 = vld [vmem:[%s1915_s8 + $0x60] ss:$8 sps:$4 sm:$0xff]   ;;  %v1517_v9 = vld [vmem:[%s1915_s8 + $0x54] ss:$8 sps:$4 sm:$0xff]   ;;  %v1521_v11 = vld [vmem:[%s1915_s8 + $0x50] ss:$8 sps:$4 sm:$0xff]  }
  0x4d   : > { %1110 = vmatpush1.bf16.msra.mxu1 %v1510_v4  ;;  %1070 = vmatprep.subr.bf16.mxu0 %v1511_v5  ;;  %v1516_v8 = vld [vmem:[%s1915_s8 + $0x160] ss:$8 sps:$4 sm:$0xff]   ;;  %v1519_v10 = vld [vmem:[%s1915_s8 + $0x154] ss:$8 sps:$4 sm:$0xff]   ;;  %v1522_v12 = vld [vmem:[%s1915_s8 + $0x150] ss:$8 sps:$4 sm:$0xff]  }
  0x4e   : > { %1111 = vmatprep.subr.bf16.mxu1 %v1513_v6  ;;  %v1523_v13 = vld [vmem:[%s1915_s8 + $0x44] ss:$8 sps:$4 sm:$0xff]   ;;  %v1527_v15 = vld [vmem:[%s1915_s8 + $0x40] ss:$8 sps:$4 sm:$0xff]   ;;  %v1529_v17 = vld [vmem:[%s1915_s8 + $0x34] ss:$8 sps:$4 sm:$0xff]  }
  0x4f   : > { %v1525_v14 = vld [vmem:[%s1915_s8 + $0x144] ss:$8 sps:$4 sm:$0xff]   ;;  %v1528_v16 = vld [vmem:[%s1915_s8 + $0x140] ss:$8 sps:$4 sm:$0xff]   ;;  %v1531_v18 = vld [vmem:[%s1915_s8 + $0x134] ss:$8 sps:$4 sm:$0xff]  }
  0x50   : > { %1071 = vmatpush1.bf16.msra.mxu0 %v1515_v7  ;;  %v1533_v19 = vld [vmem:[%s1915_s8 + $0x30] ss:$8 sps:$4 sm:$0xff]   ;;  %v1535_v21 = vld [vmem:[%s1915_s8 + $0x24] ss:$8 sps:$4 sm:$0xff]   ;;  %v1539_v23 = vld [vmem:[%s1915_s8 + $0x20] ss:$8 sps:$4 sm:$0xff]  }
  0x51   : > { %1112 = vmatpush1.bf16.msra.mxu1 %v1516_v8  ;;  %1072 = vmatprep.subr.bf16.mxu0 %v1517_v9  ;;  %v1534_v20 = vld [vmem:[%s1915_s8 + $0x130] ss:$8 sps:$4 sm:$0xff]   ;;  %v1537_v22 = vld [vmem:[%s1915_s8 + $0x124] ss:$8 sps:$4 sm:$0xff]   ;;  %v1540_v24 = vld [vmem:[%s1915_s8 + $0x120] ss:$8 sps:$4 sm:$0xff]  }
  0x52   : > { %1113 = vmatprep.subr.bf16.mxu1 %v1519_v10  ;;  %v1541_v25 = vld [vmem:[%s1915_s8 + $0x14] ss:$8 sps:$4 sm:$0xff]   ;;  %v1545_v27 = vld [vmem:[%s1915_s8 + $0x10] ss:$8 sps:$4 sm:$0xff]   ;;  %v1547_v29 = vld [vmem:[%s1915_s8 + $0x4] ss:$8 sps:$4 sm:$0xff]  }
  0x53   : > { %v1543_v26 = vld [vmem:[%s1915_s8 + $0x114] ss:$8 sps:$4 sm:$0xff]   ;;  %v1546_v28 = vld [vmem:[%s1915_s8 + $0x110] ss:$8 sps:$4 sm:$0xff]   ;;  %v1549_v30 = vld [vmem:[%s1915_s8 + $0x104] ss:$8 sps:$4 sm:$0xff]  }
  0x54   : > { %1073 = vmatpush1.bf16.msra.mxu0 %v1521_v11  ;;  %v1551_v31 = vld [vmem:[%s1915_s8] ss:$8 sps:$4 sm:$0xff]   ;;  %v1553_v33 = vld [vmem:[%s1915_s8 + $0xf4] ss:$8 sps:$4 sm:$0xff]   ;;  %v1557_v35 = vld [vmem:[%s1915_s8 + $0xf0] ss:$8 sps:$4 sm:$0xff]  }
  0x55   : > { %1114 = vmatpush1.bf16.msra.mxu1 %v1522_v12  ;;  %1074 = vmatprep.subr.bf16.mxu0 %v1523_v13  ;;  %v1552_v32 = vld [vmem:[%s1915_s8 + $0x100] ss:$8 sps:$4 sm:$0xff]   ;;  %v1555_v34 = vld [vmem:[%s1915_s8 + $0x1f4] ss:$8 sps:$4 sm:$0xff]   ;;  %v1558_v36 = vld [vmem:[%s1915_s8 + $0x1f0] ss:$8 sps:$4 sm:$0xff]  }
  0x56   : > { %1115 = vmatprep.subr.bf16.mxu1 %v1525_v14  ;;  %v1559_v37 = vld [vmem:[%s1915_s8 + $0xe4] ss:$8 sps:$4 sm:$0xff]   ;;  %v1563_v39 = vld [vmem:[%s1915_s8 + $0xe0] ss:$8 sps:$4 sm:$0xff]   ;;  %v1565_v41 = vld [vmem:[%s1915_s8 + $0xd4] ss:$8 sps:$4 sm:$0xff]  }
  0x57   : > { %v1561_v38 = vld [vmem:[%s1915_s8 + $0x1e4] ss:$8 sps:$4 sm:$0xff]   ;;  %v1564_v40 = vld [vmem:[%s1915_s8 + $0x1e0] ss:$8 sps:$4 sm:$0xff]   ;;  %v1567_v42 = vld [vmem:[%s1915_s8 + $0x1d4] ss:$8 sps:$4 sm:$0xff]  }
  0x58   : > { %1075 = vmatpush1.bf16.msra.mxu0 %v1527_v15  ;;  %v1569_v43 = vld [vmem:[%s1915_s8 + $0xd0] ss:$8 sps:$4 sm:$0xff]   ;;  %v1571_v45 = vld [vmem:[%s1915_s8 + $0xc4] ss:$8 sps:$4 sm:$0xff]   ;;  %v1575_v50 = vld [vmem:[%s1915_s8 + $0xc0] ss:$8 sps:$4 sm:$0xff]  }
  0x59   : > { %1116 = vmatpush1.bf16.msra.mxu1 %v1528_v16  ;;  %1076 = vmatprep.subr.bf16.mxu0 %v1529_v17  ;;  %v1570_v44 = vld [vmem:[%s1915_s8 + $0x1d0] ss:$8 sps:$4 sm:$0xff]   ;;  %v1573_v46 = vld [vmem:[%s1915_s8 + $0x1c4] ss:$8 sps:$4 sm:$0xff]   ;;  %v1576_v51 = vld [vmem:[%s1915_s8 + $0x1c0] ss:$8 sps:$4 sm:$0xff]  }
  0x5a   : > { %1117 = vmatprep.subr.bf16.mxu1 %v1531_v18  ;;  %v668_v47 = vld [vmem:[%s1892_s9] sm:$0xff]  ;;  %v669_v49 = vld [vmem:[%s1892_s9 + $0x8] sm:$0xff]  ;;  %v1583_v57 = vld [vmem:[%s1915_s8 + $0xa4] ss:$8 sps:$4 sm:$0xff]   ;;  %p1442_p13 = scmp.ne.s32.totalorder %s1643_s20, 8 }
  0x5b   : > { %v1375_v48 = vcombine.high %v668_v47, %v668_v47  ;;  %v1377_v52 = vcombine.high %v669_v49, %v669_v49  ;;  %v1577_v53 = vld [vmem:[%s1915_s8 + $0xb4] ss:$8 sps:$4 sm:$0xff]   ;;  %v1581_v55 = vld [vmem:[%s1915_s8 + $0xb0] ss:$8 sps:$4 sm:$0xff]   ;;  %v1585_v58 = vld [vmem:[%s1915_s8 + $0x1a4] ss:$8 sps:$4 sm:$0xff]   ;;  %v1374_v5 = vcombine.low %v668_v47, %v668_v47  ;;  %v1376_v6 = vcombine.low %v669_v49, %v669_v49 }
  0x5c   : > { %1077 = vmatpush1.bf16.msra.mxu0 %v1533_v19  ;;  %v1579_v54 = vld [vmem:[%s1915_s8 + $0x1b4] ss:$8 sps:$4 sm:$0xff]   ;;  %v1582_v56 = vld [vmem:[%s1915_s8 + $0x1b0] ss:$8 sps:$4 sm:$0xff]   ;;  %v1587_v59 = vld [vmem:[%s1915_s8 + $0xa0] ss:$8 sps:$4 sm:$0xff]  }
  0x5d   : > { %1118 = vmatpush1.bf16.msra.mxu1 %v1534_v20  ;;  %1078 = vmatprep.subr.bf16.mxu0 %v1535_v21  ;;  %v1588_v60 = vld [vmem:[%s1915_s8 + $0x1a0] ss:$8 sps:$4 sm:$0xff]   ;;  %v1589_v61 = vld [vmem:[%s1915_s8 + $0x94] ss:$8 sps:$4 sm:$0xff]   ;;  %v1593_v63 = vld [vmem:[%s1915_s8 + $0x90] ss:$8 sps:$4 sm:$0xff]  }
  0x5e   : > { %1119 = vmatprep.subr.bf16.mxu1 %v1537_v22  ;;  %1100 = vmatprep.mubr.bf16.mxu0 %v1375_v48  ;;  %v1591_v62 = vld [vmem:[%s1915_s8 + $0x194] ss:$8 sps:$4 sm:$0xff]   ;;  %v1594_v0 = vld [vmem:[%s1915_s8 + $0x190] ss:$8 sps:$4 sm:$0xff]   ;;  %v1595_v1 = vld [vmem:[%s1915_s8 + $0x84] ss:$8 sps:$4 sm:$0xff]  }
  0x5f   : > { %1141 = vmatprep.mubr.bf16.mxu1 %v1377_v52  ;;  %v1597_v2 = vld [vmem:[%s1915_s8 + $0x184] ss:$8 sps:$4 sm:$0xff]   ;;  %v1599_v3 = vld [vmem:[%s1915_s8 + $0x80] ss:$8 sps:$4 sm:$0xff]   ;;  %v666_v8 = vld [vmem:[#allocation2] sm:$0xff] }
  0x60   : > { %1079 = vmatpush1.bf16.msra.mxu0 %v1539_v23  ;;  %v1600_v4 = vld [vmem:[%s1915_s8 + $0x180] ss:$8 sps:$4 sm:$0xff]   ;;  %v667_v12 = vld [vmem:[#allocation2 + $0x8] sm:$0xff] }
  0x61   : > { %1120 = vmatpush1.bf16.msra.mxu1 %v1540_v24  ;;  %1080 = vmatprep.subr.bf16.mxu0 %v1541_v25 }
  0x62   : > { %1121 = vmatprep.subr.bf16.mxu1 %v1543_v26 }
  0x64   : > { %1081 = vmatpush1.bf16.msra.mxu0 %v1545_v27 }
  0x65   : > { %1122 = vmatpush1.bf16.msra.mxu1 %v1546_v28  ;;  %1082 = vmatprep.subr.bf16.mxu0 %v1547_v29 }
  0x66   : > { %1123 = vmatprep.subr.bf16.mxu1 %v1549_v30 }
  0x68   : > { %1083 = vmatpush1.bf16.msra.mxu0 %v1551_v31 }
  0x69   : > { %1124 = vmatpush1.bf16.msra.mxu1 %v1552_v32  ;;  %1084 = vmatprep.subr.bf16.mxu0 %v1553_v33 }
  0x6a   : > { %1125 = vmatprep.subr.bf16.mxu1 %v1555_v34 }
  0x6c   : > { %1085 = vmatpush2.bf16.msra.mxu0 %v1557_v35 }
  0x6d   : > { %1126 = vmatpush2.bf16.msra.mxu1 %v1558_v36  ;;  %1086 = vmatprep.subr.bf16.mxu0 %v1559_v37 }
  0x6e   : > { %1127 = vmatprep.subr.bf16.mxu1 %v1561_v38 }
  0x70   : > { %1087 = vmatpush2.bf16.msra.mxu0 %v1563_v39 }
  0x71   : > { %1128 = vmatpush2.bf16.msra.mxu1 %v1564_v40  ;;  %1088 = vmatprep.subr.bf16.mxu0 %v1565_v41 }
  0x72   : > { %1129 = vmatprep.subr.bf16.mxu1 %v1567_v42 }
  0x74   : > { %1089 = vmatpush2.bf16.msra.mxu0 %v1569_v43 }
  0x75   : > { %1130 = vmatpush2.bf16.msra.mxu1 %v1570_v44  ;;  %1090 = vmatprep.subr.bf16.mxu0 %v1571_v45 }
  0x76   : > { %1131 = vmatprep.subr.bf16.mxu1 %v1573_v46 }
  0x78   : > { %1091 = vmatpush2.bf16.msra.mxu0 %v1575_v50 }
  0x79   : > { %1132 = vmatpush2.bf16.msra.mxu1 %v1576_v51  ;;  %1092 = vmatprep.subr.bf16.mxu0 %v1577_v53 }
  0x7a   : > { %1133 = vmatprep.subr.bf16.mxu1 %v1579_v54 }
  0x7c   : > { %1093 = vmatpush2.bf16.msra.mxu0 %v1581_v55 }
  0x7d   : > { %1134 = vmatpush2.bf16.msra.mxu1 %v1582_v56  ;;  %1094 = vmatprep.subr.bf16.mxu0 %v1583_v57 }
  0x7e   : > { %1135 = vmatprep.subr.bf16.mxu1 %v1585_v58 }
  0x80   : > { %1095 = vmatpush2.bf16.msra.mxu0 %v1587_v59 }
  0x81   : > { %1136 = vmatpush2.bf16.msra.mxu1 %v1588_v60  ;;  %1096 = vmatprep.subr.bf16.mxu0 %v1589_v61 }
  0x82   : > { %1137 = vmatprep.subr.bf16.mxu1 %v1591_v62 }
  0x84   : > { %1097 = vmatpush2.bf16.msra.mxu0 %v1593_v63 }
  0x85   : > { %1138 = vmatpush2.bf16.msra.mxu1 %v1594_v0  ;;  %1098 = vmatprep.subr.bf16.mxu0 %v1595_v1 }
  0x86   : > { %1139 = vmatprep.subr.bf16.mxu1 %v1597_v2 }
  0x88   : > { %1099 = vmatpush2.bf16.msra.mxu0 %v1599_v3 }
  0x89   : > { %1140 = vmatpush2.bf16.msra.mxu1 %v1600_v4 }
  0x8b   : > { %1101 = vmatmul.mubr.bf16.vlgmr.msra.gmra.mxu0 %v1374_v5 }
  0x8c   : > { %1142 = vmatmul.mubr.bf16.vlgmr.msra.gmra.mxu1 %v1376_v6 }
 0x14b   : > { %v1102_v7 = vpop.f32.mrf.mxu0 }
 0x14c   : > { %v1143_v9 = vpop.f32.mrf.mxu1 }
 0x14d   : > { %v1144_v10 = vadd.f32 %v1143_v9, %v1102_v7  ;;  %v1104_v11 = vpop.f32.mrf.mxu0 }
 0x14e   : > { %v1145_v13 = vpop.f32.mrf.mxu1 }
 0x14f   : > { %v1150_v14 = vadd.f32 %v1144_v10, %v666_v8  ;;  %v1146_v15 = vadd.f32 %v1145_v13, %v1104_v11  ;;  %v1106_v16 = vpop.f32.mrf.mxu0  ;;  %1157 = sbr.rel (%p1442_p13) target bundleno = 359 (0x167), region = 86 }
 0x150   : > { %v1147_v17 = vpop.f32.mrf.mxu1 }
 0x151   : > { %1152 = vst [vmem:[#allocation2] sm:$0xff] %v1150_v14  ;;  %v1151_v18 = vadd.f32 %v1146_v15, %v667_v12  ;;  %v1107_v19 = vpop.f32.mrf.mxu0 }
 0x152   : > { %v1148_v20 = vpop.f32.mrf.mxu1 }
 0x153   : > { %1153 = vst [vmem:[#allocation2 + $0x8] sm:$0xff] %v1151_v18 }
 0x154   : > { %v1162_v21 = vlaneseq  ;;  %v1160_v23 = vld [vmem:[%s633_s18] sm:$0x3] }
 0x155   : > { %v1174_v24 = vld [vmem:[%s638_s21] sm:$0x3] }
 0x156   : > { %v1163_v22 = vshrl.u32 %v1162_v21, 7  ;;  %v1188_v29 = vld [vmem:[%s1908_s17] sm:$0xff] }
 0x157   : > { %v1189_v36 = vunpack.c.l.bf16 %v1188_v29  ;;  %v1190_v37 = vunpack.c.h.bf16 %v1188_v29 }
 0x158   : > { %v1164_v25 = vsub.s32 0, %v1163_v22  ;;  %v1168_v26 = vsub.s32 1, %v1163_v22  ;;  %v1158_v27 = vld [vmem:[#allocation2] sm:$0xff] }
 0x15a   : > { %v1159_v28 = vld [vmem:[#allocation2 + $0x8] sm:$0xff]  ;;  %v1165_v30 = vrot.slane %v1160_v23, %v1164_v25  ;;  %v1169_v31 = vrot.slane %v1160_v23, %v1168_v26  ;;  %v1179_v32 = vrot.slane %v1174_v24, %v1164_v25  ;;  %v1183_v33 = vrot.slane %v1174_v24, %v1168_v26 }
 0x15c   : > { %v1172_v34 = vmul.f32 %v1165_v30, %v1158_v27  ;;  %v1173_v35 = vmul.f32 %v1169_v31, %v1159_v28 }
 0x15e   : > { %v1186_v38 = vadd.f32 %v1179_v32, %v1172_v34  ;;  %v1187_v39 = vadd.f32 %v1183_v33, %v1173_v35 }
 0x160   : > { %v1191_v40 = vadd.f32 %v1189_v36, %v1186_v38  ;;  %v1192_v41 = vadd.f32 %v1190_v37, %v1187_v39 }
 0x162   : > { %v1193_v42 = vmax.f32 %v1191_v40, 0.0  ;;  %v1194_v43 = vmax.f32 %v1192_v41, 0.0 }
 0x164   : > { %v1447_v44 = vpack.c.bf16 %v1194_v43, %v1193_v42 }
 0x166   : > { %1203 = vst [vmem:[%s1913_s7] sm:$0xff] %v1447_v44 }
 0x167 PF: > { %s15_s24 = sadd.s32 1, %s1659_s24   ;;  %s2024_s18 = smov %s1639_s19 }
 0x168   : > { %p12_p0 = scmp.ge.s32.totalorder %s15_s24, 20   ;;  %s2025_s19 = smov %s1743_s6 }
 0x169   : > { %s2026_s20 = smov %s1651_s22  ;;  %s2027_s21 = smov %s1655_s23 }
 0x16a   : > { %s2028_s22 = smov %s2031_s25  ;;  %s2029_s23 = smov %s2035_s26 }
 0x16b   :  { %14 = sbr.rel (!%p12_p0) target bundleno = 4 (0x4), region = 133 }

// kernel: resnet_forward.27
= control target key start
LH: loop header
LB: loop body
LE: loop exit
PB: predicated region body
PF: predicated region fallthrough
CT: control target
= control target key end

     0   :  { %v94_v32 = vlaneseq  ;;  %s614_s0 = inlined_call_operand.vmem [shape: bf16[2,1,512], index: 0, kind: input, shape index: {}]   ;;  %s615_s1 = inlined_call_operand.vmem [shape: f32[512,128], index: 1, kind: input, shape index: {}]   ;;  %s616_s2 = inlined_call_operand.vmem [shape: f32[1,128], index: 2, kind: input, shape index: {}]   ;;  %s617_s3 = inlined_call_operand.hbm [shape: f32[2,128], index: 3, kind: output, shape index: {}]  }
   0x1   :  { %v52_v0 = vld [vmem:[%s615_s1 + $0xf8] sm:$0xff]  ;;  %v51_v4 = vld [vmem:[%s615_s1 + $0xf0] sm:$0xff]  ;;  %v50_v8 = vld [vmem:[%s615_s1 + $0xe8] sm:$0xff] }
   0x2   :  { %v84_v1 = vld [vmem:[%s615_s1 + $0x1f8] sm:$0xff]  ;;  %295 = vmatprep.subr.mxu0 %v52_v0  ;;  %v83_v5 = vld [vmem:[%s615_s1 + $0x1f0] sm:$0xff]  ;;  %v82_v9 = vld [vmem:[%s615_s1 + $0x1e8] sm:$0xff]  ;;  %v95_v41 = vshrl.u32 %v94_v32, 7 }
   0x3   :  { %v36_v2 = vld [vmem:[%s615_s1 + $0x78] sm:$0xff]  ;;  %330 = vmatprep.subr.mxu1 %v84_v1  ;;  %v35_v6 = vld [vmem:[%s615_s1 + $0x70] sm:$0xff]  ;;  %v34_v10 = vld [vmem:[%s615_s1 + $0x68] sm:$0xff] }
   0x4   :  { %v68_v3 = vld [vmem:[%s615_s1 + $0x178] sm:$0xff]  ;;  %296 = vmatpush3.msra.mxu0 %v36_v2  ;;  %v67_v7 = vld [vmem:[%s615_s1 + $0x170] sm:$0xff]  ;;  %v66_v11 = vld [vmem:[%s615_s1 + $0x168] sm:$0xff]  ;;  %v100_v51 = vsub.s32 2, %v95_v41 }
   0x5   :  { %331 = vmatpush3.msra.mxu1 %v68_v3  ;;  %297 = vmatprep.subr.mxu0 %v51_v4  ;;  %v49_v12 = vld [vmem:[%s615_s1 + $0xe0] sm:$0xff]  ;;  %v48_v16 = vld [vmem:[%s615_s1 + $0xd8] sm:$0xff]  ;;  %v47_v20 = vld [vmem:[%s615_s1 + $0xd0] sm:$0xff] }
   0x6   :  { %332 = vmatprep.subr.mxu1 %v83_v5  ;;  %298 = vmatpush3.msra.mxu0 %v35_v6  ;;  %v81_v13 = vld [vmem:[%s615_s1 + $0x1e0] sm:$0xff]  ;;  %v80_v17 = vld [vmem:[%s615_s1 + $0x1d8] sm:$0xff]  ;;  %v79_v21 = vld [vmem:[%s615_s1 + $0x1d0] sm:$0xff] }
   0x7   :  { %333 = vmatpush3.msra.mxu1 %v67_v7  ;;  %299 = vmatprep.subr.mxu0 %v50_v8  ;;  %v33_v14 = vld [vmem:[%s615_s1 + $0x60] sm:$0xff]  ;;  %v32_v18 = vld [vmem:[%s615_s1 + $0x58] sm:$0xff]  ;;  %v31_v22 = vld [vmem:[%s615_s1 + $0x50] sm:$0xff] }
   0x8   :  { %334 = vmatprep.subr.mxu1 %v82_v9  ;;  %v65_v15 = vld [vmem:[%s615_s1 + $0x160] sm:$0xff]  ;;  %300 = vmatpush3.msra.mxu0 %v34_v10  ;;  %v64_v19 = vld [vmem:[%s615_s1 + $0x158] sm:$0xff]  ;;  %v63_v23 = vld [vmem:[%s615_s1 + $0x150] sm:$0xff] }
   0x9   :  { %335 = vmatpush3.msra.mxu1 %v66_v11  ;;  %301 = vmatprep.subr.mxu0 %v49_v12  ;;  %v46_v24 = vld [vmem:[%s615_s1 + $0xc8] sm:$0xff]  ;;  %v45_v28 = vld [vmem:[%s615_s1 + $0xc0] sm:$0xff]  ;;  %v44_v33 = vld [vmem:[%s615_s1 + $0xb8] sm:$0xff] }
   0xa   :  { %336 = vmatprep.subr.mxu1 %v81_v13  ;;  %302 = vmatpush3.msra.mxu0 %v33_v14  ;;  %v78_v25 = vld [vmem:[%s615_s1 + $0x1c8] sm:$0xff]  ;;  %v77_v29 = vld [vmem:[%s615_s1 + $0x1c0] sm:$0xff]  ;;  %v76_v34 = vld [vmem:[%s615_s1 + $0x1b8] sm:$0xff] }
   0xb   :  { %337 = vmatpush3.msra.mxu1 %v65_v15  ;;  %303 = vmatprep.subr.mxu0 %v48_v16  ;;  %v30_v26 = vld [vmem:[%s615_s1 + $0x48] sm:$0xff]  ;;  %v29_v30 = vld [vmem:[%s615_s1 + $0x40] sm:$0xff]  ;;  %v28_v35 = vld [vmem:[%s615_s1 + $0x38] sm:$0xff] }
   0xc   :  { %338 = vmatprep.subr.mxu1 %v80_v17  ;;  %304 = vmatpush3.msra.mxu0 %v32_v18  ;;  %v62_v27 = vld [vmem:[%s615_s1 + $0x148] sm:$0xff]  ;;  %v61_v31 = vld [vmem:[%s615_s1 + $0x140] sm:$0xff]  ;;  %v60_v36 = vld [vmem:[%s615_s1 + $0x138] sm:$0xff] }
   0xd   :  { %339 = vmatpush3.msra.mxu1 %v64_v19  ;;  %305 = vmatprep.subr.mxu0 %v47_v20  ;;  %v43_v37 = vld [vmem:[%s615_s1 + $0xb0] sm:$0xff]  ;;  %v42_v42 = vld [vmem:[%s615_s1 + $0xa8] sm:$0xff]  ;;  %v41_v46 = vld [vmem:[%s615_s1 + $0xa0] sm:$0xff] }
   0xe   :  { %340 = vmatprep.subr.mxu1 %v79_v21  ;;  %306 = vmatpush3.msra.mxu0 %v31_v22  ;;  %v75_v38 = vld [vmem:[%s615_s1 + $0x1b0] sm:$0xff]  ;;  %v74_v43 = vld [vmem:[%s615_s1 + $0x1a8] sm:$0xff]  ;;  %v73_v47 = vld [vmem:[%s615_s1 + $0x1a0] sm:$0xff] }
   0xf   :  { %341 = vmatpush3.msra.mxu1 %v63_v23  ;;  %307 = vmatprep.subr.mxu0 %v46_v24  ;;  %v27_v39 = vld [vmem:[%s615_s1 + $0x30] sm:$0xff]  ;;  %v26_v44 = vld [vmem:[%s615_s1 + $0x28] sm:$0xff]  ;;  %v25_v48 = vld [vmem:[%s615_s1 + $0x20] sm:$0xff] }
  0x10   :  { %342 = vmatprep.subr.mxu1 %v78_v25  ;;  %308 = vmatpush3.msra.mxu0 %v30_v26  ;;  %v59_v40 = vld [vmem:[%s615_s1 + $0x130] sm:$0xff]  ;;  %v58_v45 = vld [vmem:[%s615_s1 + $0x128] sm:$0xff]  ;;  %v57_v49 = vld [vmem:[%s615_s1 + $0x120] sm:$0xff] }
  0x11   :  { %343 = vmatpush3.msra.mxu1 %v62_v27  ;;  %309 = vmatprep.subr.mxu0 %v45_v28  ;;  %v292_v50 = vld [vmem:[%s614_s0] sm:$0xff]  }
  0x12   :  { %344 = vmatprep.subr.mxu1 %v77_v29  ;;  %310 = vmatpush3.msra.mxu0 %v29_v30 }
  0x13   :  { %345 = vmatpush3.msra.mxu1 %v61_v31  ;;  %311 = vmatprep.subr.mxu0 %v44_v33 }
  0x14   :  { %346 = vmatprep.subr.mxu1 %v76_v34  ;;  %312 = vmatpush3.msra.mxu0 %v28_v35 }
  0x15   :  { %347 = vmatpush3.msra.mxu1 %v60_v36  ;;  %313 = vmatprep.subr.mxu0 %v43_v37 }
  0x16   :  { %348 = vmatprep.subr.mxu1 %v75_v38  ;;  %314 = vmatpush3.msra.mxu0 %v27_v39 }
  0x17   :  { %349 = vmatpush3.msra.mxu1 %v59_v40  ;;  %315 = vmatprep.subr.mxu0 %v42_v42 }
  0x18   :  { %350 = vmatprep.subr.mxu1 %v74_v43 }
  0x19   :  { %8 = vsyncpa [#allocation3], 0  ;;  %316 = vmatpush3.msra.mxu0 %v26_v44  ;;  %351 = vmatpush3.msra.mxu1 %v58_v45  ;;  %v40_v52 = vld [vmem:[%s615_s1 + $0x98] sm:$0xff]  ;;  %v293_v54 = vunpack.c.l.bf16 %v292_v50  ;;  %v294_v55 = vunpack.c.h.bf16 %v292_v50  ;;  %v108_v56 = vsub.s32 6, %v95_v41  ;;  %v96_v57 = vsub.s32 0, %v95_v41  ;;  %v39_v61 = vld [vmem:[%s615_s1 + $0x90] sm:$0xff] }
  0x1a   :  { %v72_v53 = vld [vmem:[%s615_s1 + $0x198] sm:$0xff]  ;;  %317 = vmatprep.subr.mxu0 %v41_v46  ;;  %352 = vmatprep.subr.mxu1 %v73_v47  ;;  %v104_v60 = vsub.s32 4, %v95_v41  ;;  %v71_v62 = vld [vmem:[%s615_s1 + $0x190] sm:$0xff]  ;;  %v38_v3 = vld [vmem:[%s615_s1 + $0x88] sm:$0xff]  ;;  %vm126_vm0 = vcmask 1041409  }
  0x1b   :  { %v24_v58 = vld [vmem:[%s615_s1 + $0x18] sm:$0xff]  ;;  %318 = vmatpush3.msra.mxu0 %v25_v48  ;;  %353 = vmatpush3.msra.mxu1 %v57_v49  ;;  %v23_v63 = vld [vmem:[%s615_s1 + $0x10] sm:$0xff]  ;;  %v101_v1 = vrot.slane %v293_v54, %v100_v51  ;;  %v117_v2 = vrot.slane %v294_v55, %v100_v51  ;;  %v70_v4 = vld [vmem:[%s615_s1 + $0x188] sm:$0xff]  ;;  %v109_v5 = vrot.slane %v293_v54, %v108_v56 }
  0x1c   :  { %v56_v59 = vld [vmem:[%s615_s1 + $0x118] sm:$0xff]  ;;  %319 = vmatprep.subr.mxu0 %v40_v52  ;;  %354 = vmatprep.subr.mxu1 %v72_v53  ;;  %v55_v0 = vld [vmem:[%s615_s1 + $0x110] sm:$0xff]  ;;  %v125_v6 = vrot.slane %v294_v55, %v108_v56  ;;  %v97_v7 = vrot.slane %v293_v54, %v96_v57  ;;  %v22_v8 = vld [vmem:[%s615_s1 + $0x8] sm:$0xff]  ;;  %v113_v10 = vrot.slane %v294_v55, %v96_v57 }
  0x1d   :  { %320 = vmatpush3.msra.mxu0 %v24_v58  ;;  %355 = vmatpush3.msra.mxu1 %v56_v59  ;;  %v54_v9 = vld [vmem:[%s615_s1 + $0x108] sm:$0xff]  ;;  %v105_v11 = vrot.slane %v293_v54, %v104_v60  ;;  %v121_v12 = vrot.slane %v294_v55, %v104_v60  ;;  %v37_v13 = vld [vmem:[%s615_s1 + $0x80] sm:$0xff]  ;;  %v128_v16 = vsel %vm126_vm0, %v117_v2, %v101_v1 }
  0x1e   :  { %321 = vmatprep.subr.mxu0 %v39_v61  ;;  %356 = vmatprep.subr.mxu1 %v71_v62  ;;  %v69_v14 = vld [vmem:[%s615_s1 + $0x180] sm:$0xff]  ;;  %v130_v18 = vsel %vm126_vm0, %v125_v6, %v109_v5  ;;  %v127_v19 = vsel %vm126_vm0, %v113_v10, %v97_v7 }
  0x1f   :  { %322 = vmatpush3.msra.mxu0 %v23_v63  ;;  %357 = vmatpush3.msra.mxu1 %v55_v0  ;;  %v21_v15 = vld [vmem:[%s615_s1] sm:$0xff]  ;;  %v129_v20 = vsel %vm126_vm0, %v121_v12, %v105_v11 }
  0x20   :  { %323 = vmatprep.subr.mxu0 %v38_v3  ;;  %358 = vmatprep.subr.mxu1 %v70_v4  ;;  %v53_v17 = vld [vmem:[%s615_s1 + $0x100] sm:$0xff]  ;;  %s388_s1 = smov [#allocation2]  }
  0x21   :  { %324 = vmatpush3.msra.mxu0 %v22_v8  ;;  %359 = vmatpush3.msra.mxu1 %v54_v9  ;;  %v290_v23 = vld [vmem:[%s616_s2] ss:$0 sm:$0xff]  ;;  %s282_s7 = sshll.u32 %s388_s1, 4  ;;  %s283_s7 = int_to_ptr.vmem [resolvable:$true] %s282_s7 }
  0x22   :  { %325 = vmatprep.subr.mxu0 %v37_v13  ;;  %360 = vmatprep.subr.mxu1 %v69_v14  ;;  %s366_s8 = scalar_lea.vmem %s283_s7, 32  ;;  %p371_p1 = scmp.lt.s32.totalorder %s283_s7, %s283_s7 }
  0x23   :  { %326 = vmatpush3.msra.mxu0 %v21_v15  ;;  %199 = vmatprep.mubr.f32.mxu0 %v128_v16  ;;  %p367_p0 = scmp.ne.s32.totalorder %s283_s7, %s366_s8  ;;  %p372_p2 = scmp.lt.s32.totalorder %s366_s8, %s366_s8 }
  0x24   :  { %361 = vmatpush3.msra.mxu1 %v53_v17  ;;  %269 = vmatprep.mubr.f32.mxu1 %v130_v18 }
  0x25   :  { %200 = vmatmul.mubr.f32.vlgmr.msra.gmra.mxu0 %v127_v19  ;;  %270 = vmatmul.mubr.f32.vlgmr.msra.gmra.mxu1 %v129_v20  ;;  %p373_p3 = por %p372_p2, %p371_p1 }
  0x27   :  { %p374_p4 = pnand %p373_p3, %p367_p0 }
  0xe5   :  { %v327_v21 = vpop.f32.mrf.mxu0  ;;  %v362_v22 = vpop.f32.mrf.mxu1 }
  0xe7   :  { %v328_v24 = vpop.f32.mrf.mxu0  ;;  %v363_v25 = vpop.f32.mrf.mxu1 }
  0xe8   :  { %v329_v26 = vadd.f32 %v328_v24, %v327_v21  ;;  %v364_v28 = vadd.f32 %v363_v25, %v362_v22 }
  0xea   :  { %v202_v27 = vadd.f32 %v329_v26, %v290_v23 }
  0xec   :  { %v272_v29 = vadd.f32 %v364_v28, %v202_v27 }
  0xee   :  { %275 = vst [vmem:[#allocation2] sm:$0x3] %v272_v29 }
  0xef   :  { %377 = shalt.err (!%p374_p4)
}
  0xf0   :  { %285 = dma.vmem_to_hbm [thread:$0]  %s283_s7, 32, %s617_s3, [#allocation3]  }
  0xf1   :  { %386 = dma.done.wait [#allocation3], 32  }
  0xf2   :  { %387 = vsyncadd [#allocation3], 4294967264 }
  0xf3   :  { %289 = vsyncpa [#allocation3], 1 }

</bundles_post_ra>
